<compile_context>
chip_gen: v5e
topology: v5e:2x2
jax: 0.10.0
libtpu: 0.0.40
codegen_flags: <defaults>
</compile_context>

<pallas_src>
import functools
import math

import jax
import jax.numpy as jnp
from jax.experimental import pallas as pl
from jax.experimental.pallas import tpu as pltpu


# ---------------------------------------------------------------------------
# Tiling / VMEM policy. Sized against the smallest-generation budgets:
# we explicitly request 32 MiB scoped VMEM (above v5e's 16 MiB default, safe
# on v5e/v6e 128 MiB physical, and leaves 32 MiB headroom on v7x's 64 MiB).
# ---------------------------------------------------------------------------
_MAX_COL_TILE = 32 * 1024                 # max lanes per column tile
_VMEM_TILE_BUDGET = 20 * 1024 * 1024      # budget used when picking tk
_VMEM_LIMIT_BYTES = 32 * 1024 * 1024      # explicit scoped-VMEM request
_RESIDENT_V_MAX_BYTES = 6 * 1024 * 1024   # keep V resident if 2*nb*p*4 <= this
_TINY_GROUP_BYTES = 64 * 1024             # plain-JAX bypass threshold (B*p*4)


def _round_up(x, m):
    return ((x + m - 1) // m) * m


def _tk_cap(batch, nb):
    """Largest column tile (multiple of 128) fitting the VMEM tile budget."""
    fixed = 2 * batch * nb * 4 + (1 << 16)          # emb out (dbl-buf) + slack
    avail = _VMEM_TILE_BUDGET - fixed
    per_col = 8 * (batch + nb + 2)                  # grad + V + (1,tk) outs, dbl-buf f32
    cap = (max(avail, 0) // per_col) // 128 * 128
    # TODO(synk): for very large batch this clamps to 128; shrink grid batch dim instead.
    return int(max(128, min(_MAX_COL_TILE, cap)))


def _plan_group(p, offset, tk_cap):
    """Decide how to tile one parameter group.

    Returns (use_slice, off_blk, tk, p_pad):
      use_slice=False -> read straight out of target_grad (offset baked into
                         the index_map as a block offset), p_pad == p.
      use_slice=True  -> slice the group out of target_grad and zero-pad its
                         columns to p_pad (a multiple of tk).
    """
    p128 = _round_up(p, 128)

    # In-place path: tk must divide both p and offset (so off_blk is integral
    # and every block is fully in-bounds).
    g = math.gcd(p, offset) if offset else p
    tk_inplace = 0
    if g % 128 == 0:
        for t in range(min(tk_cap, g) // 128, 0, -1):
            if g % (t * 128) == 0:
                tk_inplace = t * 128
                break

    # Slice+pad path: minimal padding for the largest tile <= tk_cap.
    kt = -(-p128 // tk_cap)                       # ceil
    tk_slice = _round_up(-(-p128 // kt), 128)     # <= tk_cap (tk_cap is 128-mult)
    p_pad = kt * tk_slice

    # Prefer in-place when its tile is not much smaller than the slice-path
    # tile (slicing costs an extra ~2*B*p bytes of HBM copy).
    if tk_inplace and (2 * tk_inplace >= tk_slice or p // tk_inplace <= 8):
        return False, offset // tk_inplace, tk_inplace, p
    return True, 0, tk_slice, p_pad


# ---------------------------------------------------------------------------
# Kernel A: projection + residual row sq-sums.
# grid = (2, kt):
#   phase 0 (k sweep): emb += grad_tile @ V_tile.T   (emb resident in VMEM)
#   phase 1 (k sweep): sq  += rowsum((grad_tile - emb @ V_tile)^2)
# ---------------------------------------------------------------------------
def _proj_sq_kernel(grad_ref, v_ref, emb_ref, sq_ref, *, tk, resident_v):
    ph = pl.program_id(0)
    k = pl.program_id(1)

    def load_v():
        if resident_v:
            start = pl.multiple_of(k * tk, 128)
            return v_ref[:, pl.ds(start, tk)].astype(jnp.float32)
        return v_ref[...].astype(jnp.float32)

    @pl.when(ph == 0)
    def _projection():
        @pl.when(k == 0)
        def _():
            emb_ref[...] = jnp.zeros_like(emb_ref)

        g = grad_ref[...].astype(jnp.float32)
        v = load_v()
        # grad_tile @ V_tile.T without materializing V.T.
        emb_ref[...] += jax.lax.dot_general(
            g, v, (((1,), (1,)), ((), ())), preferred_element_type=jnp.float32)

    @pl.when(ph == 1)
    def _residual_sq():
        @pl.when(k == 0)
        def _():
            sq_ref[...] = jnp.zeros_like(sq_ref)

        g = grad_ref[...].astype(jnp.float32)
        v = load_v()
        r = g - jnp.dot(emb_ref[...], v, preferred_element_type=jnp.float32)
        sq_ref[...] += jnp.sum(r * r, axis=1, keepdims=True)


def _group_proj_sq(grad, V, off_blk, tk, resident_v):
    """Returns (embedding [B,nb], residual row sq-sums [B,1]) for one group."""
    B = grad.shape[0]
    nb, p = V.shape
    kt = p // tk
    assert kt * tk == p, (p, tk)

    if resident_v:
        v_spec = pl.BlockSpec((nb, p), lambda ph, k: (0, 0))   # fetched once
        v_reads = 1
    else:
        v_spec = pl.BlockSpec((nb, tk), lambda ph, k: (0, k))
        v_reads = 2

    kern = functools.partial(_proj_sq_kernel, tk=tk, resident_v=resident_v)
    cost = pl.CostEstimate(
        flops=4 * B * p * nb + 3 * B * p,
        transcendentals=0,
        bytes_accessed=4 * (2 * B * p + v_reads * nb * p + B * nb + B))

    return pl.pallas_call(
        kern,
        out_shape=(jax.ShapeDtypeStruct((B, nb), jnp.float32),   # embedding
                   jax.ShapeDtypeStruct((B, 1), jnp.float32)),   # row sq-sums
        grid_spec=pltpu.PrefetchScalarGridSpec(
            num_scalar_prefetch=0,
            grid=(2, kt),
            in_specs=[
                pl.BlockSpec((B, tk), lambda ph, k: (0, off_blk + k)),
                v_spec,
            ],
            out_specs=[
                pl.BlockSpec((B, nb), lambda ph, k: (0, 0)),
                pl.BlockSpec((B, 1), lambda ph, k: (0, 0)),
            ]),
        compiler_params=pltpu.CompilerParams(
            dimension_semantics=("arbitrary", "arbitrary"),
            vmem_limit_bytes=_VMEM_LIMIT_BYTES),
        cost_estimate=cost,
    )(grad, V)


# ---------------------------------------------------------------------------
# Kernel B: averages.  grid = (kt,), fully parallel over column tiles.
#   tavg = colsum(grad)/batch
#   ravg = (colsum(s * grad) - (s^T E) @ V) / batch
# ---------------------------------------------------------------------------
def _avg_kernel(grad_ref, v_ref, s_ref, se_ref, tavg_ref, ravg_ref, *, inv_batch):
    g = grad_ref[...].astype(jnp.float32)
    v = v_ref[...].astype(jnp.float32)
    s = s_ref[...]                                         # (B, 1)
    se = se_ref[...]                                       # (1, nb)

    tavg_ref[...] = jnp.sum(g, axis=0, keepdims=True) * inv_batch
    sg = jnp.sum(s * g, axis=0, keepdims=True)             # (1, tk)
    corr = jnp.dot(se, v, preferred_element_type=jnp.float32)
    ravg_ref[...] = (sg - corr) * inv_batch


def _group_avgs(grad, V, s, se, off_blk, tk, inv_batch):
    """Returns (avg_target [1,p], avg_clipped_residual [1,p]) for one group."""
    B = grad.shape[0]
    nb, p = V.shape
    kt = p // tk
    assert kt * tk == p, (p, tk)

    kern = functools.partial(_avg_kernel, inv_batch=float(inv_batch))
    cost = pl.CostEstimate(
        flops=2 * nb * p + 4 * B * p,
        transcendentals=0,
        bytes_accessed=4 * (B * p + nb * p + 2 * p + B + nb))

    return pl.pallas_call(
        kern,
        out_shape=(jax.ShapeDtypeStruct((1, p), jnp.float32),    # avg target
                   jax.ShapeDtypeStruct((1, p), jnp.float32)),   # avg clipped residual
        grid_spec=pltpu.PrefetchScalarGridSpec(
            num_scalar_prefetch=0,
            grid=(kt,),
            in_specs=[
                pl.BlockSpec((B, tk), lambda k: (0, off_blk + k)),
                pl.BlockSpec((nb, tk), lambda k: (0, k)),
                pl.BlockSpec((B, 1), lambda k: (0, 0)),
                pl.BlockSpec((1, nb), lambda k: (0, 0)),
            ],
            out_specs=[
                pl.BlockSpec((1, tk), lambda k: (0, k)),
                pl.BlockSpec((1, tk), lambda k: (0, k)),
            ]),
        compiler_params=pltpu.CompilerParams(
            dimension_semantics=("parallel",),      # lets v7x split across TCs
            vmem_limit_bytes=_VMEM_LIMIT_BYTES),
        cost_estimate=cost,
    )(grad, V, s, se)


# ---------------------------------------------------------------------------
# GEP.forward
# ---------------------------------------------------------------------------
def gep_forward(target_grad, pca_bases, clip0, clip1, batch_size):
    """Returns (avg_clipped_embedding_pca, avg_clipped_residual_pca, avg_target_grad)."""
    B, D = target_grad.shape
    inv_batch = 1.0 / float(batch_size)

    # ---- pass 1: per-group embedding + residual row sq-sums ----------------
    plans, emb_list, sq_list = [], [], []
    offset = 0
    for V in pca_bases:                                    # V: [nb_i, p_i]
        nb, p = V.shape
        if B * p * 4 <= _TINY_GROUP_BYTES:
            # Launch overhead would dwarf the work: plain JAX for tiny groups.
            g = jax.lax.slice(target_grad, (0, offset), (B, offset + p)).astype(jnp.float32)
            Vf = V.astype(jnp.float32)
            emb = g @ Vf.T
            r = g - emb @ Vf
            sq = jnp.sum(r * r, axis=1, keepdims=True)
            tavg = jnp.sum(g, axis=0) * inv_batch
            plans.append(dict(kind="tiny", p=p, r=r, tavg=tavg))
        else:
            tk_cap = _tk_cap(B, nb)
            use_slice, off_blk, tk, p_pad = _plan_group(p, offset, tk_cap)
            if use_slice:
                g_in = jax.lax.slice(target_grad, (0, offset), (B, offset + p))
                V_in = V
                if p_pad != p:                     # zero-padding is exact (contributes 0)
                    g_in = jnp.pad(g_in, ((0, 0), (0, p_pad - p)))
                    V_in = jnp.pad(V, ((0, 0), (0, p_pad - p)))
            else:
                g_in, V_in = target_grad, V        # offset baked into the index_map
            resident_v = 2 * nb * p_pad * 4 <= _RESIDENT_V_MAX_BYTES
            emb, sq = _group_proj_sq(g_in, V_in, off_blk, tk, resident_v)
            plans.append(dict(kind="pallas", p=p, off_blk=off_blk, tk=tk,
                              g_in=g_in, V_in=V_in))
        emb_list.append(emb)
        sq_list.append(sq)
        offset += p

    # ---- tiny embedding path (B x sum(nb)): plain JAX ----------------------
    E = jnp.concatenate(emb_list, axis=1)
    e_norm = jnp.sqrt(jnp.sum(E * E, axis=1, keepdims=True))
    e_scale = jnp.where(e_norm > 0, jnp.minimum(1.0, clip0 / e_norm), 1.0)
    avg_clipped_embedding = jnp.sum(e_scale * E, axis=0) * inv_batch

    # ---- per-row residual clip scale from per-group sq-sums (tiny) ---------
    r_sq = jnp.sum(jnp.concatenate(sq_list, axis=1), axis=1, keepdims=True)
    r_norm = jnp.sqrt(r_sq)
    r_scale = jnp.where(r_norm > 0, jnp.minimum(1.0, clip1 / r_norm), 1.0)
    r_scale = r_scale.astype(jnp.float32)

    # ---- pass 2: averages via the identity sum_i s_i*(g_i - E_i V)
    #             = s^T.grad - (s^T E).V  -> no [B,p] residual materialized ---
    ravg_parts, tavg_parts = [], []
    for plan, emb in zip(plans, emb_list):
        if plan["kind"] == "tiny":
            ravg_parts.append(jnp.sum(r_scale * plan["r"], axis=0) * inv_batch)
            tavg_parts.append(plan["tavg"])
        else:
            se = jnp.sum(r_scale * emb, axis=0, keepdims=True)       # (1, nb)
            tavg, ravg = _group_avgs(plan["g_in"], plan["V_in"], r_scale, se,
                                     plan["off_blk"], plan["tk"], inv_batch)
            p = plan["p"]
            tavg_parts.append(tavg[0, :p])
            ravg_parts.append(ravg[0, :p])

    avg_clipped_residual = jnp.concatenate(ravg_parts)
    avg_target = jnp.concatenate(tavg_parts)

    # TODO(synk): logging-only bookkeeping (get_bases / check_approx_error side
    # calls, approx_error_pca dict, prints) does not affect outputs.
    return avg_clipped_embedding, avg_clipped_residual, avg_target


# Pure-JAX reference (mirrors the PyTorch semantics) for verification.
def gep_forward_ref(target_grad, pca_bases, clip0, clip1, batch_size):
    B, D = target_grad.shape
    embs, approxes = [], []
    off = 0
    for V in pca_bases:
        nb, p = V.shape
        g = target_grad[:, off:off + p]
        e = g @ V.T
        embs.append(e)
        approxes.append(e @ V)
        off += p
    E = jnp.concatenate(embs, axis=1)
    A = jnp.concatenate(approxes, axis=1)

    def clip_rows(x, c):
        n = jnp.linalg.norm(x, axis=1, keepdims=True)
        return x * jnp.minimum(1.0, c / n)

    avg_e = jnp.sum(clip_rows(E, clip0), axis=0) / batch_size
    R = target_grad - A
    avg_r = jnp.sum(clip_rows(R, clip1), axis=0) / batch_size
    avg_t = jnp.sum(target_grad, axis=0) / batch_size
    return avg_e, avg_r, avg_t


if __name__ == "__main__":
    key = jax.random.PRNGKey(0)
    B = 8                                     # batch_size (per-sample gradients)
    # Exercises: aligned in-place (kt=1, resident V), aligned in-place with
    # off_blk>0 / multi-tile / streamed V, slice+zero-pad (unaligned width),
    # and the tiny-group plain-JAX bypass.
    num_param_list = [32768, 40960, 3000, 768]
    num_bases_list = [16, 32, 8, 8]
    clip0, clip1 = 0.5, 10.0
    D = sum(num_param_list)

    k_grad, k_bases = jax.random.split(key)
    target_grad = 0.1 * jax.random.normal(k_grad, (B, D), dtype=jnp.float32)

    # Deterministic synthetic PCA bases (orthonormal rows, like pca.components_)
    pca_bases = []
    for i, (p, nb) in enumerate(zip(num_param_list, num_bases_list)):
        kb = jax.random.fold_in(k_bases, i)
        M = jax.random.normal(kb, (p, nb), dtype=jnp.float32)
        Q, _ = jnp.linalg.qr(M)               # [p, nb], orthonormal columns
        pca_bases.append(Q.T)                 # V_i: [nb, p]

    outs = gep_forward(target_grad, pca_bases, clip0, clip1, B)
    outs = jax.block_until_ready(outs)

    refs = gep_forward_ref(target_grad, pca_bases, clip0, clip1, B)
    for o, r in zip(outs, refs):
        assert o.shape == r.shape, (o.shape, r.shape)
        assert jnp.allclose(o, r, atol=1e-4, rtol=1e-4), "mismatch vs reference"

    print("KERNEL_OK")
</pallas_src>

<mosaic_0001>
module attributes {stable_mosaic.version = 11 : i64} {
  func.func @_proj_sq_kernel(%arg0: i32, %arg1: i32, %arg2: memref<8x32768xf32, #tpu.memory_space<vmem>>, %arg3: memref<16x32768xf32, #tpu.memory_space<vmem>>, %arg4: memref<8x16xf32, #tpu.memory_space<vmem>>, %arg5: memref<8x1xf32, #tpu.memory_space<vmem>>) attributes {dimension_semantics = [#tpu.dimension_semantics<arbitrary>, #tpu.dimension_semantics<arbitrary>], iteration_bounds = array<i64: 2, 1>, scalar_prefetch = 0 : i64, scratch_operands = 0 : i64, tpu.core_type = #tpu.core_type<tc>, window_params = [{transform_indices = @transform_0, window_bounds = array<i64: 8, 32768>}, {pipeline_mode = #tpu.pipeline_mode<synchronous>, transform_indices = @transform_1, window_bounds = array<i64: 16, 32768>}, {pipeline_mode = #tpu.pipeline_mode<synchronous>, transform_indices = @transform_2, window_bounds = array<i64: 8, 16>}, {pipeline_mode = #tpu.pipeline_mode<synchronous>, transform_indices = @transform_3, window_bounds = array<i64: 8, 1>}]} {
    %c0_i32 = arith.constant 0 : i32
    %0 = arith.cmpi eq, %arg0, %c0_i32 : i32
    %1 = arith.extui %0 : i1 to i32
    %c0_i32_0 = arith.constant 0 : i32
    %2 = arith.cmpi ne, %1, %c0_i32_0 : i32
    scf.if %2 {
      %c0_i32_2 = arith.constant 0 : i32
      %6 = arith.cmpi eq, %arg1, %c0_i32_2 : i32
      %7 = arith.extui %6 : i1 to i32
      %c0_i32_3 = arith.constant 0 : i32
      %8 = arith.cmpi ne, %7, %c0_i32_3 : i32
      scf.if %8 {
        %cst_10 = arith.constant 0.000000e+00 : f32
        %18 = vector.broadcast %cst_10 : f32 to vector<8x16xf32>
        %c0_11 = arith.constant 0 : index
        %c0_12 = arith.constant 0 : index
        %19 = vector.load %arg4[%c0_11, %c0_12] : memref<8x16xf32, #tpu.memory_space<vmem>>, vector<8x16xf32>
        tpu.vector_store %arg4[%c0_11, %c0_12], %18 {strides = array<i32>} : memref<8x16xf32, #tpu.memory_space<vmem>>, vector<8x16xf32>,
      } else {
      }
      %c0 = arith.constant 0 : index
      %c0_4 = arith.constant 0 : index
      %9 = vector.load %arg2[%c0, %c0_4] : memref<8x32768xf32, #tpu.memory_space<vmem>>, vector<8x32768xf32>
      %c32768_i32 = arith.constant 32768 : i32
      %10 = arith.muli %arg1, %c32768_i32 : i32
      %11 = tpu.assume_multiple %10, 128 : i32
      %c0_5 = arith.constant 0 : index
      %12 = arith.index_cast %11 : i32 to index
      %13 = vector.load %arg3[%c0_5, %12] : memref<16x32768xf32, #tpu.memory_space<vmem>>, vector<16x32768xf32>
      %c0_6 = arith.constant 0 : index
      %c0_7 = arith.constant 0 : index
      %14 = vector.load %arg4[%c0_6, %c0_7] : memref<8x16xf32, #tpu.memory_space<vmem>>, vector<8x16xf32>
      %cst = arith.constant dense<0.000000e+00> : vector<8x16xf32>
      %15 = tpu.matmul %9, %13, %cst {dimension_numbers = #tpu.dot_dimension_numbers<[1], [1], [0], [0], [0, 0, 1, 0], [], []>} : vector<8x32768xf32>, vector<16x32768xf32>, vector<8x16xf32> -> vector<8x16xf32>
      %16 = arith.addf %14, %15 : vector<8x16xf32>
      %c0_8 = arith.constant 0 : index
      %c0_9 = arith.constant 0 : index
      %17 = vector.load %arg4[%c0_8, %c0_9] : memref<8x16xf32, #tpu.memory_space<vmem>>, vector<8x16xf32>
      tpu.vector_store %arg4[%c0_8, %c0_9], %16 {strides = array<i32>} : memref<8x16xf32, #tpu.memory_space<vmem>>, vector<8x16xf32>,
    } else {
    }
    %c1_i32 = arith.constant 1 : i32
    %3 = arith.cmpi eq, %arg0, %c1_i32 : i32
    %4 = arith.extui %3 : i1 to i32
    %c0_i32_1 = arith.constant 0 : i32
    %5 = arith.cmpi ne, %4, %c0_i32_1 : i32
    scf.if %5 {
      %c0_i32_2 = arith.constant 0 : i32
      %6 = arith.cmpi eq, %arg1, %c0_i32_2 : i32
      %7 = arith.extui %6 : i1 to i32
      %c0_i32_3 = arith.constant 0 : i32
      %8 = arith.cmpi ne, %7, %c0_i32_3 : i32
      scf.if %8 {
        %cst_13 = arith.constant 0.000000e+00 : f32
        %23 = vector.broadcast %cst_13 : f32 to vector<8x1xf32>
        %c0_14 = arith.constant 0 : index
        %c0_15 = arith.constant 0 : index
        %24 = vector.load %arg5[%c0_14, %c0_15] : memref<8x1xf32, #tpu.memory_space<vmem>>, vector<8x1xf32>
        tpu.vector_store %arg5[%c0_14, %c0_15], %23 {strides = array<i32>} : memref<8x1xf32, #tpu.memory_space<vmem>>, vector<8x1xf32>,
      } else {
      }
      %c0 = arith.constant 0 : index
      %c0_4 = arith.constant 0 : index
      %9 = vector.load %arg2[%c0, %c0_4] : memref<8x32768xf32, #tpu.memory_space<vmem>>, vector<8x32768xf32>
      %c32768_i32 = arith.constant 32768 : i32
      %10 = arith.muli %arg1, %c32768_i32 : i32
      %11 = tpu.assume_multiple %10, 128 : i32
      %c0_5 = arith.constant 0 : index
      %12 = arith.index_cast %11 : i32 to index
      %13 = vector.load %arg3[%c0_5, %12] : memref<16x32768xf32, #tpu.memory_space<vmem>>, vector<16x32768xf32>
      %c0_6 = arith.constant 0 : index
      %c0_7 = arith.constant 0 : index
      %14 = vector.load %arg4[%c0_6, %c0_7] : memref<8x16xf32, #tpu.memory_space<vmem>>, vector<8x16xf32>
      %cst = arith.constant dense<0.000000e+00> : vector<8x32768xf32>
      %15 = tpu.matmul %14, %13, %cst {dimension_numbers = #tpu.dot_dimension_numbers<[1], [0], [0], [1], [0, 0, 1, 1], [], []>} : vector<8x16xf32>, vector<16x32768xf32>, vector<8x32768xf32> -> vector<8x32768xf32>
      %16 = arith.subf %9, %15 : vector<8x32768xf32>
      %c0_8 = arith.constant 0 : index
      %c0_9 = arith.constant 0 : index
      %17 = vector.load %arg5[%c0_8, %c0_9] : memref<8x1xf32, #tpu.memory_space<vmem>>, vector<8x1xf32>
      %18 = arith.mulf %16, %16 : vector<8x32768xf32>
      %cst_10 = arith.constant dense<0.000000e+00> : vector<8xf32>
      %19 = vector.multi_reduction <add>, %18, %cst_10 [1] : vector<8x32768xf32> to vector<8xf32>
      %20 = vector.shape_cast %19 : vector<8xf32> to vector<8x1xf32>
      %21 = arith.addf %17, %20 : vector<8x1xf32>
      %c0_11 = arith.constant 0 : index
      %c0_12 = arith.constant 0 : index
      %22 = vector.load %arg5[%c0_11, %c0_12] : memref<8x1xf32, #tpu.memory_space<vmem>>, vector<8x1xf32>
      tpu.vector_store %arg5[%c0_11, %c0_12], %21 {strides = array<i32>} : memref<8x1xf32, #tpu.memory_space<vmem>>, vector<8x1xf32>,
    } else {
    }
    return
  }
  func.func @transform_0(%arg0: i32, %arg1: i32) -> (i32, i32) {
    %c0_i32 = arith.constant 0 : i32
    %0 = arith.addi %c0_i32, %arg1 : i32
    %c0_i32_0 = arith.constant 0 : i32
    %c0_i32_1 = arith.constant 0 : i32
    return %c0_i32_0, %0 : i32, i32
  }
  func.func @transform_1(%arg0: i32, %arg1: i32) -> (i32, i32) {
    %c0_i32 = arith.constant 0 : i32
    %c0_i32_0 = arith.constant 0 : i32
    %c0_i32_1 = arith.constant 0 : i32
    return %c0_i32, %c0_i32_0 : i32, i32
  }
  func.func @transform_2(%arg0: i32, %arg1: i32) -> (i32, i32) {
    %c0_i32 = arith.constant 0 : i32
    %c0_i32_0 = arith.constant 0 : i32
    %c0_i32_1 = arith.constant 0 : i32
    return %c0_i32, %c0_i32_0 : i32, i32
  }
  func.func @transform_3(%arg0: i32, %arg1: i32) -> (i32, i32) {
    %c0_i32 = arith.constant 0 : i32
    %c0_i32_0 = arith.constant 0 : i32
    %c0_i32_1 = arith.constant 0 : i32
    return %c0_i32, %c0_i32_0 : i32, i32
  }
}

</mosaic_0001>

<bundles_post_ra>
// kernel: tpu_custom_call.1
= control target key start
LH: loop header
LB: loop body
LE: loop exit
PB: predicated region body
PF: predicated region fallthrough
CT: control target
= control target key end

     0   :  { %9 = vsyncpa [#allocation3], 0  ;;  %s13948_s0 = inlined_call_operand.hbm [shape: f32[8,77496], index: 0, kind: input, shape index: {}]   ;;  %s13949_s1 = inlined_call_operand.hbm [shape: f32[16,32768], index: 1, kind: input, shape index: {}]   ;;  %s13950_s2 = inlined_call_operand.hbm [shape: f32[8,16], index: 2, kind: output, shape index: {0}]   ;;  %s13951_s3 = inlined_call_operand.vmem [shape: f32[8,1], index: 3, kind: output, shape index: {1}]  }
   0x1   :  { %10 = vsyncpa [#allocation6], 0 }
   0x2   :  { %11 = vsyncpa [#allocation4], 0  ;;  %s13346_s12 = smov 0   ;;  %s13348_s13 = smov 0  }
   0x3   :  { %s13350_s14 = smov 0  }
   0x4 LB: > { %s12866_s15 = sadd.s32 4294967295, %s13317_s14   ;;  %s29_s16 = sadd.s32 1, %s13313_s13  ;;  %s13317_s14 = sphi %s13350_s14, %s17_s14   ;;  %s13313_s13 = sphi %s13348_s13, %s13955_s13   ;;  %s13309_s12 = sphi %s13346_s12, %s13954_s12  }
   0x5   : > { %p31_p0 = scmp.ge.s32.totalorder %s29_s16, 2  ;;  %p12867_p1 = scmp.ge.s32.totalorder %s13317_s14, 1 }
   0x6   : > { %p123_p2 = scmp.lt.s32.totalorder %s13317_s14, 3  ;;  %p13373_p4 = scmp.eq.s32.totalorder %s12866_s15, 0 }
   0x7   : > { %s13957_s16 = smov (%p31_p0, %s29_s16), 0  ;;  %s145_s21 = sshll.u32 %s13948_s0, 4  ;;  %s146_s21 = int_to_ptr.hbm [resolvable:$true] %s145_s21 }
   0x8   : > { %p13367_p3 = pnand %p12867_p1, %p123_p2  ;;  %s13319_s22 = smov [#allocation2]  }
   0x9   : > { %s147_s23 = sshll.u32 %s13319_s22, 4  ;;  %s156_s26 = sshll.u32 %s13949_s1, 4  ;;  %s148_s23 = int_to_ptr.vmem [resolvable:$true] %s147_s23  ;;  %s157_s26 = int_to_ptr.hbm [resolvable:$true] %s156_s26 }
   0xa   : > { %p13147_p5 = pneg %p13367_p3  ;;  %s13320_s27 = smov [#allocation5]  }
   0xb   : > { %s158_s28 = sshll.u32 %s13320_s27, 4  ;;  %s13321_s29 = smov 32768   ;;  %s159_s28 = int_to_ptr.vmem [resolvable:$true] %s158_s28 }
   0xc   : > { %p13148_p6 = pnand %p13373_p4, %p13147_p5  ;;  %s13322_s30 = smov 2048  }
   0xd   : > { %174 = sbr.rel (%p13367_p3) target bundleno = 1460 (0x5b4), region = 28 }
   0xe   : > { %13150 = dma.hbm_to_vmem [thread:$0]  (!%p13148_p6), %s146_s21, 32768, %s148_s23, [#allocation3]  }
   0xf   : > { %13153 = dma.hbm_to_vmem [thread:$0]  (!%p13148_p6), %s157_s26, 65536, %s159_s28, [#allocation6], %s13321_s29, %s13321_s29, %s13322_s30  }
  0x12   : > { %13296 = dma.done.wait (%p13373_p4), [#allocation3], 32768  }
  0x13   : > { %13298 = vsyncadd (%p13373_p4), [#allocation3], 4294934528 }
  0x14   : > { %13300 = dma.done.wait (%p13373_p4), [#allocation6], 65536  }
  0x15   : > { %13302 = vsyncadd (%p13373_p4), [#allocation6], 4294901760  ;;  %p12873_p7 = scmp.ne.s32.totalorder %s13309_s12, 0 }
  0x17   : > { %202 = sbr.rel (%p12873_p7) target bundleno = 679 (0x2a7), region = 40 }
  0x1c   : > { %v728_v0 = vld [vmem:[#allocation5 + $0x810] sm:$0xff]  ;;  %v726_v1 = vld [vmem:[#allocation5 + $0x800] sm:$0xff]  ;;  %v727_v2 = vld [vmem:[#allocation5 + $0x808] sm:$0xff]  ;;  %vm207_vm0 = vcmask 130048  }
  0x1d   : > { %1037 = vmatpush.xpose.msra.mxu2 %v728_v0  ;;  %997 = vmatpush.xpose.msra.mxu0 %v726_v1  ;;  %v729_v3 = vld [vmem:[#allocation5 + $0x818] sm:$0xff]  ;;  %v472_v4 = vld [vmem:[#allocation5 + $0x10] sm:$0xff]  ;;  %v470_v5 = vld [vmem:[#allocation5] sm:$0xff] }
  0x1e   : > { %1017 = vmatpush.xpose.msra.mxu1 %v727_v2  ;;  %1057 = vmatpush.xpose.msra.mxu3 %v729_v3  ;;  %v471_v6 = vld [vmem:[#allocation5 + $0x8] sm:$0xff]  ;;  %v473_v7 = vld [vmem:[#allocation5 + $0x18] sm:$0xff]  ;;  %v732_v8 = vld [vmem:[#allocation5 + $0x830] sm:$0xff] }
  0x1f   : > { %v730_v9 = vld [vmem:[#allocation5 + $0x820] sm:$0xff]  ;;  %v211_v10 = vld [vmem:[#allocation2 + $0x10] sm:$0xff]  ;;  %v210_v12 = vld [vmem:[#allocation2 + $0x8] sm:$0xff] }
  0x20   : > { %v209_v11 = vld [vmem:[#allocation2] sm:$0xff]  ;;  %v212_v13 = vld [vmem:[#allocation2 + $0x18] sm:$0xff]  ;;  %v731_v15 = vld [vmem:[#allocation5 + $0x828] sm:$0xff] }
  0x21   : > { %1038 = vmatpush.xpose.msra.mxu2 %v472_v4  ;;  %998 = vmatpush.xpose.msra.mxu0 %v470_v5  ;;  %v733_v14 = vld [vmem:[#allocation5 + $0x838] sm:$0xff]  ;;  %v476_v16 = vld [vmem:[#allocation5 + $0x30] sm:$0xff]  ;;  %v474_v17 = vld [vmem:[#allocation5 + $0x20] sm:$0xff] }
  0x22   : > { %1018 = vmatpush.xpose.msra.mxu1 %v471_v6  ;;  %1058 = vmatpush.xpose.msra.mxu3 %v473_v7  ;;  %v736_v18 = vld [vmem:[#allocation5 + $0x850] sm:$0xff]  ;;  %v734_v19 = vld [vmem:[#allocation5 + $0x840] sm:$0xff]  ;;  %v477_v20 = vld [vmem:[#allocation5 + $0x38] sm:$0xff] }
  0x23   : > { %v475_v21 = vld [vmem:[#allocation5 + $0x28] sm:$0xff]  ;;  %v737_v22 = vld [vmem:[#allocation5 + $0x858] sm:$0xff]  ;;  %v215_v24 = vld [vmem:[#allocation2 + $0x30] sm:$0xff] }
  0x24   : > { %1039 = vmatmul.f32.vlgmr.msra.gmra.mxu2 %v211_v10  ;;  %999 = vmatmul.f32.vlgmr.msra.gmra.mxu0 %v209_v11  ;;  %v735_v23 = vld [vmem:[#allocation5 + $0x848] sm:$0xff]  ;;  %v213_v25 = vld [vmem:[#allocation2 + $0x20] sm:$0xff]  ;;  %v216_v26 = vld [vmem:[#allocation2 + $0x38] sm:$0xff] }
  0x25   : > { %1117 = vmatpush.xpose.msrb.mxu2 %v732_v8  ;;  %1077 = vmatpush.xpose.msrb.mxu0 %v730_v9  ;;  %v214_v27 = vld [vmem:[#allocation2 + $0x28] sm:$0xff]  ;;  %v480_v28 = vld [vmem:[#allocation5 + $0x50] sm:$0xff]  ;;  %v478_v29 = vld [vmem:[#allocation5 + $0x40] sm:$0xff] }
  0x26   : > { %1019 = vmatmul.f32.vlgmr.msra.gmra.mxu1 %v210_v12  ;;  %1059 = vmatmul.f32.vlgmr.msra.gmra.mxu3 %v212_v13  ;;  %v481_v30 = vld [vmem:[#allocation5 + $0x58] sm:$0xff]  ;;  %v479_v31 = vld [vmem:[#allocation5 + $0x48] sm:$0xff]  ;;  %v740_v32 = vld [vmem:[#allocation5 + $0x870] sm:$0xff] }
  0x27   : > { %1137 = vmatpush.xpose.msrb.mxu3 %v733_v14  ;;  %1097 = vmatpush.xpose.msrb.mxu1 %v731_v15  ;;  %v738_v33 = vld [vmem:[#allocation5 + $0x860] sm:$0xff]  ;;  %v741_v34 = vld [vmem:[#allocation5 + $0x878] sm:$0xff]  ;;  %v739_v35 = vld [vmem:[#allocation5 + $0x868] sm:$0xff] }
  0x28   : > { %v219_v36 = vld [vmem:[#allocation2 + $0x50] sm:$0xff]  ;;  %v217_v37 = vld [vmem:[#allocation2 + $0x40] sm:$0xff]  ;;  %v220_v38 = vld [vmem:[#allocation2 + $0x58] sm:$0xff] }
  0x29   : > { %1118 = vmatpush.xpose.msrb.mxu2 %v476_v16  ;;  %1078 = vmatpush.xpose.msrb.mxu0 %v474_v17  ;;  %v218_v39 = vld [vmem:[#allocation2 + $0x48] sm:$0xff]  ;;  %v484_v40 = vld [vmem:[#allocation5 + $0x70] sm:$0xff]  ;;  %v482_v41 = vld [vmem:[#allocation5 + $0x60] sm:$0xff] }
  0x2a   : > { %v485_v42 = vld [vmem:[#allocation5 + $0x78] sm:$0xff]  ;;  %v483_v43 = vld [vmem:[#allocation5 + $0x68] sm:$0xff]  ;;  %v744_v44 = vld [vmem:[#allocation5 + $0x890] sm:$0xff] }
  0x2b   : > { %1138 = vmatpush.xpose.msrb.mxu3 %v477_v20  ;;  %1098 = vmatpush.xpose.msrb.mxu1 %v475_v21  ;;  %v742_v45 = vld [vmem:[#allocation5 + $0x880] sm:$0xff]  ;;  %v745_v46 = vld [vmem:[#allocation5 + $0x898] sm:$0xff]  ;;  %v743_v47 = vld [vmem:[#allocation5 + $0x888] sm:$0xff] }
  0x2c   : > { %1119 = vmatmul.f32.vlgmr.msrb.gmra.mxu2 %v215_v24  ;;  %1079 = vmatmul.f32.vlgmr.msrb.gmra.mxu0 %v213_v25  ;;  %v223_v48 = vld [vmem:[#allocation2 + $0x70] sm:$0xff]  ;;  %v221_v49 = vld [vmem:[#allocation2 + $0x60] sm:$0xff]  ;;  %v224_v50 = vld [vmem:[#allocation2 + $0x78] sm:$0xff] }
  0x2d   : > { %1197 = vmatpush.xpose.msra.mxu2 %v736_v18  ;;  %1157 = vmatpush.xpose.msra.mxu0 %v734_v19  ;;  %v222_v51 = vld [vmem:[#allocation2 + $0x68] sm:$0xff]  ;;  %v488_v52 = vld [vmem:[#allocation5 + $0x90] sm:$0xff]  ;;  %v486_v53 = vld [vmem:[#allocation5 + $0x80] sm:$0xff] }
  0x2e   : > { %1139 = vmatmul.f32.vlgmr.msrb.gmra.mxu3 %v216_v26  ;;  %1099 = vmatmul.f32.vlgmr.msrb.gmra.mxu1 %v214_v27  ;;  %v489_v54 = vld [vmem:[#allocation5 + $0x98] sm:$0xff]  ;;  %v487_v55 = vld [vmem:[#allocation5 + $0x88] sm:$0xff]  ;;  %v748_v56 = vld [vmem:[#allocation5 + $0x8b0] sm:$0xff] }
  0x2f   : > { %1217 = vmatpush.xpose.msra.mxu3 %v737_v22  ;;  %1177 = vmatpush.xpose.msra.mxu1 %v735_v23  ;;  %v746_v57 = vld [vmem:[#allocation5 + $0x8a0] sm:$0xff]  ;;  %v749_v58 = vld [vmem:[#allocation5 + $0x8b8] sm:$0xff]  ;;  %v747_v59 = vld [vmem:[#allocation5 + $0x8a8] sm:$0xff] }
  0x30   : > { %v227_v60 = vld [vmem:[#allocation2 + $0x90] sm:$0xff]  ;;  %v225_v61 = vld [vmem:[#allocation2 + $0x80] sm:$0xff]  ;;  %v228_v62 = vld [vmem:[#allocation2 + $0x98] sm:$0xff] }
  0x31   : > { %1198 = vmatpush.xpose.msra.mxu2 %v480_v28  ;;  %1158 = vmatpush.xpose.msra.mxu0 %v478_v29  ;;  %v226_v63 = vld [vmem:[#allocation2 + $0x88] sm:$0xff]  ;;  %v492_v0 = vld [vmem:[#allocation5 + $0xb0] sm:$0xff]  ;;  %v490_v1 = vld [vmem:[#allocation5 + $0xa0] sm:$0xff] }
  0x32   : > { %v493_v2 = vld [vmem:[#allocation5 + $0xb8] sm:$0xff]  ;;  %v491_v3 = vld [vmem:[#allocation5 + $0xa8] sm:$0xff]  ;;  %v752_v4 = vld [vmem:[#allocation5 + $0x8d0] sm:$0xff] }
  0x33   : > { %1218 = vmatpush.xpose.msra.mxu3 %v481_v30  ;;  %1178 = vmatpush.xpose.msra.mxu1 %v479_v31  ;;  %v750_v5 = vld [vmem:[#allocation5 + $0x8c0] sm:$0xff]  ;;  %v753_v6 = vld [vmem:[#allocation5 + $0x8d8] sm:$0xff]  ;;  %v751_v7 = vld [vmem:[#allocation5 + $0x8c8] sm:$0xff] }
  0x34   : > { %1199 = vmatmul.f32.vlgmr.msra.gmra.mxu2 %v219_v36  ;;  %1159 = vmatmul.f32.vlgmr.msra.gmra.mxu0 %v217_v37  ;;  %v231_v8 = vld [vmem:[#allocation2 + $0xb0] sm:$0xff]  ;;  %v229_v9 = vld [vmem:[#allocation2 + $0xa0] sm:$0xff]  ;;  %v232_v10 = vld [vmem:[#allocation2 + $0xb8] sm:$0xff] }
  0x35   : > { %1277 = vmatpush.xpose.msrb.mxu2 %v740_v32  ;;  %1237 = vmatpush.xpose.msrb.mxu0 %v738_v33  ;;  %v230_v11 = vld [vmem:[#allocation2 + $0xa8] sm:$0xff]  ;;  %v496_v12 = vld [vmem:[#allocation5 + $0xd0] sm:$0xff]  ;;  %v494_v13 = vld [vmem:[#allocation5 + $0xc0] sm:$0xff] }
  0x36   : > { %1219 = vmatmul.f32.vlgmr.msra.gmra.mxu3 %v220_v38  ;;  %1179 = vmatmul.f32.vlgmr.msra.gmra.mxu1 %v218_v39  ;;  %v497_v14 = vld [vmem:[#allocation5 + $0xd8] sm:$0xff]  ;;  %v495_v15 = vld [vmem:[#allocation5 + $0xc8] sm:$0xff]  ;;  %v756_v16 = vld [vmem:[#allocation5 + $0x8f0] sm:$0xff] }
  0x37   : > { %1297 = vmatpush.xpose.msrb.mxu3 %v741_v34  ;;  %1257 = vmatpush.xpose.msrb.mxu1 %v739_v35  ;;  %v754_v17 = vld [vmem:[#allocation5 + $0x8e0] sm:$0xff]  ;;  %v757_v18 = vld [vmem:[#allocation5 + $0x8f8] sm:$0xff]  ;;  %v755_v19 = vld [vmem:[#allocation5 + $0x8e8] sm:$0xff] }
  0x38   : > { %v235_v20 = vld [vmem:[#allocation2 + $0xd0] sm:$0xff]  ;;  %v233_v21 = vld [vmem:[#allocation2 + $0xc0] sm:$0xff]  ;;  %v236_v22 = vld [vmem:[#allocation2 + $0xd8] sm:$0xff] }
  0x39   : > { %1278 = vmatpush.xpose.msrb.mxu2 %v484_v40  ;;  %1238 = vmatpush.xpose.msrb.mxu0 %v482_v41  ;;  %v234_v23 = vld [vmem:[#allocation2 + $0xc8] sm:$0xff]  ;;  %v500_v24 = vld [vmem:[#allocation5 + $0xf0] sm:$0xff]  ;;  %v498_v25 = vld [vmem:[#allocation5 + $0xe0] sm:$0xff] }
  0x3a   : > { %v501_v26 = vld [vmem:[#allocation5 + $0xf8] sm:$0xff]  ;;  %v499_v27 = vld [vmem:[#allocation5 + $0xe8] sm:$0xff]  ;;  %v760_v28 = vld [vmem:[#allocation5 + $0x910] sm:$0xff] }
  0x3b   : > { %1298 = vmatpush.xpose.msrb.mxu3 %v485_v42  ;;  %1258 = vmatpush.xpose.msrb.mxu1 %v483_v43  ;;  %v758_v29 = vld [vmem:[#allocation5 + $0x900] sm:$0xff]  ;;  %v761_v30 = vld [vmem:[#allocation5 + $0x918] sm:$0xff]  ;;  %v759_v31 = vld [vmem:[#allocation5 + $0x908] sm:$0xff] }
  0x3c   : > { %1279 = vmatmul.f32.vlgmr.msrb.gmra.mxu2 %v223_v48  ;;  %1239 = vmatmul.f32.vlgmr.msrb.gmra.mxu0 %v221_v49  ;;  %v239_v32 = vld [vmem:[#allocation2 + $0xf0] sm:$0xff]  ;;  %v237_v33 = vld [vmem:[#allocation2 + $0xe0] sm:$0xff]  ;;  %v240_v34 = vld [vmem:[#allocation2 + $0xf8] sm:$0xff] }
  0x3d   : > { %1357 = vmatpush.xpose.msra.mxu2 %v744_v44  ;;  %1317 = vmatpush.xpose.msra.mxu0 %v742_v45  ;;  %v238_v35 = vld [vmem:[#allocation2 + $0xe8] sm:$0xff]  ;;  %v504_v36 = vld [vmem:[#allocation5 + $0x110] sm:$0xff]  ;;  %v502_v37 = vld [vmem:[#allocation5 + $0x100] sm:$0xff] }
  0x3e   : > { %1299 = vmatmul.f32.vlgmr.msrb.gmra.mxu3 %v224_v50  ;;  %1259 = vmatmul.f32.vlgmr.msrb.gmra.mxu1 %v222_v51  ;;  %v505_v38 = vld [vmem:[#allocation5 + $0x118] sm:$0xff]  ;;  %v503_v39 = vld [vmem:[#allocation5 + $0x108] sm:$0xff]  ;;  %v764_v40 = vld [vmem:[#allocation5 + $0x930] sm:$0xff] }
  0x3f   : > { %1377 = vmatpush.xpose.msra.mxu3 %v745_v46  ;;  %1337 = vmatpush.xpose.msra.mxu1 %v743_v47  ;;  %v762_v41 = vld [vmem:[#allocation5 + $0x920] sm:$0xff]  ;;  %v765_v42 = vld [vmem:[#allocation5 + $0x938] sm:$0xff]  ;;  %v763_v43 = vld [vmem:[#allocation5 + $0x928] sm:$0xff] }
  0x40   : > { %v243_v44 = vld [vmem:[#allocation2 + $0x110] sm:$0xff]  ;;  %v241_v45 = vld [vmem:[#allocation2 + $0x100] sm:$0xff]  ;;  %v244_v46 = vld [vmem:[#allocation2 + $0x118] sm:$0xff] }
  0x41   : > { %1358 = vmatpush.xpose.msra.mxu2 %v488_v52  ;;  %1318 = vmatpush.xpose.msra.mxu0 %v486_v53  ;;  %v242_v47 = vld [vmem:[#allocation2 + $0x108] sm:$0xff]  ;;  %v508_v48 = vld [vmem:[#allocation5 + $0x130] sm:$0xff]  ;;  %v506_v49 = vld [vmem:[#allocation5 + $0x120] sm:$0xff] }
  0x42   : > { %v509_v50 = vld [vmem:[#allocation5 + $0x138] sm:$0xff]  ;;  %v507_v51 = vld [vmem:[#allocation5 + $0x128] sm:$0xff]  ;;  %v768_v52 = vld [vmem:[#allocation5 + $0x950] sm:$0xff] }
  0x43   : > { %1378 = vmatpush.xpose.msra.mxu3 %v489_v54  ;;  %1338 = vmatpush.xpose.msra.mxu1 %v487_v55  ;;  %v766_v53 = vld [vmem:[#allocation5 + $0x940] sm:$0xff]  ;;  %v769_v54 = vld [vmem:[#allocation5 + $0x958] sm:$0xff]  ;;  %v767_v55 = vld [vmem:[#allocation5 + $0x948] sm:$0xff] }
  0x44   : > { %1359 = vmatmul.f32.vlgmr.msra.gmra.mxu2 %v227_v60  ;;  %1319 = vmatmul.f32.vlgmr.msra.gmra.mxu0 %v225_v61  ;;  %v512_v60 = vld [vmem:[#allocation5 + $0x150] sm:$0xff]  ;;  %v510_v61 = vld [vmem:[#allocation5 + $0x140] sm:$0xff] }
  0x45   : > { %1437 = vmatpush.xpose.msrb.mxu2 %v748_v56  ;;  %1397 = vmatpush.xpose.msrb.mxu0 %v746_v57  ;;  %v247_v56 = vld [vmem:[#allocation2 + $0x130] sm:$0xff]  ;;  %v245_v57 = vld [vmem:[#allocation2 + $0x120] sm:$0xff] }
  0x46   : > { %1379 = vmatmul.f32.vlgmr.msra.gmra.mxu3 %v228_v62  ;;  %1339 = vmatmul.f32.vlgmr.msra.gmra.mxu1 %v226_v63  ;;  %v513_v62 = vld [vmem:[#allocation5 + $0x158] sm:$0xff]  ;;  %v511_v63 = vld [vmem:[#allocation5 + $0x148] sm:$0xff] }
  0x47   : > { %1457 = vmatpush.xpose.msrb.mxu3 %v749_v58  ;;  %1417 = vmatpush.xpose.msrb.mxu1 %v747_v59  ;;  %v248_v58 = vld [vmem:[#allocation2 + $0x138] sm:$0xff]  ;;  %v246_v59 = vld [vmem:[#allocation2 + $0x128] sm:$0xff] }
  0x49   : > { %1438 = vmatpush.xpose.msrb.mxu2 %v492_v0  ;;  %1398 = vmatpush.xpose.msrb.mxu0 %v490_v1  ;;  %v772_v0 = vld [vmem:[#allocation5 + $0x970] sm:$0xff]  ;;  %v770_v1 = vld [vmem:[#allocation5 + $0x960] sm:$0xff] }
  0x4b   : > { %1458 = vmatpush.xpose.msrb.mxu3 %v493_v2  ;;  %1418 = vmatpush.xpose.msrb.mxu1 %v491_v3  ;;  %v773_v2 = vld [vmem:[#allocation5 + $0x978] sm:$0xff]  ;;  %v771_v3 = vld [vmem:[#allocation5 + $0x968] sm:$0xff] }
  0x4c   : > { %1439 = vmatmul.f32.vlgmr.msrb.gmra.mxu2 %v231_v8  ;;  %1399 = vmatmul.f32.vlgmr.msrb.gmra.mxu0 %v229_v9  ;;  %v516_v8 = vld [vmem:[#allocation5 + $0x170] sm:$0xff]  ;;  %v514_v9 = vld [vmem:[#allocation5 + $0x160] sm:$0xff] }
  0x4d   : > { %1517 = vmatpush.xpose.msra.mxu2 %v752_v4  ;;  %1477 = vmatpush.xpose.msra.mxu0 %v750_v5  ;;  %v251_v4 = vld [vmem:[#allocation2 + $0x150] sm:$0xff]  ;;  %v249_v5 = vld [vmem:[#allocation2 + $0x140] sm:$0xff] }
  0x4e   : > { %1459 = vmatmul.f32.vlgmr.msrb.gmra.mxu3 %v232_v10  ;;  %1419 = vmatmul.f32.vlgmr.msrb.gmra.mxu1 %v230_v11  ;;  %v517_v10 = vld [vmem:[#allocation5 + $0x178] sm:$0xff]  ;;  %v515_v11 = vld [vmem:[#allocation5 + $0x168] sm:$0xff] }
  0x4f   : > { %1537 = vmatpush.xpose.msra.mxu3 %v753_v6  ;;  %1497 = vmatpush.xpose.msra.mxu1 %v751_v7  ;;  %v252_v6 = vld [vmem:[#allocation2 + $0x158] sm:$0xff]  ;;  %v250_v7 = vld [vmem:[#allocation2 + $0x148] sm:$0xff] }
  0x51   : > { %1518 = vmatpush.xpose.msra.mxu2 %v496_v12  ;;  %1478 = vmatpush.xpose.msra.mxu0 %v494_v13  ;;  %v776_v12 = vld [vmem:[#allocation5 + $0x990] sm:$0xff]  ;;  %v774_v13 = vld [vmem:[#allocation5 + $0x980] sm:$0xff] }
  0x53   : > { %1538 = vmatpush.xpose.msra.mxu3 %v497_v14  ;;  %1498 = vmatpush.xpose.msra.mxu1 %v495_v15  ;;  %v777_v14 = vld [vmem:[#allocation5 + $0x998] sm:$0xff]  ;;  %v775_v15 = vld [vmem:[#allocation5 + $0x988] sm:$0xff] }
  0x54   : > { %1519 = vmatmul.f32.vlgmr.msra.gmra.mxu2 %v235_v20  ;;  %1479 = vmatmul.f32.vlgmr.msra.gmra.mxu0 %v233_v21  ;;  %v520_v20 = vld [vmem:[#allocation5 + $0x190] sm:$0xff]  ;;  %v518_v21 = vld [vmem:[#allocation5 + $0x180] sm:$0xff] }
  0x55   : > { %1597 = vmatpush.xpose.msrb.mxu2 %v756_v16  ;;  %1557 = vmatpush.xpose.msrb.mxu0 %v754_v17  ;;  %v255_v16 = vld [vmem:[#allocation2 + $0x170] sm:$0xff]  ;;  %v253_v17 = vld [vmem:[#allocation2 + $0x160] sm:$0xff] }
  0x56   : > { %1539 = vmatmul.f32.vlgmr.msra.gmra.mxu3 %v236_v22  ;;  %1499 = vmatmul.f32.vlgmr.msra.gmra.mxu1 %v234_v23  ;;  %v521_v22 = vld [vmem:[#allocation5 + $0x198] sm:$0xff]  ;;  %v519_v23 = vld [vmem:[#allocation5 + $0x188] sm:$0xff] }
  0x57   : > { %1617 = vmatpush.xpose.msrb.mxu3 %v757_v18  ;;  %1577 = vmatpush.xpose.msrb.mxu1 %v755_v19  ;;  %v256_v18 = vld [vmem:[#allocation2 + $0x178] sm:$0xff]  ;;  %v254_v19 = vld [vmem:[#allocation2 + $0x168] sm:$0xff] }
  0x59   : > { %1598 = vmatpush.xpose.msrb.mxu2 %v500_v24  ;;  %1558 = vmatpush.xpose.msrb.mxu0 %v498_v25  ;;  %v780_v24 = vld [vmem:[#allocation5 + $0x9b0] sm:$0xff]  ;;  %v778_v25 = vld [vmem:[#allocation5 + $0x9a0] sm:$0xff] }
  0x5b   : > { %1618 = vmatpush.xpose.msrb.mxu3 %v501_v26  ;;  %1578 = vmatpush.xpose.msrb.mxu1 %v499_v27  ;;  %v781_v26 = vld [vmem:[#allocation5 + $0x9b8] sm:$0xff]  ;;  %v779_v27 = vld [vmem:[#allocation5 + $0x9a8] sm:$0xff] }
  0x5c   : > { %1599 = vmatmul.f32.vlgmr.msrb.gmra.mxu2 %v239_v32  ;;  %1559 = vmatmul.f32.vlgmr.msrb.gmra.mxu0 %v237_v33  ;;  %v524_v32 = vld [vmem:[#allocation5 + $0x1b0] sm:$0xff]  ;;  %v522_v33 = vld [vmem:[#allocation5 + $0x1a0] sm:$0xff] }
  0x5d   : > { %1677 = vmatpush.xpose.msra.mxu2 %v760_v28  ;;  %1637 = vmatpush.xpose.msra.mxu0 %v758_v29  ;;  %v259_v28 = vld [vmem:[#allocation2 + $0x190] sm:$0xff]  ;;  %v257_v29 = vld [vmem:[#allocation2 + $0x180] sm:$0xff] }
  0x5e   : > { %1619 = vmatmul.f32.vlgmr.msrb.gmra.mxu3 %v240_v34  ;;  %1579 = vmatmul.f32.vlgmr.msrb.gmra.mxu1 %v238_v35  ;;  %v525_v34 = vld [vmem:[#allocation5 + $0x1b8] sm:$0xff]  ;;  %v523_v35 = vld [vmem:[#allocation5 + $0x1a8] sm:$0xff] }
  0x5f   : > { %1697 = vmatpush.xpose.msra.mxu3 %v761_v30  ;;  %1657 = vmatpush.xpose.msra.mxu1 %v759_v31  ;;  %v260_v30 = vld [vmem:[#allocation2 + $0x198] sm:$0xff]  ;;  %v258_v31 = vld [vmem:[#allocation2 + $0x188] sm:$0xff] }
  0x61   : > { %1678 = vmatpush.xpose.msra.mxu2 %v504_v36  ;;  %1638 = vmatpush.xpose.msra.mxu0 %v502_v37  ;;  %v784_v36 = vld [vmem:[#allocation5 + $0x9d0] sm:$0xff]  ;;  %v782_v37 = vld [vmem:[#allocation5 + $0x9c0] sm:$0xff] }
  0x63   : > { %1698 = vmatpush.xpose.msra.mxu3 %v505_v38  ;;  %1658 = vmatpush.xpose.msra.mxu1 %v503_v39  ;;  %v785_v38 = vld [vmem:[#allocation5 + $0x9d8] sm:$0xff]  ;;  %v783_v39 = vld [vmem:[#allocation5 + $0x9c8] sm:$0xff] }
  0x64   : > { %1679 = vmatmul.f32.vlgmr.msra.gmra.mxu2 %v243_v44  ;;  %1639 = vmatmul.f32.vlgmr.msra.gmra.mxu0 %v241_v45  ;;  %v528_v44 = vld [vmem:[#allocation5 + $0x1d0] sm:$0xff]  ;;  %v526_v45 = vld [vmem:[#allocation5 + $0x1c0] sm:$0xff] }
  0x65   : > { %1757 = vmatpush.xpose.msrb.mxu2 %v764_v40  ;;  %1717 = vmatpush.xpose.msrb.mxu0 %v762_v41  ;;  %v263_v40 = vld [vmem:[#allocation2 + $0x1b0] sm:$0xff]  ;;  %v261_v41 = vld [vmem:[#allocation2 + $0x1a0] sm:$0xff] }
  0x66   : > { %1699 = vmatmul.f32.vlgmr.msra.gmra.mxu3 %v244_v46  ;;  %1659 = vmatmul.f32.vlgmr.msra.gmra.mxu1 %v242_v47  ;;  %v529_v46 = vld [vmem:[#allocation5 + $0x1d8] sm:$0xff]  ;;  %v527_v47 = vld [vmem:[#allocation5 + $0x1c8] sm:$0xff] }
  0x67   : > { %1777 = vmatpush.xpose.msrb.mxu3 %v765_v42  ;;  %1737 = vmatpush.xpose.msrb.mxu1 %v763_v43  ;;  %v264_v42 = vld [vmem:[#allocation2 + $0x1b8] sm:$0xff]  ;;  %v262_v43 = vld [vmem:[#allocation2 + $0x1a8] sm:$0xff] }
  0x69   : > { %1758 = vmatpush.xpose.msrb.mxu2 %v508_v48  ;;  %1718 = vmatpush.xpose.msrb.mxu0 %v506_v49  ;;  %v788_v48 = vld [vmem:[#allocation5 + $0x9f0] sm:$0xff]  ;;  %v786_v49 = vld [vmem:[#allocation5 + $0x9e0] sm:$0xff] }
  0x6b   : > { %1778 = vmatpush.xpose.msrb.mxu3 %v509_v50  ;;  %1738 = vmatpush.xpose.msrb.mxu1 %v507_v51  ;;  %v789_v50 = vld [vmem:[#allocation5 + $0x9f8] sm:$0xff]  ;;  %v787_v51 = vld [vmem:[#allocation5 + $0x9e8] sm:$0xff] }
  0x6c   : > { %1759 = vmatmul.f32.vlgmr.msrb.gmra.mxu2 %v247_v56  ;;  %1719 = vmatmul.f32.vlgmr.msrb.gmra.mxu0 %v245_v57  ;;  %v532_v56 = vld [vmem:[#allocation5 + $0x1f0] sm:$0xff]  ;;  %v530_v57 = vld [vmem:[#allocation5 + $0x1e0] sm:$0xff] }
  0x6d   : > { %1837 = vmatpush.xpose.msra.mxu2 %v768_v52  ;;  %1797 = vmatpush.xpose.msra.mxu0 %v766_v53  ;;  %v267_v52 = vld [vmem:[#allocation2 + $0x1d0] sm:$0xff]  ;;  %v265_v53 = vld [vmem:[#allocation2 + $0x1c0] sm:$0xff] }
  0x6e   : > { %1779 = vmatmul.f32.vlgmr.msrb.gmra.mxu3 %v248_v58  ;;  %1739 = vmatmul.f32.vlgmr.msrb.gmra.mxu1 %v246_v59  ;;  %v533_v58 = vld [vmem:[#allocation5 + $0x1f8] sm:$0xff]  ;;  %v531_v59 = vld [vmem:[#allocation5 + $0x1e8] sm:$0xff] }
  0x6f   : > { %1857 = vmatpush.xpose.msra.mxu3 %v769_v54  ;;  %1817 = vmatpush.xpose.msra.mxu1 %v767_v55  ;;  %v268_v54 = vld [vmem:[#allocation2 + $0x1d8] sm:$0xff]  ;;  %v266_v55 = vld [vmem:[#allocation2 + $0x1c8] sm:$0xff] }
  0x71   : > { %1838 = vmatpush.xpose.msra.mxu2 %v512_v60  ;;  %1798 = vmatpush.xpose.msra.mxu0 %v510_v61  ;;  %v792_v60 = vld [vmem:[#allocation5 + $0xa10] sm:$0xff]  ;;  %v790_v61 = vld [vmem:[#allocation5 + $0xa00] sm:$0xff] }
  0x73   : > { %1858 = vmatpush.xpose.msra.mxu3 %v513_v62  ;;  %1818 = vmatpush.xpose.msra.mxu1 %v511_v63  ;;  %v793_v62 = vld [vmem:[#allocation5 + $0xa18] sm:$0xff]  ;;  %v791_v63 = vld [vmem:[#allocation5 + $0xa08] sm:$0xff] }
  0x74   : > { %1839 = vmatmul.f32.vlgmr.msra.gmra.mxu2 %v251_v4  ;;  %1799 = vmatmul.f32.vlgmr.msra.gmra.mxu0 %v249_v5  ;;  %v536_v4 = vld [vmem:[#allocation5 + $0x210] sm:$0xff]  ;;  %v534_v5 = vld [vmem:[#allocation5 + $0x200] sm:$0xff] }
  0x75   : > { %1917 = vmatpush.xpose.msrb.mxu2 %v772_v0  ;;  %1877 = vmatpush.xpose.msrb.mxu0 %v770_v1  ;;  %v271_v0 = vld [vmem:[#allocation2 + $0x1f0] sm:$0xff]  ;;  %v269_v1 = vld [vmem:[#allocation2 + $0x1e0] sm:$0xff] }
  0x76   : > { %1859 = vmatmul.f32.vlgmr.msra.gmra.mxu3 %v252_v6  ;;  %1819 = vmatmul.f32.vlgmr.msra.gmra.mxu1 %v250_v7  ;;  %v537_v6 = vld [vmem:[#allocation5 + $0x218] sm:$0xff]  ;;  %v535_v7 = vld [vmem:[#allocation5 + $0x208] sm:$0xff] }
  0x77   : > { %1937 = vmatpush.xpose.msrb.mxu3 %v773_v2  ;;  %1897 = vmatpush.xpose.msrb.mxu1 %v771_v3  ;;  %v272_v2 = vld [vmem:[#allocation2 + $0x1f8] sm:$0xff]  ;;  %v270_v3 = vld [vmem:[#allocation2 + $0x1e8] sm:$0xff] }
  0x79   : > { %1918 = vmatpush.xpose.msrb.mxu2 %v516_v8  ;;  %1878 = vmatpush.xpose.msrb.mxu0 %v514_v9  ;;  %v796_v8 = vld [vmem:[#allocation5 + $0xa30] sm:$0xff]  ;;  %v794_v9 = vld [vmem:[#allocation5 + $0xa20] sm:$0xff] }
  0x7b   : > { %1938 = vmatpush.xpose.msrb.mxu3 %v517_v10  ;;  %1898 = vmatpush.xpose.msrb.mxu1 %v515_v11  ;;  %v797_v10 = vld [vmem:[#allocation5 + $0xa38] sm:$0xff]  ;;  %v795_v11 = vld [vmem:[#allocation5 + $0xa28] sm:$0xff] }
  0x7c   : > { %1919 = vmatmul.f32.vlgmr.msrb.gmra.mxu2 %v255_v16  ;;  %1879 = vmatmul.f32.vlgmr.msrb.gmra.mxu0 %v253_v17  ;;  %v276_v16 = vld [vmem:[#allocation2 + $0x218] sm:$0xff]  ;;  %v274_v17 = vld [vmem:[#allocation2 + $0x208] sm:$0xff] }
  0x7d   : > { %1997 = vmatpush.xpose.msra.mxu2 %v776_v12  ;;  %1957 = vmatpush.xpose.msra.mxu0 %v774_v13  ;;  %v275_v13 = vld [vmem:[#allocation2 + $0x210] sm:$0xff] }
  0x7e   : > { %1939 = vmatmul.f32.vlgmr.msrb.gmra.mxu3 %v256_v18  ;;  %1899 = vmatmul.f32.vlgmr.msrb.gmra.mxu1 %v254_v19  ;;  %v540_v18 = vld [vmem:[#allocation5 + $0x230] sm:$0xff]  ;;  %v538_v19 = vld [vmem:[#allocation5 + $0x220] sm:$0xff] }
  0x7f   : > { %2017 = vmatpush.xpose.msra.mxu3 %v777_v14  ;;  %1977 = vmatpush.xpose.msra.mxu1 %v775_v15  ;;  %v273_v14 = vld [vmem:[#allocation2 + $0x200] sm:$0xff] }
  0x81   : > { %1998 = vmatpush.xpose.msra.mxu2 %v520_v20  ;;  %1958 = vmatpush.xpose.msra.mxu0 %v518_v21  ;;  %v541_v20 = vld [vmem:[#allocation5 + $0x238] sm:$0xff]  ;;  %v539_v21 = vld [vmem:[#allocation5 + $0x228] sm:$0xff] }
  0x83   : > { %2018 = vmatpush.xpose.msra.mxu3 %v521_v22  ;;  %1978 = vmatpush.xpose.msra.mxu1 %v519_v23  ;;  %v800_v22 = vld [vmem:[#allocation5 + $0xa50] sm:$0xff]  ;;  %v798_v23 = vld [vmem:[#allocation5 + $0xa40] sm:$0xff] }
  0x84   : > { %1999 = vmatmul.f32.vlgmr.msra.gmra.mxu2 %v259_v28  ;;  %1959 = vmatmul.f32.vlgmr.msra.gmra.mxu0 %v257_v29 }
  0x85   : > { %2077 = vmatpush.xpose.msrb.mxu2 %v780_v24  ;;  %2037 = vmatpush.xpose.msrb.mxu0 %v778_v25  ;;  %v801_v25 = vld [vmem:[#allocation5 + $0xa58] sm:$0xff] }
  0x86   : > { %2019 = vmatmul.f32.vlgmr.msra.gmra.mxu3 %v260_v30  ;;  %1979 = vmatmul.f32.vlgmr.msra.gmra.mxu1 %v258_v31  ;;  %v279_v31 = vld [vmem:[#allocation2 + $0x230] sm:$0xff] }
  0x87   : > { %2097 = vmatpush.xpose.msrb.mxu3 %v781_v26  ;;  %2057 = vmatpush.xpose.msrb.mxu1 %v779_v27  ;;  %v799_v26 = vld [vmem:[#allocation5 + $0xa48] sm:$0xff] }
  0x89   : > { %2078 = vmatpush.xpose.msrb.mxu2 %v524_v32  ;;  %2038 = vmatpush.xpose.msrb.mxu0 %v522_v33  ;;  %v277_v32 = vld [vmem:[#allocation2 + $0x220] sm:$0xff] }
  0x8b   : > { %2098 = vmatpush.xpose.msrb.mxu3 %v525_v34  ;;  %2058 = vmatpush.xpose.msrb.mxu1 %v523_v35  ;;  %v280_v35 = vld [vmem:[#allocation2 + $0x238] sm:$0xff] }
  0x8c   : > { %2079 = vmatmul.f32.vlgmr.msrb.gmra.mxu2 %v263_v40  ;;  %2039 = vmatmul.f32.vlgmr.msrb.gmra.mxu0 %v261_v41  ;;  %v545_v40 = vld [vmem:[#allocation5 + $0x258] sm:$0xff]  ;;  %v543_v41 = vld [vmem:[#allocation5 + $0x248] sm:$0xff] }
  0x8d   : > { %2157 = vmatpush.xpose.msra.mxu2 %v784_v36  ;;  %2117 = vmatpush.xpose.msra.mxu0 %v782_v37  ;;  %v278_v36 = vld [vmem:[#allocation2 + $0x228] sm:$0xff]  ;;  %v544_v37 = vld [vmem:[#allocation5 + $0x250] sm:$0xff] }
  0x8e   : > { %2099 = vmatmul.f32.vlgmr.msrb.gmra.mxu3 %v264_v42  ;;  %2059 = vmatmul.f32.vlgmr.msrb.gmra.mxu1 %v262_v43  ;;  %v804_v42 = vld [vmem:[#allocation5 + $0xa70] sm:$0xff]  ;;  %v802_v43 = vld [vmem:[#allocation5 + $0xa60] sm:$0xff] }
  0x8f   : > { %2177 = vmatpush.xpose.msra.mxu3 %v785_v38  ;;  %2137 = vmatpush.xpose.msra.mxu1 %v783_v39  ;;  %v542_v38 = vld [vmem:[#allocation5 + $0x240] sm:$0xff] }
  0x91   : > { %2158 = vmatpush.xpose.msra.mxu2 %v528_v44  ;;  %2118 = vmatpush.xpose.msra.mxu0 %v526_v45  ;;  %v805_v45 = vld [vmem:[#allocation5 + $0xa78] sm:$0xff] }
  0x93   : > { %2178 = vmatpush.xpose.msra.mxu3 %v529_v46  ;;  %2138 = vmatpush.xpose.msra.mxu1 %v527_v47  ;;  %v803_v46 = vld [vmem:[#allocation5 + $0xa68] sm:$0xff] }
  0x94   : > { %2159 = vmatmul.f32.vlgmr.msra.gmra.mxu2 %v267_v52  ;;  %2119 = vmatmul.f32.vlgmr.msra.gmra.mxu0 %v265_v53  ;;  %v281_v52 = vld [vmem:[#allocation2 + $0x240] sm:$0xff] }
  0x95   : > { %2237 = vmatpush.xpose.msrb.mxu2 %v788_v48  ;;  %2197 = vmatpush.xpose.msrb.mxu0 %v786_v49 }
  0x96   : > { %2179 = vmatmul.f32.vlgmr.msra.gmra.mxu3 %v268_v54  ;;  %2139 = vmatmul.f32.vlgmr.msra.gmra.mxu1 %v266_v55  ;;  %v284_v55 = vld [vmem:[#allocation2 + $0x258] sm:$0xff] }
  0x97   : > { %2257 = vmatpush.xpose.msrb.mxu3 %v789_v50  ;;  %2217 = vmatpush.xpose.msrb.mxu1 %v787_v51  ;;  %v283_v51 = vld [vmem:[#allocation2 + $0x250] sm:$0xff] }
  0x99   : > { %2238 = vmatpush.xpose.msrb.mxu2 %v532_v56  ;;  %2198 = vmatpush.xpose.msrb.mxu0 %v530_v57  ;;  %v282_v56 = vld [vmem:[#allocation2 + $0x248] sm:$0xff]  ;;  %v548_v57 = vld [vmem:[#allocation5 + $0x270] sm:$0xff] }
  0x9b   : > { %2258 = vmatpush.xpose.msrb.mxu3 %v533_v58  ;;  %2218 = vmatpush.xpose.msrb.mxu1 %v531_v59  ;;  %v546_v58 = vld [vmem:[#allocation5 + $0x260] sm:$0xff] }
  0x9c   : > { %2239 = vmatmul.f32.vlgmr.msrb.gmra.mxu2 %v271_v0  ;;  %2199 = vmatmul.f32.vlgmr.msrb.gmra.mxu0 %v269_v1  ;;  %v809_v1 = vld [vmem:[#allocation5 + $0xa98] sm:$0xff] }
  0x9d   : > { %2317 = vmatpush.xpose.msra.mxu2 %v792_v60  ;;  %2277 = vmatpush.xpose.msra.mxu0 %v790_v61  ;;  %v549_v60 = vld [vmem:[#allocation5 + $0x278] sm:$0xff]  ;;  %v547_v61 = vld [vmem:[#allocation5 + $0x268] sm:$0xff] }
  0x9e   : > { %2259 = vmatmul.f32.vlgmr.msrb.gmra.mxu3 %v272_v2  ;;  %2219 = vmatmul.f32.vlgmr.msrb.gmra.mxu1 %v270_v3  ;;  %v807_v2 = vld [vmem:[#allocation5 + $0xa88] sm:$0xff] }
  0x9f   : > { %2337 = vmatpush.xpose.msra.mxu3 %v793_v62  ;;  %2297 = vmatpush.xpose.msra.mxu1 %v791_v63  ;;  %v808_v62 = vld [vmem:[#allocation5 + $0xa90] sm:$0xff]  ;;  %v806_v63 = vld [vmem:[#allocation5 + $0xa80] sm:$0xff] }
  0xa1   : > { %2318 = vmatpush.xpose.msra.mxu2 %v536_v4  ;;  %2278 = vmatpush.xpose.msra.mxu0 %v534_v5  ;;  %v1000_v12 = vpop.f32.mrf.mxu0 }
  0xa3   : > { %2338 = vmatpush.xpose.msra.mxu3 %v537_v6  ;;  %2298 = vmatpush.xpose.msra.mxu1 %v535_v7  ;;  %v1020_v15 = vpop.f32.mrf.mxu1  ;;  %v287_v7 = vld [vmem:[#allocation2 + $0x270] sm:$0xff] }
  0xa4   : > { %2319 = vmatmul.f32.vlgmr.msra.gmra.mxu2 %v275_v13  ;;  %2279 = vmatmul.f32.vlgmr.msra.gmra.mxu0 %v273_v14  ;;  %v1021_v24 = vadd.f32 %v1020_v15, %v1000_v12  ;;  %v286_v12 = vld [vmem:[#allocation2 + $0x268] sm:$0xff]  ;;  %v552_v13 = vld [vmem:[#allocation5 + $0x290] sm:$0xff]  ;;  %v550_v14 = vld [vmem:[#allocation5 + $0x280] sm:$0xff] }
  0xa5   : > { %2397 = vmatpush.xpose.msrb.mxu2 %v796_v8  ;;  %2357 = vmatpush.xpose.msrb.mxu0 %v794_v9  ;;  %v285_v8 = vld [vmem:[#allocation2 + $0x260] sm:$0xff] }
  0xa6   : > { %2339 = vmatmul.f32.vlgmr.msra.gmra.mxu3 %v276_v16  ;;  %2299 = vmatmul.f32.vlgmr.msra.gmra.mxu1 %v274_v17  ;;  %v553_v16 = vld [vmem:[#allocation5 + $0x298] sm:$0xff]  ;;  %v551_v17 = vld [vmem:[#allocation5 + $0x288] sm:$0xff] }
  0xa7   : > { %2417 = vmatpush.xpose.msrb.mxu3 %v797_v10  ;;  %2377 = vmatpush.xpose.msrb.mxu1 %v795_v11  ;;  %v1040_v27 = vpop.f32.mrf.mxu2  ;;  %v288_v11 = vld [vmem:[#allocation2 + $0x278] sm:$0xff] }
  0xa8   : > { %v1041_v28 = vadd.f32 %v1040_v27, %v1021_v24  ;;  %v291_v27 = vld [vmem:[#allocation2 + $0x290] sm:$0xff] }
  0xa9   : > { %2398 = vmatpush.xpose.msrb.mxu2 %v540_v18  ;;  %2358 = vmatpush.xpose.msrb.mxu0 %v538_v19  ;;  %v1060_v29 = vpop.f32.mrf.mxu3  ;;  %v1080_v30 = vpop.f32.mrf.mxu0  ;;  %v812_v18 = vld [vmem:[#allocation5 + $0xab0] sm:$0xff]  ;;  %v810_v19 = vld [vmem:[#allocation5 + $0xaa0] sm:$0xff] }
  0xaa   : > { %v1061_v33 = vadd.f32 %v1060_v29, %v1041_v28  ;;  %v289_v28 = vld [vmem:[#allocation2 + $0x280] sm:$0xff] }
  0xab   : > { %2418 = vmatpush.xpose.msrb.mxu3 %v541_v20  ;;  %2378 = vmatpush.xpose.msrb.mxu1 %v539_v21  ;;  %v1100_v34 = vpop.f32.mrf.mxu1  ;;  %v813_v21 = vld [vmem:[#allocation5 + $0xab8] sm:$0xff] }
  0xac   : > { %v1081_v39 = vadd.f32 %v1080_v30, %v1061_v33  ;;  %2399 = vmatmul.f32.vlgmr.msrb.gmra.mxu2 %v279_v31  ;;  %2359 = vmatmul.f32.vlgmr.msrb.gmra.mxu0 %v277_v32  ;;  %v292_v31 = vld [vmem:[#allocation2 + $0x298] sm:$0xff]  ;;  %v290_v32 = vld [vmem:[#allocation2 + $0x288] sm:$0xff]  ;;  %v556_v33 = vld [vmem:[#allocation5 + $0x2b0] sm:$0xff] }
  0xad   : > { %2477 = vmatpush.xpose.msra.mxu2 %v800_v22  ;;  %2437 = vmatpush.xpose.msra.mxu0 %v798_v23  ;;  %v811_v22 = vld [vmem:[#allocation5 + $0xaa8] sm:$0xff] }
  0xae   : > { %2419 = vmatmul.f32.vlgmr.msrb.gmra.mxu3 %v280_v35  ;;  %2379 = vmatmul.f32.vlgmr.msrb.gmra.mxu1 %v278_v36  ;;  %v1101_v44 = vadd.f32 %v1100_v34, %v1081_v39  ;;  %v554_v34 = vld [vmem:[#allocation5 + $0x2a0] sm:$0xff]  ;;  %v557_v36 = vld [vmem:[#allocation5 + $0x2b8] sm:$0xff] }
  0xaf   : > { %2497 = vmatpush.xpose.msra.mxu3 %v801_v25  ;;  %2457 = vmatpush.xpose.msra.mxu1 %v799_v26  ;;  %v1120_v47 = vpop.f32.mrf.mxu2  ;;  %v814_v39 = vld [vmem:[#allocation5 + $0xac0] sm:$0xff] }
  0xb0   : > { %v1121_v48 = vadd.f32 %v1120_v47, %v1101_v44  ;;  %v295_v47 = vld [vmem:[#allocation2 + $0x2b0] sm:$0xff] }
  0xb1   : > { %2478 = vmatpush.xpose.msra.mxu2 %v544_v37  ;;  %2438 = vmatpush.xpose.msra.mxu0 %v542_v38  ;;  %v1140_v49 = vpop.f32.mrf.mxu3  ;;  %v1160_v50 = vpop.f32.mrf.mxu0  ;;  %v555_v37 = vld [vmem:[#allocation5 + $0x2a8] sm:$0xff]  ;;  %v816_v38 = vld [vmem:[#allocation5 + $0xad0] sm:$0xff] }
  0xb2   : > { %v1141_v53 = vadd.f32 %v1140_v49, %v1121_v48  ;;  %v293_v48 = vld [vmem:[#allocation2 + $0x2a0] sm:$0xff] }
  0xb3   : > { %2498 = vmatpush.xpose.msra.mxu3 %v545_v40  ;;  %2458 = vmatpush.xpose.msra.mxu1 %v543_v41  ;;  %v1180_v54 = vpop.f32.mrf.mxu1  ;;  %v817_v41 = vld [vmem:[#allocation5 + $0xad8] sm:$0xff] }
  0xb4   : > { %v1161_v59 = vadd.f32 %v1160_v50, %v1141_v53  ;;  %2479 = vmatmul.f32.vlgmr.msra.gmra.mxu2 %v283_v51  ;;  %2439 = vmatmul.f32.vlgmr.msra.gmra.mxu0 %v281_v52  ;;  %v296_v51 = vld [vmem:[#allocation2 + $0x2b8] sm:$0xff]  ;;  %v294_v52 = vld [vmem:[#allocation2 + $0x2a8] sm:$0xff]  ;;  %v560_v53 = vld [vmem:[#allocation5 + $0x2d0] sm:$0xff] }
  0xb5   : > { %2557 = vmatpush.xpose.msrb.mxu2 %v804_v42  ;;  %2517 = vmatpush.xpose.msrb.mxu0 %v802_v43  ;;  %v815_v42 = vld [vmem:[#allocation5 + $0xac8] sm:$0xff] }
  0xb6   : > { %2499 = vmatmul.f32.vlgmr.msra.gmra.mxu3 %v284_v55  ;;  %2459 = vmatmul.f32.vlgmr.msra.gmra.mxu1 %v282_v56  ;;  %v1181_v0 = vadd.f32 %v1180_v54, %v1161_v59  ;;  %v558_v54 = vld [vmem:[#allocation5 + $0x2c0] sm:$0xff]  ;;  %v561_v56 = vld [vmem:[#allocation5 + $0x2d8] sm:$0xff] }
  0xb7   : > { %2577 = vmatpush.xpose.msrb.mxu3 %v805_v45  ;;  %2537 = vmatpush.xpose.msrb.mxu1 %v803_v46  ;;  %v1200_v3 = vpop.f32.mrf.mxu2  ;;  %v818_v59 = vld [vmem:[#allocation5 + $0xae0] sm:$0xff] }
  0xb8   : > { %v1201_v4 = vadd.f32 %v1200_v3, %v1181_v0  ;;  %v299_v3 = vld [vmem:[#allocation2 + $0x2d0] sm:$0xff] }
  0xb9   : > { %2558 = vmatpush.xpose.msrb.mxu2 %v548_v57  ;;  %2518 = vmatpush.xpose.msrb.mxu0 %v546_v58  ;;  %v1220_v5 = vpop.f32.mrf.mxu3  ;;  %v1240_v6 = vpop.f32.mrf.mxu0  ;;  %v559_v57 = vld [vmem:[#allocation5 + $0x2c8] sm:$0xff]  ;;  %v820_v58 = vld [vmem:[#allocation5 + $0xaf0] sm:$0xff] }
  0xba   : > { %v1221_v9 = vadd.f32 %v1220_v5, %v1201_v4  ;;  %v297_v4 = vld [vmem:[#allocation2 + $0x2c0] sm:$0xff] }
  0xbb   : > { %2578 = vmatpush.xpose.msrb.mxu3 %v549_v60  ;;  %2538 = vmatpush.xpose.msrb.mxu1 %v547_v61  ;;  %v1260_v10 = vpop.f32.mrf.mxu1  ;;  %v821_v61 = vld [vmem:[#allocation5 + $0xaf8] sm:$0xff] }
  0xbc   : > { %v1241_v15 = vadd.f32 %v1240_v6, %v1221_v9  ;;  %2559 = vmatmul.f32.vlgmr.msrb.gmra.mxu2 %v287_v7  ;;  %2519 = vmatmul.f32.vlgmr.msrb.gmra.mxu0 %v285_v8  ;;  %v300_v7 = vld [vmem:[#allocation2 + $0x2d8] sm:$0xff]  ;;  %v298_v8 = vld [vmem:[#allocation2 + $0x2c8] sm:$0xff]  ;;  %v564_v9 = vld [vmem:[#allocation5 + $0x2f0] sm:$0xff] }
  0xbd   : > { %2637 = vmatpush.xpose.msra.mxu2 %v808_v62  ;;  %2597 = vmatpush.xpose.msra.mxu0 %v806_v63  ;;  %v819_v62 = vld [vmem:[#allocation5 + $0xae8] sm:$0xff] }
  0xbe   : > { %2579 = vmatmul.f32.vlgmr.msrb.gmra.mxu3 %v288_v11  ;;  %2539 = vmatmul.f32.vlgmr.msrb.gmra.mxu1 %v286_v12  ;;  %v1261_v20 = vadd.f32 %v1260_v10, %v1241_v15  ;;  %v562_v10 = vld [vmem:[#allocation5 + $0x2e0] sm:$0xff]  ;;  %v565_v12 = vld [vmem:[#allocation5 + $0x2f8] sm:$0xff] }
  0xbf   : > { %2657 = vmatpush.xpose.msra.mxu3 %v809_v1  ;;  %2617 = vmatpush.xpose.msra.mxu1 %v807_v2  ;;  %v1280_v23 = vpop.f32.mrf.mxu2  ;;  %v822_v15 = vld [vmem:[#allocation5 + $0xb00] sm:$0xff] }
  0xc0   : > { %v1281_v24 = vadd.f32 %v1280_v23, %v1261_v20  ;;  %v303_v23 = vld [vmem:[#allocation2 + $0x2f0] sm:$0xff] }
  0xc1   : > { %2638 = vmatpush.xpose.msra.mxu2 %v552_v13  ;;  %2598 = vmatpush.xpose.msra.mxu0 %v550_v14  ;;  %v1300_v25 = vpop.f32.mrf.mxu3  ;;  %v1320_v26 = vpop.f32.mrf.mxu0  ;;  %v563_v13 = vld [vmem:[#allocation5 + $0x2e8] sm:$0xff]  ;;  %v824_v14 = vld [vmem:[#allocation5 + $0xb10] sm:$0xff] }
  0xc2   : > { %v1301_v29 = vadd.f32 %v1300_v25, %v1281_v24  ;;  %v301_v24 = vld [vmem:[#allocation2 + $0x2e0] sm:$0xff] }
  0xc3   : > { %2658 = vmatpush.xpose.msra.mxu3 %v553_v16  ;;  %2618 = vmatpush.xpose.msra.mxu1 %v551_v17  ;;  %v1340_v30 = vpop.f32.mrf.mxu1  ;;  %v825_v17 = vld [vmem:[#allocation5 + $0xb18] sm:$0xff] }
  0xc4   : > { %v1321_v35 = vadd.f32 %v1320_v26, %v1301_v29  ;;  %2639 = vmatmul.f32.vlgmr.msra.gmra.mxu2 %v291_v27  ;;  %2599 = vmatmul.f32.vlgmr.msra.gmra.mxu0 %v289_v28  ;;  %v304_v27 = vld [vmem:[#allocation2 + $0x2f8] sm:$0xff]  ;;  %v302_v28 = vld [vmem:[#allocation2 + $0x2e8] sm:$0xff]  ;;  %v568_v29 = vld [vmem:[#allocation5 + $0x310] sm:$0xff] }
  0xc5   : > { %2717 = vmatpush.xpose.msrb.mxu2 %v812_v18  ;;  %2677 = vmatpush.xpose.msrb.mxu0 %v810_v19  ;;  %v823_v18 = vld [vmem:[#allocation5 + $0xb08] sm:$0xff] }
  0xc6   : > { %2659 = vmatmul.f32.vlgmr.msra.gmra.mxu3 %v292_v31  ;;  %2619 = vmatmul.f32.vlgmr.msra.gmra.mxu1 %v290_v32  ;;  %v1341_v40 = vadd.f32 %v1340_v30, %v1321_v35  ;;  %v566_v30 = vld [vmem:[#allocation5 + $0x300] sm:$0xff]  ;;  %v569_v32 = vld [vmem:[#allocation5 + $0x318] sm:$0xff] }
  0xc7   : > { %2737 = vmatpush.xpose.msrb.mxu3 %v813_v21  ;;  %2697 = vmatpush.xpose.msrb.mxu1 %v811_v22  ;;  %v1360_v43 = vpop.f32.mrf.mxu2  ;;  %v826_v35 = vld [vmem:[#allocation5 + $0xb20] sm:$0xff] }
  0xc8   : > { %v1361_v44 = vadd.f32 %v1360_v43, %v1341_v40  ;;  %v307_v43 = vld [vmem:[#allocation2 + $0x310] sm:$0xff] }
  0xc9   : > { %2718 = vmatpush.xpose.msrb.mxu2 %v556_v33  ;;  %2678 = vmatpush.xpose.msrb.mxu0 %v554_v34  ;;  %v1380_v45 = vpop.f32.mrf.mxu3  ;;  %v1400_v46 = vpop.f32.mrf.mxu0  ;;  %v567_v33 = vld [vmem:[#allocation5 + $0x308] sm:$0xff]  ;;  %v828_v34 = vld [vmem:[#allocation5 + $0xb30] sm:$0xff] }
  0xca   : > { %v1381_v49 = vadd.f32 %v1380_v45, %v1361_v44  ;;  %v305_v44 = vld [vmem:[#allocation2 + $0x300] sm:$0xff] }
  0xcb   : > { %2738 = vmatpush.xpose.msrb.mxu3 %v557_v36  ;;  %2698 = vmatpush.xpose.msrb.mxu1 %v555_v37  ;;  %v1420_v50 = vpop.f32.mrf.mxu1  ;;  %v829_v37 = vld [vmem:[#allocation5 + $0xb38] sm:$0xff] }
  0xcc   : > { %v1401_v55 = vadd.f32 %v1400_v46, %v1381_v49  ;;  %2719 = vmatmul.f32.vlgmr.msrb.gmra.mxu2 %v295_v47  ;;  %2679 = vmatmul.f32.vlgmr.msrb.gmra.mxu0 %v293_v48  ;;  %v308_v47 = vld [vmem:[#allocation2 + $0x318] sm:$0xff]  ;;  %v306_v48 = vld [vmem:[#allocation2 + $0x308] sm:$0xff]  ;;  %v572_v49 = vld [vmem:[#allocation5 + $0x330] sm:$0xff] }
  0xcd   : > { %2797 = vmatpush.xpose.msra.mxu2 %v816_v38  ;;  %2757 = vmatpush.xpose.msra.mxu0 %v814_v39  ;;  %v827_v38 = vld [vmem:[#allocation5 + $0xb28] sm:$0xff] }
  0xce   : > { %2739 = vmatmul.f32.vlgmr.msrb.gmra.mxu3 %v296_v51  ;;  %2699 = vmatmul.f32.vlgmr.msrb.gmra.mxu1 %v294_v52  ;;  %v1421_v60 = vadd.f32 %v1420_v50, %v1401_v55  ;;  %v570_v50 = vld [vmem:[#allocation5 + $0x320] sm:$0xff]  ;;  %v573_v52 = vld [vmem:[#allocation5 + $0x338] sm:$0xff] }
  0xcf   : > { %2817 = vmatpush.xpose.msra.mxu3 %v817_v41  ;;  %2777 = vmatpush.xpose.msra.mxu1 %v815_v42  ;;  %v1440_v63 = vpop.f32.mrf.mxu2  ;;  %v830_v55 = vld [vmem:[#allocation5 + $0xb40] sm:$0xff] }
  0xd0   : > { %v1441_v0 = vadd.f32 %v1440_v63, %v1421_v60  ;;  %v311_v63 = vld [vmem:[#allocation2 + $0x330] sm:$0xff] }
  0xd1   : > { %2798 = vmatpush.xpose.msra.mxu2 %v560_v53  ;;  %2758 = vmatpush.xpose.msra.mxu0 %v558_v54  ;;  %v1460_v1 = vpop.f32.mrf.mxu3  ;;  %v1480_v2 = vpop.f32.mrf.mxu0  ;;  %v571_v53 = vld [vmem:[#allocation5 + $0x328] sm:$0xff]  ;;  %v832_v54 = vld [vmem:[#allocation5 + $0xb50] sm:$0xff] }
  0xd2   : > { %v1461_v5 = vadd.f32 %v1460_v1, %v1441_v0  ;;  %v309_v0 = vld [vmem:[#allocation2 + $0x320] sm:$0xff] }
  0xd3   : > { %2818 = vmatpush.xpose.msra.mxu3 %v561_v56  ;;  %2778 = vmatpush.xpose.msra.mxu1 %v559_v57  ;;  %v1500_v6 = vpop.f32.mrf.mxu1  ;;  %v833_v57 = vld [vmem:[#allocation5 + $0xb58] sm:$0xff] }
  0xd4   : > { %v1481_v11 = vadd.f32 %v1480_v2, %v1461_v5  ;;  %2799 = vmatmul.f32.vlgmr.msra.gmra.mxu2 %v299_v3  ;;  %2759 = vmatmul.f32.vlgmr.msra.gmra.mxu0 %v297_v4  ;;  %v312_v3 = vld [vmem:[#allocation2 + $0x338] sm:$0xff]  ;;  %v310_v4 = vld [vmem:[#allocation2 + $0x328] sm:$0xff]  ;;  %v576_v5 = vld [vmem:[#allocation5 + $0x350] sm:$0xff] }
  0xd5   : > { %2877 = vmatpush.xpose.msrb.mxu2 %v820_v58  ;;  %2837 = vmatpush.xpose.msrb.mxu0 %v818_v59  ;;  %v831_v58 = vld [vmem:[#allocation5 + $0xb48] sm:$0xff] }
  0xd6   : > { %2819 = vmatmul.f32.vlgmr.msra.gmra.mxu3 %v300_v7  ;;  %2779 = vmatmul.f32.vlgmr.msra.gmra.mxu1 %v298_v8  ;;  %v1501_v16 = vadd.f32 %v1500_v6, %v1481_v11  ;;  %v574_v6 = vld [vmem:[#allocation5 + $0x340] sm:$0xff]  ;;  %v577_v8 = vld [vmem:[#allocation5 + $0x358] sm:$0xff] }
  0xd7   : > { %2897 = vmatpush.xpose.msrb.mxu3 %v821_v61  ;;  %2857 = vmatpush.xpose.msrb.mxu1 %v819_v62  ;;  %v1520_v19 = vpop.f32.mrf.mxu2  ;;  %v834_v11 = vld [vmem:[#allocation5 + $0xb60] sm:$0xff] }
  0xd8   : > { %v1521_v20 = vadd.f32 %v1520_v19, %v1501_v16  ;;  %v315_v19 = vld [vmem:[#allocation2 + $0x350] sm:$0xff] }
  0xd9   : > { %2878 = vmatpush.xpose.msrb.mxu2 %v564_v9  ;;  %2838 = vmatpush.xpose.msrb.mxu0 %v562_v10  ;;  %v1540_v21 = vpop.f32.mrf.mxu3  ;;  %v1560_v22 = vpop.f32.mrf.mxu0  ;;  %v575_v9 = vld [vmem:[#allocation5 + $0x348] sm:$0xff]  ;;  %v836_v10 = vld [vmem:[#allocation5 + $0xb70] sm:$0xff] }
  0xda   : > { %v1541_v25 = vadd.f32 %v1540_v21, %v1521_v20  ;;  %v313_v20 = vld [vmem:[#allocation2 + $0x340] sm:$0xff] }
  0xdb   : > { %2898 = vmatpush.xpose.msrb.mxu3 %v565_v12  ;;  %2858 = vmatpush.xpose.msrb.mxu1 %v563_v13  ;;  %v1580_v26 = vpop.f32.mrf.mxu1  ;;  %v837_v13 = vld [vmem:[#allocation5 + $0xb78] sm:$0xff] }
  0xdc   : > { %v1561_v31 = vadd.f32 %v1560_v22, %v1541_v25  ;;  %2879 = vmatmul.f32.vlgmr.msrb.gmra.mxu2 %v303_v23  ;;  %2839 = vmatmul.f32.vlgmr.msrb.gmra.mxu0 %v301_v24  ;;  %v316_v23 = vld [vmem:[#allocation2 + $0x358] sm:$0xff]  ;;  %v314_v24 = vld [vmem:[#allocation2 + $0x348] sm:$0xff]  ;;  %v580_v25 = vld [vmem:[#allocation5 + $0x370] sm:$0xff] }
  0xdd   : > { %2957 = vmatpush.xpose.msra.mxu2 %v824_v14  ;;  %2917 = vmatpush.xpose.msra.mxu0 %v822_v15  ;;  %v835_v14 = vld [vmem:[#allocation5 + $0xb68] sm:$0xff] }
  0xde   : > { %2899 = vmatmul.f32.vlgmr.msrb.gmra.mxu3 %v304_v27  ;;  %2859 = vmatmul.f32.vlgmr.msrb.gmra.mxu1 %v302_v28  ;;  %v1581_v36 = vadd.f32 %v1580_v26, %v1561_v31  ;;  %v578_v26 = vld [vmem:[#allocation5 + $0x360] sm:$0xff]  ;;  %v581_v28 = vld [vmem:[#allocation5 + $0x378] sm:$0xff] }
  0xdf   : > { %2977 = vmatpush.xpose.msra.mxu3 %v825_v17  ;;  %2937 = vmatpush.xpose.msra.mxu1 %v823_v18  ;;  %v1600_v39 = vpop.f32.mrf.mxu2  ;;  %v838_v31 = vld [vmem:[#allocation5 + $0xb80] sm:$0xff] }
  0xe0   : > { %v1601_v40 = vadd.f32 %v1600_v39, %v1581_v36  ;;  %v319_v39 = vld [vmem:[#allocation2 + $0x370] sm:$0xff] }
  0xe1   : > { %2958 = vmatpush.xpose.msra.mxu2 %v568_v29  ;;  %2918 = vmatpush.xpose.msra.mxu0 %v566_v30  ;;  %v1620_v41 = vpop.f32.mrf.mxu3  ;;  %v1640_v42 = vpop.f32.mrf.mxu0  ;;  %v579_v29 = vld [vmem:[#allocation5 + $0x368] sm:$0xff]  ;;  %v840_v30 = vld [vmem:[#allocation5 + $0xb90] sm:$0xff] }
  0xe2   : > { %v1621_v45 = vadd.f32 %v1620_v41, %v1601_v40  ;;  %v317_v40 = vld [vmem:[#allocation2 + $0x360] sm:$0xff] }
  0xe3   : > { %2978 = vmatpush.xpose.msra.mxu3 %v569_v32  ;;  %2938 = vmatpush.xpose.msra.mxu1 %v567_v33  ;;  %v1660_v46 = vpop.f32.mrf.mxu1  ;;  %v841_v33 = vld [vmem:[#allocation5 + $0xb98] sm:$0xff] }
  0xe4   : > { %v1641_v51 = vadd.f32 %v1640_v42, %v1621_v45  ;;  %2959 = vmatmul.f32.vlgmr.msra.gmra.mxu2 %v307_v43  ;;  %2919 = vmatmul.f32.vlgmr.msra.gmra.mxu0 %v305_v44  ;;  %v320_v43 = vld [vmem:[#allocation2 + $0x378] sm:$0xff]  ;;  %v318_v44 = vld [vmem:[#allocation2 + $0x368] sm:$0xff]  ;;  %v584_v45 = vld [vmem:[#allocation5 + $0x390] sm:$0xff] }
  0xe5   : > { %3037 = vmatpush.xpose.msrb.mxu2 %v828_v34  ;;  %2997 = vmatpush.xpose.msrb.mxu0 %v826_v35  ;;  %v839_v34 = vld [vmem:[#allocation5 + $0xb88] sm:$0xff] }
  0xe6   : > { %2979 = vmatmul.f32.vlgmr.msra.gmra.mxu3 %v308_v47  ;;  %2939 = vmatmul.f32.vlgmr.msra.gmra.mxu1 %v306_v48  ;;  %v1661_v56 = vadd.f32 %v1660_v46, %v1641_v51  ;;  %v582_v46 = vld [vmem:[#allocation5 + $0x380] sm:$0xff]  ;;  %v585_v48 = vld [vmem:[#allocation5 + $0x398] sm:$0xff] }
  0xe7   : > { %3057 = vmatpush.xpose.msrb.mxu3 %v829_v37  ;;  %3017 = vmatpush.xpose.msrb.mxu1 %v827_v38  ;;  %v1680_v59 = vpop.f32.mrf.mxu2  ;;  %v842_v51 = vld [vmem:[#allocation5 + $0xba0] sm:$0xff] }
  0xe8   : > { %v1681_v60 = vadd.f32 %v1680_v59, %v1661_v56  ;;  %v323_v59 = vld [vmem:[#allocation2 + $0x390] sm:$0xff] }
  0xe9   : > { %3038 = vmatpush.xpose.msrb.mxu2 %v572_v49  ;;  %2998 = vmatpush.xpose.msrb.mxu0 %v570_v50  ;;  %v1700_v61 = vpop.f32.mrf.mxu3  ;;  %v1720_v62 = vpop.f32.mrf.mxu0  ;;  %v583_v49 = vld [vmem:[#allocation5 + $0x388] sm:$0xff]  ;;  %v844_v50 = vld [vmem:[#allocation5 + $0xbb0] sm:$0xff] }
  0xea   : > { %v1701_v1 = vadd.f32 %v1700_v61, %v1681_v60  ;;  %v321_v60 = vld [vmem:[#allocation2 + $0x380] sm:$0xff] }
  0xeb   : > { %3058 = vmatpush.xpose.msrb.mxu3 %v573_v52  ;;  %3018 = vmatpush.xpose.msrb.mxu1 %v571_v53  ;;  %v1740_v2 = vpop.f32.mrf.mxu1  ;;  %v845_v53 = vld [vmem:[#allocation5 + $0xbb8] sm:$0xff] }
  0xec   : > { %v1721_v7 = vadd.f32 %v1720_v62, %v1701_v1  ;;  %3039 = vmatmul.f32.vlgmr.msrb.gmra.mxu2 %v311_v63  ;;  %2999 = vmatmul.f32.vlgmr.msrb.gmra.mxu0 %v309_v0  ;;  %v324_v63 = vld [vmem:[#allocation2 + $0x398] sm:$0xff]  ;;  %v322_v0 = vld [vmem:[#allocation2 + $0x388] sm:$0xff]  ;;  %v588_v1 = vld [vmem:[#allocation5 + $0x3b0] sm:$0xff] }
  0xed   : > { %3117 = vmatpush.xpose.msra.mxu2 %v832_v54  ;;  %3077 = vmatpush.xpose.msra.mxu0 %v830_v55  ;;  %v843_v54 = vld [vmem:[#allocation5 + $0xba8] sm:$0xff] }
  0xee   : > { %3059 = vmatmul.f32.vlgmr.msrb.gmra.mxu3 %v312_v3  ;;  %3019 = vmatmul.f32.vlgmr.msrb.gmra.mxu1 %v310_v4  ;;  %v1741_v12 = vadd.f32 %v1740_v2, %v1721_v7  ;;  %v586_v2 = vld [vmem:[#allocation5 + $0x3a0] sm:$0xff]  ;;  %v589_v4 = vld [vmem:[#allocation5 + $0x3b8] sm:$0xff] }
  0xef   : > { %3137 = vmatpush.xpose.msra.mxu3 %v833_v57  ;;  %3097 = vmatpush.xpose.msra.mxu1 %v831_v58  ;;  %v1760_v15 = vpop.f32.mrf.mxu2  ;;  %v846_v7 = vld [vmem:[#allocation5 + $0xbc0] sm:$0xff] }
  0xf0   : > { %v1761_v16 = vadd.f32 %v1760_v15, %v1741_v12  ;;  %v327_v15 = vld [vmem:[#allocation2 + $0x3b0] sm:$0xff] }
  0xf1   : > { %3118 = vmatpush.xpose.msra.mxu2 %v576_v5  ;;  %3078 = vmatpush.xpose.msra.mxu0 %v574_v6  ;;  %v1780_v17 = vpop.f32.mrf.mxu3  ;;  %v1800_v18 = vpop.f32.mrf.mxu0  ;;  %v587_v5 = vld [vmem:[#allocation5 + $0x3a8] sm:$0xff]  ;;  %v848_v6 = vld [vmem:[#allocation5 + $0xbd0] sm:$0xff] }
  0xf2   : > { %v1781_v21 = vadd.f32 %v1780_v17, %v1761_v16  ;;  %v325_v16 = vld [vmem:[#allocation2 + $0x3a0] sm:$0xff] }
  0xf3   : > { %3138 = vmatpush.xpose.msra.mxu3 %v577_v8  ;;  %3098 = vmatpush.xpose.msra.mxu1 %v575_v9  ;;  %v1820_v22 = vpop.f32.mrf.mxu1  ;;  %v849_v9 = vld [vmem:[#allocation5 + $0xbd8] sm:$0xff] }
  0xf4   : > { %v1801_v27 = vadd.f32 %v1800_v18, %v1781_v21  ;;  %3119 = vmatmul.f32.vlgmr.msra.gmra.mxu2 %v315_v19  ;;  %3079 = vmatmul.f32.vlgmr.msra.gmra.mxu0 %v313_v20  ;;  %v328_v19 = vld [vmem:[#allocation2 + $0x3b8] sm:$0xff]  ;;  %v326_v20 = vld [vmem:[#allocation2 + $0x3a8] sm:$0xff]  ;;  %v592_v21 = vld [vmem:[#allocation5 + $0x3d0] sm:$0xff] }
  0xf5   : > { %3197 = vmatpush.xpose.msrb.mxu2 %v836_v10  ;;  %3157 = vmatpush.xpose.msrb.mxu0 %v834_v11  ;;  %v847_v10 = vld [vmem:[#allocation5 + $0xbc8] sm:$0xff] }
  0xf6   : > { %3139 = vmatmul.f32.vlgmr.msra.gmra.mxu3 %v316_v23  ;;  %3099 = vmatmul.f32.vlgmr.msra.gmra.mxu1 %v314_v24  ;;  %v1821_v32 = vadd.f32 %v1820_v22, %v1801_v27  ;;  %v590_v22 = vld [vmem:[#allocation5 + $0x3c0] sm:$0xff]  ;;  %v593_v24 = vld [vmem:[#allocation5 + $0x3d8] sm:$0xff] }
  0xf7   : > { %3217 = vmatpush.xpose.msrb.mxu3 %v837_v13  ;;  %3177 = vmatpush.xpose.msrb.mxu1 %v835_v14  ;;  %v1840_v35 = vpop.f32.mrf.mxu2  ;;  %v850_v27 = vld [vmem:[#allocation5 + $0xbe0] sm:$0xff] }
  0xf8   : > { %v1841_v36 = vadd.f32 %v1840_v35, %v1821_v32  ;;  %v331_v35 = vld [vmem:[#allocation2 + $0x3d0] sm:$0xff] }
  0xf9   : > { %3198 = vmatpush.xpose.msrb.mxu2 %v580_v25  ;;  %3158 = vmatpush.xpose.msrb.mxu0 %v578_v26  ;;  %v1860_v37 = vpop.f32.mrf.mxu3  ;;  %v1880_v38 = vpop.f32.mrf.mxu0  ;;  %v591_v25 = vld [vmem:[#allocation5 + $0x3c8] sm:$0xff]  ;;  %v852_v26 = vld [vmem:[#allocation5 + $0xbf0] sm:$0xff] }
  0xfa   : > { %v1861_v41 = vadd.f32 %v1860_v37, %v1841_v36  ;;  %v329_v36 = vld [vmem:[#allocation2 + $0x3c0] sm:$0xff] }
  0xfb   : > { %3218 = vmatpush.xpose.msrb.mxu3 %v581_v28  ;;  %3178 = vmatpush.xpose.msrb.mxu1 %v579_v29  ;;  %v1900_v42 = vpop.f32.mrf.mxu1  ;;  %v853_v29 = vld [vmem:[#allocation5 + $0xbf8] sm:$0xff] }
  0xfc   : > { %v1881_v47 = vadd.f32 %v1880_v38, %v1861_v41  ;;  %3199 = vmatmul.f32.vlgmr.msrb.gmra.mxu2 %v319_v39  ;;  %3159 = vmatmul.f32.vlgmr.msrb.gmra.mxu0 %v317_v40  ;;  %v332_v39 = vld [vmem:[#allocation2 + $0x3d8] sm:$0xff]  ;;  %v330_v40 = vld [vmem:[#allocation2 + $0x3c8] sm:$0xff]  ;;  %v596_v41 = vld [vmem:[#allocation5 + $0x3f0] sm:$0xff] }
  0xfd   : > { %3277 = vmatpush.xpose.msra.mxu2 %v840_v30  ;;  %3237 = vmatpush.xpose.msra.mxu0 %v838_v31  ;;  %v851_v30 = vld [vmem:[#allocation5 + $0xbe8] sm:$0xff] }
  0xfe   : > { %3219 = vmatmul.f32.vlgmr.msrb.gmra.mxu3 %v320_v43  ;;  %3179 = vmatmul.f32.vlgmr.msrb.gmra.mxu1 %v318_v44  ;;  %v1901_v52 = vadd.f32 %v1900_v42, %v1881_v47  ;;  %v594_v42 = vld [vmem:[#allocation5 + $0x3e0] sm:$0xff]  ;;  %v597_v44 = vld [vmem:[#allocation5 + $0x3f8] sm:$0xff] }
  0xff   : > { %3297 = vmatpush.xpose.msra.mxu3 %v841_v33  ;;  %3257 = vmatpush.xpose.msra.mxu1 %v839_v34  ;;  %v1920_v55 = vpop.f32.mrf.mxu2  ;;  %v854_v47 = vld [vmem:[#allocation5 + $0xc00] sm:$0xff] }
 0x100   : > { %v1921_v56 = vadd.f32 %v1920_v55, %v1901_v52  ;;  %v335_v55 = vld [vmem:[#allocation2 + $0x3f0] sm:$0xff] }
 0x101   : > { %3278 = vmatpush.xpose.msra.mxu2 %v584_v45  ;;  %3238 = vmatpush.xpose.msra.mxu0 %v582_v46  ;;  %v1940_v57 = vpop.f32.mrf.mxu3  ;;  %v1960_v58 = vpop.f32.mrf.mxu0  ;;  %v595_v45 = vld [vmem:[#allocation5 + $0x3e8] sm:$0xff]  ;;  %v856_v46 = vld [vmem:[#allocation5 + $0xc10] sm:$0xff] }
 0x102   : > { %v1941_v61 = vadd.f32 %v1940_v57, %v1921_v56  ;;  %v333_v56 = vld [vmem:[#allocation2 + $0x3e0] sm:$0xff] }
 0x103   : > { %3298 = vmatpush.xpose.msra.mxu3 %v585_v48  ;;  %3258 = vmatpush.xpose.msra.mxu1 %v583_v49  ;;  %v1980_v62 = vpop.f32.mrf.mxu1  ;;  %v857_v49 = vld [vmem:[#allocation5 + $0xc18] sm:$0xff] }
 0x104   : > { %v1961_v3 = vadd.f32 %v1960_v58, %v1941_v61  ;;  %3279 = vmatmul.f32.vlgmr.msra.gmra.mxu2 %v323_v59  ;;  %3239 = vmatmul.f32.vlgmr.msra.gmra.mxu0 %v321_v60  ;;  %v336_v59 = vld [vmem:[#allocation2 + $0x3f8] sm:$0xff]  ;;  %v334_v60 = vld [vmem:[#allocation2 + $0x3e8] sm:$0xff]  ;;  %v600_v61 = vld [vmem:[#allocation5 + $0x410] sm:$0xff] }
 0x105   : > { %3357 = vmatpush.xpose.msrb.mxu2 %v844_v50  ;;  %3317 = vmatpush.xpose.msrb.mxu0 %v842_v51  ;;  %v855_v50 = vld [vmem:[#allocation5 + $0xc08] sm:$0xff] }
 0x106   : > { %3299 = vmatmul.f32.vlgmr.msra.gmra.mxu3 %v324_v63  ;;  %3259 = vmatmul.f32.vlgmr.msra.gmra.mxu1 %v322_v0  ;;  %v1981_v8 = vadd.f32 %v1980_v62, %v1961_v3  ;;  %v598_v62 = vld [vmem:[#allocation5 + $0x400] sm:$0xff]  ;;  %v601_v0 = vld [vmem:[#allocation5 + $0x418] sm:$0xff] }
 0x107   : > { %3377 = vmatpush.xpose.msrb.mxu3 %v845_v53  ;;  %3337 = vmatpush.xpose.msrb.mxu1 %v843_v54  ;;  %v2000_v11 = vpop.f32.mrf.mxu2  ;;  %v858_v3 = vld [vmem:[#allocation5 + $0xc20] sm:$0xff] }
 0x108   : > { %v2001_v12 = vadd.f32 %v2000_v11, %v1981_v8  ;;  %v339_v11 = vld [vmem:[#allocation2 + $0x410] sm:$0xff] }
 0x109   : > { %3358 = vmatpush.xpose.msrb.mxu2 %v588_v1  ;;  %3318 = vmatpush.xpose.msrb.mxu0 %v586_v2  ;;  %v2020_v13 = vpop.f32.mrf.mxu3  ;;  %v2040_v14 = vpop.f32.mrf.mxu0  ;;  %v599_v1 = vld [vmem:[#allocation5 + $0x408] sm:$0xff]  ;;  %v860_v2 = vld [vmem:[#allocation5 + $0xc30] sm:$0xff] }
 0x10a   : > { %v2021_v17 = vadd.f32 %v2020_v13, %v2001_v12  ;;  %v337_v12 = vld [vmem:[#allocation2 + $0x400] sm:$0xff] }
 0x10b   : > { %3378 = vmatpush.xpose.msrb.mxu3 %v589_v4  ;;  %3338 = vmatpush.xpose.msrb.mxu1 %v587_v5  ;;  %v2060_v18 = vpop.f32.mrf.mxu1  ;;  %v861_v5 = vld [vmem:[#allocation5 + $0xc38] sm:$0xff] }
 0x10c   : > { %v2041_v23 = vadd.f32 %v2040_v14, %v2021_v17  ;;  %3359 = vmatmul.f32.vlgmr.msrb.gmra.mxu2 %v327_v15  ;;  %3319 = vmatmul.f32.vlgmr.msrb.gmra.mxu0 %v325_v16  ;;  %v340_v15 = vld [vmem:[#allocation2 + $0x418] sm:$0xff]  ;;  %v338_v16 = vld [vmem:[#allocation2 + $0x408] sm:$0xff]  ;;  %v604_v17 = vld [vmem:[#allocation5 + $0x430] sm:$0xff] }
 0x10d   : > { %3437 = vmatpush.xpose.msra.mxu2 %v848_v6  ;;  %3397 = vmatpush.xpose.msra.mxu0 %v846_v7  ;;  %v859_v6 = vld [vmem:[#allocation5 + $0xc28] sm:$0xff] }
 0x10e   : > { %3379 = vmatmul.f32.vlgmr.msrb.gmra.mxu3 %v328_v19  ;;  %3339 = vmatmul.f32.vlgmr.msrb.gmra.mxu1 %v326_v20  ;;  %v2061_v28 = vadd.f32 %v2060_v18, %v2041_v23  ;;  %v602_v18 = vld [vmem:[#allocation5 + $0x420] sm:$0xff]  ;;  %v605_v20 = vld [vmem:[#allocation5 + $0x438] sm:$0xff] }
 0x10f   : > { %3457 = vmatpush.xpose.msra.mxu3 %v849_v9  ;;  %3417 = vmatpush.xpose.msra.mxu1 %v847_v10  ;;  %v2080_v31 = vpop.f32.mrf.mxu2  ;;  %v862_v23 = vld [vmem:[#allocation5 + $0xc40] sm:$0xff] }
 0x110   : > { %v2081_v32 = vadd.f32 %v2080_v31, %v2061_v28  ;;  %v343_v31 = vld [vmem:[#allocation2 + $0x430] sm:$0xff] }
 0x111   : > { %3438 = vmatpush.xpose.msra.mxu2 %v592_v21  ;;  %3398 = vmatpush.xpose.msra.mxu0 %v590_v22  ;;  %v2100_v33 = vpop.f32.mrf.mxu3  ;;  %v2120_v34 = vpop.f32.mrf.mxu0  ;;  %v603_v21 = vld [vmem:[#allocation5 + $0x428] sm:$0xff]  ;;  %v864_v22 = vld [vmem:[#allocation5 + $0xc50] sm:$0xff] }
 0x112   : > { %v2101_v37 = vadd.f32 %v2100_v33, %v2081_v32  ;;  %v341_v32 = vld [vmem:[#allocation2 + $0x420] sm:$0xff] }
 0x113   : > { %3458 = vmatpush.xpose.msra.mxu3 %v593_v24  ;;  %3418 = vmatpush.xpose.msra.mxu1 %v591_v25  ;;  %v2140_v38 = vpop.f32.mrf.mxu1  ;;  %v865_v25 = vld [vmem:[#allocation5 + $0xc58] sm:$0xff] }
 0x114   : > { %v2121_v43 = vadd.f32 %v2120_v34, %v2101_v37  ;;  %3439 = vmatmul.f32.vlgmr.msra.gmra.mxu2 %v331_v35  ;;  %3399 = vmatmul.f32.vlgmr.msra.gmra.mxu0 %v329_v36  ;;  %v344_v35 = vld [vmem:[#allocation2 + $0x438] sm:$0xff]  ;;  %v342_v36 = vld [vmem:[#allocation2 + $0x428] sm:$0xff]  ;;  %v608_v37 = vld [vmem:[#allocation5 + $0x450] sm:$0xff] }
 0x115   : > { %3517 = vmatpush.xpose.msrb.mxu2 %v852_v26  ;;  %3477 = vmatpush.xpose.msrb.mxu0 %v850_v27  ;;  %v863_v26 = vld [vmem:[#allocation5 + $0xc48] sm:$0xff] }
 0x116   : > { %3459 = vmatmul.f32.vlgmr.msra.gmra.mxu3 %v332_v39  ;;  %3419 = vmatmul.f32.vlgmr.msra.gmra.mxu1 %v330_v40  ;;  %v2141_v48 = vadd.f32 %v2140_v38, %v2121_v43  ;;  %v606_v38 = vld [vmem:[#allocation5 + $0x440] sm:$0xff]  ;;  %v609_v40 = vld [vmem:[#allocation5 + $0x458] sm:$0xff] }
 0x117   : > { %3537 = vmatpush.xpose.msrb.mxu3 %v853_v29  ;;  %3497 = vmatpush.xpose.msrb.mxu1 %v851_v30  ;;  %v2160_v51 = vpop.f32.mrf.mxu2  ;;  %v866_v43 = vld [vmem:[#allocation5 + $0xc60] sm:$0xff] }
 0x118   : > { %v2161_v52 = vadd.f32 %v2160_v51, %v2141_v48  ;;  %v347_v51 = vld [vmem:[#allocation2 + $0x450] sm:$0xff] }
 0x119   : > { %3518 = vmatpush.xpose.msrb.mxu2 %v596_v41  ;;  %3478 = vmatpush.xpose.msrb.mxu0 %v594_v42  ;;  %v2180_v53 = vpop.f32.mrf.mxu3  ;;  %v2200_v54 = vpop.f32.mrf.mxu0  ;;  %v607_v41 = vld [vmem:[#allocation5 + $0x448] sm:$0xff]  ;;  %v868_v42 = vld [vmem:[#allocation5 + $0xc70] sm:$0xff] }
 0x11a   : > { %v2181_v57 = vadd.f32 %v2180_v53, %v2161_v52  ;;  %v345_v52 = vld [vmem:[#allocation2 + $0x440] sm:$0xff] }
 0x11b   : > { %3538 = vmatpush.xpose.msrb.mxu3 %v597_v44  ;;  %3498 = vmatpush.xpose.msrb.mxu1 %v595_v45  ;;  %v2220_v58 = vpop.f32.mrf.mxu1  ;;  %v869_v45 = vld [vmem:[#allocation5 + $0xc78] sm:$0xff] }
 0x11c   : > { %v2201_v63 = vadd.f32 %v2200_v54, %v2181_v57  ;;  %3519 = vmatmul.f32.vlgmr.msrb.gmra.mxu2 %v335_v55  ;;  %3479 = vmatmul.f32.vlgmr.msrb.gmra.mxu0 %v333_v56  ;;  %v348_v55 = vld [vmem:[#allocation2 + $0x458] sm:$0xff]  ;;  %v346_v56 = vld [vmem:[#allocation2 + $0x448] sm:$0xff]  ;;  %v612_v57 = vld [vmem:[#allocation5 + $0x470] sm:$0xff] }
 0x11d   : > { %3597 = vmatpush.xpose.msra.mxu2 %v856_v46  ;;  %3557 = vmatpush.xpose.msra.mxu0 %v854_v47  ;;  %v867_v46 = vld [vmem:[#allocation5 + $0xc68] sm:$0xff] }
 0x11e   : > { %3539 = vmatmul.f32.vlgmr.msrb.gmra.mxu3 %v336_v59  ;;  %3499 = vmatmul.f32.vlgmr.msrb.gmra.mxu1 %v334_v60  ;;  %v2221_v4 = vadd.f32 %v2220_v58, %v2201_v63  ;;  %v610_v58 = vld [vmem:[#allocation5 + $0x460] sm:$0xff]  ;;  %v613_v60 = vld [vmem:[#allocation5 + $0x478] sm:$0xff] }
 0x11f   : > { %3617 = vmatpush.xpose.msra.mxu3 %v857_v49  ;;  %3577 = vmatpush.xpose.msra.mxu1 %v855_v50  ;;  %v2240_v7 = vpop.f32.mrf.mxu2  ;;  %v870_v63 = vld [vmem:[#allocation5 + $0xc80] sm:$0xff] }
 0x120   : > { %v2241_v8 = vadd.f32 %v2240_v7, %v2221_v4  ;;  %v351_v7 = vld [vmem:[#allocation2 + $0x470] sm:$0xff] }
 0x121   : > { %3598 = vmatpush.xpose.msra.mxu2 %v600_v61  ;;  %3558 = vmatpush.xpose.msra.mxu0 %v598_v62  ;;  %v2260_v9 = vpop.f32.mrf.mxu3  ;;  %v2280_v10 = vpop.f32.mrf.mxu0  ;;  %v611_v61 = vld [vmem:[#allocation5 + $0x468] sm:$0xff]  ;;  %v872_v62 = vld [vmem:[#allocation5 + $0xc90] sm:$0xff] }
 0x122   : > { %v2261_v13 = vadd.f32 %v2260_v9, %v2241_v8  ;;  %v349_v8 = vld [vmem:[#allocation2 + $0x460] sm:$0xff] }
 0x123   : > { %3618 = vmatpush.xpose.msra.mxu3 %v601_v0  ;;  %3578 = vmatpush.xpose.msra.mxu1 %v599_v1  ;;  %v2300_v14 = vpop.f32.mrf.mxu1  ;;  %v873_v1 = vld [vmem:[#allocation5 + $0xc98] sm:$0xff] }
 0x124   : > { %v2281_v19 = vadd.f32 %v2280_v10, %v2261_v13  ;;  %3599 = vmatmul.f32.vlgmr.msra.gmra.mxu2 %v339_v11  ;;  %3559 = vmatmul.f32.vlgmr.msra.gmra.mxu0 %v337_v12  ;;  %v352_v11 = vld [vmem:[#allocation2 + $0x478] sm:$0xff]  ;;  %v350_v12 = vld [vmem:[#allocation2 + $0x468] sm:$0xff]  ;;  %v616_v13 = vld [vmem:[#allocation5 + $0x490] sm:$0xff] }
 0x125   : > { %3677 = vmatpush.xpose.msrb.mxu2 %v860_v2  ;;  %3637 = vmatpush.xpose.msrb.mxu0 %v858_v3  ;;  %v871_v2 = vld [vmem:[#allocation5 + $0xc88] sm:$0xff] }
 0x126   : > { %3619 = vmatmul.f32.vlgmr.msra.gmra.mxu3 %v340_v15  ;;  %3579 = vmatmul.f32.vlgmr.msra.gmra.mxu1 %v338_v16  ;;  %v2301_v24 = vadd.f32 %v2300_v14, %v2281_v19  ;;  %v614_v14 = vld [vmem:[#allocation5 + $0x480] sm:$0xff]  ;;  %v617_v16 = vld [vmem:[#allocation5 + $0x498] sm:$0xff] }
 0x127   : > { %3697 = vmatpush.xpose.msrb.mxu3 %v861_v5  ;;  %3657 = vmatpush.xpose.msrb.mxu1 %v859_v6  ;;  %v2320_v27 = vpop.f32.mrf.mxu2  ;;  %v874_v19 = vld [vmem:[#allocation5 + $0xca0] sm:$0xff] }
 0x128   : > { %v2321_v28 = vadd.f32 %v2320_v27, %v2301_v24  ;;  %v355_v27 = vld [vmem:[#allocation2 + $0x490] sm:$0xff] }
 0x129   : > { %3678 = vmatpush.xpose.msrb.mxu2 %v604_v17  ;;  %3638 = vmatpush.xpose.msrb.mxu0 %v602_v18  ;;  %v2340_v29 = vpop.f32.mrf.mxu3  ;;  %v2360_v30 = vpop.f32.mrf.mxu0  ;;  %v615_v17 = vld [vmem:[#allocation5 + $0x488] sm:$0xff]  ;;  %v876_v18 = vld [vmem:[#allocation5 + $0xcb0] sm:$0xff] }
 0x12a   : > { %v2341_v33 = vadd.f32 %v2340_v29, %v2321_v28  ;;  %v353_v28 = vld [vmem:[#allocation2 + $0x480] sm:$0xff] }
 0x12b   : > { %3698 = vmatpush.xpose.msrb.mxu3 %v605_v20  ;;  %3658 = vmatpush.xpose.msrb.mxu1 %v603_v21  ;;  %v2380_v34 = vpop.f32.mrf.mxu1  ;;  %v877_v21 = vld [vmem:[#allocation5 + $0xcb8] sm:$0xff] }
 0x12c   : > { %v2361_v39 = vadd.f32 %v2360_v30, %v2341_v33  ;;  %3679 = vmatmul.f32.vlgmr.msrb.gmra.mxu2 %v343_v31  ;;  %3639 = vmatmul.f32.vlgmr.msrb.gmra.mxu0 %v341_v32  ;;  %v356_v31 = vld [vmem:[#allocation2 + $0x498] sm:$0xff]  ;;  %v354_v32 = vld [vmem:[#allocation2 + $0x488] sm:$0xff]  ;;  %v620_v33 = vld [vmem:[#allocation5 + $0x4b0] sm:$0xff] }
 0x12d   : > { %3757 = vmatpush.xpose.msra.mxu2 %v864_v22  ;;  %3717 = vmatpush.xpose.msra.mxu0 %v862_v23  ;;  %v875_v22 = vld [vmem:[#allocation5 + $0xca8] sm:$0xff] }
 0x12e   : > { %3699 = vmatmul.f32.vlgmr.msrb.gmra.mxu3 %v344_v35  ;;  %3659 = vmatmul.f32.vlgmr.msrb.gmra.mxu1 %v342_v36  ;;  %v2381_v44 = vadd.f32 %v2380_v34, %v2361_v39  ;;  %v618_v34 = vld [vmem:[#allocation5 + $0x4a0] sm:$0xff]  ;;  %v621_v36 = vld [vmem:[#allocation5 + $0x4b8] sm:$0xff] }
 0x12f   : > { %3777 = vmatpush.xpose.msra.mxu3 %v865_v25  ;;  %3737 = vmatpush.xpose.msra.mxu1 %v863_v26  ;;  %v2400_v47 = vpop.f32.mrf.mxu2  ;;  %v878_v39 = vld [vmem:[#allocation5 + $0xcc0] sm:$0xff] }
 0x130   : > { %v2401_v48 = vadd.f32 %v2400_v47, %v2381_v44  ;;  %v359_v47 = vld [vmem:[#allocation2 + $0x4b0] sm:$0xff] }
 0x131   : > { %3758 = vmatpush.xpose.msra.mxu2 %v608_v37  ;;  %3718 = vmatpush.xpose.msra.mxu0 %v606_v38  ;;  %v2420_v49 = vpop.f32.mrf.mxu3  ;;  %v2440_v50 = vpop.f32.mrf.mxu0  ;;  %v619_v37 = vld [vmem:[#allocation5 + $0x4a8] sm:$0xff]  ;;  %v880_v38 = vld [vmem:[#allocation5 + $0xcd0] sm:$0xff] }
 0x132   : > { %v2421_v53 = vadd.f32 %v2420_v49, %v2401_v48  ;;  %v357_v48 = vld [vmem:[#allocation2 + $0x4a0] sm:$0xff] }
 0x133   : > { %3778 = vmatpush.xpose.msra.mxu3 %v609_v40  ;;  %3738 = vmatpush.xpose.msra.mxu1 %v607_v41  ;;  %v2460_v54 = vpop.f32.mrf.mxu1  ;;  %v881_v41 = vld [vmem:[#allocation5 + $0xcd8] sm:$0xff] }
 0x134   : > { %v2441_v59 = vadd.f32 %v2440_v50, %v2421_v53  ;;  %3759 = vmatmul.f32.vlgmr.msra.gmra.mxu2 %v347_v51  ;;  %3719 = vmatmul.f32.vlgmr.msra.gmra.mxu0 %v345_v52  ;;  %v360_v51 = vld [vmem:[#allocation2 + $0x4b8] sm:$0xff]  ;;  %v358_v52 = vld [vmem:[#allocation2 + $0x4a8] sm:$0xff]  ;;  %v624_v53 = vld [vmem:[#allocation5 + $0x4d0] sm:$0xff] }
 0x135   : > { %3837 = vmatpush.xpose.msrb.mxu2 %v868_v42  ;;  %3797 = vmatpush.xpose.msrb.mxu0 %v866_v43  ;;  %v879_v42 = vld [vmem:[#allocation5 + $0xcc8] sm:$0xff] }
 0x136   : > { %3779 = vmatmul.f32.vlgmr.msra.gmra.mxu3 %v348_v55  ;;  %3739 = vmatmul.f32.vlgmr.msra.gmra.mxu1 %v346_v56  ;;  %v2461_v0 = vadd.f32 %v2460_v54, %v2441_v59  ;;  %v622_v54 = vld [vmem:[#allocation5 + $0x4c0] sm:$0xff]  ;;  %v625_v56 = vld [vmem:[#allocation5 + $0x4d8] sm:$0xff] }
 0x137   : > { %3857 = vmatpush.xpose.msrb.mxu3 %v869_v45  ;;  %3817 = vmatpush.xpose.msrb.mxu1 %v867_v46  ;;  %v2480_v3 = vpop.f32.mrf.mxu2  ;;  %v882_v59 = vld [vmem:[#allocation5 + $0xce0] sm:$0xff] }
 0x138   : > { %v2481_v4 = vadd.f32 %v2480_v3, %v2461_v0  ;;  %v363_v3 = vld [vmem:[#allocation2 + $0x4d0] sm:$0xff] }
 0x139   : > { %3838 = vmatpush.xpose.msrb.mxu2 %v612_v57  ;;  %3798 = vmatpush.xpose.msrb.mxu0 %v610_v58  ;;  %v2500_v5 = vpop.f32.mrf.mxu3  ;;  %v2520_v6 = vpop.f32.mrf.mxu0  ;;  %v623_v57 = vld [vmem:[#allocation5 + $0x4c8] sm:$0xff]  ;;  %v884_v58 = vld [vmem:[#allocation5 + $0xcf0] sm:$0xff] }
 0x13a   : > { %v2501_v9 = vadd.f32 %v2500_v5, %v2481_v4  ;;  %v361_v4 = vld [vmem:[#allocation2 + $0x4c0] sm:$0xff] }
 0x13b   : > { %3858 = vmatpush.xpose.msrb.mxu3 %v613_v60  ;;  %3818 = vmatpush.xpose.msrb.mxu1 %v611_v61  ;;  %v2540_v10 = vpop.f32.mrf.mxu1  ;;  %v885_v61 = vld [vmem:[#allocation5 + $0xcf8] sm:$0xff] }
 0x13c   : > { %v2521_v15 = vadd.f32 %v2520_v6, %v2501_v9  ;;  %3839 = vmatmul.f32.vlgmr.msrb.gmra.mxu2 %v351_v7  ;;  %3799 = vmatmul.f32.vlgmr.msrb.gmra.mxu0 %v349_v8  ;;  %v364_v7 = vld [vmem:[#allocation2 + $0x4d8] sm:$0xff]  ;;  %v362_v8 = vld [vmem:[#allocation2 + $0x4c8] sm:$0xff]  ;;  %v628_v9 = vld [vmem:[#allocation5 + $0x4f0] sm:$0xff] }
 0x13d   : > { %3917 = vmatpush.xpose.msra.mxu2 %v872_v62  ;;  %3877 = vmatpush.xpose.msra.mxu0 %v870_v63  ;;  %v883_v62 = vld [vmem:[#allocation5 + $0xce8] sm:$0xff] }
 0x13e   : > { %3859 = vmatmul.f32.vlgmr.msrb.gmra.mxu3 %v352_v11  ;;  %3819 = vmatmul.f32.vlgmr.msrb.gmra.mxu1 %v350_v12  ;;  %v2541_v20 = vadd.f32 %v2540_v10, %v2521_v15  ;;  %v626_v10 = vld [vmem:[#allocation5 + $0x4e0] sm:$0xff]  ;;  %v629_v12 = vld [vmem:[#allocation5 + $0x4f8] sm:$0xff] }
 0x13f   : > { %3937 = vmatpush.xpose.msra.mxu3 %v873_v1  ;;  %3897 = vmatpush.xpose.msra.mxu1 %v871_v2  ;;  %v2560_v23 = vpop.f32.mrf.mxu2  ;;  %v886_v15 = vld [vmem:[#allocation5 + $0xd00] sm:$0xff] }
 0x140   : > { %v2561_v24 = vadd.f32 %v2560_v23, %v2541_v20  ;;  %v367_v23 = vld [vmem:[#allocation2 + $0x4f0] sm:$0xff] }
 0x141   : > { %3918 = vmatpush.xpose.msra.mxu2 %v616_v13  ;;  %3878 = vmatpush.xpose.msra.mxu0 %v614_v14  ;;  %v2580_v25 = vpop.f32.mrf.mxu3  ;;  %v2600_v26 = vpop.f32.mrf.mxu0  ;;  %v627_v13 = vld [vmem:[#allocation5 + $0x4e8] sm:$0xff]  ;;  %v888_v14 = vld [vmem:[#allocation5 + $0xd10] sm:$0xff] }
 0x142   : > { %v2581_v29 = vadd.f32 %v2580_v25, %v2561_v24  ;;  %v365_v24 = vld [vmem:[#allocation2 + $0x4e0] sm:$0xff] }
 0x143   : > { %3938 = vmatpush.xpose.msra.mxu3 %v617_v16  ;;  %3898 = vmatpush.xpose.msra.mxu1 %v615_v17  ;;  %v2620_v30 = vpop.f32.mrf.mxu1  ;;  %v889_v17 = vld [vmem:[#allocation5 + $0xd18] sm:$0xff] }
 0x144   : > { %v2601_v35 = vadd.f32 %v2600_v26, %v2581_v29  ;;  %3919 = vmatmul.f32.vlgmr.msra.gmra.mxu2 %v355_v27  ;;  %3879 = vmatmul.f32.vlgmr.msra.gmra.mxu0 %v353_v28  ;;  %v368_v27 = vld [vmem:[#allocation2 + $0x4f8] sm:$0xff]  ;;  %v366_v28 = vld [vmem:[#allocation2 + $0x4e8] sm:$0xff]  ;;  %v632_v29 = vld [vmem:[#allocation5 + $0x510] sm:$0xff] }
 0x145   : > { %3997 = vmatpush.xpose.msrb.mxu2 %v876_v18  ;;  %3957 = vmatpush.xpose.msrb.mxu0 %v874_v19  ;;  %v887_v18 = vld [vmem:[#allocation5 + $0xd08] sm:$0xff] }
 0x146   : > { %3939 = vmatmul.f32.vlgmr.msra.gmra.mxu3 %v356_v31  ;;  %3899 = vmatmul.f32.vlgmr.msra.gmra.mxu1 %v354_v32  ;;  %v2621_v40 = vadd.f32 %v2620_v30, %v2601_v35  ;;  %v630_v30 = vld [vmem:[#allocation5 + $0x500] sm:$0xff]  ;;  %v633_v32 = vld [vmem:[#allocation5 + $0x518] sm:$0xff] }
 0x147   : > { %4017 = vmatpush.xpose.msrb.mxu3 %v877_v21  ;;  %3977 = vmatpush.xpose.msrb.mxu1 %v875_v22  ;;  %v2640_v43 = vpop.f32.mrf.mxu2  ;;  %v890_v35 = vld [vmem:[#allocation5 + $0xd20] sm:$0xff] }
 0x148   : > { %v2641_v44 = vadd.f32 %v2640_v43, %v2621_v40  ;;  %v371_v43 = vld [vmem:[#allocation2 + $0x510] sm:$0xff] }
 0x149   : > { %3998 = vmatpush.xpose.msrb.mxu2 %v620_v33  ;;  %3958 = vmatpush.xpose.msrb.mxu0 %v618_v34  ;;  %v2660_v45 = vpop.f32.mrf.mxu3  ;;  %v2680_v46 = vpop.f32.mrf.mxu0  ;;  %v631_v33 = vld [vmem:[#allocation5 + $0x508] sm:$0xff]  ;;  %v892_v34 = vld [vmem:[#allocation5 + $0xd30] sm:$0xff] }
 0x14a   : > { %v2661_v49 = vadd.f32 %v2660_v45, %v2641_v44  ;;  %v369_v44 = vld [vmem:[#allocation2 + $0x500] sm:$0xff] }
 0x14b   : > { %4018 = vmatpush.xpose.msrb.mxu3 %v621_v36  ;;  %3978 = vmatpush.xpose.msrb.mxu1 %v619_v37  ;;  %v2700_v50 = vpop.f32.mrf.mxu1  ;;  %v893_v37 = vld [vmem:[#allocation5 + $0xd38] sm:$0xff] }
 0x14c   : > { %v2681_v55 = vadd.f32 %v2680_v46, %v2661_v49  ;;  %3999 = vmatmul.f32.vlgmr.msrb.gmra.mxu2 %v359_v47  ;;  %3959 = vmatmul.f32.vlgmr.msrb.gmra.mxu0 %v357_v48  ;;  %v372_v47 = vld [vmem:[#allocation2 + $0x518] sm:$0xff]  ;;  %v370_v48 = vld [vmem:[#allocation2 + $0x508] sm:$0xff]  ;;  %v636_v49 = vld [vmem:[#allocation5 + $0x530] sm:$0xff] }
 0x14d   : > { %4077 = vmatpush.xpose.msra.mxu2 %v880_v38  ;;  %4037 = vmatpush.xpose.msra.mxu0 %v878_v39  ;;  %v891_v38 = vld [vmem:[#allocation5 + $0xd28] sm:$0xff] }
 0x14e   : > { %4019 = vmatmul.f32.vlgmr.msrb.gmra.mxu3 %v360_v51  ;;  %3979 = vmatmul.f32.vlgmr.msrb.gmra.mxu1 %v358_v52  ;;  %v2701_v60 = vadd.f32 %v2700_v50, %v2681_v55  ;;  %v634_v50 = vld [vmem:[#allocation5 + $0x520] sm:$0xff]  ;;  %v637_v52 = vld [vmem:[#allocation5 + $0x538] sm:$0xff] }
 0x14f   : > { %4097 = vmatpush.xpose.msra.mxu3 %v881_v41  ;;  %4057 = vmatpush.xpose.msra.mxu1 %v879_v42  ;;  %v2720_v63 = vpop.f32.mrf.mxu2  ;;  %v894_v55 = vld [vmem:[#allocation5 + $0xd40] sm:$0xff] }
 0x150   : > { %v2721_v0 = vadd.f32 %v2720_v63, %v2701_v60  ;;  %v375_v63 = vld [vmem:[#allocation2 + $0x530] sm:$0xff] }
 0x151   : > { %4078 = vmatpush.xpose.msra.mxu2 %v624_v53  ;;  %4038 = vmatpush.xpose.msra.mxu0 %v622_v54  ;;  %v2740_v1 = vpop.f32.mrf.mxu3  ;;  %v2760_v2 = vpop.f32.mrf.mxu0  ;;  %v635_v53 = vld [vmem:[#allocation5 + $0x528] sm:$0xff]  ;;  %v896_v54 = vld [vmem:[#allocation5 + $0xd50] sm:$0xff] }
 0x152   : > { %v2741_v5 = vadd.f32 %v2740_v1, %v2721_v0  ;;  %v373_v0 = vld [vmem:[#allocation2 + $0x520] sm:$0xff] }
 0x153   : > { %4098 = vmatpush.xpose.msra.mxu3 %v625_v56  ;;  %4058 = vmatpush.xpose.msra.mxu1 %v623_v57  ;;  %v2780_v6 = vpop.f32.mrf.mxu1  ;;  %v897_v57 = vld [vmem:[#allocation5 + $0xd58] sm:$0xff] }
 0x154   : > { %v2761_v11 = vadd.f32 %v2760_v2, %v2741_v5  ;;  %4079 = vmatmul.f32.vlgmr.msra.gmra.mxu2 %v363_v3  ;;  %4039 = vmatmul.f32.vlgmr.msra.gmra.mxu0 %v361_v4  ;;  %v376_v3 = vld [vmem:[#allocation2 + $0x538] sm:$0xff]  ;;  %v374_v4 = vld [vmem:[#allocation2 + $0x528] sm:$0xff]  ;;  %v640_v5 = vld [vmem:[#allocation5 + $0x550] sm:$0xff] }
 0x155   : > { %4157 = vmatpush.xpose.msrb.mxu2 %v884_v58  ;;  %4117 = vmatpush.xpose.msrb.mxu0 %v882_v59  ;;  %v895_v58 = vld [vmem:[#allocation5 + $0xd48] sm:$0xff] }
 0x156   : > { %4099 = vmatmul.f32.vlgmr.msra.gmra.mxu3 %v364_v7  ;;  %4059 = vmatmul.f32.vlgmr.msra.gmra.mxu1 %v362_v8  ;;  %v2781_v16 = vadd.f32 %v2780_v6, %v2761_v11  ;;  %v638_v6 = vld [vmem:[#allocation5 + $0x540] sm:$0xff]  ;;  %v641_v8 = vld [vmem:[#allocation5 + $0x558] sm:$0xff] }
 0x157   : > { %4177 = vmatpush.xpose.msrb.mxu3 %v885_v61  ;;  %4137 = vmatpush.xpose.msrb.mxu1 %v883_v62  ;;  %v2800_v19 = vpop.f32.mrf.mxu2  ;;  %v898_v11 = vld [vmem:[#allocation5 + $0xd60] sm:$0xff] }
 0x158   : > { %v2801_v20 = vadd.f32 %v2800_v19, %v2781_v16  ;;  %v379_v19 = vld [vmem:[#allocation2 + $0x550] sm:$0xff] }
 0x159   : > { %4158 = vmatpush.xpose.msrb.mxu2 %v628_v9  ;;  %4118 = vmatpush.xpose.msrb.mxu0 %v626_v10  ;;  %v2820_v21 = vpop.f32.mrf.mxu3  ;;  %v2840_v22 = vpop.f32.mrf.mxu0  ;;  %v639_v9 = vld [vmem:[#allocation5 + $0x548] sm:$0xff]  ;;  %v900_v10 = vld [vmem:[#allocation5 + $0xd70] sm:$0xff] }
 0x15a   : > { %v2821_v25 = vadd.f32 %v2820_v21, %v2801_v20  ;;  %v377_v20 = vld [vmem:[#allocation2 + $0x540] sm:$0xff] }
 0x15b   : > { %4178 = vmatpush.xpose.msrb.mxu3 %v629_v12  ;;  %4138 = vmatpush.xpose.msrb.mxu1 %v627_v13  ;;  %v2860_v26 = vpop.f32.mrf.mxu1  ;;  %v901_v13 = vld [vmem:[#allocation5 + $0xd78] sm:$0xff] }
 0x15c   : > { %v2841_v31 = vadd.f32 %v2840_v22, %v2821_v25  ;;  %4159 = vmatmul.f32.vlgmr.msrb.gmra.mxu2 %v367_v23  ;;  %4119 = vmatmul.f32.vlgmr.msrb.gmra.mxu0 %v365_v24  ;;  %v380_v23 = vld [vmem:[#allocation2 + $0x558] sm:$0xff]  ;;  %v378_v24 = vld [vmem:[#allocation2 + $0x548] sm:$0xff]  ;;  %v644_v25 = vld [vmem:[#allocation5 + $0x570] sm:$0xff] }
 0x15d   : > { %4237 = vmatpush.xpose.msra.mxu2 %v888_v14  ;;  %4197 = vmatpush.xpose.msra.mxu0 %v886_v15  ;;  %v899_v14 = vld [vmem:[#allocation5 + $0xd68] sm:$0xff] }
 0x15e   : > { %4179 = vmatmul.f32.vlgmr.msrb.gmra.mxu3 %v368_v27  ;;  %4139 = vmatmul.f32.vlgmr.msrb.gmra.mxu1 %v366_v28  ;;  %v2861_v36 = vadd.f32 %v2860_v26, %v2841_v31  ;;  %v642_v26 = vld [vmem:[#allocation5 + $0x560] sm:$0xff]  ;;  %v645_v28 = vld [vmem:[#allocation5 + $0x578] sm:$0xff] }
 0x15f   : > { %4257 = vmatpush.xpose.msra.mxu3 %v889_v17  ;;  %4217 = vmatpush.xpose.msra.mxu1 %v887_v18  ;;  %v2880_v39 = vpop.f32.mrf.mxu2  ;;  %v902_v31 = vld [vmem:[#allocation5 + $0xd80] sm:$0xff] }
 0x160   : > { %v2881_v40 = vadd.f32 %v2880_v39, %v2861_v36  ;;  %v383_v39 = vld [vmem:[#allocation2 + $0x570] sm:$0xff] }
 0x161   : > { %4238 = vmatpush.xpose.msra.mxu2 %v632_v29  ;;  %4198 = vmatpush.xpose.msra.mxu0 %v630_v30  ;;  %v2900_v41 = vpop.f32.mrf.mxu3  ;;  %v2920_v42 = vpop.f32.mrf.mxu0  ;;  %v643_v29 = vld [vmem:[#allocation5 + $0x568] sm:$0xff]  ;;  %v904_v30 = vld [vmem:[#allocation5 + $0xd90] sm:$0xff] }
 0x162   : > { %v2901_v45 = vadd.f32 %v2900_v41, %v2881_v40  ;;  %v381_v40 = vld [vmem:[#allocation2 + $0x560] sm:$0xff] }
 0x163   : > { %4258 = vmatpush.xpose.msra.mxu3 %v633_v32  ;;  %4218 = vmatpush.xpose.msra.mxu1 %v631_v33  ;;  %v2940_v46 = vpop.f32.mrf.mxu1  ;;  %v905_v33 = vld [vmem:[#allocation5 + $0xd98] sm:$0xff] }
 0x164   : > { %v2921_v51 = vadd.f32 %v2920_v42, %v2901_v45  ;;  %4239 = vmatmul.f32.vlgmr.msra.gmra.mxu2 %v371_v43  ;;  %4199 = vmatmul.f32.vlgmr.msra.gmra.mxu0 %v369_v44  ;;  %v384_v43 = vld [vmem:[#allocation2 + $0x578] sm:$0xff]  ;;  %v382_v44 = vld [vmem:[#allocation2 + $0x568] sm:$0xff]  ;;  %v648_v45 = vld [vmem:[#allocation5 + $0x590] sm:$0xff] }
 0x165   : > { %4317 = vmatpush.xpose.msrb.mxu2 %v892_v34  ;;  %4277 = vmatpush.xpose.msrb.mxu0 %v890_v35  ;;  %v903_v34 = vld [vmem:[#allocation5 + $0xd88] sm:$0xff] }
 0x166   : > { %4259 = vmatmul.f32.vlgmr.msra.gmra.mxu3 %v372_v47  ;;  %4219 = vmatmul.f32.vlgmr.msra.gmra.mxu1 %v370_v48  ;;  %v2941_v56 = vadd.f32 %v2940_v46, %v2921_v51  ;;  %v646_v46 = vld [vmem:[#allocation5 + $0x580] sm:$0xff]  ;;  %v649_v48 = vld [vmem:[#allocation5 + $0x598] sm:$0xff] }
 0x167   : > { %4337 = vmatpush.xpose.msrb.mxu3 %v893_v37  ;;  %4297 = vmatpush.xpose.msrb.mxu1 %v891_v38  ;;  %v2960_v59 = vpop.f32.mrf.mxu2  ;;  %v906_v51 = vld [vmem:[#allocation5 + $0xda0] sm:$0xff] }
 0x168   : > { %v2961_v60 = vadd.f32 %v2960_v59, %v2941_v56  ;;  %v387_v59 = vld [vmem:[#allocation2 + $0x590] sm:$0xff] }
 0x169   : > { %4318 = vmatpush.xpose.msrb.mxu2 %v636_v49  ;;  %4278 = vmatpush.xpose.msrb.mxu0 %v634_v50  ;;  %v2980_v61 = vpop.f32.mrf.mxu3  ;;  %v3000_v62 = vpop.f32.mrf.mxu0  ;;  %v647_v49 = vld [vmem:[#allocation5 + $0x588] sm:$0xff]  ;;  %v908_v50 = vld [vmem:[#allocation5 + $0xdb0] sm:$0xff] }
 0x16a   : > { %v2981_v1 = vadd.f32 %v2980_v61, %v2961_v60  ;;  %v385_v60 = vld [vmem:[#allocation2 + $0x580] sm:$0xff] }
 0x16b   : > { %4338 = vmatpush.xpose.msrb.mxu3 %v637_v52  ;;  %4298 = vmatpush.xpose.msrb.mxu1 %v635_v53  ;;  %v3020_v2 = vpop.f32.mrf.mxu1  ;;  %v909_v53 = vld [vmem:[#allocation5 + $0xdb8] sm:$0xff] }
 0x16c   : > { %v3001_v7 = vadd.f32 %v3000_v62, %v2981_v1  ;;  %4319 = vmatmul.f32.vlgmr.msrb.gmra.mxu2 %v375_v63  ;;  %4279 = vmatmul.f32.vlgmr.msrb.gmra.mxu0 %v373_v0  ;;  %v388_v63 = vld [vmem:[#allocation2 + $0x598] sm:$0xff]  ;;  %v386_v0 = vld [vmem:[#allocation2 + $0x588] sm:$0xff]  ;;  %v652_v1 = vld [vmem:[#allocation5 + $0x5b0] sm:$0xff] }
 0x16d   : > { %4397 = vmatpush.xpose.msra.mxu2 %v896_v54  ;;  %4357 = vmatpush.xpose.msra.mxu0 %v894_v55  ;;  %v907_v54 = vld [vmem:[#allocation5 + $0xda8] sm:$0xff] }
 0x16e   : > { %4339 = vmatmul.f32.vlgmr.msrb.gmra.mxu3 %v376_v3  ;;  %4299 = vmatmul.f32.vlgmr.msrb.gmra.mxu1 %v374_v4  ;;  %v3021_v12 = vadd.f32 %v3020_v2, %v3001_v7  ;;  %v650_v2 = vld [vmem:[#allocation5 + $0x5a0] sm:$0xff]  ;;  %v653_v4 = vld [vmem:[#allocation5 + $0x5b8] sm:$0xff] }
 0x16f   : > { %4417 = vmatpush.xpose.msra.mxu3 %v897_v57  ;;  %4377 = vmatpush.xpose.msra.mxu1 %v895_v58  ;;  %v3040_v15 = vpop.f32.mrf.mxu2  ;;  %v910_v7 = vld [vmem:[#allocation5 + $0xdc0] sm:$0xff] }
 0x170   : > { %v3041_v16 = vadd.f32 %v3040_v15, %v3021_v12  ;;  %v391_v15 = vld [vmem:[#allocation2 + $0x5b0] sm:$0xff] }
 0x171   : > { %4398 = vmatpush.xpose.msra.mxu2 %v640_v5  ;;  %4358 = vmatpush.xpose.msra.mxu0 %v638_v6  ;;  %v3060_v17 = vpop.f32.mrf.mxu3  ;;  %v3080_v18 = vpop.f32.mrf.mxu0  ;;  %v651_v5 = vld [vmem:[#allocation5 + $0x5a8] sm:$0xff]  ;;  %v912_v6 = vld [vmem:[#allocation5 + $0xdd0] sm:$0xff] }
 0x172   : > { %v3061_v21 = vadd.f32 %v3060_v17, %v3041_v16  ;;  %v389_v16 = vld [vmem:[#allocation2 + $0x5a0] sm:$0xff] }
 0x173   : > { %4418 = vmatpush.xpose.msra.mxu3 %v641_v8  ;;  %4378 = vmatpush.xpose.msra.mxu1 %v639_v9  ;;  %v3100_v22 = vpop.f32.mrf.mxu1  ;;  %v913_v9 = vld [vmem:[#allocation5 + $0xdd8] sm:$0xff] }
 0x174   : > { %v3081_v27 = vadd.f32 %v3080_v18, %v3061_v21  ;;  %4399 = vmatmul.f32.vlgmr.msra.gmra.mxu2 %v379_v19  ;;  %4359 = vmatmul.f32.vlgmr.msra.gmra.mxu0 %v377_v20  ;;  %v392_v19 = vld [vmem:[#allocation2 + $0x5b8] sm:$0xff]  ;;  %v390_v20 = vld [vmem:[#allocation2 + $0x5a8] sm:$0xff]  ;;  %v656_v21 = vld [vmem:[#allocation5 + $0x5d0] sm:$0xff] }
 0x175   : > { %4477 = vmatpush.xpose.msrb.mxu2 %v900_v10  ;;  %4437 = vmatpush.xpose.msrb.mxu0 %v898_v11  ;;  %v911_v10 = vld [vmem:[#allocation5 + $0xdc8] sm:$0xff] }
 0x176   : > { %4419 = vmatmul.f32.vlgmr.msra.gmra.mxu3 %v380_v23  ;;  %4379 = vmatmul.f32.vlgmr.msra.gmra.mxu1 %v378_v24  ;;  %v3101_v32 = vadd.f32 %v3100_v22, %v3081_v27  ;;  %v654_v22 = vld [vmem:[#allocation5 + $0x5c0] sm:$0xff]  ;;  %v657_v24 = vld [vmem:[#allocation5 + $0x5d8] sm:$0xff] }
 0x177   : > { %4497 = vmatpush.xpose.msrb.mxu3 %v901_v13  ;;  %4457 = vmatpush.xpose.msrb.mxu1 %v899_v14  ;;  %v3120_v35 = vpop.f32.mrf.mxu2  ;;  %v914_v27 = vld [vmem:[#allocation5 + $0xde0] sm:$0xff] }
 0x178   : > { %v3121_v36 = vadd.f32 %v3120_v35, %v3101_v32  ;;  %v395_v35 = vld [vmem:[#allocation2 + $0x5d0] sm:$0xff] }
 0x179   : > { %4478 = vmatpush.xpose.msrb.mxu2 %v644_v25  ;;  %4438 = vmatpush.xpose.msrb.mxu0 %v642_v26  ;;  %v3140_v37 = vpop.f32.mrf.mxu3  ;;  %v3160_v38 = vpop.f32.mrf.mxu0  ;;  %v655_v25 = vld [vmem:[#allocation5 + $0x5c8] sm:$0xff]  ;;  %v916_v26 = vld [vmem:[#allocation5 + $0xdf0] sm:$0xff] }
 0x17a   : > { %v3141_v41 = vadd.f32 %v3140_v37, %v3121_v36  ;;  %v393_v36 = vld [vmem:[#allocation2 + $0x5c0] sm:$0xff] }
 0x17b   : > { %4498 = vmatpush.xpose.msrb.mxu3 %v645_v28  ;;  %4458 = vmatpush.xpose.msrb.mxu1 %v643_v29  ;;  %v3180_v42 = vpop.f32.mrf.mxu1  ;;  %v917_v29 = vld [vmem:[#allocation5 + $0xdf8] sm:$0xff] }
 0x17c   : > { %v3161_v47 = vadd.f32 %v3160_v38, %v3141_v41  ;;  %4479 = vmatmul.f32.vlgmr.msrb.gmra.mxu2 %v383_v39  ;;  %4439 = vmatmul.f32.vlgmr.msrb.gmra.mxu0 %v381_v40  ;;  %v396_v39 = vld [vmem:[#allocation2 + $0x5d8] sm:$0xff]  ;;  %v394_v40 = vld [vmem:[#allocation2 + $0x5c8] sm:$0xff]  ;;  %v660_v41 = vld [vmem:[#allocation5 + $0x5f0] sm:$0xff] }
 0x17d   : > { %4557 = vmatpush.xpose.msra.mxu2 %v904_v30  ;;  %4517 = vmatpush.xpose.msra.mxu0 %v902_v31  ;;  %v915_v30 = vld [vmem:[#allocation5 + $0xde8] sm:$0xff] }
 0x17e   : > { %4499 = vmatmul.f32.vlgmr.msrb.gmra.mxu3 %v384_v43  ;;  %4459 = vmatmul.f32.vlgmr.msrb.gmra.mxu1 %v382_v44  ;;  %v3181_v52 = vadd.f32 %v3180_v42, %v3161_v47  ;;  %v658_v42 = vld [vmem:[#allocation5 + $0x5e0] sm:$0xff]  ;;  %v661_v44 = vld [vmem:[#allocation5 + $0x5f8] sm:$0xff] }
 0x17f   : > { %4577 = vmatpush.xpose.msra.mxu3 %v905_v33  ;;  %4537 = vmatpush.xpose.msra.mxu1 %v903_v34  ;;  %v3200_v55 = vpop.f32.mrf.mxu2  ;;  %v918_v47 = vld [vmem:[#allocation5 + $0xe00] sm:$0xff] }
 0x180   : > { %v3201_v56 = vadd.f32 %v3200_v55, %v3181_v52  ;;  %v399_v55 = vld [vmem:[#allocation2 + $0x5f0] sm:$0xff] }
 0x181   : > { %4558 = vmatpush.xpose.msra.mxu2 %v648_v45  ;;  %4518 = vmatpush.xpose.msra.mxu0 %v646_v46  ;;  %v3220_v57 = vpop.f32.mrf.mxu3  ;;  %v3240_v58 = vpop.f32.mrf.mxu0  ;;  %v659_v45 = vld [vmem:[#allocation5 + $0x5e8] sm:$0xff]  ;;  %v920_v46 = vld [vmem:[#allocation5 + $0xe10] sm:$0xff] }
 0x182   : > { %v3221_v61 = vadd.f32 %v3220_v57, %v3201_v56  ;;  %v397_v56 = vld [vmem:[#allocation2 + $0x5e0] sm:$0xff] }
 0x183   : > { %4578 = vmatpush.xpose.msra.mxu3 %v649_v48  ;;  %4538 = vmatpush.xpose.msra.mxu1 %v647_v49  ;;  %v3260_v62 = vpop.f32.mrf.mxu1  ;;  %v921_v49 = vld [vmem:[#allocation5 + $0xe18] sm:$0xff] }
 0x184   : > { %v3241_v3 = vadd.f32 %v3240_v58, %v3221_v61  ;;  %4559 = vmatmul.f32.vlgmr.msra.gmra.mxu2 %v387_v59  ;;  %4519 = vmatmul.f32.vlgmr.msra.gmra.mxu0 %v385_v60  ;;  %v400_v59 = vld [vmem:[#allocation2 + $0x5f8] sm:$0xff]  ;;  %v398_v60 = vld [vmem:[#allocation2 + $0x5e8] sm:$0xff]  ;;  %v664_v61 = vld [vmem:[#allocation5 + $0x610] sm:$0xff] }
 0x185   : > { %4637 = vmatpush.xpose.msrb.mxu2 %v908_v50  ;;  %4597 = vmatpush.xpose.msrb.mxu0 %v906_v51  ;;  %v919_v50 = vld [vmem:[#allocation5 + $0xe08] sm:$0xff] }
 0x186   : > { %4579 = vmatmul.f32.vlgmr.msra.gmra.mxu3 %v388_v63  ;;  %4539 = vmatmul.f32.vlgmr.msra.gmra.mxu1 %v386_v0  ;;  %v3261_v8 = vadd.f32 %v3260_v62, %v3241_v3  ;;  %v662_v62 = vld [vmem:[#allocation5 + $0x600] sm:$0xff]  ;;  %v665_v0 = vld [vmem:[#allocation5 + $0x618] sm:$0xff] }
 0x187   : > { %4657 = vmatpush.xpose.msrb.mxu3 %v909_v53  ;;  %4617 = vmatpush.xpose.msrb.mxu1 %v907_v54  ;;  %v3280_v11 = vpop.f32.mrf.mxu2  ;;  %v922_v3 = vld [vmem:[#allocation5 + $0xe20] sm:$0xff] }
 0x188   : > { %v3281_v12 = vadd.f32 %v3280_v11, %v3261_v8  ;;  %v403_v11 = vld [vmem:[#allocation2 + $0x610] sm:$0xff] }
 0x189   : > { %4638 = vmatpush.xpose.msrb.mxu2 %v652_v1  ;;  %4598 = vmatpush.xpose.msrb.mxu0 %v650_v2  ;;  %v3300_v13 = vpop.f32.mrf.mxu3  ;;  %v3320_v14 = vpop.f32.mrf.mxu0  ;;  %v663_v1 = vld [vmem:[#allocation5 + $0x608] sm:$0xff]  ;;  %v924_v2 = vld [vmem:[#allocation5 + $0xe30] sm:$0xff] }
 0x18a   : > { %v3301_v17 = vadd.f32 %v3300_v13, %v3281_v12  ;;  %v401_v12 = vld [vmem:[#allocation2 + $0x600] sm:$0xff] }
 0x18b   : > { %4658 = vmatpush.xpose.msrb.mxu3 %v653_v4  ;;  %4618 = vmatpush.xpose.msrb.mxu1 %v651_v5  ;;  %v3340_v18 = vpop.f32.mrf.mxu1  ;;  %v925_v5 = vld [vmem:[#allocation5 + $0xe38] sm:$0xff] }
 0x18c   : > { %v3321_v23 = vadd.f32 %v3320_v14, %v3301_v17  ;;  %4639 = vmatmul.f32.vlgmr.msrb.gmra.mxu2 %v391_v15  ;;  %4599 = vmatmul.f32.vlgmr.msrb.gmra.mxu0 %v389_v16  ;;  %v404_v15 = vld [vmem:[#allocation2 + $0x618] sm:$0xff]  ;;  %v402_v16 = vld [vmem:[#allocation2 + $0x608] sm:$0xff]  ;;  %v668_v17 = vld [vmem:[#allocation5 + $0x630] sm:$0xff] }
 0x18d   : > { %4717 = vmatpush.xpose.msra.mxu2 %v912_v6  ;;  %4677 = vmatpush.xpose.msra.mxu0 %v910_v7  ;;  %v923_v6 = vld [vmem:[#allocation5 + $0xe28] sm:$0xff] }
 0x18e   : > { %4659 = vmatmul.f32.vlgmr.msrb.gmra.mxu3 %v392_v19  ;;  %4619 = vmatmul.f32.vlgmr.msrb.gmra.mxu1 %v390_v20  ;;  %v3341_v28 = vadd.f32 %v3340_v18, %v3321_v23  ;;  %v666_v18 = vld [vmem:[#allocation5 + $0x620] sm:$0xff]  ;;  %v669_v20 = vld [vmem:[#allocation5 + $0x638] sm:$0xff] }
 0x18f   : > { %4737 = vmatpush.xpose.msra.mxu3 %v913_v9  ;;  %4697 = vmatpush.xpose.msra.mxu1 %v911_v10  ;;  %v3360_v31 = vpop.f32.mrf.mxu2  ;;  %v926_v23 = vld [vmem:[#allocation5 + $0xe40] sm:$0xff] }
 0x190   : > { %v3361_v32 = vadd.f32 %v3360_v31, %v3341_v28  ;;  %v407_v31 = vld [vmem:[#allocation2 + $0x630] sm:$0xff] }
 0x191   : > { %4718 = vmatpush.xpose.msra.mxu2 %v656_v21  ;;  %4678 = vmatpush.xpose.msra.mxu0 %v654_v22  ;;  %v3380_v33 = vpop.f32.mrf.mxu3  ;;  %v3400_v34 = vpop.f32.mrf.mxu0  ;;  %v667_v21 = vld [vmem:[#allocation5 + $0x628] sm:$0xff]  ;;  %v928_v22 = vld [vmem:[#allocation5 + $0xe50] sm:$0xff] }
 0x192   : > { %v3381_v37 = vadd.f32 %v3380_v33, %v3361_v32  ;;  %v405_v32 = vld [vmem:[#allocation2 + $0x620] sm:$0xff] }
 0x193   : > { %4738 = vmatpush.xpose.msra.mxu3 %v657_v24  ;;  %4698 = vmatpush.xpose.msra.mxu1 %v655_v25  ;;  %v3420_v38 = vpop.f32.mrf.mxu1  ;;  %v929_v25 = vld [vmem:[#allocation5 + $0xe58] sm:$0xff] }
 0x194   : > { %v3401_v43 = vadd.f32 %v3400_v34, %v3381_v37  ;;  %4719 = vmatmul.f32.vlgmr.msra.gmra.mxu2 %v395_v35  ;;  %4679 = vmatmul.f32.vlgmr.msra.gmra.mxu0 %v393_v36  ;;  %v408_v35 = vld [vmem:[#allocation2 + $0x638] sm:$0xff]  ;;  %v406_v36 = vld [vmem:[#allocation2 + $0x628] sm:$0xff]  ;;  %v672_v37 = vld [vmem:[#allocation5 + $0x650] sm:$0xff] }
 0x195   : > { %4797 = vmatpush.xpose.msrb.mxu2 %v916_v26  ;;  %4757 = vmatpush.xpose.msrb.mxu0 %v914_v27  ;;  %v927_v26 = vld [vmem:[#allocation5 + $0xe48] sm:$0xff] }
 0x196   : > { %4739 = vmatmul.f32.vlgmr.msra.gmra.mxu3 %v396_v39  ;;  %4699 = vmatmul.f32.vlgmr.msra.gmra.mxu1 %v394_v40  ;;  %v3421_v48 = vadd.f32 %v3420_v38, %v3401_v43  ;;  %v670_v38 = vld [vmem:[#allocation5 + $0x640] sm:$0xff]  ;;  %v673_v40 = vld [vmem:[#allocation5 + $0x658] sm:$0xff] }
 0x197   : > { %4817 = vmatpush.xpose.msrb.mxu3 %v917_v29  ;;  %4777 = vmatpush.xpose.msrb.mxu1 %v915_v30  ;;  %v3440_v51 = vpop.f32.mrf.mxu2  ;;  %v930_v43 = vld [vmem:[#allocation5 + $0xe60] sm:$0xff] }
 0x198   : > { %v3441_v52 = vadd.f32 %v3440_v51, %v3421_v48  ;;  %v411_v51 = vld [vmem:[#allocation2 + $0x650] sm:$0xff] }
 0x199   : > { %4798 = vmatpush.xpose.msrb.mxu2 %v660_v41  ;;  %4758 = vmatpush.xpose.msrb.mxu0 %v658_v42  ;;  %v3460_v53 = vpop.f32.mrf.mxu3  ;;  %v3480_v54 = vpop.f32.mrf.mxu0  ;;  %v671_v41 = vld [vmem:[#allocation5 + $0x648] sm:$0xff]  ;;  %v932_v42 = vld [vmem:[#allocation5 + $0xe70] sm:$0xff] }
 0x19a   : > { %v3461_v57 = vadd.f32 %v3460_v53, %v3441_v52  ;;  %v409_v52 = vld [vmem:[#allocation2 + $0x640] sm:$0xff] }
 0x19b   : > { %4818 = vmatpush.xpose.msrb.mxu3 %v661_v44  ;;  %4778 = vmatpush.xpose.msrb.mxu1 %v659_v45  ;;  %v3500_v58 = vpop.f32.mrf.mxu1  ;;  %v933_v45 = vld [vmem:[#allocation5 + $0xe78] sm:$0xff] }
 0x19c   : > { %v3481_v63 = vadd.f32 %v3480_v54, %v3461_v57  ;;  %4799 = vmatmul.f32.vlgmr.msrb.gmra.mxu2 %v399_v55  ;;  %4759 = vmatmul.f32.vlgmr.msrb.gmra.mxu0 %v397_v56  ;;  %v412_v55 = vld [vmem:[#allocation2 + $0x658] sm:$0xff]  ;;  %v410_v56 = vld [vmem:[#allocation2 + $0x648] sm:$0xff]  ;;  %v676_v57 = vld [vmem:[#allocation5 + $0x670] sm:$0xff] }
 0x19d   : > { %4877 = vmatpush.xpose.msra.mxu2 %v920_v46  ;;  %4837 = vmatpush.xpose.msra.mxu0 %v918_v47  ;;  %v931_v46 = vld [vmem:[#allocation5 + $0xe68] sm:$0xff] }
 0x19e   : > { %4819 = vmatmul.f32.vlgmr.msrb.gmra.mxu3 %v400_v59  ;;  %4779 = vmatmul.f32.vlgmr.msrb.gmra.mxu1 %v398_v60  ;;  %v3501_v4 = vadd.f32 %v3500_v58, %v3481_v63  ;;  %v674_v58 = vld [vmem:[#allocation5 + $0x660] sm:$0xff]  ;;  %v677_v60 = vld [vmem:[#allocation5 + $0x678] sm:$0xff] }
 0x19f   : > { %4897 = vmatpush.xpose.msra.mxu3 %v921_v49  ;;  %4857 = vmatpush.xpose.msra.mxu1 %v919_v50  ;;  %v3520_v7 = vpop.f32.mrf.mxu2  ;;  %v934_v63 = vld [vmem:[#allocation5 + $0xe80] sm:$0xff] }
 0x1a0   : > { %v3521_v8 = vadd.f32 %v3520_v7, %v3501_v4  ;;  %v415_v7 = vld [vmem:[#allocation2 + $0x670] sm:$0xff] }
 0x1a1   : > { %4878 = vmatpush.xpose.msra.mxu2 %v664_v61  ;;  %4838 = vmatpush.xpose.msra.mxu0 %v662_v62  ;;  %v3540_v9 = vpop.f32.mrf.mxu3  ;;  %v3560_v10 = vpop.f32.mrf.mxu0  ;;  %v675_v61 = vld [vmem:[#allocation5 + $0x668] sm:$0xff]  ;;  %v936_v62 = vld [vmem:[#allocation5 + $0xe90] sm:$0xff] }
 0x1a2   : > { %v3541_v13 = vadd.f32 %v3540_v9, %v3521_v8  ;;  %v413_v8 = vld [vmem:[#allocation2 + $0x660] sm:$0xff] }
 0x1a3   : > { %4898 = vmatpush.xpose.msra.mxu3 %v665_v0  ;;  %4858 = vmatpush.xpose.msra.mxu1 %v663_v1  ;;  %v3580_v14 = vpop.f32.mrf.mxu1  ;;  %v937_v1 = vld [vmem:[#allocation5 + $0xe98] sm:$0xff] }
 0x1a4   : > { %v3561_v19 = vadd.f32 %v3560_v10, %v3541_v13  ;;  %4879 = vmatmul.f32.vlgmr.msra.gmra.mxu2 %v403_v11  ;;  %4839 = vmatmul.f32.vlgmr.msra.gmra.mxu0 %v401_v12  ;;  %v416_v11 = vld [vmem:[#allocation2 + $0x678] sm:$0xff]  ;;  %v414_v12 = vld [vmem:[#allocation2 + $0x668] sm:$0xff]  ;;  %v680_v13 = vld [vmem:[#allocation5 + $0x690] sm:$0xff] }
 0x1a5   : > { %4957 = vmatpush.xpose.msrb.mxu2 %v924_v2  ;;  %4917 = vmatpush.xpose.msrb.mxu0 %v922_v3  ;;  %v935_v2 = vld [vmem:[#allocation5 + $0xe88] sm:$0xff] }
 0x1a6   : > { %4899 = vmatmul.f32.vlgmr.msra.gmra.mxu3 %v404_v15  ;;  %4859 = vmatmul.f32.vlgmr.msra.gmra.mxu1 %v402_v16  ;;  %v3581_v24 = vadd.f32 %v3580_v14, %v3561_v19  ;;  %v678_v14 = vld [vmem:[#allocation5 + $0x680] sm:$0xff]  ;;  %v681_v16 = vld [vmem:[#allocation5 + $0x698] sm:$0xff] }
 0x1a7   : > { %4977 = vmatpush.xpose.msrb.mxu3 %v925_v5  ;;  %4937 = vmatpush.xpose.msrb.mxu1 %v923_v6  ;;  %v3600_v27 = vpop.f32.mrf.mxu2  ;;  %v938_v19 = vld [vmem:[#allocation5 + $0xea0] sm:$0xff] }
 0x1a8   : > { %v3601_v28 = vadd.f32 %v3600_v27, %v3581_v24  ;;  %v419_v27 = vld [vmem:[#allocation2 + $0x690] sm:$0xff] }
 0x1a9   : > { %4958 = vmatpush.xpose.msrb.mxu2 %v668_v17  ;;  %4918 = vmatpush.xpose.msrb.mxu0 %v666_v18  ;;  %v3620_v29 = vpop.f32.mrf.mxu3  ;;  %v3640_v30 = vpop.f32.mrf.mxu0  ;;  %v679_v17 = vld [vmem:[#allocation5 + $0x688] sm:$0xff]  ;;  %v940_v18 = vld [vmem:[#allocation5 + $0xeb0] sm:$0xff] }
 0x1aa   : > { %v3621_v33 = vadd.f32 %v3620_v29, %v3601_v28  ;;  %v417_v28 = vld [vmem:[#allocation2 + $0x680] sm:$0xff] }
 0x1ab   : > { %4978 = vmatpush.xpose.msrb.mxu3 %v669_v20  ;;  %4938 = vmatpush.xpose.msrb.mxu1 %v667_v21  ;;  %v3660_v34 = vpop.f32.mrf.mxu1  ;;  %v941_v21 = vld [vmem:[#allocation5 + $0xeb8] sm:$0xff] }
 0x1ac   : > { %v3641_v39 = vadd.f32 %v3640_v30, %v3621_v33  ;;  %4959 = vmatmul.f32.vlgmr.msrb.gmra.mxu2 %v407_v31  ;;  %4919 = vmatmul.f32.vlgmr.msrb.gmra.mxu0 %v405_v32  ;;  %v420_v31 = vld [vmem:[#allocation2 + $0x698] sm:$0xff]  ;;  %v418_v32 = vld [vmem:[#allocation2 + $0x688] sm:$0xff]  ;;  %v684_v33 = vld [vmem:[#allocation5 + $0x6b0] sm:$0xff] }
 0x1ad   : > { %5037 = vmatpush.xpose.msra.mxu2 %v928_v22  ;;  %4997 = vmatpush.xpose.msra.mxu0 %v926_v23  ;;  %v939_v22 = vld [vmem:[#allocation5 + $0xea8] sm:$0xff] }
 0x1ae   : > { %4979 = vmatmul.f32.vlgmr.msrb.gmra.mxu3 %v408_v35  ;;  %4939 = vmatmul.f32.vlgmr.msrb.gmra.mxu1 %v406_v36  ;;  %v3661_v44 = vadd.f32 %v3660_v34, %v3641_v39  ;;  %v682_v34 = vld [vmem:[#allocation5 + $0x6a0] sm:$0xff]  ;;  %v685_v36 = vld [vmem:[#allocation5 + $0x6b8] sm:$0xff] }
 0x1af   : > { %5057 = vmatpush.xpose.msra.mxu3 %v929_v25  ;;  %5017 = vmatpush.xpose.msra.mxu1 %v927_v26  ;;  %v3680_v47 = vpop.f32.mrf.mxu2  ;;  %v942_v39 = vld [vmem:[#allocation5 + $0xec0] sm:$0xff] }
 0x1b0   : > { %v3681_v48 = vadd.f32 %v3680_v47, %v3661_v44  ;;  %v423_v47 = vld [vmem:[#allocation2 + $0x6b0] sm:$0xff] }
 0x1b1   : > { %5038 = vmatpush.xpose.msra.mxu2 %v672_v37  ;;  %4998 = vmatpush.xpose.msra.mxu0 %v670_v38  ;;  %v3700_v49 = vpop.f32.mrf.mxu3  ;;  %v3720_v50 = vpop.f32.mrf.mxu0  ;;  %v683_v37 = vld [vmem:[#allocation5 + $0x6a8] sm:$0xff]  ;;  %v944_v38 = vld [vmem:[#allocation5 + $0xed0] sm:$0xff] }
 0x1b2   : > { %v3701_v53 = vadd.f32 %v3700_v49, %v3681_v48  ;;  %v421_v48 = vld [vmem:[#allocation2 + $0x6a0] sm:$0xff] }
 0x1b3   : > { %5058 = vmatpush.xpose.msra.mxu3 %v673_v40  ;;  %5018 = vmatpush.xpose.msra.mxu1 %v671_v41  ;;  %v3740_v54 = vpop.f32.mrf.mxu1  ;;  %v945_v41 = vld [vmem:[#allocation5 + $0xed8] sm:$0xff] }
 0x1b4   : > { %v3721_v59 = vadd.f32 %v3720_v50, %v3701_v53  ;;  %5039 = vmatmul.f32.vlgmr.msra.gmra.mxu2 %v411_v51  ;;  %4999 = vmatmul.f32.vlgmr.msra.gmra.mxu0 %v409_v52  ;;  %v424_v51 = vld [vmem:[#allocation2 + $0x6b8] sm:$0xff]  ;;  %v422_v52 = vld [vmem:[#allocation2 + $0x6a8] sm:$0xff]  ;;  %v688_v53 = vld [vmem:[#allocation5 + $0x6d0] sm:$0xff] }
 0x1b5   : > { %5117 = vmatpush.xpose.msrb.mxu2 %v932_v42  ;;  %5077 = vmatpush.xpose.msrb.mxu0 %v930_v43  ;;  %v943_v42 = vld [vmem:[#allocation5 + $0xec8] sm:$0xff] }
 0x1b6   : > { %5059 = vmatmul.f32.vlgmr.msra.gmra.mxu3 %v412_v55  ;;  %5019 = vmatmul.f32.vlgmr.msra.gmra.mxu1 %v410_v56  ;;  %v3741_v0 = vadd.f32 %v3740_v54, %v3721_v59  ;;  %v686_v54 = vld [vmem:[#allocation5 + $0x6c0] sm:$0xff]  ;;  %v689_v56 = vld [vmem:[#allocation5 + $0x6d8] sm:$0xff] }
 0x1b7   : > { %5137 = vmatpush.xpose.msrb.mxu3 %v933_v45  ;;  %5097 = vmatpush.xpose.msrb.mxu1 %v931_v46  ;;  %v3760_v3 = vpop.f32.mrf.mxu2  ;;  %v946_v59 = vld [vmem:[#allocation5 + $0xee0] sm:$0xff] }
 0x1b8   : > { %v3761_v4 = vadd.f32 %v3760_v3, %v3741_v0  ;;  %v427_v3 = vld [vmem:[#allocation2 + $0x6d0] sm:$0xff] }
 0x1b9   : > { %5118 = vmatpush.xpose.msrb.mxu2 %v676_v57  ;;  %5078 = vmatpush.xpose.msrb.mxu0 %v674_v58  ;;  %v3780_v5 = vpop.f32.mrf.mxu3  ;;  %v3800_v6 = vpop.f32.mrf.mxu0  ;;  %v687_v57 = vld [vmem:[#allocation5 + $0x6c8] sm:$0xff]  ;;  %v948_v58 = vld [vmem:[#allocation5 + $0xef0] sm:$0xff] }
 0x1ba   : > { %v3781_v9 = vadd.f32 %v3780_v5, %v3761_v4  ;;  %v425_v4 = vld [vmem:[#allocation2 + $0x6c0] sm:$0xff] }
 0x1bb   : > { %5138 = vmatpush.xpose.msrb.mxu3 %v677_v60  ;;  %5098 = vmatpush.xpose.msrb.mxu1 %v675_v61  ;;  %v3820_v10 = vpop.f32.mrf.mxu1  ;;  %v949_v61 = vld [vmem:[#allocation5 + $0xef8] sm:$0xff] }
 0x1bc   : > { %v3801_v15 = vadd.f32 %v3800_v6, %v3781_v9  ;;  %5119 = vmatmul.f32.vlgmr.msrb.gmra.mxu2 %v415_v7  ;;  %5079 = vmatmul.f32.vlgmr.msrb.gmra.mxu0 %v413_v8  ;;  %v428_v7 = vld [vmem:[#allocation2 + $0x6d8] sm:$0xff]  ;;  %v426_v8 = vld [vmem:[#allocation2 + $0x6c8] sm:$0xff]  ;;  %v692_v9 = vld [vmem:[#allocation5 + $0x6f0] sm:$0xff] }
 0x1bd   : > { %5197 = vmatpush.xpose.msra.mxu2 %v936_v62  ;;  %5157 = vmatpush.xpose.msra.mxu0 %v934_v63  ;;  %v947_v62 = vld [vmem:[#allocation5 + $0xee8] sm:$0xff] }
 0x1be   : > { %5139 = vmatmul.f32.vlgmr.msrb.gmra.mxu3 %v416_v11  ;;  %5099 = vmatmul.f32.vlgmr.msrb.gmra.mxu1 %v414_v12  ;;  %v3821_v20 = vadd.f32 %v3820_v10, %v3801_v15  ;;  %v690_v10 = vld [vmem:[#allocation5 + $0x6e0] sm:$0xff]  ;;  %v693_v12 = vld [vmem:[#allocation5 + $0x6f8] sm:$0xff] }
 0x1bf   : > { %5217 = vmatpush.xpose.msra.mxu3 %v937_v1  ;;  %5177 = vmatpush.xpose.msra.mxu1 %v935_v2  ;;  %v3840_v23 = vpop.f32.mrf.mxu2  ;;  %v950_v15 = vld [vmem:[#allocation5 + $0xf00] sm:$0xff] }
 0x1c0   : > { %v3841_v24 = vadd.f32 %v3840_v23, %v3821_v20  ;;  %v431_v23 = vld [vmem:[#allocation2 + $0x6f0] sm:$0xff] }
 0x1c1   : > { %5198 = vmatpush.xpose.msra.mxu2 %v680_v13  ;;  %5158 = vmatpush.xpose.msra.mxu0 %v678_v14  ;;  %v3860_v25 = vpop.f32.mrf.mxu3  ;;  %v3880_v26 = vpop.f32.mrf.mxu0  ;;  %v691_v13 = vld [vmem:[#allocation5 + $0x6e8] sm:$0xff]  ;;  %v952_v14 = vld [vmem:[#allocation5 + $0xf10] sm:$0xff] }
 0x1c2   : > { %v3861_v29 = vadd.f32 %v3860_v25, %v3841_v24  ;;  %v429_v24 = vld [vmem:[#allocation2 + $0x6e0] sm:$0xff] }
 0x1c3   : > { %5218 = vmatpush.xpose.msra.mxu3 %v681_v16  ;;  %5178 = vmatpush.xpose.msra.mxu1 %v679_v17  ;;  %v3900_v30 = vpop.f32.mrf.mxu1  ;;  %v953_v17 = vld [vmem:[#allocation5 + $0xf18] sm:$0xff] }
 0x1c4   : > { %v3881_v35 = vadd.f32 %v3880_v26, %v3861_v29  ;;  %5199 = vmatmul.f32.vlgmr.msra.gmra.mxu2 %v419_v27  ;;  %5159 = vmatmul.f32.vlgmr.msra.gmra.mxu0 %v417_v28  ;;  %v432_v27 = vld [vmem:[#allocation2 + $0x6f8] sm:$0xff]  ;;  %v430_v28 = vld [vmem:[#allocation2 + $0x6e8] sm:$0xff]  ;;  %v696_v29 = vld [vmem:[#allocation5 + $0x710] sm:$0xff] }
 0x1c5   : > { %5277 = vmatpush.xpose.msrb.mxu2 %v940_v18  ;;  %5237 = vmatpush.xpose.msrb.mxu0 %v938_v19  ;;  %v951_v18 = vld [vmem:[#allocation5 + $0xf08] sm:$0xff] }
 0x1c6   : > { %5219 = vmatmul.f32.vlgmr.msra.gmra.mxu3 %v420_v31  ;;  %5179 = vmatmul.f32.vlgmr.msra.gmra.mxu1 %v418_v32  ;;  %v3901_v40 = vadd.f32 %v3900_v30, %v3881_v35  ;;  %v694_v30 = vld [vmem:[#allocation5 + $0x700] sm:$0xff]  ;;  %v697_v32 = vld [vmem:[#allocation5 + $0x718] sm:$0xff] }
 0x1c7   : > { %5297 = vmatpush.xpose.msrb.mxu3 %v941_v21  ;;  %5257 = vmatpush.xpose.msrb.mxu1 %v939_v22  ;;  %v3920_v43 = vpop.f32.mrf.mxu2  ;;  %v954_v35 = vld [vmem:[#allocation5 + $0xf20] sm:$0xff] }
 0x1c8   : > { %v3921_v44 = vadd.f32 %v3920_v43, %v3901_v40  ;;  %v435_v43 = vld [vmem:[#allocation2 + $0x710] sm:$0xff] }
 0x1c9   : > { %5278 = vmatpush.xpose.msrb.mxu2 %v684_v33  ;;  %5238 = vmatpush.xpose.msrb.mxu0 %v682_v34  ;;  %v3940_v45 = vpop.f32.mrf.mxu3  ;;  %v3960_v46 = vpop.f32.mrf.mxu0  ;;  %v695_v33 = vld [vmem:[#allocation5 + $0x708] sm:$0xff]  ;;  %v956_v34 = vld [vmem:[#allocation5 + $0xf30] sm:$0xff] }
 0x1ca   : > { %v3941_v49 = vadd.f32 %v3940_v45, %v3921_v44  ;;  %v433_v44 = vld [vmem:[#allocation2 + $0x700] sm:$0xff] }
 0x1cb   : > { %5298 = vmatpush.xpose.msrb.mxu3 %v685_v36  ;;  %5258 = vmatpush.xpose.msrb.mxu1 %v683_v37  ;;  %v3980_v50 = vpop.f32.mrf.mxu1  ;;  %v957_v37 = vld [vmem:[#allocation5 + $0xf38] sm:$0xff] }
 0x1cc   : > { %v3961_v55 = vadd.f32 %v3960_v46, %v3941_v49  ;;  %5279 = vmatmul.f32.vlgmr.msrb.gmra.mxu2 %v423_v47  ;;  %5239 = vmatmul.f32.vlgmr.msrb.gmra.mxu0 %v421_v48  ;;  %v436_v47 = vld [vmem:[#allocation2 + $0x718] sm:$0xff]  ;;  %v434_v48 = vld [vmem:[#allocation2 + $0x708] sm:$0xff]  ;;  %v700_v49 = vld [vmem:[#allocation5 + $0x730] sm:$0xff] }
 0x1cd   : > { %5357 = vmatpush.xpose.msra.mxu2 %v944_v38  ;;  %5317 = vmatpush.xpose.msra.mxu0 %v942_v39  ;;  %v955_v38 = vld [vmem:[#allocation5 + $0xf28] sm:$0xff] }
 0x1ce   : > { %5299 = vmatmul.f32.vlgmr.msrb.gmra.mxu3 %v424_v51  ;;  %5259 = vmatmul.f32.vlgmr.msrb.gmra.mxu1 %v422_v52  ;;  %v3981_v60 = vadd.f32 %v3980_v50, %v3961_v55  ;;  %v698_v50 = vld [vmem:[#allocation5 + $0x720] sm:$0xff]  ;;  %v701_v52 = vld [vmem:[#allocation5 + $0x738] sm:$0xff] }
 0x1cf   : > { %5377 = vmatpush.xpose.msra.mxu3 %v945_v41  ;;  %5337 = vmatpush.xpose.msra.mxu1 %v943_v42  ;;  %v4000_v63 = vpop.f32.mrf.mxu2  ;;  %v958_v55 = vld [vmem:[#allocation5 + $0xf40] sm:$0xff] }
 0x1d0   : > { %v4001_v0 = vadd.f32 %v4000_v63, %v3981_v60  ;;  %v439_v63 = vld [vmem:[#allocation2 + $0x730] sm:$0xff] }
 0x1d1   : > { %5358 = vmatpush.xpose.msra.mxu2 %v688_v53  ;;  %5318 = vmatpush.xpose.msra.mxu0 %v686_v54  ;;  %v4020_v1 = vpop.f32.mrf.mxu3  ;;  %v4040_v2 = vpop.f32.mrf.mxu0  ;;  %v699_v53 = vld [vmem:[#allocation5 + $0x728] sm:$0xff]  ;;  %v960_v54 = vld [vmem:[#allocation5 + $0xf50] sm:$0xff] }
 0x1d2   : > { %v4021_v5 = vadd.f32 %v4020_v1, %v4001_v0  ;;  %v437_v0 = vld [vmem:[#allocation2 + $0x720] sm:$0xff] }
 0x1d3   : > { %5378 = vmatpush.xpose.msra.mxu3 %v689_v56  ;;  %5338 = vmatpush.xpose.msra.mxu1 %v687_v57  ;;  %v4060_v6 = vpop.f32.mrf.mxu1  ;;  %v961_v57 = vld [vmem:[#allocation5 + $0xf58] sm:$0xff] }
 0x1d4   : > { %v4041_v11 = vadd.f32 %v4040_v2, %v4021_v5  ;;  %5359 = vmatmul.f32.vlgmr.msra.gmra.mxu2 %v427_v3  ;;  %5319 = vmatmul.f32.vlgmr.msra.gmra.mxu0 %v425_v4  ;;  %v440_v3 = vld [vmem:[#allocation2 + $0x738] sm:$0xff]  ;;  %v438_v4 = vld [vmem:[#allocation2 + $0x728] sm:$0xff]  ;;  %v704_v5 = vld [vmem:[#allocation5 + $0x750] sm:$0xff] }
 0x1d5   : > { %5437 = vmatpush.xpose.msrb.mxu2 %v948_v58  ;;  %5397 = vmatpush.xpose.msrb.mxu0 %v946_v59  ;;  %v959_v58 = vld [vmem:[#allocation5 + $0xf48] sm:$0xff] }
 0x1d6   : > { %5379 = vmatmul.f32.vlgmr.msra.gmra.mxu3 %v428_v7  ;;  %5339 = vmatmul.f32.vlgmr.msra.gmra.mxu1 %v426_v8  ;;  %v4061_v16 = vadd.f32 %v4060_v6, %v4041_v11  ;;  %v702_v6 = vld [vmem:[#allocation5 + $0x740] sm:$0xff]  ;;  %v705_v8 = vld [vmem:[#allocation5 + $0x758] sm:$0xff] }
 0x1d7   : > { %5457 = vmatpush.xpose.msrb.mxu3 %v949_v61  ;;  %5417 = vmatpush.xpose.msrb.mxu1 %v947_v62  ;;  %v4080_v19 = vpop.f32.mrf.mxu2  ;;  %v962_v11 = vld [vmem:[#allocation5 + $0xf60] sm:$0xff] }
 0x1d8   : > { %v4081_v20 = vadd.f32 %v4080_v19, %v4061_v16  ;;  %v443_v19 = vld [vmem:[#allocation2 + $0x750] sm:$0xff] }
 0x1d9   : > { %5438 = vmatpush.xpose.msrb.mxu2 %v692_v9  ;;  %5398 = vmatpush.xpose.msrb.mxu0 %v690_v10  ;;  %v4100_v21 = vpop.f32.mrf.mxu3  ;;  %v4120_v22 = vpop.f32.mrf.mxu0  ;;  %v703_v9 = vld [vmem:[#allocation5 + $0x748] sm:$0xff]  ;;  %v964_v10 = vld [vmem:[#allocation5 + $0xf70] sm:$0xff] }
 0x1da   : > { %v4101_v25 = vadd.f32 %v4100_v21, %v4081_v20  ;;  %v441_v20 = vld [vmem:[#allocation2 + $0x740] sm:$0xff] }
 0x1db   : > { %5458 = vmatpush.xpose.msrb.mxu3 %v693_v12  ;;  %5418 = vmatpush.xpose.msrb.mxu1 %v691_v13  ;;  %v4140_v26 = vpop.f32.mrf.mxu1  ;;  %v965_v13 = vld [vmem:[#allocation5 + $0xf78] sm:$0xff] }
 0x1dc   : > { %v4121_v31 = vadd.f32 %v4120_v22, %v4101_v25  ;;  %5439 = vmatmul.f32.vlgmr.msrb.gmra.mxu2 %v431_v23  ;;  %5399 = vmatmul.f32.vlgmr.msrb.gmra.mxu0 %v429_v24  ;;  %v444_v23 = vld [vmem:[#allocation2 + $0x758] sm:$0xff]  ;;  %v442_v24 = vld [vmem:[#allocation2 + $0x748] sm:$0xff]  ;;  %v708_v25 = vld [vmem:[#allocation5 + $0x770] sm:$0xff] }
 0x1dd   : > { %5517 = vmatpush.xpose.msra.mxu2 %v952_v14  ;;  %5477 = vmatpush.xpose.msra.mxu0 %v950_v15  ;;  %v963_v14 = vld [vmem:[#allocation5 + $0xf68] sm:$0xff] }
 0x1de   : > { %5459 = vmatmul.f32.vlgmr.msrb.gmra.mxu3 %v432_v27  ;;  %5419 = vmatmul.f32.vlgmr.msrb.gmra.mxu1 %v430_v28  ;;  %v4141_v36 = vadd.f32 %v4140_v26, %v4121_v31  ;;  %v706_v26 = vld [vmem:[#allocation5 + $0x760] sm:$0xff]  ;;  %v709_v28 = vld [vmem:[#allocation5 + $0x778] sm:$0xff] }
 0x1df   : > { %5537 = vmatpush.xpose.msra.mxu3 %v953_v17  ;;  %5497 = vmatpush.xpose.msra.mxu1 %v951_v18  ;;  %v4160_v39 = vpop.f32.mrf.mxu2  ;;  %v966_v31 = vld [vmem:[#allocation5 + $0xf80] sm:$0xff] }
 0x1e0   : > { %v4161_v40 = vadd.f32 %v4160_v39, %v4141_v36  ;;  %v447_v39 = vld [vmem:[#allocation2 + $0x770] sm:$0xff] }
 0x1e1   : > { %5518 = vmatpush.xpose.msra.mxu2 %v696_v29  ;;  %5478 = vmatpush.xpose.msra.mxu0 %v694_v30  ;;  %v4180_v41 = vpop.f32.mrf.mxu3  ;;  %v4200_v42 = vpop.f32.mrf.mxu0  ;;  %v707_v29 = vld [vmem:[#allocation5 + $0x768] sm:$0xff]  ;;  %v968_v30 = vld [vmem:[#allocation5 + $0xf90] sm:$0xff] }
 0x1e2   : > { %v4181_v45 = vadd.f32 %v4180_v41, %v4161_v40  ;;  %v445_v40 = vld [vmem:[#allocation2 + $0x760] sm:$0xff] }
 0x1e3   : > { %5538 = vmatpush.xpose.msra.mxu3 %v697_v32  ;;  %5498 = vmatpush.xpose.msra.mxu1 %v695_v33  ;;  %v4220_v46 = vpop.f32.mrf.mxu1  ;;  %v969_v33 = vld [vmem:[#allocation5 + $0xf98] sm:$0xff] }
 0x1e4   : > { %v4201_v51 = vadd.f32 %v4200_v42, %v4181_v45  ;;  %5519 = vmatmul.f32.vlgmr.msra.gmra.mxu2 %v435_v43  ;;  %5479 = vmatmul.f32.vlgmr.msra.gmra.mxu0 %v433_v44  ;;  %v448_v43 = vld [vmem:[#allocation2 + $0x778] sm:$0xff]  ;;  %v446_v44 = vld [vmem:[#allocation2 + $0x768] sm:$0xff]  ;;  %v712_v45 = vld [vmem:[#allocation5 + $0x790] sm:$0xff] }
 0x1e5   : > { %5597 = vmatpush.xpose.msrb.mxu2 %v956_v34  ;;  %5557 = vmatpush.xpose.msrb.mxu0 %v954_v35  ;;  %v967_v34 = vld [vmem:[#allocation5 + $0xf88] sm:$0xff] }
 0x1e6   : > { %5539 = vmatmul.f32.vlgmr.msra.gmra.mxu3 %v436_v47  ;;  %5499 = vmatmul.f32.vlgmr.msra.gmra.mxu1 %v434_v48  ;;  %v4221_v56 = vadd.f32 %v4220_v46, %v4201_v51  ;;  %v710_v46 = vld [vmem:[#allocation5 + $0x780] sm:$0xff]  ;;  %v713_v48 = vld [vmem:[#allocation5 + $0x798] sm:$0xff] }
 0x1e7   : > { %5617 = vmatpush.xpose.msrb.mxu3 %v957_v37  ;;  %5577 = vmatpush.xpose.msrb.mxu1 %v955_v38  ;;  %v4240_v59 = vpop.f32.mrf.mxu2  ;;  %v970_v51 = vld [vmem:[#allocation5 + $0xfa0] sm:$0xff] }
 0x1e8   : > { %v4241_v60 = vadd.f32 %v4240_v59, %v4221_v56  ;;  %v451_v59 = vld [vmem:[#allocation2 + $0x790] sm:$0xff] }
 0x1e9   : > { %5598 = vmatpush.xpose.msrb.mxu2 %v700_v49  ;;  %5558 = vmatpush.xpose.msrb.mxu0 %v698_v50  ;;  %v4260_v61 = vpop.f32.mrf.mxu3  ;;  %v4280_v62 = vpop.f32.mrf.mxu0  ;;  %v711_v49 = vld [vmem:[#allocation5 + $0x788] sm:$0xff]  ;;  %v972_v50 = vld [vmem:[#allocation5 + $0xfb0] sm:$0xff] }
 0x1ea   : > { %v4261_v1 = vadd.f32 %v4260_v61, %v4241_v60  ;;  %v449_v60 = vld [vmem:[#allocation2 + $0x780] sm:$0xff] }
 0x1eb   : > { %5618 = vmatpush.xpose.msrb.mxu3 %v701_v52  ;;  %5578 = vmatpush.xpose.msrb.mxu1 %v699_v53  ;;  %v4300_v2 = vpop.f32.mrf.mxu1  ;;  %v973_v53 = vld [vmem:[#allocation5 + $0xfb8] sm:$0xff] }
 0x1ec   : > { %v4281_v7 = vadd.f32 %v4280_v62, %v4261_v1  ;;  %5599 = vmatmul.f32.vlgmr.msrb.gmra.mxu2 %v439_v63  ;;  %5559 = vmatmul.f32.vlgmr.msrb.gmra.mxu0 %v437_v0  ;;  %v452_v63 = vld [vmem:[#allocation2 + $0x798] sm:$0xff]  ;;  %v450_v0 = vld [vmem:[#allocation2 + $0x788] sm:$0xff]  ;;  %v716_v1 = vld [vmem:[#allocation5 + $0x7b0] sm:$0xff] }
 0x1ed   : > { %5677 = vmatpush.xpose.msra.mxu2 %v960_v54  ;;  %5637 = vmatpush.xpose.msra.mxu0 %v958_v55  ;;  %v971_v54 = vld [vmem:[#allocation5 + $0xfa8] sm:$0xff] }
 0x1ee   : > { %5619 = vmatmul.f32.vlgmr.msrb.gmra.mxu3 %v440_v3  ;;  %5579 = vmatmul.f32.vlgmr.msrb.gmra.mxu1 %v438_v4  ;;  %v4301_v12 = vadd.f32 %v4300_v2, %v4281_v7  ;;  %v714_v2 = vld [vmem:[#allocation5 + $0x7a0] sm:$0xff]  ;;  %v717_v4 = vld [vmem:[#allocation5 + $0x7b8] sm:$0xff] }
 0x1ef   : > { %5697 = vmatpush.xpose.msra.mxu3 %v961_v57  ;;  %5657 = vmatpush.xpose.msra.mxu1 %v959_v58  ;;  %v4320_v15 = vpop.f32.mrf.mxu2  ;;  %v974_v7 = vld [vmem:[#allocation5 + $0xfc0] sm:$0xff] }
 0x1f0   : > { %v4321_v16 = vadd.f32 %v4320_v15, %v4301_v12  ;;  %v455_v15 = vld [vmem:[#allocation2 + $0x7b0] sm:$0xff] }
 0x1f1   : > { %5678 = vmatpush.xpose.msra.mxu2 %v704_v5  ;;  %5638 = vmatpush.xpose.msra.mxu0 %v702_v6  ;;  %v4340_v17 = vpop.f32.mrf.mxu3  ;;  %v4360_v18 = vpop.f32.mrf.mxu0  ;;  %v715_v5 = vld [vmem:[#allocation5 + $0x7a8] sm:$0xff]  ;;  %v976_v6 = vld [vmem:[#allocation5 + $0xfd0] sm:$0xff] }
 0x1f2   : > { %v4341_v21 = vadd.f32 %v4340_v17, %v4321_v16  ;;  %v453_v16 = vld [vmem:[#allocation2 + $0x7a0] sm:$0xff] }
 0x1f3   : > { %5698 = vmatpush.xpose.msra.mxu3 %v705_v8  ;;  %5658 = vmatpush.xpose.msra.mxu1 %v703_v9  ;;  %v4380_v22 = vpop.f32.mrf.mxu1  ;;  %v977_v9 = vld [vmem:[#allocation5 + $0xfd8] sm:$0xff] }
 0x1f4   : > { %v4361_v27 = vadd.f32 %v4360_v18, %v4341_v21  ;;  %5679 = vmatmul.f32.vlgmr.msra.gmra.mxu2 %v443_v19  ;;  %5639 = vmatmul.f32.vlgmr.msra.gmra.mxu0 %v441_v20  ;;  %v456_v19 = vld [vmem:[#allocation2 + $0x7b8] sm:$0xff]  ;;  %v454_v20 = vld [vmem:[#allocation2 + $0x7a8] sm:$0xff]  ;;  %v720_v21 = vld [vmem:[#allocation5 + $0x7d0] sm:$0xff] }
 0x1f5   : > { %5757 = vmatpush.xpose.msrb.mxu2 %v964_v10  ;;  %5717 = vmatpush.xpose.msrb.mxu0 %v962_v11  ;;  %v975_v10 = vld [vmem:[#allocation5 + $0xfc8] sm:$0xff] }
 0x1f6   : > { %5699 = vmatmul.f32.vlgmr.msra.gmra.mxu3 %v444_v23  ;;  %5659 = vmatmul.f32.vlgmr.msra.gmra.mxu1 %v442_v24  ;;  %v4381_v32 = vadd.f32 %v4380_v22, %v4361_v27  ;;  %v718_v22 = vld [vmem:[#allocation5 + $0x7c0] sm:$0xff]  ;;  %v721_v24 = vld [vmem:[#allocation5 + $0x7d8] sm:$0xff] }
 0x1f7   : > { %5777 = vmatpush.xpose.msrb.mxu3 %v965_v13  ;;  %5737 = vmatpush.xpose.msrb.mxu1 %v963_v14  ;;  %v4400_v35 = vpop.f32.mrf.mxu2  ;;  %v978_v27 = vld [vmem:[#allocation5 + $0xfe0] sm:$0xff] }
 0x1f8   : > { %v4401_v36 = vadd.f32 %v4400_v35, %v4381_v32  ;;  %v459_v35 = vld [vmem:[#allocation2 + $0x7d0] sm:$0xff] }
 0x1f9   : > { %5758 = vmatpush.xpose.msrb.mxu2 %v708_v25  ;;  %5718 = vmatpush.xpose.msrb.mxu0 %v706_v26  ;;  %v4420_v37 = vpop.f32.mrf.mxu3  ;;  %v4440_v38 = vpop.f32.mrf.mxu0  ;;  %v719_v25 = vld [vmem:[#allocation5 + $0x7c8] sm:$0xff]  ;;  %v980_v26 = vld [vmem:[#allocation5 + $0xff0] sm:$0xff] }
 0x1fa   : > { %v4421_v41 = vadd.f32 %v4420_v37, %v4401_v36  ;;  %v457_v36 = vld [vmem:[#allocation2 + $0x7c0] sm:$0xff] }
 0x1fb   : > { %5778 = vmatpush.xpose.msrb.mxu3 %v709_v28  ;;  %5738 = vmatpush.xpose.msrb.mxu1 %v707_v29  ;;  %v4460_v42 = vpop.f32.mrf.mxu1  ;;  %v981_v29 = vld [vmem:[#allocation5 + $0xff8] sm:$0xff] }
 0x1fc   : > { %v4441_v47 = vadd.f32 %v4440_v38, %v4421_v41  ;;  %5759 = vmatmul.f32.vlgmr.msrb.gmra.mxu2 %v447_v39  ;;  %5719 = vmatmul.f32.vlgmr.msrb.gmra.mxu0 %v445_v40  ;;  %v460_v39 = vld [vmem:[#allocation2 + $0x7d8] sm:$0xff]  ;;  %v458_v40 = vld [vmem:[#allocation2 + $0x7c8] sm:$0xff]  ;;  %v724_v41 = vld [vmem:[#allocation5 + $0x7f0] sm:$0xff] }
 0x1fd   : > { %5837 = vmatpush.xpose.msra.mxu2 %v968_v30  ;;  %5797 = vmatpush.xpose.msra.mxu0 %v966_v31  ;;  %v979_v30 = vld [vmem:[#allocation5 + $0xfe8] sm:$0xff] }
 0x1fe   : > { %5779 = vmatmul.f32.vlgmr.msrb.gmra.mxu3 %v448_v43  ;;  %5739 = vmatmul.f32.vlgmr.msrb.gmra.mxu1 %v446_v44  ;;  %v4461_v52 = vadd.f32 %v4460_v42, %v4441_v47  ;;  %v722_v42 = vld [vmem:[#allocation5 + $0x7e0] sm:$0xff]  ;;  %v725_v44 = vld [vmem:[#allocation5 + $0x7f8] sm:$0xff] }
 0x1ff   : > { %5857 = vmatpush.xpose.msra.mxu3 %v969_v33  ;;  %5817 = vmatpush.xpose.msra.mxu1 %v967_v34  ;;  %v4480_v55 = vpop.f32.mrf.mxu2 }
 0x200   : > { %v4481_v56 = vadd.f32 %v4480_v55, %v4461_v52  ;;  %v461_v52 = vld [vmem:[#allocation2 + $0x7e0] sm:$0xff]  ;;  %v464_v55 = vld [vmem:[#allocation2 + $0x7f8] sm:$0xff] }
 0x201   : > { %5838 = vmatpush.xpose.msra.mxu2 %v712_v45  ;;  %5798 = vmatpush.xpose.msra.mxu0 %v710_v46  ;;  %v4500_v57 = vpop.f32.mrf.mxu3  ;;  %v4520_v58 = vpop.f32.mrf.mxu0  ;;  %v723_v45 = vld [vmem:[#allocation5 + $0x7e8] sm:$0xff] }
 0x202   : > { %v4501_v61 = vadd.f32 %v4500_v57, %v4481_v56  ;;  %v462_v56 = vld [vmem:[#allocation2 + $0x7e8] sm:$0xff] }
 0x203   : > { %5858 = vmatpush.xpose.msra.mxu3 %v713_v48  ;;  %5818 = vmatpush.xpose.msra.mxu1 %v711_v49  ;;  %v4540_v62 = vpop.f32.mrf.mxu1 }
 0x204   : > { %v4521_v3 = vadd.f32 %v4520_v58, %v4501_v61  ;;  %5839 = vmatmul.f32.vlgmr.msra.gmra.mxu2 %v451_v59  ;;  %5799 = vmatmul.f32.vlgmr.msra.gmra.mxu0 %v449_v60 }
 0x205   : > { %5917 = vmatpush.xpose.msrb.mxu2 %v972_v50  ;;  %5877 = vmatpush.xpose.msrb.mxu0 %v970_v51  ;;  %v463_v51 = vld [vmem:[#allocation2 + $0x7f0] sm:$0xff] }
 0x206   : > { %5859 = vmatmul.f32.vlgmr.msra.gmra.mxu3 %v452_v63  ;;  %5819 = vmatmul.f32.vlgmr.msra.gmra.mxu1 %v450_v0  ;;  %v4541_v8 = vadd.f32 %v4540_v62, %v4521_v3 }
 0x207   : > { %5937 = vmatpush.xpose.msrb.mxu3 %v973_v53  ;;  %5897 = vmatpush.xpose.msrb.mxu1 %v971_v54  ;;  %v4560_v11 = vpop.f32.mrf.mxu2 }
 0x208   : > { %v4561_v12 = vadd.f32 %v4560_v11, %v4541_v8 }
 0x209   : > { %5918 = vmatpush.xpose.msrb.mxu2 %v716_v1  ;;  %5878 = vmatpush.xpose.msrb.mxu0 %v714_v2  ;;  %v4580_v13 = vpop.f32.mrf.mxu3  ;;  %v4600_v14 = vpop.f32.mrf.mxu0 }
 0x20a   : > { %v4581_v17 = vadd.f32 %v4580_v13, %v4561_v12 }
 0x20b   : > { %5938 = vmatpush.xpose.msrb.mxu3 %v717_v4  ;;  %5898 = vmatpush.xpose.msrb.mxu1 %v715_v5  ;;  %v4620_v18 = vpop.f32.mrf.mxu1 }
 0x20c   : > { %v4601_v23 = vadd.f32 %v4600_v14, %v4581_v17  ;;  %5919 = vmatmul.f32.vlgmr.msrb.gmra.mxu2 %v455_v15  ;;  %5879 = vmatmul.f32.vlgmr.msrb.gmra.mxu0 %v453_v16 }
 0x20d   : > { %5997 = vmatpush.xpose.msra.mxu2 %v976_v6  ;;  %5957 = vmatpush.xpose.msra.mxu0 %v974_v7 }
 0x20e   : > { %5939 = vmatmul.f32.vlgmr.msrb.gmra.mxu3 %v456_v19  ;;  %5899 = vmatmul.f32.vlgmr.msrb.gmra.mxu1 %v454_v20  ;;  %v4621_v28 = vadd.f32 %v4620_v18, %v4601_v23 }
 0x20f   : > { %6017 = vmatpush.xpose.msra.mxu3 %v977_v9  ;;  %5977 = vmatpush.xpose.msra.mxu1 %v975_v10  ;;  %v4640_v31 = vpop.f32.mrf.mxu2 }
 0x210   : > { %v4641_v32 = vadd.f32 %v4640_v31, %v4621_v28 }
 0x211   : > { %5998 = vmatpush.xpose.msra.mxu2 %v720_v21  ;;  %5958 = vmatpush.xpose.msra.mxu0 %v718_v22  ;;  %v4660_v33 = vpop.f32.mrf.mxu3  ;;  %v4680_v34 = vpop.f32.mrf.mxu0 }
 0x212   : > { %v4661_v37 = vadd.f32 %v4660_v33, %v4641_v32 }
 0x213   : > { %6018 = vmatpush.xpose.msra.mxu3 %v721_v24  ;;  %5978 = vmatpush.xpose.msra.mxu1 %v719_v25  ;;  %v4700_v38 = vpop.f32.mrf.mxu1 }
 0x214   : > { %v4681_v43 = vadd.f32 %v4680_v34, %v4661_v37  ;;  %5999 = vmatmul.f32.vlgmr.msra.gmra.mxu2 %v459_v35  ;;  %5959 = vmatmul.f32.vlgmr.msra.gmra.mxu0 %v457_v36 }
 0x215   : > { %6077 = vmatpush.xpose.msrb.mxu2 %v980_v26  ;;  %6037 = vmatpush.xpose.msrb.mxu0 %v978_v27 }
 0x216   : > { %6019 = vmatmul.f32.vlgmr.msra.gmra.mxu3 %v460_v39  ;;  %5979 = vmatmul.f32.vlgmr.msra.gmra.mxu1 %v458_v40  ;;  %v4701_v46 = vadd.f32 %v4700_v38, %v4681_v43 }
 0x217   : > { %6097 = vmatpush.xpose.msrb.mxu3 %v981_v29  ;;  %6057 = vmatpush.xpose.msrb.mxu1 %v979_v30  ;;  %v4720_v47 = vpop.f32.mrf.mxu2 }
 0x218   : > { %v4721_v48 = vadd.f32 %v4720_v47, %v4701_v46 }
 0x219   : > { %6078 = vmatpush.xpose.msrb.mxu2 %v724_v41  ;;  %6038 = vmatpush.xpose.msrb.mxu0 %v722_v42  ;;  %v4740_v49 = vpop.f32.mrf.mxu3  ;;  %v4760_v50 = vpop.f32.mrf.mxu0 }
 0x21a   : > { %v4741_v53 = vadd.f32 %v4740_v49, %v4721_v48 }
 0x21b   : > { %6098 = vmatpush.xpose.msrb.mxu3 %v725_v44  ;;  %6058 = vmatpush.xpose.msrb.mxu1 %v723_v45  ;;  %v4780_v54 = vpop.f32.mrf.mxu1 }
 0x21c   : > { %v4761_v57 = vadd.f32 %v4760_v50, %v4741_v53  ;;  %6079 = vmatmul.f32.vlgmr.msrb.gmra.mxu2 %v463_v51  ;;  %6039 = vmatmul.f32.vlgmr.msrb.gmra.mxu0 %v461_v52 }
 0x21e   : > { %6099 = vmatmul.f32.vlgmr.msrb.gmra.mxu3 %v464_v55  ;;  %6059 = vmatmul.f32.vlgmr.msrb.gmra.mxu1 %v462_v56  ;;  %v4781_v58 = vadd.f32 %v4780_v54, %v4761_v57 }
 0x21f   : > { %v4800_v59 = vpop.f32.mrf.mxu2 }
 0x220   : > { %v4801_v60 = vadd.f32 %v4800_v59, %v4781_v58 }
 0x221   : > { %v4820_v61 = vpop.f32.mrf.mxu3  ;;  %v4840_v62 = vpop.f32.mrf.mxu0 }
 0x222   : > { %v4821_v63 = vadd.f32 %v4820_v61, %v4801_v60 }
 0x223   : > { %v4860_v0 = vpop.f32.mrf.mxu1 }
 0x224   : > { %v4841_v1 = vadd.f32 %v4840_v62, %v4821_v63 }
 0x226   : > { %v4861_v2 = vadd.f32 %v4860_v0, %v4841_v1 }
 0x227   : > { %v4880_v3 = vpop.f32.mrf.mxu2 }
 0x228   : > { %v4881_v4 = vadd.f32 %v4880_v3, %v4861_v2 }
 0x229   : > { %v4900_v5 = vpop.f32.mrf.mxu3  ;;  %v4920_v6 = vpop.f32.mrf.mxu0 }
 0x22a   : > { %v4901_v7 = vadd.f32 %v4900_v5, %v4881_v4 }
 0x22b   : > { %v4940_v8 = vpop.f32.mrf.mxu1 }
 0x22c   : > { %v4921_v9 = vadd.f32 %v4920_v6, %v4901_v7 }
 0x22e   : > { %v4941_v10 = vadd.f32 %v4940_v8, %v4921_v9 }
 0x22f   : > { %v4960_v11 = vpop.f32.mrf.mxu2 }
 0x230   : > { %v4961_v12 = vadd.f32 %v4960_v11, %v4941_v10 }
 0x231   : > { %v4980_v13 = vpop.f32.mrf.mxu3  ;;  %v5000_v14 = vpop.f32.mrf.mxu0 }
 0x232   : > { %v4981_v15 = vadd.f32 %v4980_v13, %v4961_v12 }
 0x233   : > { %v5020_v16 = vpop.f32.mrf.mxu1 }
 0x234   : > { %v5001_v17 = vadd.f32 %v5000_v14, %v4981_v15 }
 0x236   : > { %v5021_v18 = vadd.f32 %v5020_v16, %v5001_v17 }
 0x237   : > { %v5040_v19 = vpop.f32.mrf.mxu2 }
 0x238   : > { %v5041_v20 = vadd.f32 %v5040_v19, %v5021_v18 }
 0x239   : > { %v5060_v21 = vpop.f32.mrf.mxu3  ;;  %v5080_v22 = vpop.f32.mrf.mxu0 }
 0x23a   : > { %v5061_v23 = vadd.f32 %v5060_v21, %v5041_v20 }
 0x23b   : > { %v5100_v24 = vpop.f32.mrf.mxu1 }
 0x23c   : > { %v5081_v25 = vadd.f32 %v5080_v22, %v5061_v23 }
 0x23e   : > { %v5101_v26 = vadd.f32 %v5100_v24, %v5081_v25 }
 0x23f   : > { %v5120_v27 = vpop.f32.mrf.mxu2 }
 0x240   : > { %v5121_v28 = vadd.f32 %v5120_v27, %v5101_v26  ;;  %v13323_v26 = vmov 0.0  }
 0x241   : > { %v5140_v29 = vpop.f32.mrf.mxu3  ;;  %v5160_v30 = vpop.f32.mrf.mxu0  ;;  %208 = vst.msk [vmem:[#allocation7] sm:$0xff] %vm207_vm0, %v13323_v26 }
 0x242   : > { %v5141_v31 = vadd.f32 %v5140_v29, %v5121_v28 }
 0x243   : > { %v5180_v32 = vpop.f32.mrf.mxu1 }
 0x244   : > { %v5161_v33 = vadd.f32 %v5160_v30, %v5141_v31 }
 0x246   : > { %v5181_v34 = vadd.f32 %v5180_v32, %v5161_v33 }
 0x247   : > { %v5200_v35 = vpop.f32.mrf.mxu2 }
 0x248   : > { %v5201_v36 = vadd.f32 %v5200_v35, %v5181_v34 }
 0x249   : > { %v5220_v37 = vpop.f32.mrf.mxu3  ;;  %v5240_v38 = vpop.f32.mrf.mxu0 }
 0x24a   : > { %v5221_v39 = vadd.f32 %v5220_v37, %v5201_v36 }
 0x24b   : > { %v5260_v40 = vpop.f32.mrf.mxu1 }
 0x24c   : > { %v5241_v41 = vadd.f32 %v5240_v38, %v5221_v39 }
 0x24e   : > { %v5261_v42 = vadd.f32 %v5260_v40, %v5241_v41 }
 0x24f   : > { %v5280_v43 = vpop.f32.mrf.mxu2 }
 0x250   : > { %v5281_v44 = vadd.f32 %v5280_v43, %v5261_v42 }
 0x251   : > { %v5300_v45 = vpop.f32.mrf.mxu3  ;;  %v5320_v46 = vpop.f32.mrf.mxu0 }
 0x252   : > { %v5301_v47 = vadd.f32 %v5300_v45, %v5281_v44 }
 0x253   : > { %v5340_v48 = vpop.f32.mrf.mxu1 }
 0x254   : > { %v5321_v49 = vadd.f32 %v5320_v46, %v5301_v47 }
 0x256   : > { %v5341_v50 = vadd.f32 %v5340_v48, %v5321_v49 }
 0x257   : > { %v5360_v51 = vpop.f32.mrf.mxu2 }
 0x258   : > { %v5361_v52 = vadd.f32 %v5360_v51, %v5341_v50 }
 0x259   : > { %v5380_v53 = vpop.f32.mrf.mxu3  ;;  %v5400_v54 = vpop.f32.mrf.mxu0 }
 0x25a   : > { %v5381_v55 = vadd.f32 %v5380_v53, %v5361_v52 }
 0x25b   : > { %v5420_v56 = vpop.f32.mrf.mxu1 }
 0x25c   : > { %v5401_v57 = vadd.f32 %v5400_v54, %v5381_v55 }
 0x25e   : > { %v5421_v58 = vadd.f32 %v5420_v56, %v5401_v57 }
 0x25f   : > { %v5440_v59 = vpop.f32.mrf.mxu2 }
 0x260   : > { %v5441_v60 = vadd.f32 %v5440_v59, %v5421_v58 }
 0x261   : > { %v5460_v61 = vpop.f32.mrf.mxu3  ;;  %v5480_v62 = vpop.f32.mrf.mxu0 }
 0x262   : > { %v5461_v63 = vadd.f32 %v5460_v61, %v5441_v60 }
 0x263   : > { %v5500_v0 = vpop.f32.mrf.mxu1 }
 0x264   : > { %v5481_v1 = vadd.f32 %v5480_v62, %v5461_v63  ;;  %v982_v63 = vld [vmem:[#allocation7] sm:$0xff] }
 0x266   : > { %v5501_v2 = vadd.f32 %v5500_v0, %v5481_v1 }
 0x267   : > { %v5520_v3 = vpop.f32.mrf.mxu2 }
 0x268   : > { %v5521_v4 = vadd.f32 %v5520_v3, %v5501_v2 }
 0x269   : > { %v5540_v5 = vpop.f32.mrf.mxu3  ;;  %v5560_v6 = vpop.f32.mrf.mxu0 }
 0x26a   : > { %v5541_v7 = vadd.f32 %v5540_v5, %v5521_v4 }
 0x26b   : > { %v5580_v8 = vpop.f32.mrf.mxu1 }
 0x26c   : > { %v5561_v9 = vadd.f32 %v5560_v6, %v5541_v7 }
 0x26e   : > { %v5581_v10 = vadd.f32 %v5580_v8, %v5561_v9 }
 0x26f   : > { %v5600_v11 = vpop.f32.mrf.mxu2 }
 0x270   : > { %v5601_v12 = vadd.f32 %v5600_v11, %v5581_v10 }
 0x271   : > { %v5620_v13 = vpop.f32.mrf.mxu3  ;;  %v5640_v14 = vpop.f32.mrf.mxu0 }
 0x272   : > { %v5621_v15 = vadd.f32 %v5620_v13, %v5601_v12 }
 0x273   : > { %v5660_v16 = vpop.f32.mrf.mxu1 }
 0x274   : > { %v5641_v17 = vadd.f32 %v5640_v14, %v5621_v15 }
 0x276   : > { %v5661_v18 = vadd.f32 %v5660_v16, %v5641_v17 }
 0x277   : > { %v5680_v19 = vpop.f32.mrf.mxu2 }
 0x278   : > { %v5681_v20 = vadd.f32 %v5680_v19, %v5661_v18 }
 0x279   : > { %v5700_v21 = vpop.f32.mrf.mxu3  ;;  %v5720_v22 = vpop.f32.mrf.mxu0 }
 0x27a   : > { %v5701_v23 = vadd.f32 %v5700_v21, %v5681_v20 }
 0x27b   : > { %v5740_v24 = vpop.f32.mrf.mxu1 }
 0x27c   : > { %v5721_v25 = vadd.f32 %v5720_v22, %v5701_v23 }
 0x27e   : > { %v5741_v27 = vadd.f32 %v5740_v24, %v5721_v25 }
 0x27f   : > { %v5760_v28 = vpop.f32.mrf.mxu2 }
 0x280   : > { %v5761_v29 = vadd.f32 %v5760_v28, %v5741_v27 }
 0x281   : > { %v5780_v30 = vpop.f32.mrf.mxu3  ;;  %v5800_v31 = vpop.f32.mrf.mxu0 }
 0x282   : > { %v5781_v32 = vadd.f32 %v5780_v30, %v5761_v29 }
 0x283   : > { %v5820_v33 = vpop.f32.mrf.mxu1 }
 0x284   : > { %v5801_v34 = vadd.f32 %v5800_v31, %v5781_v32 }
 0x286   : > { %v5821_v35 = vadd.f32 %v5820_v33, %v5801_v34 }
 0x287   : > { %v5840_v36 = vpop.f32.mrf.mxu2 }
 0x288   : > { %v5841_v37 = vadd.f32 %v5840_v36, %v5821_v35 }
 0x289   : > { %v5860_v38 = vpop.f32.mrf.mxu3  ;;  %v5880_v39 = vpop.f32.mrf.mxu0 }
 0x28a   : > { %v5861_v40 = vadd.f32 %v5860_v38, %v5841_v37 }
 0x28b   : > { %v5900_v41 = vpop.f32.mrf.mxu1 }
 0x28c   : > { %v5881_v42 = vadd.f32 %v5880_v39, %v5861_v40 }
 0x28e   : > { %v5901_v43 = vadd.f32 %v5900_v41, %v5881_v42 }
 0x28f   : > { %v5920_v44 = vpop.f32.mrf.mxu2 }
 0x290   : > { %v5921_v45 = vadd.f32 %v5920_v44, %v5901_v43 }
 0x291   : > { %v5940_v46 = vpop.f32.mrf.mxu3  ;;  %v5960_v47 = vpop.f32.mrf.mxu0 }
 0x292   : > { %v5941_v48 = vadd.f32 %v5940_v46, %v5921_v45 }
 0x293   : > { %v5980_v49 = vpop.f32.mrf.mxu1 }
 0x294   : > { %v5961_v50 = vadd.f32 %v5960_v47, %v5941_v48 }
 0x296   : > { %v5981_v51 = vadd.f32 %v5980_v49, %v5961_v50 }
 0x297   : > { %v6000_v52 = vpop.f32.mrf.mxu2 }
 0x298   : > { %v6001_v53 = vadd.f32 %v6000_v52, %v5981_v51 }
 0x299   : > { %v6020_v54 = vpop.f32.mrf.mxu3  ;;  %v6040_v55 = vpop.f32.mrf.mxu0 }
 0x29a   : > { %v6021_v56 = vadd.f32 %v6020_v54, %v6001_v53 }
 0x29b   : > { %v6060_v57 = vpop.f32.mrf.mxu1 }
 0x29c   : > { %v6041_v58 = vadd.f32 %v6040_v55, %v6021_v56 }
 0x29e   : > { %v6061_v59 = vadd.f32 %v6060_v57, %v6041_v58 }
 0x29f   : > { %v6080_v60 = vpop.f32.mrf.mxu2 }
 0x2a0   : > { %v6081_v61 = vadd.f32 %v6080_v60, %v6061_v59 }
 0x2a1   : > { %v6100_v62 = vpop.f32.mrf.mxu3 }
 0x2a2   : > { %v6101_v0 = vadd.f32 %v6100_v62, %v6081_v61 }
 0x2a4   : > { %v6103_v1 = vadd.f32 %v6101_v0, %v982_v63 }
 0x2a6   : > { %6105 = vst.msk [vmem:[#allocation7] sm:$0xff] %vm207_vm0, %v6103_v1 }
 0x2a7 PF: > { %p12874_p8 = scmp.ne.s32.totalorder %s13309_s12, 1 }
 0x2a9   : > { %6109 = sbr.rel (%p12874_p8) target bundleno = 1454 (0x5ae), region = 48 }
 0x2ae   : > { %v6635_v2 = vld [vmem:[#allocation5 + $0x810] sm:$0xff]  ;;  %v6633_v3 = vld [vmem:[#allocation5 + $0x800] sm:$0xff]  ;;  %v6634_v4 = vld [vmem:[#allocation5 + $0x808] sm:$0xff]  ;;  %vm6890_vm1 = vcmask 130048   ;;  %vm6114_vm2 = vcmask 7168  }
 0x2af   : > { %6948 = vmatpush.msra.mxu2 %v6635_v2  ;;  %6908 = vmatpush.msra.mxu0 %v6633_v3  ;;  %v6379_v5 = vld [vmem:[#allocation5 + $0x10] sm:$0xff]  ;;  %v6636_v6 = vld [vmem:[#allocation5 + $0x818] sm:$0xff]  ;;  %v13401_v7 = vld [vmem:[#allocation7] sm:$0xff] }
 0x2b0   : > { %6928 = vmatpush.msra.mxu1 %v6634_v4  ;;  %6968 = vmatpush.msra.mxu3 %v6636_v6  ;;  %v6639_v8 = vld [vmem:[#allocation5 + $0x830] sm:$0xff]  ;;  %v6377_v9 = vld [vmem:[#allocation5] sm:$0xff]  ;;  %v6378_v10 = vld [vmem:[#allocation5 + $0x8] sm:$0xff] }
 0x2b1   : > { %6949 = vmatpush.msra.mxu2 %v6379_v5  ;;  %6909 = vmatpush.msra.mxu0 %v6377_v9  ;;  %v6380_v11 = vld [vmem:[#allocation5 + $0x18] sm:$0xff]  ;;  %v6637_v12 = vld [vmem:[#allocation5 + $0x820] sm:$0xff]  ;;  %v6638_v14 = vld [vmem:[#allocation5 + $0x828] sm:$0xff] }
 0x2b2   : > { %12877 = vmatmul.msk.f32.vlgmr.msra.gmra.mxu2 %vm6890_vm1, %v13401_v7  ;;  %6929 = vmatpush.msra.mxu1 %v6378_v10  ;;  %v6640_v13 = vld [vmem:[#allocation5 + $0x838] sm:$0xff]  ;;  %v6383_v15 = vld [vmem:[#allocation5 + $0x30] sm:$0xff]  ;;  %v6381_v16 = vld [vmem:[#allocation5 + $0x20] sm:$0xff] }
 0x2b3   : > { %7028 = vmatpush.msrb.mxu2 %v6639_v8  ;;  %6969 = vmatpush.msra.mxu3 %v6380_v11  ;;  %v6384_v17 = vld [vmem:[#allocation5 + $0x38] sm:$0xff]  ;;  %v6382_v18 = vld [vmem:[#allocation5 + $0x28] sm:$0xff]  ;;  %v6643_v19 = vld [vmem:[#allocation5 + $0x850] sm:$0xff] }
 0x2b4   : > { %12875 = vmatmul.msk.f32.vlgmr.msra.gmra.mxu0 %vm6890_vm1, %v13401_v7  ;;  %12876 = vmatmul.msk.f32.vlgmr.msra.gmra.mxu1 %vm6890_vm1, %v13401_v7  ;;  %v6641_v20 = vld [vmem:[#allocation5 + $0x840] sm:$0xff]  ;;  %v6644_v21 = vld [vmem:[#allocation5 + $0x858] sm:$0xff]  ;;  %v6642_v22 = vld [vmem:[#allocation5 + $0x848] sm:$0xff] }
 0x2b5   : > { %12878 = vmatmul.msk.f32.vlgmr.msra.gmra.mxu3 %vm6890_vm1, %v13401_v7  ;;  %6988 = vmatpush.msrb.mxu0 %v6637_v12  ;;  %v6387_v23 = vld [vmem:[#allocation5 + $0x50] sm:$0xff]  ;;  %v6385_v24 = vld [vmem:[#allocation5 + $0x40] sm:$0xff]  ;;  %v6388_v25 = vld [vmem:[#allocation5 + $0x58] sm:$0xff] }
 0x2b6   : > { %7048 = vmatpush.msrb.mxu3 %v6640_v13  ;;  %7008 = vmatpush.msrb.mxu1 %v6638_v14  ;;  %v6386_v26 = vld [vmem:[#allocation5 + $0x48] sm:$0xff]  ;;  %v6647_v27 = vld [vmem:[#allocation5 + $0x870] sm:$0xff]  ;;  %v6645_v28 = vld [vmem:[#allocation5 + $0x860] sm:$0xff] }
 0x2b7   : > { %7029 = vmatpush.msrb.mxu2 %v6383_v15  ;;  %6989 = vmatpush.msrb.mxu0 %v6381_v16  ;;  %v6648_v29 = vld [vmem:[#allocation5 + $0x878] sm:$0xff]  ;;  %v6646_v30 = vld [vmem:[#allocation5 + $0x868] sm:$0xff]  ;;  %v6391_v31 = vld [vmem:[#allocation5 + $0x70] sm:$0xff] }
 0x2b8   : > { %7049 = vmatpush.msrb.mxu3 %v6384_v17  ;;  %7009 = vmatpush.msrb.mxu1 %v6382_v18  ;;  %v6389_v32 = vld [vmem:[#allocation5 + $0x60] sm:$0xff]  ;;  %v6392_v33 = vld [vmem:[#allocation5 + $0x78] sm:$0xff]  ;;  %v6390_v34 = vld [vmem:[#allocation5 + $0x68] sm:$0xff] }
 0x2b9   : > { %7108 = vmatpush.msra.mxu2 %v6643_v19  ;;  %7068 = vmatpush.msra.mxu0 %v6641_v20  ;;  %v6651_v35 = vld [vmem:[#allocation5 + $0x890] sm:$0xff]  ;;  %v6649_v36 = vld [vmem:[#allocation5 + $0x880] sm:$0xff]  ;;  %v6652_v37 = vld [vmem:[#allocation5 + $0x898] sm:$0xff] }
 0x2ba   : > { %12881 = vmatmul.msk.f32.vlgmr.msrb.gmra.mxu2 %vm6890_vm1, %v13401_v7  ;;  %7128 = vmatpush.msra.mxu3 %v6644_v21  ;;  %v6650_v38 = vld [vmem:[#allocation5 + $0x888] sm:$0xff]  ;;  %v6395_v39 = vld [vmem:[#allocation5 + $0x90] sm:$0xff]  ;;  %v6393_v40 = vld [vmem:[#allocation5 + $0x80] sm:$0xff] }
 0x2bb   : > { %7088 = vmatpush.msra.mxu1 %v6642_v22  ;;  %7109 = vmatpush.msra.mxu2 %v6387_v23  ;;  %v6396_v41 = vld [vmem:[#allocation5 + $0x98] sm:$0xff]  ;;  %v6394_v42 = vld [vmem:[#allocation5 + $0x88] sm:$0xff]  ;;  %v6655_v43 = vld [vmem:[#allocation5 + $0x8b0] sm:$0xff] }
 0x2bc   : > { %12879 = vmatmul.msk.f32.vlgmr.msrb.gmra.mxu0 %vm6890_vm1, %v13401_v7  ;;  %12880 = vmatmul.msk.f32.vlgmr.msrb.gmra.mxu1 %vm6890_vm1, %v13401_v7  ;;  %v6653_v44 = vld [vmem:[#allocation5 + $0x8a0] sm:$0xff]  ;;  %v6656_v45 = vld [vmem:[#allocation5 + $0x8b8] sm:$0xff]  ;;  %v6654_v46 = vld [vmem:[#allocation5 + $0x8a8] sm:$0xff] }
 0x2bd   : > { %12882 = vmatmul.msk.f32.vlgmr.msrb.gmra.mxu3 %vm6890_vm1, %v13401_v7  ;;  %7069 = vmatpush.msra.mxu0 %v6385_v24  ;;  %v6399_v47 = vld [vmem:[#allocation5 + $0xb0] sm:$0xff]  ;;  %v6397_v48 = vld [vmem:[#allocation5 + $0xa0] sm:$0xff]  ;;  %v6400_v49 = vld [vmem:[#allocation5 + $0xb8] sm:$0xff] }
 0x2be   : > { %7129 = vmatpush.msra.mxu3 %v6388_v25  ;;  %7089 = vmatpush.msra.mxu1 %v6386_v26  ;;  %v6398_v50 = vld [vmem:[#allocation5 + $0xa8] sm:$0xff]  ;;  %v6659_v51 = vld [vmem:[#allocation5 + $0x8d0] sm:$0xff]  ;;  %v6657_v52 = vld [vmem:[#allocation5 + $0x8c0] sm:$0xff] }
 0x2bf   : > { %7188 = vmatpush.msrb.mxu2 %v6647_v27  ;;  %7148 = vmatpush.msrb.mxu0 %v6645_v28  ;;  %v6660_v53 = vld [vmem:[#allocation5 + $0x8d8] sm:$0xff]  ;;  %v6658_v54 = vld [vmem:[#allocation5 + $0x8c8] sm:$0xff]  ;;  %v6403_v55 = vld [vmem:[#allocation5 + $0xd0] sm:$0xff] }
 0x2c0   : > { %7208 = vmatpush.msrb.mxu3 %v6648_v29  ;;  %7168 = vmatpush.msrb.mxu1 %v6646_v30  ;;  %v6401_v56 = vld [vmem:[#allocation5 + $0xc0] sm:$0xff]  ;;  %v6404_v57 = vld [vmem:[#allocation5 + $0xd8] sm:$0xff]  ;;  %v6402_v58 = vld [vmem:[#allocation5 + $0xc8] sm:$0xff] }
 0x2c1   : > { %7189 = vmatpush.msrb.mxu2 %v6391_v31  ;;  %7149 = vmatpush.msrb.mxu0 %v6389_v32  ;;  %v6663_v59 = vld [vmem:[#allocation5 + $0x8f0] sm:$0xff]  ;;  %v6661_v60 = vld [vmem:[#allocation5 + $0x8e0] sm:$0xff]  ;;  %v6664_v61 = vld [vmem:[#allocation5 + $0x8f8] sm:$0xff] }
 0x2c2   : > { %12885 = vmatmul.msk.f32.vlgmr.msra.gmra.mxu2 %vm6890_vm1, %v13401_v7  ;;  %7209 = vmatpush.msrb.mxu3 %v6392_v33  ;;  %v6662_v62 = vld [vmem:[#allocation5 + $0x8e8] sm:$0xff]  ;;  %v6407_v63 = vld [vmem:[#allocation5 + $0xf0] sm:$0xff]  ;;  %v6405_v0 = vld [vmem:[#allocation5 + $0xe0] sm:$0xff] }
 0x2c3   : > { %7169 = vmatpush.msrb.mxu1 %v6390_v34  ;;  %7268 = vmatpush.msra.mxu2 %v6651_v35  ;;  %v6408_v1 = vld [vmem:[#allocation5 + $0xf8] sm:$0xff]  ;;  %v6406_v2 = vld [vmem:[#allocation5 + $0xe8] sm:$0xff]  ;;  %v6667_v3 = vld [vmem:[#allocation5 + $0x910] sm:$0xff] }
 0x2c4   : > { %12883 = vmatmul.msk.f32.vlgmr.msra.gmra.mxu0 %vm6890_vm1, %v13401_v7  ;;  %12884 = vmatmul.msk.f32.vlgmr.msra.gmra.mxu1 %vm6890_vm1, %v13401_v7  ;;  %v6665_v4 = vld [vmem:[#allocation5 + $0x900] sm:$0xff]  ;;  %v6668_v5 = vld [vmem:[#allocation5 + $0x918] sm:$0xff]  ;;  %v6666_v6 = vld [vmem:[#allocation5 + $0x908] sm:$0xff] }
 0x2c5   : > { %12886 = vmatmul.msk.f32.vlgmr.msra.gmra.mxu3 %vm6890_vm1, %v13401_v7  ;;  %7228 = vmatpush.msra.mxu0 %v6649_v36  ;;  %v6411_v8 = vld [vmem:[#allocation5 + $0x110] sm:$0xff]  ;;  %v6409_v9 = vld [vmem:[#allocation5 + $0x100] sm:$0xff]  ;;  %v6412_v10 = vld [vmem:[#allocation5 + $0x118] sm:$0xff] }
 0x2c6   : > { %7288 = vmatpush.msra.mxu3 %v6652_v37  ;;  %7248 = vmatpush.msra.mxu1 %v6650_v38  ;;  %v6410_v11 = vld [vmem:[#allocation5 + $0x108] sm:$0xff]  ;;  %v6671_v12 = vld [vmem:[#allocation5 + $0x930] sm:$0xff]  ;;  %v6669_v13 = vld [vmem:[#allocation5 + $0x920] sm:$0xff] }
 0x2c7   : > { %7269 = vmatpush.msra.mxu2 %v6395_v39  ;;  %7229 = vmatpush.msra.mxu0 %v6393_v40  ;;  %v6672_v14 = vld [vmem:[#allocation5 + $0x938] sm:$0xff]  ;;  %v6670_v15 = vld [vmem:[#allocation5 + $0x928] sm:$0xff]  ;;  %v6415_v16 = vld [vmem:[#allocation5 + $0x130] sm:$0xff] }
 0x2c8   : > { %7289 = vmatpush.msra.mxu3 %v6396_v41  ;;  %7249 = vmatpush.msra.mxu1 %v6394_v42  ;;  %v6413_v17 = vld [vmem:[#allocation5 + $0x120] sm:$0xff]  ;;  %v6416_v18 = vld [vmem:[#allocation5 + $0x138] sm:$0xff]  ;;  %v6414_v19 = vld [vmem:[#allocation5 + $0x128] sm:$0xff] }
 0x2c9   : > { %v6675_v20 = vld [vmem:[#allocation5 + $0x950] sm:$0xff]  ;;  %v6673_v21 = vld [vmem:[#allocation5 + $0x940] sm:$0xff]  ;;  %v6676_v22 = vld [vmem:[#allocation5 + $0x958] sm:$0xff] }
 0x2ca   : > { %12889 = vmatmul.msk.f32.vlgmr.msrb.gmra.mxu2 %vm6890_vm1, %v13401_v7  ;;  %v6674_v23 = vld [vmem:[#allocation5 + $0x948] sm:$0xff]  ;;  %v6419_v24 = vld [vmem:[#allocation5 + $0x150] sm:$0xff]  ;;  %v6417_v25 = vld [vmem:[#allocation5 + $0x140] sm:$0xff] }
 0x2cb   : > { %7348 = vmatpush.msrb.mxu2 %v6655_v43  ;;  %v6420_v26 = vld [vmem:[#allocation5 + $0x158] sm:$0xff]  ;;  %v6418_v27 = vld [vmem:[#allocation5 + $0x148] sm:$0xff]  ;;  %v6679_v28 = vld [vmem:[#allocation5 + $0x970] sm:$0xff] }
 0x2cc   : > { %12887 = vmatmul.msk.f32.vlgmr.msrb.gmra.mxu0 %vm6890_vm1, %v13401_v7  ;;  %12888 = vmatmul.msk.f32.vlgmr.msrb.gmra.mxu1 %vm6890_vm1, %v13401_v7  ;;  %v6677_v29 = vld [vmem:[#allocation5 + $0x960] sm:$0xff]  ;;  %v6680_v30 = vld [vmem:[#allocation5 + $0x978] sm:$0xff]  ;;  %v6678_v31 = vld [vmem:[#allocation5 + $0x968] sm:$0xff] }
 0x2cd   : > { %12890 = vmatmul.msk.f32.vlgmr.msrb.gmra.mxu3 %vm6890_vm1, %v13401_v7  ;;  %7308 = vmatpush.msrb.mxu0 %v6653_v44  ;;  %v6423_v32 = vld [vmem:[#allocation5 + $0x170] sm:$0xff]  ;;  %v6421_v33 = vld [vmem:[#allocation5 + $0x160] sm:$0xff]  ;;  %v6424_v34 = vld [vmem:[#allocation5 + $0x178] sm:$0xff] }
 0x2ce   : > { %7368 = vmatpush.msrb.mxu3 %v6656_v45  ;;  %7328 = vmatpush.msrb.mxu1 %v6654_v46  ;;  %v6422_v35 = vld [vmem:[#allocation5 + $0x168] sm:$0xff]  ;;  %v6683_v36 = vld [vmem:[#allocation5 + $0x990] sm:$0xff]  ;;  %v6681_v37 = vld [vmem:[#allocation5 + $0x980] sm:$0xff] }
 0x2cf   : > { %7349 = vmatpush.msrb.mxu2 %v6399_v47  ;;  %7309 = vmatpush.msrb.mxu0 %v6397_v48  ;;  %v6684_v38 = vld [vmem:[#allocation5 + $0x998] sm:$0xff]  ;;  %v6682_v39 = vld [vmem:[#allocation5 + $0x988] sm:$0xff]  ;;  %v6427_v40 = vld [vmem:[#allocation5 + $0x190] sm:$0xff] }
 0x2d0   : > { %7369 = vmatpush.msrb.mxu3 %v6400_v49  ;;  %7329 = vmatpush.msrb.mxu1 %v6398_v50  ;;  %v6425_v41 = vld [vmem:[#allocation5 + $0x180] sm:$0xff]  ;;  %v6428_v42 = vld [vmem:[#allocation5 + $0x198] sm:$0xff]  ;;  %v6426_v43 = vld [vmem:[#allocation5 + $0x188] sm:$0xff] }
 0x2d1   : > { %v6687_v44 = vld [vmem:[#allocation5 + $0x9b0] sm:$0xff]  ;;  %v6685_v45 = vld [vmem:[#allocation5 + $0x9a0] sm:$0xff]  ;;  %v6688_v46 = vld [vmem:[#allocation5 + $0x9b8] sm:$0xff] }
 0x2d2   : > { %12893 = vmatmul.msk.f32.vlgmr.msra.gmra.mxu2 %vm6890_vm1, %v13401_v7  ;;  %v6686_v47 = vld [vmem:[#allocation5 + $0x9a8] sm:$0xff]  ;;  %v6431_v48 = vld [vmem:[#allocation5 + $0x1b0] sm:$0xff]  ;;  %v6429_v49 = vld [vmem:[#allocation5 + $0x1a0] sm:$0xff] }
 0x2d3   : > { %7428 = vmatpush.msra.mxu2 %v6659_v51  ;;  %v6432_v50 = vld [vmem:[#allocation5 + $0x1b8] sm:$0xff]  ;;  %v6430_v51 = vld [vmem:[#allocation5 + $0x1a8] sm:$0xff] }
 0x2d4   : > { %12891 = vmatmul.msk.f32.vlgmr.msra.gmra.mxu0 %vm6890_vm1, %v13401_v7  ;;  %12892 = vmatmul.msk.f32.vlgmr.msra.gmra.mxu1 %vm6890_vm1, %v13401_v7 }
 0x2d5   : > { %12894 = vmatmul.msk.f32.vlgmr.msra.gmra.mxu3 %vm6890_vm1, %v13401_v7  ;;  %7388 = vmatpush.msra.mxu0 %v6657_v52  ;;  %v6691_v52 = vld [vmem:[#allocation5 + $0x9d0] sm:$0xff] }
 0x2d6   : > { %7448 = vmatpush.msra.mxu3 %v6660_v53  ;;  %7408 = vmatpush.msra.mxu1 %v6658_v54  ;;  %v6689_v53 = vld [vmem:[#allocation5 + $0x9c0] sm:$0xff]  ;;  %v6692_v54 = vld [vmem:[#allocation5 + $0x9d8] sm:$0xff] }
 0x2d7   : > { %7429 = vmatpush.msra.mxu2 %v6403_v55  ;;  %7389 = vmatpush.msra.mxu0 %v6401_v56  ;;  %v6690_v55 = vld [vmem:[#allocation5 + $0x9c8] sm:$0xff]  ;;  %v6435_v56 = vld [vmem:[#allocation5 + $0x1d0] sm:$0xff] }
 0x2d8   : > { %7449 = vmatpush.msra.mxu3 %v6404_v57  ;;  %7409 = vmatpush.msra.mxu1 %v6402_v58  ;;  %v6433_v57 = vld [vmem:[#allocation5 + $0x1c0] sm:$0xff]  ;;  %v6436_v58 = vld [vmem:[#allocation5 + $0x1d8] sm:$0xff] }
 0x2da   : > { %12897 = vmatmul.msk.f32.vlgmr.msrb.gmra.mxu2 %vm6890_vm1, %v13401_v7 }
 0x2db   : > { %7508 = vmatpush.msrb.mxu2 %v6663_v59  ;;  %v6434_v59 = vld [vmem:[#allocation5 + $0x1c8] sm:$0xff] }
 0x2dc   : > { %12895 = vmatmul.msk.f32.vlgmr.msrb.gmra.mxu0 %vm6890_vm1, %v13401_v7  ;;  %12896 = vmatmul.msk.f32.vlgmr.msrb.gmra.mxu1 %vm6890_vm1, %v13401_v7 }
 0x2dd   : > { %12898 = vmatmul.msk.f32.vlgmr.msrb.gmra.mxu3 %vm6890_vm1, %v13401_v7  ;;  %7468 = vmatpush.msrb.mxu0 %v6661_v60  ;;  %v6695_v60 = vld [vmem:[#allocation5 + $0x9f0] sm:$0xff] }
 0x2de   : > { %7528 = vmatpush.msrb.mxu3 %v6664_v61  ;;  %7488 = vmatpush.msrb.mxu1 %v6662_v62  ;;  %v6693_v61 = vld [vmem:[#allocation5 + $0x9e0] sm:$0xff]  ;;  %v6696_v62 = vld [vmem:[#allocation5 + $0x9f8] sm:$0xff] }
 0x2df   : > { %7509 = vmatpush.msrb.mxu2 %v6407_v63  ;;  %7469 = vmatpush.msrb.mxu0 %v6405_v0  ;;  %v6694_v63 = vld [vmem:[#allocation5 + $0x9e8] sm:$0xff]  ;;  %v6439_v0 = vld [vmem:[#allocation5 + $0x1f0] sm:$0xff] }
 0x2e0   : > { %7529 = vmatpush.msrb.mxu3 %v6408_v1  ;;  %7489 = vmatpush.msrb.mxu1 %v6406_v2  ;;  %v6437_v1 = vld [vmem:[#allocation5 + $0x1e0] sm:$0xff]  ;;  %v6440_v2 = vld [vmem:[#allocation5 + $0x1f8] sm:$0xff] }
 0x2e2   : > { %12901 = vmatmul.msk.f32.vlgmr.msra.gmra.mxu2 %vm6890_vm1, %v13401_v7 }
 0x2e3   : > { %7588 = vmatpush.msra.mxu2 %v6667_v3  ;;  %v6438_v3 = vld [vmem:[#allocation5 + $0x1e8] sm:$0xff] }
 0x2e4   : > { %12899 = vmatmul.msk.f32.vlgmr.msra.gmra.mxu0 %vm6890_vm1, %v13401_v7  ;;  %12900 = vmatmul.msk.f32.vlgmr.msra.gmra.mxu1 %vm6890_vm1, %v13401_v7 }
 0x2e5   : > { %12902 = vmatmul.msk.f32.vlgmr.msra.gmra.mxu3 %vm6890_vm1, %v13401_v7  ;;  %7548 = vmatpush.msra.mxu0 %v6665_v4  ;;  %v6699_v4 = vld [vmem:[#allocation5 + $0xa10] sm:$0xff] }
 0x2e6   : > { %7608 = vmatpush.msra.mxu3 %v6668_v5  ;;  %7568 = vmatpush.msra.mxu1 %v6666_v6  ;;  %v6697_v5 = vld [vmem:[#allocation5 + $0xa00] sm:$0xff]  ;;  %v6700_v6 = vld [vmem:[#allocation5 + $0xa18] sm:$0xff] }
 0x2e7   : > { %7589 = vmatpush.msra.mxu2 %v6411_v8  ;;  %7549 = vmatpush.msra.mxu0 %v6409_v9  ;;  %v6698_v8 = vld [vmem:[#allocation5 + $0xa08] sm:$0xff]  ;;  %v6443_v9 = vld [vmem:[#allocation5 + $0x210] sm:$0xff] }
 0x2e8   : > { %7609 = vmatpush.msra.mxu3 %v6412_v10  ;;  %7569 = vmatpush.msra.mxu1 %v6410_v11  ;;  %v6441_v10 = vld [vmem:[#allocation5 + $0x200] sm:$0xff]  ;;  %v6444_v11 = vld [vmem:[#allocation5 + $0x218] sm:$0xff] }
 0x2ea   : > { %12905 = vmatmul.msk.f32.vlgmr.msrb.gmra.mxu2 %vm6890_vm1, %v13401_v7 }
 0x2eb   : > { %7668 = vmatpush.msrb.mxu2 %v6671_v12  ;;  %v6442_v12 = vld [vmem:[#allocation5 + $0x208] sm:$0xff] }
 0x2ec   : > { %12903 = vmatmul.msk.f32.vlgmr.msrb.gmra.mxu0 %vm6890_vm1, %v13401_v7  ;;  %12904 = vmatmul.msk.f32.vlgmr.msrb.gmra.mxu1 %vm6890_vm1, %v13401_v7 }
 0x2ed   : > { %12906 = vmatmul.msk.f32.vlgmr.msrb.gmra.mxu3 %vm6890_vm1, %v13401_v7  ;;  %7628 = vmatpush.msrb.mxu0 %v6669_v13  ;;  %v6703_v13 = vld [vmem:[#allocation5 + $0xa30] sm:$0xff] }
 0x2ee   : > { %7688 = vmatpush.msrb.mxu3 %v6672_v14  ;;  %7648 = vmatpush.msrb.mxu1 %v6670_v15  ;;  %v6701_v14 = vld [vmem:[#allocation5 + $0xa20] sm:$0xff]  ;;  %v6704_v15 = vld [vmem:[#allocation5 + $0xa38] sm:$0xff] }
 0x2ef   : > { %7669 = vmatpush.msrb.mxu2 %v6415_v16  ;;  %7629 = vmatpush.msrb.mxu0 %v6413_v17  ;;  %v6702_v16 = vld [vmem:[#allocation5 + $0xa28] sm:$0xff]  ;;  %v6447_v17 = vld [vmem:[#allocation5 + $0x230] sm:$0xff] }
 0x2f0   : > { %7689 = vmatpush.msrb.mxu3 %v6416_v18  ;;  %7649 = vmatpush.msrb.mxu1 %v6414_v19  ;;  %v6445_v18 = vld [vmem:[#allocation5 + $0x220] sm:$0xff]  ;;  %v6448_v19 = vld [vmem:[#allocation5 + $0x238] sm:$0xff] }
 0x2f2   : > { %12909 = vmatmul.msk.f32.vlgmr.msra.gmra.mxu2 %vm6890_vm1, %v13401_v7 }
 0x2f3   : > { %7748 = vmatpush.msra.mxu2 %v6675_v20  ;;  %v6446_v20 = vld [vmem:[#allocation5 + $0x228] sm:$0xff] }
 0x2f4   : > { %12907 = vmatmul.msk.f32.vlgmr.msra.gmra.mxu0 %vm6890_vm1, %v13401_v7  ;;  %12908 = vmatmul.msk.f32.vlgmr.msra.gmra.mxu1 %vm6890_vm1, %v13401_v7 }
 0x2f5   : > { %12910 = vmatmul.msk.f32.vlgmr.msra.gmra.mxu3 %vm6890_vm1, %v13401_v7  ;;  %7708 = vmatpush.msra.mxu0 %v6673_v21  ;;  %v6116_v21 = vld [vmem:[#allocation2] sm:$0xff] }
 0x2f6   : > { %7768 = vmatpush.msra.mxu3 %v6676_v22  ;;  %7728 = vmatpush.msra.mxu1 %v6674_v23  ;;  %v6117_v22 = vld [vmem:[#allocation2 + $0x8] sm:$0xff]  ;;  %v6707_v23 = vld [vmem:[#allocation5 + $0xa50] sm:$0xff] }
 0x2f7   : > { %7749 = vmatpush.msra.mxu2 %v6419_v24  ;;  %7709 = vmatpush.msra.mxu0 %v6417_v25 }
 0x2f8   : > { %7769 = vmatpush.msra.mxu3 %v6420_v26  ;;  %7729 = vmatpush.msra.mxu1 %v6418_v27 }
 0x2fa   : > { %12913 = vmatmul.msk.f32.vlgmr.msrb.gmra.mxu2 %vm6890_vm1, %v13401_v7 }
 0x2fb   : > { %7828 = vmatpush.msrb.mxu2 %v6679_v28  ;;  %v6705_v28 = vld [vmem:[#allocation5 + $0xa40] sm:$0xff] }
 0x2fc   : > { %12911 = vmatmul.msk.f32.vlgmr.msrb.gmra.mxu0 %vm6890_vm1, %v13401_v7  ;;  %12912 = vmatmul.msk.f32.vlgmr.msrb.gmra.mxu1 %vm6890_vm1, %v13401_v7 }
 0x2fd   : > { %12914 = vmatmul.msk.f32.vlgmr.msrb.gmra.mxu3 %vm6890_vm1, %v13401_v7  ;;  %7788 = vmatpush.msrb.mxu0 %v6677_v29  ;;  %v6118_v29 = vld [vmem:[#allocation2 + $0x10] sm:$0xff] }
 0x2fe   : > { %7848 = vmatpush.msrb.mxu3 %v6680_v30  ;;  %7808 = vmatpush.msrb.mxu1 %v6678_v31  ;;  %v6708_v30 = vld [vmem:[#allocation5 + $0xa58] sm:$0xff]  ;;  %v6706_v31 = vld [vmem:[#allocation5 + $0xa48] sm:$0xff] }
 0x2ff   : > { %7829 = vmatpush.msrb.mxu2 %v6423_v32  ;;  %7789 = vmatpush.msrb.mxu0 %v6421_v33 }
 0x300   : > { %7849 = vmatpush.msrb.mxu3 %v6424_v34  ;;  %7809 = vmatpush.msrb.mxu1 %v6422_v35  ;;  %v6451_v34 = vld [vmem:[#allocation5 + $0x250] sm:$0xff]  ;;  %v6449_v35 = vld [vmem:[#allocation5 + $0x240] sm:$0xff] }
 0x302   : > { %12917 = vmatmul.msk.f32.vlgmr.msra.gmra.mxu2 %vm6890_vm1, %v13401_v7 }
 0x303   : > { %7908 = vmatpush.msra.mxu2 %v6683_v36 }
 0x304   : > { %12915 = vmatmul.msk.f32.vlgmr.msra.gmra.mxu0 %vm6890_vm1, %v13401_v7  ;;  %12916 = vmatmul.msk.f32.vlgmr.msra.gmra.mxu1 %vm6890_vm1, %v13401_v7 }
 0x305   : > { %12918 = vmatmul.msk.f32.vlgmr.msra.gmra.mxu3 %vm6890_vm1, %v13401_v7  ;;  %7868 = vmatpush.msra.mxu0 %v6681_v37  ;;  %v6452_v37 = vld [vmem:[#allocation5 + $0x258] sm:$0xff] }
 0x306   : > { %7928 = vmatpush.msra.mxu3 %v6684_v38  ;;  %7888 = vmatpush.msra.mxu1 %v6682_v39  ;;  %v6450_v38 = vld [vmem:[#allocation5 + $0x248] sm:$0xff] }
 0x307   : > { %7909 = vmatpush.msra.mxu2 %v6427_v40  ;;  %7869 = vmatpush.msra.mxu0 %v6425_v41  ;;  %v6119_v40 = vld [vmem:[#allocation2 + $0x18] sm:$0xff]  ;;  %v6120_v41 = vld [vmem:[#allocation2 + $0x20] sm:$0xff] }
 0x308   : > { %7929 = vmatpush.msra.mxu3 %v6428_v42  ;;  %7889 = vmatpush.msra.mxu1 %v6426_v43  ;;  %v6121_v42 = vld [vmem:[#allocation2 + $0x28] sm:$0xff] }
 0x30a   : > { %12921 = vmatmul.msk.f32.vlgmr.msrb.gmra.mxu2 %vm6890_vm1, %v13401_v7 }
 0x30b   : > { %7988 = vmatpush.msrb.mxu2 %v6687_v44 }
 0x30c   : > { %12919 = vmatmul.msk.f32.vlgmr.msrb.gmra.mxu0 %vm6890_vm1, %v13401_v7  ;;  %12920 = vmatmul.msk.f32.vlgmr.msrb.gmra.mxu1 %vm6890_vm1, %v13401_v7 }
 0x30d   : > { %12922 = vmatmul.msk.f32.vlgmr.msrb.gmra.mxu3 %vm6890_vm1, %v13401_v7  ;;  %7948 = vmatpush.msrb.mxu0 %v6685_v45 }
 0x30e   : > { %8008 = vmatpush.msrb.mxu3 %v6688_v46  ;;  %7968 = vmatpush.msrb.mxu1 %v6686_v47  ;;  %v6711_v46 = vld [vmem:[#allocation5 + $0xa70] sm:$0xff] }
 0x30f   : > { %7989 = vmatpush.msrb.mxu2 %v6431_v48  ;;  %7949 = vmatpush.msrb.mxu0 %v6429_v49 }
 0x310   : > { %8009 = vmatpush.msrb.mxu3 %v6432_v50  ;;  %7969 = vmatpush.msrb.mxu1 %v6430_v51 }
 0x312   : > { %12925 = vmatmul.msk.f32.vlgmr.msra.gmra.mxu2 %vm6890_vm1, %v13401_v7 }
 0x313   : > { %8068 = vmatpush.msra.mxu2 %v6691_v52 }
 0x314   : > { %12923 = vmatmul.msk.f32.vlgmr.msra.gmra.mxu0 %vm6890_vm1, %v13401_v7  ;;  %12924 = vmatmul.msk.f32.vlgmr.msra.gmra.mxu1 %vm6890_vm1, %v13401_v7 }
 0x315   : > { %12926 = vmatmul.msk.f32.vlgmr.msra.gmra.mxu3 %vm6890_vm1, %v13401_v7  ;;  %8028 = vmatpush.msra.mxu0 %v6689_v53  ;;  %v6709_v53 = vld [vmem:[#allocation5 + $0xa60] sm:$0xff] }
 0x316   : > { %8088 = vmatpush.msra.mxu3 %v6692_v54  ;;  %8048 = vmatpush.msra.mxu1 %v6690_v55  ;;  %v6122_v55 = vld [vmem:[#allocation2 + $0x30] sm:$0xff] }
 0x317   : > { %8069 = vmatpush.msra.mxu2 %v6435_v56  ;;  %8029 = vmatpush.msra.mxu0 %v6433_v57  ;;  %v6712_v56 = vld [vmem:[#allocation5 + $0xa78] sm:$0xff]  ;;  %v6710_v57 = vld [vmem:[#allocation5 + $0xa68] sm:$0xff] }
 0x318   : > { %8089 = vmatpush.msra.mxu3 %v6436_v58  ;;  %8049 = vmatpush.msra.mxu1 %v6434_v59  ;;  %v6455_v59 = vld [vmem:[#allocation5 + $0x270] sm:$0xff] }
 0x31a   : > { %12929 = vmatmul.msk.f32.vlgmr.msrb.gmra.mxu2 %vm6890_vm1, %v13401_v7 }
 0x31b   : > { %8148 = vmatpush.msrb.mxu2 %v6695_v60  ;;  %v6453_v60 = vld [vmem:[#allocation5 + $0x260] sm:$0xff] }
 0x31c   : > { %12927 = vmatmul.msk.f32.vlgmr.msrb.gmra.mxu0 %vm6890_vm1, %v13401_v7  ;;  %12928 = vmatmul.msk.f32.vlgmr.msrb.gmra.mxu1 %vm6890_vm1, %v13401_v7 }
 0x31d   : > { %12930 = vmatmul.msk.f32.vlgmr.msrb.gmra.mxu3 %vm6890_vm1, %v13401_v7  ;;  %8108 = vmatpush.msrb.mxu0 %v6693_v61 }
 0x31e   : > { %8168 = vmatpush.msrb.mxu3 %v6696_v62  ;;  %8128 = vmatpush.msrb.mxu1 %v6694_v63 }
 0x31f   : > { %8149 = vmatpush.msrb.mxu2 %v6439_v0  ;;  %8109 = vmatpush.msrb.mxu0 %v6437_v1  ;;  %v6456_v0 = vld [vmem:[#allocation5 + $0x278] sm:$0xff]  ;;  %v6454_v1 = vld [vmem:[#allocation5 + $0x268] sm:$0xff] }
 0x320   : > { %8169 = vmatpush.msrb.mxu3 %v6440_v2  ;;  %8129 = vmatpush.msrb.mxu1 %v6438_v3  ;;  %v6123_v3 = vld [vmem:[#allocation2 + $0x38] sm:$0xff] }
 0x322   : > { %12933 = vmatmul.msk.f32.vlgmr.msra.gmra.mxu2 %vm6890_vm1, %v13401_v7 }
 0x323   : > { %8228 = vmatpush.msra.mxu2 %v6699_v4 }
 0x324   : > { %12931 = vmatmul.msk.f32.vlgmr.msra.gmra.mxu0 %vm6890_vm1, %v13401_v7  ;;  %12932 = vmatmul.msk.f32.vlgmr.msra.gmra.mxu1 %vm6890_vm1, %v13401_v7 }
 0x325   : > { %12934 = vmatmul.msk.f32.vlgmr.msra.gmra.mxu3 %vm6890_vm1, %v13401_v7  ;;  %8188 = vmatpush.msra.mxu0 %v6697_v5  ;;  %v6124_v5 = vld [vmem:[#allocation2 + $0x40] sm:$0xff] }
 0x326   : > { %8248 = vmatpush.msra.mxu3 %v6700_v6  ;;  %8208 = vmatpush.msra.mxu1 %v6698_v8  ;;  %v6125_v6 = vld [vmem:[#allocation2 + $0x48] sm:$0xff] }
 0x327   : > { %8229 = vmatpush.msra.mxu2 %v6443_v9  ;;  %8189 = vmatpush.msra.mxu0 %v6441_v10  ;;  %v6715_v10 = vld [vmem:[#allocation5 + $0xa90] sm:$0xff] }
 0x328   : > { %8249 = vmatpush.msra.mxu3 %v6444_v11  ;;  %8209 = vmatpush.msra.mxu1 %v6442_v12 }
 0x32a   : > { %12937 = vmatmul.msk.f32.vlgmr.msrb.gmra.mxu2 %vm6890_vm1, %v13401_v7 }
 0x32b   : > { %8308 = vmatpush.msrb.mxu2 %v6703_v13 }
 0x32c   : > { %12935 = vmatmul.msk.f32.vlgmr.msrb.gmra.mxu0 %vm6890_vm1, %v13401_v7  ;;  %12936 = vmatmul.msk.f32.vlgmr.msrb.gmra.mxu1 %vm6890_vm1, %v13401_v7 }
 0x32d   : > { %12938 = vmatmul.msk.f32.vlgmr.msrb.gmra.mxu3 %vm6890_vm1, %v13401_v7  ;;  %8268 = vmatpush.msrb.mxu0 %v6701_v14 }
 0x32e   : > { %8328 = vmatpush.msrb.mxu3 %v6704_v15  ;;  %8288 = vmatpush.msrb.mxu1 %v6702_v16 }
 0x32f   : > { %8309 = vmatpush.msrb.mxu2 %v6447_v17  ;;  %8269 = vmatpush.msrb.mxu0 %v6445_v18  ;;  %v6713_v17 = vld [vmem:[#allocation5 + $0xa80] sm:$0xff] }
 0x330   : > { %8329 = vmatpush.msrb.mxu3 %v6448_v19  ;;  %8289 = vmatpush.msrb.mxu1 %v6446_v20  ;;  %v6126_v20 = vld [vmem:[#allocation2 + $0x50] sm:$0xff] }
 0x331   : > { %v6911_v24 = vpop.f32.mrf.mxu0  ;;  %v6931_v25 = vpop.f32.mrf.mxu1 }
 0x332   : > { %v12014_v26 = vsub.f32 %v6116_v21, %v6911_v24  ;;  %v12015_v27 = vsub.f32 %v6117_v22, %v6931_v25  ;;  %12941 = vmatmul.msk.f32.vlgmr.msra.gmra.mxu2 %vm6890_vm1, %v13401_v7  ;;  %v6716_v21 = vld [vmem:[#allocation5 + $0xa98] sm:$0xff]  ;;  %v6714_v22 = vld [vmem:[#allocation5 + $0xa88] sm:$0xff]  ;;  %v6459_v24 = vld [vmem:[#allocation5 + $0x290] sm:$0xff] }
 0x333   : > { %8388 = vmatpush.msra.mxu2 %v6707_v23  ;;  %v6457_v25 = vld [vmem:[#allocation5 + $0x280] sm:$0xff] }
 0x334   : > { %v12271_v32 = vmul.f32 %v12014_v26, %v12014_v26  ;;  %v12272_v33 = vmul.f32 %v12015_v27, %v12015_v27  ;;  %12939 = vmatmul.msk.f32.vlgmr.msra.gmra.mxu0 %vm6890_vm1, %v13401_v7  ;;  %12940 = vmatmul.msk.f32.vlgmr.msra.gmra.mxu1 %vm6890_vm1, %v13401_v7 }
 0x335   : > { %12942 = vmatmul.msk.f32.vlgmr.msra.gmra.mxu3 %vm6890_vm1, %v13401_v7  ;;  %v6951_v36 = vpop.f32.mrf.mxu2  ;;  %8348 = vmatpush.msra.mxu0 %v6705_v28 }
 0x336   : > { %v12016_v39 = vsub.f32 %v6118_v29, %v6951_v36  ;;  %8408 = vmatpush.msra.mxu3 %v6708_v30  ;;  %8368 = vmatpush.msra.mxu1 %v6706_v31  ;;  %v12527_v43 = vadd.f32 %v12272_v33, %v12271_v32  ;;  %v6460_v29 = vld [vmem:[#allocation5 + $0x298] sm:$0xff]  ;;  %v6458_v30 = vld [vmem:[#allocation5 + $0x288] sm:$0xff] }
 0x337   : > { %8389 = vmatpush.msra.mxu2 %v6451_v34  ;;  %8349 = vmatpush.msra.mxu0 %v6449_v35  ;;  %v6127_v32 = vld [vmem:[#allocation2 + $0x58] sm:$0xff]  ;;  %v6128_v34 = vld [vmem:[#allocation2 + $0x60] sm:$0xff]  ;;  %v6129_v35 = vld [vmem:[#allocation2 + $0x68] sm:$0xff] }
 0x338   : > { %v12273_v44 = vmul.f32 %v12016_v39, %v12016_v39  ;;  %v6971_v45 = vpop.f32.mrf.mxu3  ;;  %8409 = vmatpush.msra.mxu3 %v6452_v37  ;;  %8369 = vmatpush.msra.mxu1 %v6450_v38  ;;  %v6719_v38 = vld [vmem:[#allocation5 + $0xab0] sm:$0xff] }
 0x339   : > { %v12017_v47 = vsub.f32 %v6119_v40, %v6971_v45  ;;  %v6991_v48 = vpop.f32.mrf.mxu0  ;;  %v7011_v49 = vpop.f32.mrf.mxu1  ;;  %v6717_v45 = vld [vmem:[#allocation5 + $0xaa0] sm:$0xff] }
 0x33a   : > { %v12528_v50 = vadd.f32 %v12527_v43, %v12273_v44  ;;  %v12018_v51 = vsub.f32 %v6120_v41, %v6991_v48  ;;  %12945 = vmatmul.msk.f32.vlgmr.msrb.gmra.mxu2 %vm6890_vm1, %v13401_v7  ;;  %v12019_v52 = vsub.f32 %v6121_v42, %v7011_v49  ;;  %v6130_v48 = vld [vmem:[#allocation2 + $0x70] sm:$0xff]  ;;  %v6720_v49 = vld [vmem:[#allocation5 + $0xab8] sm:$0xff] }
 0x33b   : > { %v12274_v54 = vmul.f32 %v12017_v47, %v12017_v47  ;;  %8468 = vmatpush.msrb.mxu2 %v6711_v46 }
 0x33c   : > { %v12275_v58 = vmul.f32 %v12018_v51, %v12018_v51  ;;  %12943 = vmatmul.msk.f32.vlgmr.msrb.gmra.mxu0 %vm6890_vm1, %v13401_v7  ;;  %12944 = vmatmul.msk.f32.vlgmr.msrb.gmra.mxu1 %vm6890_vm1, %v13401_v7  ;;  %v12276_v62 = vmul.f32 %v12019_v52, %v12019_v52  ;;  %v6463_v52 = vld [vmem:[#allocation5 + $0x2b0] sm:$0xff] }
 0x33d   : > { %v12529_v61 = vadd.f32 %v12528_v50, %v12274_v54  ;;  %12946 = vmatmul.msk.f32.vlgmr.msrb.gmra.mxu3 %vm6890_vm1, %v13401_v7  ;;  %v7031_v63 = vpop.f32.mrf.mxu2  ;;  %8428 = vmatpush.msrb.mxu0 %v6709_v53  ;;  %v6718_v50 = vld [vmem:[#allocation5 + $0xaa8] sm:$0xff]  ;;  %v6461_v53 = vld [vmem:[#allocation5 + $0x2a0] sm:$0xff] }
 0x33e   : > { %v12020_v2 = vsub.f32 %v6122_v55, %v7031_v63  ;;  %8488 = vmatpush.msrb.mxu3 %v6712_v56  ;;  %8448 = vmatpush.msrb.mxu1 %v6710_v57  ;;  %v6464_v57 = vld [vmem:[#allocation5 + $0x2b8] sm:$0xff]  ;;  %v6133_v63 = vld [vmem:[#allocation2 + $0x88] sm:$0xff] }
 0x33f   : > { %v12530_v4 = vadd.f32 %v12529_v61, %v12275_v58  ;;  %8469 = vmatpush.msrb.mxu2 %v6455_v59  ;;  %8429 = vmatpush.msrb.mxu0 %v6453_v60  ;;  %v6462_v58 = vld [vmem:[#allocation5 + $0x2a8] sm:$0xff]  ;;  %v6131_v60 = vld [vmem:[#allocation2 + $0x78] sm:$0xff] }
 0x340   : > { %v12277_v8 = vmul.f32 %v12020_v2, %v12020_v2  ;;  %v7051_v9 = vpop.f32.mrf.mxu3  ;;  %8489 = vmatpush.msrb.mxu3 %v6456_v0  ;;  %8449 = vmatpush.msrb.mxu1 %v6454_v1  ;;  %v6723_v2 = vld [vmem:[#allocation5 + $0xad0] sm:$0xff] }
 0x341   : > { %v12531_v11 = vadd.f32 %v12530_v4, %v12276_v62  ;;  %v12021_v12 = vsub.f32 %v6123_v3, %v7051_v9  ;;  %v7071_v13 = vpop.f32.mrf.mxu0  ;;  %v7091_v14 = vpop.f32.mrf.mxu1  ;;  %v6132_v62 = vld [vmem:[#allocation2 + $0x80] sm:$0xff] }
 0x342   : > { %v12022_v15 = vsub.f32 %v6124_v5, %v7071_v13  ;;  %12949 = vmatmul.msk.f32.vlgmr.msra.gmra.mxu2 %vm6890_vm1, %v13401_v7  ;;  %v12023_v16 = vsub.f32 %v6125_v6, %v7091_v14  ;;  %v6134_v13 = vld [vmem:[#allocation2 + $0x90] sm:$0xff]  ;;  %v6724_v14 = vld [vmem:[#allocation5 + $0xad8] sm:$0xff] }
 0x343   : > { %v12532_v18 = vadd.f32 %v12531_v11, %v12277_v8  ;;  %v12278_v19 = vmul.f32 %v12021_v12, %v12021_v12  ;;  %8548 = vmatpush.msra.mxu2 %v6715_v10  ;;  %v6721_v10 = vld [vmem:[#allocation5 + $0xac0] sm:$0xff] }
 0x344   : > { %v12279_v23 = vmul.f32 %v12022_v15, %v12022_v15  ;;  %12947 = vmatmul.msk.f32.vlgmr.msra.gmra.mxu0 %vm6890_vm1, %v13401_v7  ;;  %12948 = vmatmul.msk.f32.vlgmr.msra.gmra.mxu1 %vm6890_vm1, %v13401_v7  ;;  %v12280_v27 = vmul.f32 %v12023_v16, %v12023_v16  ;;  %v6722_v15 = vld [vmem:[#allocation5 + $0xac8] sm:$0xff] }
 0x345   : > { %v12533_v26 = vadd.f32 %v12532_v18, %v12278_v19  ;;  %12950 = vmatmul.msk.f32.vlgmr.msra.gmra.mxu3 %vm6890_vm1, %v13401_v7  ;;  %v7111_v28 = vpop.f32.mrf.mxu2  ;;  %8508 = vmatpush.msra.mxu0 %v6713_v17  ;;  %v13565_v17 = vld [vmem:[#allocation7] sm:$0xff]  ;;  %v6467_v18 = vld [vmem:[#allocation5 + $0x2d0] sm:$0xff] }
 0x346   : > { %v12024_v31 = vsub.f32 %v6126_v20, %v7111_v28  ;;  %8568 = vmatpush.msra.mxu3 %v6716_v21  ;;  %8528 = vmatpush.msra.mxu1 %v6714_v22  ;;  %v6465_v19 = vld [vmem:[#allocation5 + $0x2c0] sm:$0xff]  ;;  %v6468_v22 = vld [vmem:[#allocation5 + $0x2d8] sm:$0xff]  ;;  %v6137_v28 = vld [vmem:[#allocation2 + $0xa8] sm:$0xff] }
 0x347   : > { %v12534_v33 = vadd.f32 %v12533_v26, %v12279_v23  ;;  %8549 = vmatpush.msra.mxu2 %v6459_v24  ;;  %8509 = vmatpush.msra.mxu0 %v6457_v25  ;;  %v6466_v23 = vld [vmem:[#allocation5 + $0x2c8] sm:$0xff]  ;;  %v6135_v25 = vld [vmem:[#allocation2 + $0x98] sm:$0xff] }
 0x348   : > { %v12281_v36 = vmul.f32 %v12024_v31, %v12024_v31  ;;  %v7131_v37 = vpop.f32.mrf.mxu3  ;;  %8569 = vmatpush.msra.mxu3 %v6460_v29  ;;  %8529 = vmatpush.msra.mxu1 %v6458_v30  ;;  %v6727_v31 = vld [vmem:[#allocation5 + $0xaf0] sm:$0xff] }
 0x349   : > { %v12535_v39 = vadd.f32 %v12534_v33, %v12280_v27  ;;  %v12025_v40 = vsub.f32 %v6127_v32, %v7131_v37  ;;  %v7151_v41 = vpop.f32.mrf.mxu0  ;;  %v7171_v42 = vpop.f32.mrf.mxu1  ;;  %v6136_v27 = vld [vmem:[#allocation2 + $0xa0] sm:$0xff] }
 0x34a   : > { %v12026_v43 = vsub.f32 %v6128_v34, %v7151_v41  ;;  %12953 = vmatmul.msk.f32.vlgmr.msrb.gmra.mxu2 %vm6890_vm1, %v13401_v7  ;;  %v12027_v44 = vsub.f32 %v6129_v35, %v7171_v42  ;;  %v6138_v41 = vld [vmem:[#allocation2 + $0xb0] sm:$0xff]  ;;  %v6728_v42 = vld [vmem:[#allocation5 + $0xaf8] sm:$0xff] }
 0x34b   : > { %v12536_v46 = vadd.f32 %v12535_v39, %v12281_v36  ;;  %v12282_v47 = vmul.f32 %v12025_v40, %v12025_v40  ;;  %8628 = vmatpush.msrb.mxu2 %v6719_v38  ;;  %v6725_v38 = vld [vmem:[#allocation5 + $0xae0] sm:$0xff] }
 0x34c   : > { %v12283_v51 = vmul.f32 %v12026_v43, %v12026_v43  ;;  %12951 = vmatmul.msk.f32.vlgmr.msrb.gmra.mxu0 %vm6890_vm1, %v13401_v7  ;;  %12952 = vmatmul.msk.f32.vlgmr.msrb.gmra.mxu1 %vm6890_vm1, %v13401_v7  ;;  %v12284_v55 = vmul.f32 %v12027_v44, %v12027_v44  ;;  %v6726_v43 = vld [vmem:[#allocation5 + $0xae8] sm:$0xff] }
 0x34d   : > { %v12537_v54 = vadd.f32 %v12536_v46, %v12282_v47  ;;  %12954 = vmatmul.msk.f32.vlgmr.msrb.gmra.mxu3 %vm6890_vm1, %v13401_v7  ;;  %v7191_v56 = vpop.f32.mrf.mxu2  ;;  %8588 = vmatpush.msrb.mxu0 %v6717_v45  ;;  %v6471_v45 = vld [vmem:[#allocation5 + $0x2f0] sm:$0xff]  ;;  %v6469_v46 = vld [vmem:[#allocation5 + $0x2e0] sm:$0xff] }
 0x34e   : > { %v12028_v59 = vsub.f32 %v6130_v48, %v7191_v56  ;;  %8648 = vmatpush.msrb.mxu3 %v6720_v49  ;;  %8608 = vmatpush.msrb.mxu1 %v6718_v50  ;;  %v6472_v50 = vld [vmem:[#allocation5 + $0x2f8] sm:$0xff]  ;;  %v6141_v56 = vld [vmem:[#allocation2 + $0xc8] sm:$0xff] }
 0x34f   : > { %v12538_v61 = vadd.f32 %v12537_v54, %v12283_v51  ;;  %8629 = vmatpush.msrb.mxu2 %v6463_v52  ;;  %8589 = vmatpush.msrb.mxu0 %v6461_v53  ;;  %v6470_v51 = vld [vmem:[#allocation5 + $0x2e8] sm:$0xff]  ;;  %v6139_v53 = vld [vmem:[#allocation2 + $0xb8] sm:$0xff] }
 0x350   : > { %v12285_v0 = vmul.f32 %v12028_v59, %v12028_v59  ;;  %v7211_v1 = vpop.f32.mrf.mxu3  ;;  %8649 = vmatpush.msrb.mxu3 %v6464_v57  ;;  %8609 = vmatpush.msrb.mxu1 %v6462_v58  ;;  %v6731_v59 = vld [vmem:[#allocation5 + $0xb10] sm:$0xff] }
 0x351   : > { %v12539_v3 = vadd.f32 %v12538_v61, %v12284_v55  ;;  %v12029_v4 = vsub.f32 %v6131_v60, %v7211_v1  ;;  %v7231_v5 = vpop.f32.mrf.mxu0  ;;  %v7251_v6 = vpop.f32.mrf.mxu1  ;;  %v6140_v55 = vld [vmem:[#allocation2 + $0xc0] sm:$0xff] }
 0x352   : > { %v12030_v8 = vsub.f32 %v6132_v62, %v7231_v5  ;;  %12957 = vmatmul.msk.f32.vlgmr.msra.gmra.mxu2 %vm6890_vm1, %v13401_v7  ;;  %v12031_v9 = vsub.f32 %v6133_v63, %v7251_v6  ;;  %v6142_v5 = vld [vmem:[#allocation2 + $0xd0] sm:$0xff]  ;;  %v6732_v6 = vld [vmem:[#allocation5 + $0xb18] sm:$0xff] }
 0x353   : > { %v12540_v11 = vadd.f32 %v12539_v3, %v12285_v0  ;;  %v12286_v12 = vmul.f32 %v12029_v4, %v12029_v4  ;;  %8708 = vmatpush.msra.mxu2 %v6723_v2  ;;  %v6729_v2 = vld [vmem:[#allocation5 + $0xb00] sm:$0xff] }
 0x354   : > { %v12287_v16 = vmul.f32 %v12030_v8, %v12030_v8  ;;  %12955 = vmatmul.msk.f32.vlgmr.msra.gmra.mxu0 %vm6890_vm1, %v13565_v17  ;;  %12956 = vmatmul.msk.f32.vlgmr.msra.gmra.mxu1 %vm6890_vm1, %v13565_v17  ;;  %v12288_v20 = vmul.f32 %v12031_v9, %v12031_v9  ;;  %v6730_v8 = vld [vmem:[#allocation5 + $0xb08] sm:$0xff] }
 0x355   : > { %v12541_v7 = vadd.f32 %v12540_v11, %v12286_v12  ;;  %12958 = vmatmul.msk.f32.vlgmr.msra.gmra.mxu3 %vm6890_vm1, %v13565_v17  ;;  %v7271_v21 = vpop.f32.mrf.mxu2  ;;  %8668 = vmatpush.msra.mxu0 %v6721_v10  ;;  %v6475_v10 = vld [vmem:[#allocation5 + $0x310] sm:$0xff]  ;;  %v6473_v11 = vld [vmem:[#allocation5 + $0x300] sm:$0xff] }
 0x356   : > { %v12032_v24 = vsub.f32 %v6134_v13, %v7271_v21  ;;  %8728 = vmatpush.msra.mxu3 %v6724_v14  ;;  %8688 = vmatpush.msra.mxu1 %v6722_v15  ;;  %v6476_v15 = vld [vmem:[#allocation5 + $0x318] sm:$0xff]  ;;  %v6145_v21 = vld [vmem:[#allocation2 + $0xe8] sm:$0xff] }
 0x357   : > { %v12542_v26 = vadd.f32 %v12541_v7, %v12287_v16  ;;  %8709 = vmatpush.msra.mxu2 %v6467_v18  ;;  %8669 = vmatpush.msra.mxu0 %v6465_v19  ;;  %v6474_v16 = vld [vmem:[#allocation5 + $0x308] sm:$0xff]  ;;  %v6143_v19 = vld [vmem:[#allocation2 + $0xd8] sm:$0xff] }
 0x358   : > { %v12289_v29 = vmul.f32 %v12032_v24, %v12032_v24  ;;  %v7291_v30 = vpop.f32.mrf.mxu3  ;;  %8729 = vmatpush.msra.mxu3 %v6468_v22  ;;  %8689 = vmatpush.msra.mxu1 %v6466_v23  ;;  %v6735_v24 = vld [vmem:[#allocation5 + $0xb30] sm:$0xff] }
 0x359   : > { %v12543_v32 = vadd.f32 %v12542_v26, %v12288_v20  ;;  %v12033_v33 = vsub.f32 %v6135_v25, %v7291_v30  ;;  %v7311_v34 = vpop.f32.mrf.mxu0  ;;  %v7331_v35 = vpop.f32.mrf.mxu1  ;;  %v6144_v20 = vld [vmem:[#allocation2 + $0xe0] sm:$0xff] }
 0x35a   : > { %v12034_v36 = vsub.f32 %v6136_v27, %v7311_v34  ;;  %12961 = vmatmul.msk.f32.vlgmr.msrb.gmra.mxu2 %vm6890_vm1, %v13565_v17  ;;  %v12035_v37 = vsub.f32 %v6137_v28, %v7331_v35  ;;  %v6146_v34 = vld [vmem:[#allocation2 + $0xf0] sm:$0xff]  ;;  %v6736_v35 = vld [vmem:[#allocation5 + $0xb38] sm:$0xff] }
 0x35b   : > { %v12544_v39 = vadd.f32 %v12543_v32, %v12289_v29  ;;  %v12290_v40 = vmul.f32 %v12033_v33, %v12033_v33  ;;  %8788 = vmatpush.msrb.mxu2 %v6727_v31  ;;  %v6733_v31 = vld [vmem:[#allocation5 + $0xb20] sm:$0xff] }
 0x35c   : > { %v12291_v44 = vmul.f32 %v12034_v36, %v12034_v36  ;;  %12959 = vmatmul.msk.f32.vlgmr.msrb.gmra.mxu0 %vm6890_vm1, %v13565_v17  ;;  %12960 = vmatmul.msk.f32.vlgmr.msrb.gmra.mxu1 %vm6890_vm1, %v13565_v17  ;;  %v12292_v48 = vmul.f32 %v12035_v37, %v12035_v37  ;;  %v6734_v36 = vld [vmem:[#allocation5 + $0xb28] sm:$0xff] }
 0x35d   : > { %v12545_v47 = vadd.f32 %v12544_v39, %v12290_v40  ;;  %12962 = vmatmul.msk.f32.vlgmr.msrb.gmra.mxu3 %vm6890_vm1, %v13565_v17  ;;  %v7351_v49 = vpop.f32.mrf.mxu2  ;;  %8748 = vmatpush.msrb.mxu0 %v6725_v38  ;;  %v6479_v38 = vld [vmem:[#allocation5 + $0x330] sm:$0xff]  ;;  %v6477_v39 = vld [vmem:[#allocation5 + $0x320] sm:$0xff] }
 0x35e   : > { %v12036_v52 = vsub.f32 %v6138_v41, %v7351_v49  ;;  %8808 = vmatpush.msrb.mxu3 %v6728_v42  ;;  %8768 = vmatpush.msrb.mxu1 %v6726_v43  ;;  %v6480_v43 = vld [vmem:[#allocation5 + $0x338] sm:$0xff]  ;;  %v6149_v49 = vld [vmem:[#allocation2 + $0x108] sm:$0xff] }
 0x35f   : > { %v12546_v54 = vadd.f32 %v12545_v47, %v12291_v44  ;;  %8789 = vmatpush.msrb.mxu2 %v6471_v45  ;;  %8749 = vmatpush.msrb.mxu0 %v6469_v46  ;;  %v6478_v44 = vld [vmem:[#allocation5 + $0x328] sm:$0xff]  ;;  %v6147_v46 = vld [vmem:[#allocation2 + $0xf8] sm:$0xff] }
 0x360   : > { %v12293_v57 = vmul.f32 %v12036_v52, %v12036_v52  ;;  %v7371_v58 = vpop.f32.mrf.mxu3  ;;  %8809 = vmatpush.msrb.mxu3 %v6472_v50  ;;  %8769 = vmatpush.msrb.mxu1 %v6470_v51  ;;  %v6739_v52 = vld [vmem:[#allocation5 + $0xb50] sm:$0xff] }
 0x361   : > { %v12547_v60 = vadd.f32 %v12546_v54, %v12292_v48  ;;  %v12037_v61 = vsub.f32 %v6139_v53, %v7371_v58  ;;  %v7391_v62 = vpop.f32.mrf.mxu0  ;;  %v7411_v63 = vpop.f32.mrf.mxu1  ;;  %v6148_v48 = vld [vmem:[#allocation2 + $0x100] sm:$0xff] }
 0x362   : > { %v12038_v0 = vsub.f32 %v6140_v55, %v7391_v62  ;;  %12965 = vmatmul.msk.f32.vlgmr.msra.gmra.mxu2 %vm6890_vm1, %v13565_v17  ;;  %v12039_v1 = vsub.f32 %v6141_v56, %v7411_v63  ;;  %v6150_v62 = vld [vmem:[#allocation2 + $0x110] sm:$0xff]  ;;  %v6740_v63 = vld [vmem:[#allocation5 + $0xb58] sm:$0xff] }
 0x363   : > { %v12548_v3 = vadd.f32 %v12547_v60, %v12293_v57  ;;  %v12294_v4 = vmul.f32 %v12037_v61, %v12037_v61  ;;  %8868 = vmatpush.msra.mxu2 %v6731_v59  ;;  %v6737_v59 = vld [vmem:[#allocation5 + $0xb40] sm:$0xff] }
 0x364   : > { %v12295_v9 = vmul.f32 %v12038_v0, %v12038_v0  ;;  %12963 = vmatmul.msk.f32.vlgmr.msra.gmra.mxu0 %vm6890_vm1, %v13565_v17  ;;  %12964 = vmatmul.msk.f32.vlgmr.msra.gmra.mxu1 %vm6890_vm1, %v13565_v17  ;;  %v12296_v13 = vmul.f32 %v12039_v1, %v12039_v1  ;;  %v6738_v0 = vld [vmem:[#allocation5 + $0xb48] sm:$0xff] }
 0x365   : > { %v12549_v12 = vadd.f32 %v12548_v3, %v12294_v4  ;;  %12966 = vmatmul.msk.f32.vlgmr.msra.gmra.mxu3 %vm6890_vm1, %v13565_v17  ;;  %v7431_v14 = vpop.f32.mrf.mxu2  ;;  %8828 = vmatpush.msra.mxu0 %v6729_v2  ;;  %v6483_v2 = vld [vmem:[#allocation5 + $0x350] sm:$0xff]  ;;  %v6481_v3 = vld [vmem:[#allocation5 + $0x340] sm:$0xff] }
 0x366   : > { %v12040_v18 = vsub.f32 %v6142_v5, %v7431_v14  ;;  %8888 = vmatpush.msra.mxu3 %v6732_v6  ;;  %8848 = vmatpush.msra.mxu1 %v6730_v8  ;;  %v6484_v8 = vld [vmem:[#allocation5 + $0x358] sm:$0xff]  ;;  %v6153_v14 = vld [vmem:[#allocation2 + $0x128] sm:$0xff] }
 0x367   : > { %v12550_v7 = vadd.f32 %v12549_v12, %v12295_v9  ;;  %8869 = vmatpush.msra.mxu2 %v6475_v10  ;;  %8829 = vmatpush.msra.mxu0 %v6473_v11  ;;  %v6482_v9 = vld [vmem:[#allocation5 + $0x348] sm:$0xff]  ;;  %v6151_v11 = vld [vmem:[#allocation2 + $0x118] sm:$0xff] }
 0x368   : > { %v12297_v22 = vmul.f32 %v12040_v18, %v12040_v18  ;;  %v7451_v23 = vpop.f32.mrf.mxu3  ;;  %8889 = vmatpush.msra.mxu3 %v6476_v15  ;;  %8849 = vmatpush.msra.mxu1 %v6474_v16  ;;  %v6743_v18 = vld [vmem:[#allocation5 + $0xb70] sm:$0xff] }
 0x369   : > { %v12551_v25 = vadd.f32 %v12550_v7, %v12296_v13  ;;  %v12041_v26 = vsub.f32 %v6143_v19, %v7451_v23  ;;  %v7471_v27 = vpop.f32.mrf.mxu0  ;;  %v7491_v28 = vpop.f32.mrf.mxu1  ;;  %v6152_v13 = vld [vmem:[#allocation2 + $0x120] sm:$0xff] }
 0x36a   : > { %v12042_v29 = vsub.f32 %v6144_v20, %v7471_v27  ;;  %12969 = vmatmul.msk.f32.vlgmr.msrb.gmra.mxu2 %vm6890_vm1, %v13565_v17  ;;  %v12043_v30 = vsub.f32 %v6145_v21, %v7491_v28  ;;  %v6154_v27 = vld [vmem:[#allocation2 + $0x130] sm:$0xff]  ;;  %v6744_v28 = vld [vmem:[#allocation5 + $0xb78] sm:$0xff] }
 0x36b   : > { %v12552_v32 = vadd.f32 %v12551_v25, %v12297_v22  ;;  %v12298_v33 = vmul.f32 %v12041_v26, %v12041_v26  ;;  %8948 = vmatpush.msrb.mxu2 %v6735_v24  ;;  %v6741_v24 = vld [vmem:[#allocation5 + $0xb60] sm:$0xff] }
 0x36c   : > { %v12299_v37 = vmul.f32 %v12042_v29, %v12042_v29  ;;  %12967 = vmatmul.msk.f32.vlgmr.msrb.gmra.mxu0 %vm6890_vm1, %v13565_v17  ;;  %12968 = vmatmul.msk.f32.vlgmr.msrb.gmra.mxu1 %vm6890_vm1, %v13565_v17  ;;  %v12300_v41 = vmul.f32 %v12043_v30, %v12043_v30  ;;  %v6742_v29 = vld [vmem:[#allocation5 + $0xb68] sm:$0xff] }
 0x36d   : > { %v12553_v40 = vadd.f32 %v12552_v32, %v12298_v33  ;;  %12970 = vmatmul.msk.f32.vlgmr.msrb.gmra.mxu3 %vm6890_vm1, %v13565_v17  ;;  %v7511_v42 = vpop.f32.mrf.mxu2  ;;  %8908 = vmatpush.msrb.mxu0 %v6733_v31  ;;  %v6487_v31 = vld [vmem:[#allocation5 + $0x370] sm:$0xff]  ;;  %v6485_v32 = vld [vmem:[#allocation5 + $0x360] sm:$0xff] }
 0x36e   : > { %v12044_v45 = vsub.f32 %v6146_v34, %v7511_v42  ;;  %8968 = vmatpush.msrb.mxu3 %v6736_v35  ;;  %8928 = vmatpush.msrb.mxu1 %v6734_v36  ;;  %v6488_v36 = vld [vmem:[#allocation5 + $0x378] sm:$0xff]  ;;  %v6157_v42 = vld [vmem:[#allocation2 + $0x148] sm:$0xff] }
 0x36f   : > { %v12554_v47 = vadd.f32 %v12553_v40, %v12299_v37  ;;  %8949 = vmatpush.msrb.mxu2 %v6479_v38  ;;  %8909 = vmatpush.msrb.mxu0 %v6477_v39  ;;  %v6486_v37 = vld [vmem:[#allocation5 + $0x368] sm:$0xff]  ;;  %v6155_v39 = vld [vmem:[#allocation2 + $0x138] sm:$0xff] }
 0x370   : > { %v12301_v50 = vmul.f32 %v12044_v45, %v12044_v45  ;;  %v7531_v51 = vpop.f32.mrf.mxu3  ;;  %8969 = vmatpush.msrb.mxu3 %v6480_v43  ;;  %8929 = vmatpush.msrb.mxu1 %v6478_v44  ;;  %v6747_v45 = vld [vmem:[#allocation5 + $0xb90] sm:$0xff] }
 0x371   : > { %v12555_v53 = vadd.f32 %v12554_v47, %v12300_v41  ;;  %v12045_v54 = vsub.f32 %v6147_v46, %v7531_v51  ;;  %v7551_v55 = vpop.f32.mrf.mxu0  ;;  %v7571_v56 = vpop.f32.mrf.mxu1  ;;  %v6156_v41 = vld [vmem:[#allocation2 + $0x140] sm:$0xff] }
 0x372   : > { %v12046_v57 = vsub.f32 %v6148_v48, %v7551_v55  ;;  %12973 = vmatmul.msk.f32.vlgmr.msra.gmra.mxu2 %vm6890_vm1, %v13565_v17  ;;  %v12047_v58 = vsub.f32 %v6149_v49, %v7571_v56  ;;  %v6158_v55 = vld [vmem:[#allocation2 + $0x150] sm:$0xff]  ;;  %v6748_v56 = vld [vmem:[#allocation5 + $0xb98] sm:$0xff] }
 0x373   : > { %v12556_v60 = vadd.f32 %v12555_v53, %v12301_v50  ;;  %v12302_v61 = vmul.f32 %v12045_v54, %v12045_v54  ;;  %9028 = vmatpush.msra.mxu2 %v6739_v52  ;;  %v6745_v52 = vld [vmem:[#allocation5 + $0xb80] sm:$0xff] }
 0x374   : > { %v12303_v1 = vmul.f32 %v12046_v57, %v12046_v57  ;;  %12971 = vmatmul.msk.f32.vlgmr.msra.gmra.mxu0 %vm6890_vm1, %v13565_v17  ;;  %12972 = vmatmul.msk.f32.vlgmr.msra.gmra.mxu1 %vm6890_vm1, %v13565_v17  ;;  %v12304_v5 = vmul.f32 %v12047_v58, %v12047_v58  ;;  %v6746_v57 = vld [vmem:[#allocation5 + $0xb88] sm:$0xff] }
 0x375   : > { %v12557_v4 = vadd.f32 %v12556_v60, %v12302_v61  ;;  %12974 = vmatmul.msk.f32.vlgmr.msra.gmra.mxu3 %vm6890_vm1, %v13565_v17  ;;  %v7591_v6 = vpop.f32.mrf.mxu2  ;;  %8988 = vmatpush.msra.mxu0 %v6737_v59  ;;  %v6491_v59 = vld [vmem:[#allocation5 + $0x390] sm:$0xff]  ;;  %v6489_v60 = vld [vmem:[#allocation5 + $0x380] sm:$0xff] }
 0x376   : > { %v12048_v10 = vsub.f32 %v6150_v62, %v7591_v6  ;;  %9048 = vmatpush.msra.mxu3 %v6740_v63  ;;  %9008 = vmatpush.msra.mxu1 %v6738_v0  ;;  %v6492_v0 = vld [vmem:[#allocation5 + $0x398] sm:$0xff]  ;;  %v6161_v6 = vld [vmem:[#allocation2 + $0x168] sm:$0xff] }
 0x377   : > { %v12558_v12 = vadd.f32 %v12557_v4, %v12303_v1  ;;  %9029 = vmatpush.msra.mxu2 %v6483_v2  ;;  %8989 = vmatpush.msra.mxu0 %v6481_v3  ;;  %v6490_v1 = vld [vmem:[#allocation5 + $0x388] sm:$0xff]  ;;  %v6159_v3 = vld [vmem:[#allocation2 + $0x158] sm:$0xff] }
 0x378   : > { %v12305_v15 = vmul.f32 %v12048_v10, %v12048_v10  ;;  %v7611_v16 = vpop.f32.mrf.mxu3  ;;  %9049 = vmatpush.msra.mxu3 %v6484_v8  ;;  %9009 = vmatpush.msra.mxu1 %v6482_v9  ;;  %v6751_v10 = vld [vmem:[#allocation5 + $0xbb0] sm:$0xff] }
 0x379   : > { %v12559_v19 = vadd.f32 %v12558_v12, %v12304_v5  ;;  %v12049_v7 = vsub.f32 %v6151_v11, %v7611_v16  ;;  %v7631_v20 = vpop.f32.mrf.mxu0  ;;  %v7651_v21 = vpop.f32.mrf.mxu1  ;;  %v6160_v5 = vld [vmem:[#allocation2 + $0x160] sm:$0xff] }
 0x37a   : > { %v12050_v22 = vsub.f32 %v6152_v13, %v7631_v20  ;;  %12977 = vmatmul.msk.f32.vlgmr.msrb.gmra.mxu2 %vm6890_vm1, %v13565_v17  ;;  %v12051_v23 = vsub.f32 %v6153_v14, %v7651_v21  ;;  %v6162_v20 = vld [vmem:[#allocation2 + $0x170] sm:$0xff]  ;;  %v6752_v21 = vld [vmem:[#allocation5 + $0xbb8] sm:$0xff] }
 0x37b   : > { %v12560_v25 = vadd.f32 %v12559_v19, %v12305_v15  ;;  %v12306_v26 = vmul.f32 %v12049_v7, %v12049_v7  ;;  %9108 = vmatpush.msrb.mxu2 %v6743_v18  ;;  %v6749_v18 = vld [vmem:[#allocation5 + $0xba0] sm:$0xff] }
 0x37c   : > { %v12307_v30 = vmul.f32 %v12050_v22, %v12050_v22  ;;  %12975 = vmatmul.msk.f32.vlgmr.msrb.gmra.mxu0 %vm6890_vm1, %v13565_v17  ;;  %12976 = vmatmul.msk.f32.vlgmr.msrb.gmra.mxu1 %vm6890_vm1, %v13565_v17  ;;  %v12308_v34 = vmul.f32 %v12051_v23, %v12051_v23  ;;  %v6750_v22 = vld [vmem:[#allocation5 + $0xba8] sm:$0xff] }
 0x37d   : > { %v12561_v33 = vadd.f32 %v12560_v25, %v12306_v26  ;;  %12978 = vmatmul.msk.f32.vlgmr.msrb.gmra.mxu3 %vm6890_vm1, %v13565_v17  ;;  %v7671_v35 = vpop.f32.mrf.mxu2  ;;  %9068 = vmatpush.msrb.mxu0 %v6741_v24  ;;  %v6495_v24 = vld [vmem:[#allocation5 + $0x3b0] sm:$0xff]  ;;  %v6493_v25 = vld [vmem:[#allocation5 + $0x3a0] sm:$0xff] }
 0x37e   : > { %v12052_v38 = vsub.f32 %v6154_v27, %v7671_v35  ;;  %9128 = vmatpush.msrb.mxu3 %v6744_v28  ;;  %9088 = vmatpush.msrb.mxu1 %v6742_v29  ;;  %v6496_v29 = vld [vmem:[#allocation5 + $0x3b8] sm:$0xff]  ;;  %v6165_v35 = vld [vmem:[#allocation2 + $0x188] sm:$0xff] }
 0x37f   : > { %v12562_v40 = vadd.f32 %v12561_v33, %v12307_v30  ;;  %9109 = vmatpush.msrb.mxu2 %v6487_v31  ;;  %9069 = vmatpush.msrb.mxu0 %v6485_v32  ;;  %v6494_v30 = vld [vmem:[#allocation5 + $0x3a8] sm:$0xff]  ;;  %v6163_v32 = vld [vmem:[#allocation2 + $0x178] sm:$0xff] }
 0x380   : > { %v12309_v43 = vmul.f32 %v12052_v38, %v12052_v38  ;;  %v7691_v44 = vpop.f32.mrf.mxu3  ;;  %9129 = vmatpush.msrb.mxu3 %v6488_v36  ;;  %9089 = vmatpush.msrb.mxu1 %v6486_v37  ;;  %v6755_v38 = vld [vmem:[#allocation5 + $0xbd0] sm:$0xff] }
 0x381   : > { %v12563_v46 = vadd.f32 %v12562_v40, %v12308_v34  ;;  %v12053_v47 = vsub.f32 %v6155_v39, %v7691_v44  ;;  %v7711_v48 = vpop.f32.mrf.mxu0  ;;  %v7731_v49 = vpop.f32.mrf.mxu1  ;;  %v6164_v34 = vld [vmem:[#allocation2 + $0x180] sm:$0xff] }
 0x382   : > { %v12054_v50 = vsub.f32 %v6156_v41, %v7711_v48  ;;  %12981 = vmatmul.msk.f32.vlgmr.msra.gmra.mxu2 %vm6890_vm1, %v13565_v17  ;;  %v12055_v51 = vsub.f32 %v6157_v42, %v7731_v49  ;;  %v6166_v48 = vld [vmem:[#allocation2 + $0x190] sm:$0xff]  ;;  %v6756_v49 = vld [vmem:[#allocation5 + $0xbd8] sm:$0xff] }
 0x383   : > { %v12564_v53 = vadd.f32 %v12563_v46, %v12309_v43  ;;  %v12310_v54 = vmul.f32 %v12053_v47, %v12053_v47  ;;  %9188 = vmatpush.msra.mxu2 %v6747_v45  ;;  %v6753_v45 = vld [vmem:[#allocation5 + $0xbc0] sm:$0xff] }
 0x384   : > { %v12311_v58 = vmul.f32 %v12054_v50, %v12054_v50  ;;  %12979 = vmatmul.msk.f32.vlgmr.msra.gmra.mxu0 %vm6890_vm1, %v13565_v17  ;;  %12980 = vmatmul.msk.f32.vlgmr.msra.gmra.mxu1 %vm6890_vm1, %v13565_v17  ;;  %v12312_v62 = vmul.f32 %v12055_v51, %v12055_v51  ;;  %v6754_v50 = vld [vmem:[#allocation5 + $0xbc8] sm:$0xff] }
 0x385   : > { %v12565_v61 = vadd.f32 %v12564_v53, %v12310_v54  ;;  %12982 = vmatmul.msk.f32.vlgmr.msra.gmra.mxu3 %vm6890_vm1, %v13565_v17  ;;  %v7751_v63 = vpop.f32.mrf.mxu2  ;;  %9148 = vmatpush.msra.mxu0 %v6745_v52  ;;  %v6499_v52 = vld [vmem:[#allocation5 + $0x3d0] sm:$0xff]  ;;  %v6497_v53 = vld [vmem:[#allocation5 + $0x3c0] sm:$0xff] }
 0x386   : > { %v12056_v2 = vsub.f32 %v6158_v55, %v7751_v63  ;;  %9208 = vmatpush.msra.mxu3 %v6748_v56  ;;  %9168 = vmatpush.msra.mxu1 %v6746_v57  ;;  %v6500_v57 = vld [vmem:[#allocation5 + $0x3d8] sm:$0xff]  ;;  %v6169_v63 = vld [vmem:[#allocation2 + $0x1a8] sm:$0xff] }
 0x387   : > { %v12566_v4 = vadd.f32 %v12565_v61, %v12311_v58  ;;  %9189 = vmatpush.msra.mxu2 %v6491_v59  ;;  %9149 = vmatpush.msra.mxu0 %v6489_v60  ;;  %v6498_v58 = vld [vmem:[#allocation5 + $0x3c8] sm:$0xff]  ;;  %v6167_v60 = vld [vmem:[#allocation2 + $0x198] sm:$0xff] }
 0x388   : > { %v12313_v8 = vmul.f32 %v12056_v2, %v12056_v2  ;;  %v7771_v9 = vpop.f32.mrf.mxu3  ;;  %9209 = vmatpush.msra.mxu3 %v6492_v0  ;;  %9169 = vmatpush.msra.mxu1 %v6490_v1  ;;  %v6759_v2 = vld [vmem:[#allocation5 + $0xbf0] sm:$0xff] }
 0x389   : > { %v12567_v11 = vadd.f32 %v12566_v4, %v12312_v62  ;;  %v12057_v12 = vsub.f32 %v6159_v3, %v7771_v9  ;;  %v7791_v13 = vpop.f32.mrf.mxu0  ;;  %v7811_v14 = vpop.f32.mrf.mxu1  ;;  %v6168_v62 = vld [vmem:[#allocation2 + $0x1a0] sm:$0xff] }
 0x38a   : > { %v12058_v15 = vsub.f32 %v6160_v5, %v7791_v13  ;;  %12985 = vmatmul.msk.f32.vlgmr.msrb.gmra.mxu2 %vm6890_vm1, %v13565_v17  ;;  %v12059_v16 = vsub.f32 %v6161_v6, %v7811_v14  ;;  %v6170_v13 = vld [vmem:[#allocation2 + $0x1b0] sm:$0xff]  ;;  %v6760_v14 = vld [vmem:[#allocation5 + $0xbf8] sm:$0xff] }
 0x38b   : > { %v12568_v19 = vadd.f32 %v12567_v11, %v12313_v8  ;;  %v12314_v7 = vmul.f32 %v12057_v12, %v12057_v12  ;;  %9268 = vmatpush.msrb.mxu2 %v6751_v10  ;;  %v6757_v10 = vld [vmem:[#allocation5 + $0xbe0] sm:$0xff] }
 0x38c   : > { %v12315_v23 = vmul.f32 %v12058_v15, %v12058_v15  ;;  %12983 = vmatmul.msk.f32.vlgmr.msrb.gmra.mxu0 %vm6890_vm1, %v13565_v17  ;;  %12984 = vmatmul.msk.f32.vlgmr.msrb.gmra.mxu1 %vm6890_vm1, %v13565_v17  ;;  %v12316_v27 = vmul.f32 %v12059_v16, %v12059_v16  ;;  %v6758_v15 = vld [vmem:[#allocation5 + $0xbe8] sm:$0xff] }
 0x38d   : > { %v12569_v26 = vadd.f32 %v12568_v19, %v12314_v7  ;;  %12986 = vmatmul.msk.f32.vlgmr.msrb.gmra.mxu3 %vm6890_vm1, %v13565_v17  ;;  %v7831_v28 = vpop.f32.mrf.mxu2  ;;  %9228 = vmatpush.msrb.mxu0 %v6749_v18  ;;  %v6503_v18 = vld [vmem:[#allocation5 + $0x3f0] sm:$0xff]  ;;  %v6501_v19 = vld [vmem:[#allocation5 + $0x3e0] sm:$0xff] }
 0x38e   : > { %v12060_v31 = vsub.f32 %v6162_v20, %v7831_v28  ;;  %9288 = vmatpush.msrb.mxu3 %v6752_v21  ;;  %9248 = vmatpush.msrb.mxu1 %v6750_v22  ;;  %v6504_v22 = vld [vmem:[#allocation5 + $0x3f8] sm:$0xff]  ;;  %v6173_v28 = vld [vmem:[#allocation2 + $0x1c8] sm:$0xff] }
 0x38f   : > { %v12570_v33 = vadd.f32 %v12569_v26, %v12315_v23  ;;  %9269 = vmatpush.msrb.mxu2 %v6495_v24  ;;  %9229 = vmatpush.msrb.mxu0 %v6493_v25  ;;  %v6502_v23 = vld [vmem:[#allocation5 + $0x3e8] sm:$0xff]  ;;  %v6171_v25 = vld [vmem:[#allocation2 + $0x1b8] sm:$0xff] }
 0x390   : > { %v12317_v36 = vmul.f32 %v12060_v31, %v12060_v31  ;;  %v7851_v37 = vpop.f32.mrf.mxu3  ;;  %9289 = vmatpush.msrb.mxu3 %v6496_v29  ;;  %9249 = vmatpush.msrb.mxu1 %v6494_v30  ;;  %v6763_v31 = vld [vmem:[#allocation5 + $0xc10] sm:$0xff] }
 0x391   : > { %v12571_v39 = vadd.f32 %v12570_v33, %v12316_v27  ;;  %v12061_v40 = vsub.f32 %v6163_v32, %v7851_v37  ;;  %v7871_v41 = vpop.f32.mrf.mxu0  ;;  %v7891_v42 = vpop.f32.mrf.mxu1  ;;  %v6172_v27 = vld [vmem:[#allocation2 + $0x1c0] sm:$0xff] }
 0x392   : > { %v12062_v43 = vsub.f32 %v6164_v34, %v7871_v41  ;;  %12989 = vmatmul.msk.f32.vlgmr.msra.gmra.mxu2 %vm6890_vm1, %v13565_v17  ;;  %v12063_v44 = vsub.f32 %v6165_v35, %v7891_v42  ;;  %v6174_v41 = vld [vmem:[#allocation2 + $0x1d0] sm:$0xff]  ;;  %v6764_v42 = vld [vmem:[#allocation5 + $0xc18] sm:$0xff] }
 0x393   : > { %v12572_v46 = vadd.f32 %v12571_v39, %v12317_v36  ;;  %v12318_v47 = vmul.f32 %v12061_v40, %v12061_v40  ;;  %9348 = vmatpush.msra.mxu2 %v6755_v38  ;;  %v6761_v38 = vld [vmem:[#allocation5 + $0xc00] sm:$0xff] }
 0x394   : > { %v12319_v51 = vmul.f32 %v12062_v43, %v12062_v43  ;;  %12987 = vmatmul.msk.f32.vlgmr.msra.gmra.mxu0 %vm6890_vm1, %v13565_v17  ;;  %12988 = vmatmul.msk.f32.vlgmr.msra.gmra.mxu1 %vm6890_vm1, %v13565_v17  ;;  %v12320_v55 = vmul.f32 %v12063_v44, %v12063_v44  ;;  %v6762_v43 = vld [vmem:[#allocation5 + $0xc08] sm:$0xff] }
 0x395   : > { %v12573_v54 = vadd.f32 %v12572_v46, %v12318_v47  ;;  %12990 = vmatmul.msk.f32.vlgmr.msra.gmra.mxu3 %vm6890_vm1, %v13565_v17  ;;  %v7911_v56 = vpop.f32.mrf.mxu2  ;;  %9308 = vmatpush.msra.mxu0 %v6753_v45  ;;  %v6507_v45 = vld [vmem:[#allocation5 + $0x410] sm:$0xff]  ;;  %v6505_v46 = vld [vmem:[#allocation5 + $0x400] sm:$0xff] }
 0x396   : > { %v12064_v59 = vsub.f32 %v6166_v48, %v7911_v56  ;;  %9368 = vmatpush.msra.mxu3 %v6756_v49  ;;  %9328 = vmatpush.msra.mxu1 %v6754_v50  ;;  %v6508_v50 = vld [vmem:[#allocation5 + $0x418] sm:$0xff]  ;;  %v6177_v56 = vld [vmem:[#allocation2 + $0x1e8] sm:$0xff] }
 0x397   : > { %v12574_v61 = vadd.f32 %v12573_v54, %v12319_v51  ;;  %9349 = vmatpush.msra.mxu2 %v6499_v52  ;;  %9309 = vmatpush.msra.mxu0 %v6497_v53  ;;  %v6506_v51 = vld [vmem:[#allocation5 + $0x408] sm:$0xff]  ;;  %v6175_v53 = vld [vmem:[#allocation2 + $0x1d8] sm:$0xff] }
 0x398   : > { %v12321_v0 = vmul.f32 %v12064_v59, %v12064_v59  ;;  %v7931_v1 = vpop.f32.mrf.mxu3  ;;  %9369 = vmatpush.msra.mxu3 %v6500_v57  ;;  %9329 = vmatpush.msra.mxu1 %v6498_v58  ;;  %v6767_v59 = vld [vmem:[#allocation5 + $0xc30] sm:$0xff] }
 0x399   : > { %v12575_v3 = vadd.f32 %v12574_v61, %v12320_v55  ;;  %v12065_v4 = vsub.f32 %v6167_v60, %v7931_v1  ;;  %v7951_v5 = vpop.f32.mrf.mxu0  ;;  %v7971_v6 = vpop.f32.mrf.mxu1  ;;  %v6176_v55 = vld [vmem:[#allocation2 + $0x1e0] sm:$0xff] }
 0x39a   : > { %v12066_v8 = vsub.f32 %v6168_v62, %v7951_v5  ;;  %12993 = vmatmul.msk.f32.vlgmr.msrb.gmra.mxu2 %vm6890_vm1, %v13565_v17  ;;  %v12067_v9 = vsub.f32 %v6169_v63, %v7971_v6  ;;  %v6178_v5 = vld [vmem:[#allocation2 + $0x1f0] sm:$0xff]  ;;  %v6768_v6 = vld [vmem:[#allocation5 + $0xc38] sm:$0xff] }
 0x39b   : > { %v12576_v11 = vadd.f32 %v12575_v3, %v12321_v0  ;;  %v12322_v12 = vmul.f32 %v12065_v4, %v12065_v4  ;;  %9428 = vmatpush.msrb.mxu2 %v6759_v2  ;;  %v6765_v2 = vld [vmem:[#allocation5 + $0xc20] sm:$0xff] }
 0x39c   : > { %v12323_v16 = vmul.f32 %v12066_v8, %v12066_v8  ;;  %12991 = vmatmul.msk.f32.vlgmr.msrb.gmra.mxu0 %vm6890_vm1, %v13565_v17  ;;  %12992 = vmatmul.msk.f32.vlgmr.msrb.gmra.mxu1 %vm6890_vm1, %v13565_v17  ;;  %v12324_v20 = vmul.f32 %v12067_v9, %v12067_v9  ;;  %v6766_v8 = vld [vmem:[#allocation5 + $0xc28] sm:$0xff] }
 0x39d   : > { %v12577_v7 = vadd.f32 %v12576_v11, %v12322_v12  ;;  %12994 = vmatmul.msk.f32.vlgmr.msrb.gmra.mxu3 %vm6890_vm1, %v13565_v17  ;;  %v7991_v21 = vpop.f32.mrf.mxu2  ;;  %9388 = vmatpush.msrb.mxu0 %v6757_v10  ;;  %v6511_v10 = vld [vmem:[#allocation5 + $0x430] sm:$0xff]  ;;  %v6509_v11 = vld [vmem:[#allocation5 + $0x420] sm:$0xff] }
 0x39e   : > { %v12068_v24 = vsub.f32 %v6170_v13, %v7991_v21  ;;  %9448 = vmatpush.msrb.mxu3 %v6760_v14  ;;  %9408 = vmatpush.msrb.mxu1 %v6758_v15  ;;  %v6512_v15 = vld [vmem:[#allocation5 + $0x438] sm:$0xff]  ;;  %v6181_v21 = vld [vmem:[#allocation2 + $0x208] sm:$0xff] }
 0x39f   : > { %v12578_v26 = vadd.f32 %v12577_v7, %v12323_v16  ;;  %9429 = vmatpush.msrb.mxu2 %v6503_v18  ;;  %9389 = vmatpush.msrb.mxu0 %v6501_v19  ;;  %v6510_v16 = vld [vmem:[#allocation5 + $0x428] sm:$0xff]  ;;  %v6179_v19 = vld [vmem:[#allocation2 + $0x1f8] sm:$0xff] }
 0x3a0   : > { %v12325_v29 = vmul.f32 %v12068_v24, %v12068_v24  ;;  %v8011_v30 = vpop.f32.mrf.mxu3  ;;  %9449 = vmatpush.msrb.mxu3 %v6504_v22  ;;  %9409 = vmatpush.msrb.mxu1 %v6502_v23  ;;  %v6771_v24 = vld [vmem:[#allocation5 + $0xc50] sm:$0xff] }
 0x3a1   : > { %v12579_v32 = vadd.f32 %v12578_v26, %v12324_v20  ;;  %v12069_v33 = vsub.f32 %v6171_v25, %v8011_v30  ;;  %v8031_v34 = vpop.f32.mrf.mxu0  ;;  %v8051_v35 = vpop.f32.mrf.mxu1  ;;  %v6180_v20 = vld [vmem:[#allocation2 + $0x200] sm:$0xff] }
 0x3a2   : > { %v12070_v36 = vsub.f32 %v6172_v27, %v8031_v34  ;;  %12997 = vmatmul.msk.f32.vlgmr.msra.gmra.mxu2 %vm6890_vm1, %v13565_v17  ;;  %v12071_v37 = vsub.f32 %v6173_v28, %v8051_v35  ;;  %v6182_v34 = vld [vmem:[#allocation2 + $0x210] sm:$0xff]  ;;  %v6772_v35 = vld [vmem:[#allocation5 + $0xc58] sm:$0xff] }
 0x3a3   : > { %v12580_v39 = vadd.f32 %v12579_v32, %v12325_v29  ;;  %v12326_v40 = vmul.f32 %v12069_v33, %v12069_v33  ;;  %9508 = vmatpush.msra.mxu2 %v6763_v31  ;;  %v6769_v31 = vld [vmem:[#allocation5 + $0xc40] sm:$0xff] }
 0x3a4   : > { %v12327_v44 = vmul.f32 %v12070_v36, %v12070_v36  ;;  %12995 = vmatmul.msk.f32.vlgmr.msra.gmra.mxu0 %vm6890_vm1, %v13565_v17  ;;  %12996 = vmatmul.msk.f32.vlgmr.msra.gmra.mxu1 %vm6890_vm1, %v13565_v17  ;;  %v12328_v48 = vmul.f32 %v12071_v37, %v12071_v37  ;;  %v6770_v36 = vld [vmem:[#allocation5 + $0xc48] sm:$0xff] }
 0x3a5   : > { %v12581_v47 = vadd.f32 %v12580_v39, %v12326_v40  ;;  %12998 = vmatmul.msk.f32.vlgmr.msra.gmra.mxu3 %vm6890_vm1, %v13565_v17  ;;  %v8071_v49 = vpop.f32.mrf.mxu2  ;;  %9468 = vmatpush.msra.mxu0 %v6761_v38  ;;  %v6515_v38 = vld [vmem:[#allocation5 + $0x450] sm:$0xff]  ;;  %v6513_v39 = vld [vmem:[#allocation5 + $0x440] sm:$0xff] }
 0x3a6   : > { %v12072_v52 = vsub.f32 %v6174_v41, %v8071_v49  ;;  %9528 = vmatpush.msra.mxu3 %v6764_v42  ;;  %9488 = vmatpush.msra.mxu1 %v6762_v43  ;;  %v6516_v43 = vld [vmem:[#allocation5 + $0x458] sm:$0xff]  ;;  %v6185_v49 = vld [vmem:[#allocation2 + $0x228] sm:$0xff] }
 0x3a7   : > { %v12582_v54 = vadd.f32 %v12581_v47, %v12327_v44  ;;  %9509 = vmatpush.msra.mxu2 %v6507_v45  ;;  %9469 = vmatpush.msra.mxu0 %v6505_v46  ;;  %v6514_v44 = vld [vmem:[#allocation5 + $0x448] sm:$0xff]  ;;  %v6183_v46 = vld [vmem:[#allocation2 + $0x218] sm:$0xff] }
 0x3a8   : > { %v12329_v57 = vmul.f32 %v12072_v52, %v12072_v52  ;;  %v8091_v58 = vpop.f32.mrf.mxu3  ;;  %9529 = vmatpush.msra.mxu3 %v6508_v50  ;;  %9489 = vmatpush.msra.mxu1 %v6506_v51  ;;  %v6775_v52 = vld [vmem:[#allocation5 + $0xc70] sm:$0xff] }
 0x3a9   : > { %v12583_v60 = vadd.f32 %v12582_v54, %v12328_v48  ;;  %v12073_v61 = vsub.f32 %v6175_v53, %v8091_v58  ;;  %v8111_v62 = vpop.f32.mrf.mxu0  ;;  %v8131_v63 = vpop.f32.mrf.mxu1  ;;  %v6184_v48 = vld [vmem:[#allocation2 + $0x220] sm:$0xff] }
 0x3aa   : > { %v12074_v0 = vsub.f32 %v6176_v55, %v8111_v62  ;;  %13001 = vmatmul.msk.f32.vlgmr.msrb.gmra.mxu2 %vm6890_vm1, %v13565_v17  ;;  %v12075_v1 = vsub.f32 %v6177_v56, %v8131_v63  ;;  %v6186_v62 = vld [vmem:[#allocation2 + $0x230] sm:$0xff]  ;;  %v6776_v63 = vld [vmem:[#allocation5 + $0xc78] sm:$0xff] }
 0x3ab   : > { %v12584_v3 = vadd.f32 %v12583_v60, %v12329_v57  ;;  %v12330_v4 = vmul.f32 %v12073_v61, %v12073_v61  ;;  %9588 = vmatpush.msrb.mxu2 %v6767_v59  ;;  %v6773_v59 = vld [vmem:[#allocation5 + $0xc60] sm:$0xff] }
 0x3ac   : > { %v12331_v9 = vmul.f32 %v12074_v0, %v12074_v0  ;;  %12999 = vmatmul.msk.f32.vlgmr.msrb.gmra.mxu0 %vm6890_vm1, %v13565_v17  ;;  %13000 = vmatmul.msk.f32.vlgmr.msrb.gmra.mxu1 %vm6890_vm1, %v13565_v17  ;;  %v12332_v13 = vmul.f32 %v12075_v1, %v12075_v1  ;;  %v6774_v0 = vld [vmem:[#allocation5 + $0xc68] sm:$0xff] }
 0x3ad   : > { %v12585_v12 = vadd.f32 %v12584_v3, %v12330_v4  ;;  %13002 = vmatmul.msk.f32.vlgmr.msrb.gmra.mxu3 %vm6890_vm1, %v13565_v17  ;;  %v8151_v14 = vpop.f32.mrf.mxu2  ;;  %9548 = vmatpush.msrb.mxu0 %v6765_v2  ;;  %v13671_v2 = vld [vmem:[#allocation7] sm:$0xff]  ;;  %v6519_v3 = vld [vmem:[#allocation5 + $0x470] sm:$0xff] }
 0x3ae   : > { %v12076_v18 = vsub.f32 %v6178_v5, %v8151_v14  ;;  %9608 = vmatpush.msrb.mxu3 %v6768_v6  ;;  %9568 = vmatpush.msrb.mxu1 %v6766_v8  ;;  %v6517_v4 = vld [vmem:[#allocation5 + $0x460] sm:$0xff]  ;;  %v6520_v8 = vld [vmem:[#allocation5 + $0x478] sm:$0xff]  ;;  %v6189_v14 = vld [vmem:[#allocation2 + $0x248] sm:$0xff] }
 0x3af   : > { %v12586_v7 = vadd.f32 %v12585_v12, %v12331_v9  ;;  %9589 = vmatpush.msrb.mxu2 %v6511_v10  ;;  %9549 = vmatpush.msrb.mxu0 %v6509_v11  ;;  %v6518_v9 = vld [vmem:[#allocation5 + $0x468] sm:$0xff]  ;;  %v6187_v11 = vld [vmem:[#allocation2 + $0x238] sm:$0xff] }
 0x3b0   : > { %v12333_v22 = vmul.f32 %v12076_v18, %v12076_v18  ;;  %v8171_v23 = vpop.f32.mrf.mxu3  ;;  %9609 = vmatpush.msrb.mxu3 %v6512_v15  ;;  %9569 = vmatpush.msrb.mxu1 %v6510_v16  ;;  %v6779_v18 = vld [vmem:[#allocation5 + $0xc90] sm:$0xff] }
 0x3b1   : > { %v12587_v25 = vadd.f32 %v12586_v7, %v12332_v13  ;;  %v12077_v26 = vsub.f32 %v6179_v19, %v8171_v23  ;;  %v8191_v27 = vpop.f32.mrf.mxu0  ;;  %v8211_v28 = vpop.f32.mrf.mxu1  ;;  %v6188_v13 = vld [vmem:[#allocation2 + $0x240] sm:$0xff] }
 0x3b2   : > { %v12078_v29 = vsub.f32 %v6180_v20, %v8191_v27  ;;  %13005 = vmatmul.msk.f32.vlgmr.msra.gmra.mxu2 %vm6890_vm1, %v13565_v17  ;;  %v12079_v30 = vsub.f32 %v6181_v21, %v8211_v28  ;;  %v6190_v27 = vld [vmem:[#allocation2 + $0x250] sm:$0xff]  ;;  %v6780_v28 = vld [vmem:[#allocation5 + $0xc98] sm:$0xff] }
 0x3b3   : > { %v12588_v32 = vadd.f32 %v12587_v25, %v12333_v22  ;;  %v12334_v33 = vmul.f32 %v12077_v26, %v12077_v26  ;;  %9668 = vmatpush.msra.mxu2 %v6771_v24  ;;  %v6777_v24 = vld [vmem:[#allocation5 + $0xc80] sm:$0xff] }
 0x3b4   : > { %v12335_v37 = vmul.f32 %v12078_v29, %v12078_v29  ;;  %13003 = vmatmul.msk.f32.vlgmr.msra.gmra.mxu0 %vm6890_vm1, %v13565_v17  ;;  %13004 = vmatmul.msk.f32.vlgmr.msra.gmra.mxu1 %vm6890_vm1, %v13565_v17  ;;  %v12336_v41 = vmul.f32 %v12079_v30, %v12079_v30  ;;  %v6778_v29 = vld [vmem:[#allocation5 + $0xc88] sm:$0xff] }
 0x3b5   : > { %v12589_v40 = vadd.f32 %v12588_v32, %v12334_v33  ;;  %13006 = vmatmul.msk.f32.vlgmr.msra.gmra.mxu3 %vm6890_vm1, %v13565_v17  ;;  %v8231_v42 = vpop.f32.mrf.mxu2  ;;  %9628 = vmatpush.msra.mxu0 %v6769_v31  ;;  %v6523_v31 = vld [vmem:[#allocation5 + $0x490] sm:$0xff]  ;;  %v6521_v32 = vld [vmem:[#allocation5 + $0x480] sm:$0xff] }
 0x3b6   : > { %v12080_v45 = vsub.f32 %v6182_v34, %v8231_v42  ;;  %9688 = vmatpush.msra.mxu3 %v6772_v35  ;;  %9648 = vmatpush.msra.mxu1 %v6770_v36  ;;  %v6524_v36 = vld [vmem:[#allocation5 + $0x498] sm:$0xff]  ;;  %v6193_v42 = vld [vmem:[#allocation2 + $0x268] sm:$0xff] }
 0x3b7   : > { %v12590_v47 = vadd.f32 %v12589_v40, %v12335_v37  ;;  %9669 = vmatpush.msra.mxu2 %v6515_v38  ;;  %9629 = vmatpush.msra.mxu0 %v6513_v39  ;;  %v6522_v37 = vld [vmem:[#allocation5 + $0x488] sm:$0xff]  ;;  %v6191_v39 = vld [vmem:[#allocation2 + $0x258] sm:$0xff] }
 0x3b8   : > { %v12337_v50 = vmul.f32 %v12080_v45, %v12080_v45  ;;  %v8251_v51 = vpop.f32.mrf.mxu3  ;;  %9689 = vmatpush.msra.mxu3 %v6516_v43  ;;  %9649 = vmatpush.msra.mxu1 %v6514_v44  ;;  %v6783_v45 = vld [vmem:[#allocation5 + $0xcb0] sm:$0xff] }
 0x3b9   : > { %v12591_v53 = vadd.f32 %v12590_v47, %v12336_v41  ;;  %v12081_v54 = vsub.f32 %v6183_v46, %v8251_v51  ;;  %v8271_v55 = vpop.f32.mrf.mxu0  ;;  %v8291_v56 = vpop.f32.mrf.mxu1  ;;  %v6192_v41 = vld [vmem:[#allocation2 + $0x260] sm:$0xff] }
 0x3ba   : > { %v12082_v57 = vsub.f32 %v6184_v48, %v8271_v55  ;;  %13009 = vmatmul.msk.f32.vlgmr.msrb.gmra.mxu2 %vm6890_vm1, %v13565_v17  ;;  %v12083_v58 = vsub.f32 %v6185_v49, %v8291_v56  ;;  %v6194_v55 = vld [vmem:[#allocation2 + $0x270] sm:$0xff]  ;;  %v6784_v56 = vld [vmem:[#allocation5 + $0xcb8] sm:$0xff] }
 0x3bb   : > { %v12592_v60 = vadd.f32 %v12591_v53, %v12337_v50  ;;  %v12338_v61 = vmul.f32 %v12081_v54, %v12081_v54  ;;  %9748 = vmatpush.msrb.mxu2 %v6775_v52  ;;  %v6781_v52 = vld [vmem:[#allocation5 + $0xca0] sm:$0xff] }
 0x3bc   : > { %v12339_v1 = vmul.f32 %v12082_v57, %v12082_v57  ;;  %13007 = vmatmul.msk.f32.vlgmr.msrb.gmra.mxu0 %vm6890_vm1, %v13671_v2  ;;  %13008 = vmatmul.msk.f32.vlgmr.msrb.gmra.mxu1 %vm6890_vm1, %v13671_v2  ;;  %v12340_v5 = vmul.f32 %v12083_v58, %v12083_v58  ;;  %v6782_v57 = vld [vmem:[#allocation5 + $0xca8] sm:$0xff] }
 0x3bd   : > { %v12593_v17 = vadd.f32 %v12592_v60, %v12338_v61  ;;  %13010 = vmatmul.msk.f32.vlgmr.msrb.gmra.mxu3 %vm6890_vm1, %v13671_v2  ;;  %v8311_v6 = vpop.f32.mrf.mxu2  ;;  %9708 = vmatpush.msrb.mxu0 %v6773_v59  ;;  %v6527_v59 = vld [vmem:[#allocation5 + $0x4b0] sm:$0xff]  ;;  %v6525_v60 = vld [vmem:[#allocation5 + $0x4a0] sm:$0xff] }
 0x3be   : > { %v12084_v10 = vsub.f32 %v6186_v62, %v8311_v6  ;;  %9768 = vmatpush.msrb.mxu3 %v6776_v63  ;;  %9728 = vmatpush.msrb.mxu1 %v6774_v0  ;;  %v6528_v0 = vld [vmem:[#allocation5 + $0x4b8] sm:$0xff]  ;;  %v6197_v6 = vld [vmem:[#allocation2 + $0x288] sm:$0xff] }
 0x3bf   : > { %v12594_v12 = vadd.f32 %v12593_v17, %v12339_v1  ;;  %9749 = vmatpush.msrb.mxu2 %v6519_v3  ;;  %9709 = vmatpush.msrb.mxu0 %v6517_v4  ;;  %v6526_v1 = vld [vmem:[#allocation5 + $0x4a8] sm:$0xff]  ;;  %v6195_v4 = vld [vmem:[#allocation2 + $0x278] sm:$0xff] }
 0x3c0   : > { %v12341_v15 = vmul.f32 %v12084_v10, %v12084_v10  ;;  %v8331_v16 = vpop.f32.mrf.mxu3  ;;  %9769 = vmatpush.msrb.mxu3 %v6520_v8  ;;  %9729 = vmatpush.msrb.mxu1 %v6518_v9  ;;  %v6787_v10 = vld [vmem:[#allocation5 + $0xcd0] sm:$0xff] }
 0x3c1   : > { %v12595_v19 = vadd.f32 %v12594_v12, %v12340_v5  ;;  %v12085_v7 = vsub.f32 %v6187_v11, %v8331_v16  ;;  %v8351_v20 = vpop.f32.mrf.mxu0  ;;  %v8371_v21 = vpop.f32.mrf.mxu1  ;;  %v6196_v5 = vld [vmem:[#allocation2 + $0x280] sm:$0xff] }
 0x3c2   : > { %v12086_v22 = vsub.f32 %v6188_v13, %v8351_v20  ;;  %13013 = vmatmul.msk.f32.vlgmr.msra.gmra.mxu2 %vm6890_vm1, %v13671_v2  ;;  %v12087_v23 = vsub.f32 %v6189_v14, %v8371_v21  ;;  %v6198_v20 = vld [vmem:[#allocation2 + $0x290] sm:$0xff]  ;;  %v6788_v21 = vld [vmem:[#allocation5 + $0xcd8] sm:$0xff] }
 0x3c3   : > { %v12596_v25 = vadd.f32 %v12595_v19, %v12341_v15  ;;  %v12342_v26 = vmul.f32 %v12085_v7, %v12085_v7  ;;  %9828 = vmatpush.msra.mxu2 %v6779_v18  ;;  %v6785_v18 = vld [vmem:[#allocation5 + $0xcc0] sm:$0xff] }
 0x3c4   : > { %v12343_v30 = vmul.f32 %v12086_v22, %v12086_v22  ;;  %13011 = vmatmul.msk.f32.vlgmr.msra.gmra.mxu0 %vm6890_vm1, %v13671_v2  ;;  %13012 = vmatmul.msk.f32.vlgmr.msra.gmra.mxu1 %vm6890_vm1, %v13671_v2  ;;  %v12344_v34 = vmul.f32 %v12087_v23, %v12087_v23  ;;  %v6786_v22 = vld [vmem:[#allocation5 + $0xcc8] sm:$0xff] }
 0x3c5   : > { %v12597_v33 = vadd.f32 %v12596_v25, %v12342_v26  ;;  %13014 = vmatmul.msk.f32.vlgmr.msra.gmra.mxu3 %vm6890_vm1, %v13671_v2  ;;  %v8391_v35 = vpop.f32.mrf.mxu2  ;;  %9788 = vmatpush.msra.mxu0 %v6777_v24  ;;  %v6531_v24 = vld [vmem:[#allocation5 + $0x4d0] sm:$0xff]  ;;  %v6529_v25 = vld [vmem:[#allocation5 + $0x4c0] sm:$0xff] }
 0x3c6   : > { %v12088_v38 = vsub.f32 %v6190_v27, %v8391_v35  ;;  %9848 = vmatpush.msra.mxu3 %v6780_v28  ;;  %9808 = vmatpush.msra.mxu1 %v6778_v29  ;;  %v6532_v29 = vld [vmem:[#allocation5 + $0x4d8] sm:$0xff]  ;;  %v6201_v35 = vld [vmem:[#allocation2 + $0x2a8] sm:$0xff] }
 0x3c7   : > { %v12598_v40 = vadd.f32 %v12597_v33, %v12343_v30  ;;  %9829 = vmatpush.msra.mxu2 %v6523_v31  ;;  %9789 = vmatpush.msra.mxu0 %v6521_v32  ;;  %v6530_v30 = vld [vmem:[#allocation5 + $0x4c8] sm:$0xff]  ;;  %v6199_v32 = vld [vmem:[#allocation2 + $0x298] sm:$0xff] }
 0x3c8   : > { %v12345_v43 = vmul.f32 %v12088_v38, %v12088_v38  ;;  %v8411_v44 = vpop.f32.mrf.mxu3  ;;  %9849 = vmatpush.msra.mxu3 %v6524_v36  ;;  %9809 = vmatpush.msra.mxu1 %v6522_v37  ;;  %v6791_v38 = vld [vmem:[#allocation5 + $0xcf0] sm:$0xff] }
 0x3c9   : > { %v12599_v46 = vadd.f32 %v12598_v40, %v12344_v34  ;;  %v12089_v47 = vsub.f32 %v6191_v39, %v8411_v44  ;;  %v8431_v48 = vpop.f32.mrf.mxu0  ;;  %v8451_v49 = vpop.f32.mrf.mxu1  ;;  %v6200_v34 = vld [vmem:[#allocation2 + $0x2a0] sm:$0xff] }
 0x3ca   : > { %v12090_v50 = vsub.f32 %v6192_v41, %v8431_v48  ;;  %13017 = vmatmul.msk.f32.vlgmr.msrb.gmra.mxu2 %vm6890_vm1, %v13671_v2  ;;  %v12091_v51 = vsub.f32 %v6193_v42, %v8451_v49  ;;  %v6202_v48 = vld [vmem:[#allocation2 + $0x2b0] sm:$0xff]  ;;  %v6792_v49 = vld [vmem:[#allocation5 + $0xcf8] sm:$0xff] }
 0x3cb   : > { %v12600_v53 = vadd.f32 %v12599_v46, %v12345_v43  ;;  %v12346_v54 = vmul.f32 %v12089_v47, %v12089_v47  ;;  %9908 = vmatpush.msrb.mxu2 %v6783_v45  ;;  %v6789_v45 = vld [vmem:[#allocation5 + $0xce0] sm:$0xff] }
 0x3cc   : > { %v12347_v58 = vmul.f32 %v12090_v50, %v12090_v50  ;;  %13015 = vmatmul.msk.f32.vlgmr.msrb.gmra.mxu0 %vm6890_vm1, %v13671_v2  ;;  %13016 = vmatmul.msk.f32.vlgmr.msrb.gmra.mxu1 %vm6890_vm1, %v13671_v2  ;;  %v12348_v62 = vmul.f32 %v12091_v51, %v12091_v51  ;;  %v6790_v50 = vld [vmem:[#allocation5 + $0xce8] sm:$0xff] }
 0x3cd   : > { %v12601_v61 = vadd.f32 %v12600_v53, %v12346_v54  ;;  %13018 = vmatmul.msk.f32.vlgmr.msrb.gmra.mxu3 %vm6890_vm1, %v13671_v2  ;;  %v8471_v63 = vpop.f32.mrf.mxu2  ;;  %9868 = vmatpush.msrb.mxu0 %v6781_v52  ;;  %v6535_v52 = vld [vmem:[#allocation5 + $0x4f0] sm:$0xff]  ;;  %v6533_v53 = vld [vmem:[#allocation5 + $0x4e0] sm:$0xff] }
 0x3ce   : > { %v12092_v3 = vsub.f32 %v6194_v55, %v8471_v63  ;;  %9928 = vmatpush.msrb.mxu3 %v6784_v56  ;;  %9888 = vmatpush.msrb.mxu1 %v6782_v57  ;;  %v6536_v57 = vld [vmem:[#allocation5 + $0x4f8] sm:$0xff]  ;;  %v6205_v63 = vld [vmem:[#allocation2 + $0x2c8] sm:$0xff] }
 0x3cf   : > { %v12602_v17 = vadd.f32 %v12601_v61, %v12347_v58  ;;  %9909 = vmatpush.msrb.mxu2 %v6527_v59  ;;  %9869 = vmatpush.msrb.mxu0 %v6525_v60  ;;  %v6534_v58 = vld [vmem:[#allocation5 + $0x4e8] sm:$0xff]  ;;  %v6203_v60 = vld [vmem:[#allocation2 + $0x2b8] sm:$0xff] }
 0x3d0   : > { %v12349_v8 = vmul.f32 %v12092_v3, %v12092_v3  ;;  %v8491_v9 = vpop.f32.mrf.mxu3  ;;  %9929 = vmatpush.msrb.mxu3 %v6528_v0  ;;  %9889 = vmatpush.msrb.mxu1 %v6526_v1  ;;  %v6795_v3 = vld [vmem:[#allocation5 + $0xd10] sm:$0xff] }
 0x3d1   : > { %v12603_v11 = vadd.f32 %v12602_v17, %v12348_v62  ;;  %v12093_v12 = vsub.f32 %v6195_v4, %v8491_v9  ;;  %v8511_v13 = vpop.f32.mrf.mxu0  ;;  %v8531_v14 = vpop.f32.mrf.mxu1  ;;  %v6204_v62 = vld [vmem:[#allocation2 + $0x2c0] sm:$0xff] }
 0x3d2   : > { %v12094_v15 = vsub.f32 %v6196_v5, %v8511_v13  ;;  %13021 = vmatmul.msk.f32.vlgmr.msra.gmra.mxu2 %vm6890_vm1, %v13671_v2  ;;  %v12095_v16 = vsub.f32 %v6197_v6, %v8531_v14  ;;  %v6206_v13 = vld [vmem:[#allocation2 + $0x2d0] sm:$0xff]  ;;  %v6796_v14 = vld [vmem:[#allocation5 + $0xd18] sm:$0xff] }
 0x3d3   : > { %v12604_v19 = vadd.f32 %v12603_v11, %v12349_v8  ;;  %v12350_v7 = vmul.f32 %v12093_v12, %v12093_v12  ;;  %9988 = vmatpush.msra.mxu2 %v6787_v10  ;;  %v6793_v10 = vld [vmem:[#allocation5 + $0xd00] sm:$0xff] }
 0x3d4   : > { %v12351_v23 = vmul.f32 %v12094_v15, %v12094_v15  ;;  %13019 = vmatmul.msk.f32.vlgmr.msra.gmra.mxu0 %vm6890_vm1, %v13671_v2  ;;  %13020 = vmatmul.msk.f32.vlgmr.msra.gmra.mxu1 %vm6890_vm1, %v13671_v2  ;;  %v12352_v27 = vmul.f32 %v12095_v16, %v12095_v16  ;;  %v6794_v15 = vld [vmem:[#allocation5 + $0xd08] sm:$0xff] }
 0x3d5   : > { %v12605_v26 = vadd.f32 %v12604_v19, %v12350_v7  ;;  %13022 = vmatmul.msk.f32.vlgmr.msra.gmra.mxu3 %vm6890_vm1, %v13671_v2  ;;  %v8551_v28 = vpop.f32.mrf.mxu2  ;;  %9948 = vmatpush.msra.mxu0 %v6785_v18  ;;  %v6539_v18 = vld [vmem:[#allocation5 + $0x510] sm:$0xff]  ;;  %v6537_v19 = vld [vmem:[#allocation5 + $0x500] sm:$0xff] }
 0x3d6   : > { %v12096_v31 = vsub.f32 %v6198_v20, %v8551_v28  ;;  %10008 = vmatpush.msra.mxu3 %v6788_v21  ;;  %9968 = vmatpush.msra.mxu1 %v6786_v22  ;;  %v6540_v22 = vld [vmem:[#allocation5 + $0x518] sm:$0xff]  ;;  %v6209_v28 = vld [vmem:[#allocation2 + $0x2e8] sm:$0xff] }
 0x3d7   : > { %v12606_v33 = vadd.f32 %v12605_v26, %v12351_v23  ;;  %9989 = vmatpush.msra.mxu2 %v6531_v24  ;;  %9949 = vmatpush.msra.mxu0 %v6529_v25  ;;  %v6538_v23 = vld [vmem:[#allocation5 + $0x508] sm:$0xff]  ;;  %v6207_v25 = vld [vmem:[#allocation2 + $0x2d8] sm:$0xff] }
 0x3d8   : > { %v12353_v36 = vmul.f32 %v12096_v31, %v12096_v31  ;;  %v8571_v37 = vpop.f32.mrf.mxu3  ;;  %10009 = vmatpush.msra.mxu3 %v6532_v29  ;;  %9969 = vmatpush.msra.mxu1 %v6530_v30  ;;  %v6799_v31 = vld [vmem:[#allocation5 + $0xd30] sm:$0xff] }
 0x3d9   : > { %v12607_v39 = vadd.f32 %v12606_v33, %v12352_v27  ;;  %v12097_v40 = vsub.f32 %v6199_v32, %v8571_v37  ;;  %v8591_v41 = vpop.f32.mrf.mxu0  ;;  %v8611_v42 = vpop.f32.mrf.mxu1  ;;  %v6208_v27 = vld [vmem:[#allocation2 + $0x2e0] sm:$0xff] }
 0x3da   : > { %v12098_v43 = vsub.f32 %v6200_v34, %v8591_v41  ;;  %13025 = vmatmul.msk.f32.vlgmr.msrb.gmra.mxu2 %vm6890_vm1, %v13671_v2  ;;  %v12099_v44 = vsub.f32 %v6201_v35, %v8611_v42  ;;  %v6210_v41 = vld [vmem:[#allocation2 + $0x2f0] sm:$0xff]  ;;  %v6800_v42 = vld [vmem:[#allocation5 + $0xd38] sm:$0xff] }
 0x3db   : > { %v12608_v46 = vadd.f32 %v12607_v39, %v12353_v36  ;;  %v12354_v47 = vmul.f32 %v12097_v40, %v12097_v40  ;;  %10068 = vmatpush.msrb.mxu2 %v6791_v38  ;;  %v6797_v38 = vld [vmem:[#allocation5 + $0xd20] sm:$0xff] }
 0x3dc   : > { %v12355_v51 = vmul.f32 %v12098_v43, %v12098_v43  ;;  %13023 = vmatmul.msk.f32.vlgmr.msrb.gmra.mxu0 %vm6890_vm1, %v13671_v2  ;;  %13024 = vmatmul.msk.f32.vlgmr.msrb.gmra.mxu1 %vm6890_vm1, %v13671_v2  ;;  %v12356_v55 = vmul.f32 %v12099_v44, %v12099_v44  ;;  %v6798_v43 = vld [vmem:[#allocation5 + $0xd28] sm:$0xff] }
 0x3dd   : > { %v12609_v54 = vadd.f32 %v12608_v46, %v12354_v47  ;;  %13026 = vmatmul.msk.f32.vlgmr.msrb.gmra.mxu3 %vm6890_vm1, %v13671_v2  ;;  %v8631_v56 = vpop.f32.mrf.mxu2  ;;  %10028 = vmatpush.msrb.mxu0 %v6789_v45  ;;  %v6543_v45 = vld [vmem:[#allocation5 + $0x530] sm:$0xff]  ;;  %v6541_v46 = vld [vmem:[#allocation5 + $0x520] sm:$0xff] }
 0x3de   : > { %v12100_v59 = vsub.f32 %v6202_v48, %v8631_v56  ;;  %10088 = vmatpush.msrb.mxu3 %v6792_v49  ;;  %10048 = vmatpush.msrb.mxu1 %v6790_v50  ;;  %v6544_v50 = vld [vmem:[#allocation5 + $0x538] sm:$0xff]  ;;  %v6213_v56 = vld [vmem:[#allocation2 + $0x308] sm:$0xff] }
 0x3df   : > { %v12610_v61 = vadd.f32 %v12609_v54, %v12355_v51  ;;  %10069 = vmatpush.msrb.mxu2 %v6535_v52  ;;  %10029 = vmatpush.msrb.mxu0 %v6533_v53  ;;  %v6542_v51 = vld [vmem:[#allocation5 + $0x528] sm:$0xff]  ;;  %v6211_v53 = vld [vmem:[#allocation2 + $0x2f8] sm:$0xff] }
 0x3e0   : > { %v12357_v0 = vmul.f32 %v12100_v59, %v12100_v59  ;;  %v8651_v1 = vpop.f32.mrf.mxu3  ;;  %10089 = vmatpush.msrb.mxu3 %v6536_v57  ;;  %10049 = vmatpush.msrb.mxu1 %v6534_v58  ;;  %v6803_v59 = vld [vmem:[#allocation5 + $0xd50] sm:$0xff] }
 0x3e1   : > { %v12611_v4 = vadd.f32 %v12610_v61, %v12356_v55  ;;  %v12101_v17 = vsub.f32 %v6203_v60, %v8651_v1  ;;  %v8671_v5 = vpop.f32.mrf.mxu0  ;;  %v8691_v6 = vpop.f32.mrf.mxu1  ;;  %v6212_v55 = vld [vmem:[#allocation2 + $0x300] sm:$0xff] }
 0x3e2   : > { %v12102_v8 = vsub.f32 %v6204_v62, %v8671_v5  ;;  %13029 = vmatmul.msk.f32.vlgmr.msra.gmra.mxu2 %vm6890_vm1, %v13671_v2  ;;  %v12103_v9 = vsub.f32 %v6205_v63, %v8691_v6  ;;  %v6214_v5 = vld [vmem:[#allocation2 + $0x310] sm:$0xff]  ;;  %v6804_v6 = vld [vmem:[#allocation5 + $0xd58] sm:$0xff] }
 0x3e3   : > { %v12612_v11 = vadd.f32 %v12611_v4, %v12357_v0  ;;  %v12358_v12 = vmul.f32 %v12101_v17, %v12101_v17  ;;  %10148 = vmatpush.msra.mxu2 %v6795_v3  ;;  %v6801_v3 = vld [vmem:[#allocation5 + $0xd40] sm:$0xff] }
 0x3e4   : > { %v12359_v16 = vmul.f32 %v12102_v8, %v12102_v8  ;;  %13027 = vmatmul.msk.f32.vlgmr.msra.gmra.mxu0 %vm6890_vm1, %v13671_v2  ;;  %13028 = vmatmul.msk.f32.vlgmr.msra.gmra.mxu1 %vm6890_vm1, %v13671_v2  ;;  %v12360_v20 = vmul.f32 %v12103_v9, %v12103_v9  ;;  %v6802_v8 = vld [vmem:[#allocation5 + $0xd48] sm:$0xff] }
 0x3e5   : > { %v12613_v7 = vadd.f32 %v12612_v11, %v12358_v12  ;;  %13030 = vmatmul.msk.f32.vlgmr.msra.gmra.mxu3 %vm6890_vm1, %v13671_v2  ;;  %v8711_v21 = vpop.f32.mrf.mxu2  ;;  %10108 = vmatpush.msra.mxu0 %v6793_v10  ;;  %v6547_v10 = vld [vmem:[#allocation5 + $0x550] sm:$0xff]  ;;  %v6545_v11 = vld [vmem:[#allocation5 + $0x540] sm:$0xff] }
 0x3e6   : > { %v12104_v24 = vsub.f32 %v6206_v13, %v8711_v21  ;;  %10168 = vmatpush.msra.mxu3 %v6796_v14  ;;  %10128 = vmatpush.msra.mxu1 %v6794_v15  ;;  %v6548_v15 = vld [vmem:[#allocation5 + $0x558] sm:$0xff]  ;;  %v6217_v21 = vld [vmem:[#allocation2 + $0x328] sm:$0xff] }
 0x3e7   : > { %v12614_v26 = vadd.f32 %v12613_v7, %v12359_v16  ;;  %10149 = vmatpush.msra.mxu2 %v6539_v18  ;;  %10109 = vmatpush.msra.mxu0 %v6537_v19  ;;  %v6546_v16 = vld [vmem:[#allocation5 + $0x548] sm:$0xff]  ;;  %v6215_v19 = vld [vmem:[#allocation2 + $0x318] sm:$0xff] }
 0x3e8   : > { %v12361_v29 = vmul.f32 %v12104_v24, %v12104_v24  ;;  %v8731_v30 = vpop.f32.mrf.mxu3  ;;  %10169 = vmatpush.msra.mxu3 %v6540_v22  ;;  %10129 = vmatpush.msra.mxu1 %v6538_v23  ;;  %v6807_v24 = vld [vmem:[#allocation5 + $0xd70] sm:$0xff] }
 0x3e9   : > { %v12615_v32 = vadd.f32 %v12614_v26, %v12360_v20  ;;  %v12105_v33 = vsub.f32 %v6207_v25, %v8731_v30  ;;  %v8751_v34 = vpop.f32.mrf.mxu0  ;;  %v8771_v35 = vpop.f32.mrf.mxu1  ;;  %v6216_v20 = vld [vmem:[#allocation2 + $0x320] sm:$0xff] }
 0x3ea   : > { %v12106_v36 = vsub.f32 %v6208_v27, %v8751_v34  ;;  %13033 = vmatmul.msk.f32.vlgmr.msrb.gmra.mxu2 %vm6890_vm1, %v13671_v2  ;;  %v12107_v37 = vsub.f32 %v6209_v28, %v8771_v35  ;;  %v6218_v34 = vld [vmem:[#allocation2 + $0x330] sm:$0xff]  ;;  %v6808_v35 = vld [vmem:[#allocation5 + $0xd78] sm:$0xff] }
 0x3eb   : > { %v12616_v39 = vadd.f32 %v12615_v32, %v12361_v29  ;;  %v12362_v40 = vmul.f32 %v12105_v33, %v12105_v33  ;;  %10228 = vmatpush.msrb.mxu2 %v6799_v31  ;;  %v6805_v31 = vld [vmem:[#allocation5 + $0xd60] sm:$0xff] }
 0x3ec   : > { %v12363_v44 = vmul.f32 %v12106_v36, %v12106_v36  ;;  %13031 = vmatmul.msk.f32.vlgmr.msrb.gmra.mxu0 %vm6890_vm1, %v13671_v2  ;;  %13032 = vmatmul.msk.f32.vlgmr.msrb.gmra.mxu1 %vm6890_vm1, %v13671_v2  ;;  %v12364_v48 = vmul.f32 %v12107_v37, %v12107_v37  ;;  %v6806_v36 = vld [vmem:[#allocation5 + $0xd68] sm:$0xff] }
 0x3ed   : > { %v12617_v47 = vadd.f32 %v12616_v39, %v12362_v40  ;;  %13034 = vmatmul.msk.f32.vlgmr.msrb.gmra.mxu3 %vm6890_vm1, %v13671_v2  ;;  %v8791_v49 = vpop.f32.mrf.mxu2  ;;  %10188 = vmatpush.msrb.mxu0 %v6797_v38  ;;  %v6551_v38 = vld [vmem:[#allocation5 + $0x570] sm:$0xff]  ;;  %v6549_v39 = vld [vmem:[#allocation5 + $0x560] sm:$0xff] }
 0x3ee   : > { %v12108_v52 = vsub.f32 %v6210_v41, %v8791_v49  ;;  %10248 = vmatpush.msrb.mxu3 %v6800_v42  ;;  %10208 = vmatpush.msrb.mxu1 %v6798_v43  ;;  %v6552_v43 = vld [vmem:[#allocation5 + $0x578] sm:$0xff]  ;;  %v6221_v49 = vld [vmem:[#allocation2 + $0x348] sm:$0xff] }
 0x3ef   : > { %v12618_v54 = vadd.f32 %v12617_v47, %v12363_v44  ;;  %10229 = vmatpush.msrb.mxu2 %v6543_v45  ;;  %10189 = vmatpush.msrb.mxu0 %v6541_v46  ;;  %v6550_v44 = vld [vmem:[#allocation5 + $0x568] sm:$0xff]  ;;  %v6219_v46 = vld [vmem:[#allocation2 + $0x338] sm:$0xff] }
 0x3f0   : > { %v12365_v57 = vmul.f32 %v12108_v52, %v12108_v52  ;;  %v8811_v58 = vpop.f32.mrf.mxu3  ;;  %10249 = vmatpush.msrb.mxu3 %v6544_v50  ;;  %10209 = vmatpush.msrb.mxu1 %v6542_v51  ;;  %v6811_v52 = vld [vmem:[#allocation5 + $0xd90] sm:$0xff] }
 0x3f1   : > { %v12619_v60 = vadd.f32 %v12618_v54, %v12364_v48  ;;  %v12109_v61 = vsub.f32 %v6211_v53, %v8811_v58  ;;  %v8831_v62 = vpop.f32.mrf.mxu0  ;;  %v8851_v63 = vpop.f32.mrf.mxu1  ;;  %v6220_v48 = vld [vmem:[#allocation2 + $0x340] sm:$0xff] }
 0x3f2   : > { %v12110_v0 = vsub.f32 %v6212_v55, %v8831_v62  ;;  %13037 = vmatmul.msk.f32.vlgmr.msra.gmra.mxu2 %vm6890_vm1, %v13671_v2  ;;  %v12111_v1 = vsub.f32 %v6213_v56, %v8851_v63  ;;  %v6222_v62 = vld [vmem:[#allocation2 + $0x350] sm:$0xff]  ;;  %v6812_v63 = vld [vmem:[#allocation5 + $0xd98] sm:$0xff] }
 0x3f3   : > { %v12620_v4 = vadd.f32 %v12619_v60, %v12365_v57  ;;  %v12366_v17 = vmul.f32 %v12109_v61, %v12109_v61  ;;  %10308 = vmatpush.msra.mxu2 %v6803_v59  ;;  %v6809_v59 = vld [vmem:[#allocation5 + $0xd80] sm:$0xff] }
 0x3f4   : > { %v12367_v9 = vmul.f32 %v12110_v0, %v12110_v0  ;;  %13035 = vmatmul.msk.f32.vlgmr.msra.gmra.mxu0 %vm6890_vm1, %v13671_v2  ;;  %13036 = vmatmul.msk.f32.vlgmr.msra.gmra.mxu1 %vm6890_vm1, %v13671_v2  ;;  %v12368_v13 = vmul.f32 %v12111_v1, %v12111_v1  ;;  %v6810_v0 = vld [vmem:[#allocation5 + $0xd88] sm:$0xff] }
 0x3f5   : > { %v12621_v12 = vadd.f32 %v12620_v4, %v12366_v17  ;;  %13038 = vmatmul.msk.f32.vlgmr.msra.gmra.mxu3 %vm6890_vm1, %v13671_v2  ;;  %v8871_v14 = vpop.f32.mrf.mxu2  ;;  %10268 = vmatpush.msra.mxu0 %v6801_v3  ;;  %v6555_v3 = vld [vmem:[#allocation5 + $0x590] sm:$0xff]  ;;  %v6553_v4 = vld [vmem:[#allocation5 + $0x580] sm:$0xff] }
 0x3f6   : > { %v12112_v18 = vsub.f32 %v6214_v5, %v8871_v14  ;;  %10328 = vmatpush.msra.mxu3 %v6804_v6  ;;  %10288 = vmatpush.msra.mxu1 %v6802_v8  ;;  %v6556_v8 = vld [vmem:[#allocation5 + $0x598] sm:$0xff]  ;;  %v6225_v14 = vld [vmem:[#allocation2 + $0x368] sm:$0xff] }
 0x3f7   : > { %v12622_v7 = vadd.f32 %v12621_v12, %v12367_v9  ;;  %10309 = vmatpush.msra.mxu2 %v6547_v10  ;;  %10269 = vmatpush.msra.mxu0 %v6545_v11  ;;  %v6554_v9 = vld [vmem:[#allocation5 + $0x588] sm:$0xff]  ;;  %v6223_v11 = vld [vmem:[#allocation2 + $0x358] sm:$0xff] }
 0x3f8   : > { %v12369_v22 = vmul.f32 %v12112_v18, %v12112_v18  ;;  %v8891_v23 = vpop.f32.mrf.mxu3  ;;  %10329 = vmatpush.msra.mxu3 %v6548_v15  ;;  %10289 = vmatpush.msra.mxu1 %v6546_v16  ;;  %v6815_v18 = vld [vmem:[#allocation5 + $0xdb0] sm:$0xff] }
 0x3f9   : > { %v12623_v25 = vadd.f32 %v12622_v7, %v12368_v13  ;;  %v12113_v26 = vsub.f32 %v6215_v19, %v8891_v23  ;;  %v8911_v27 = vpop.f32.mrf.mxu0  ;;  %v8931_v28 = vpop.f32.mrf.mxu1  ;;  %v6224_v13 = vld [vmem:[#allocation2 + $0x360] sm:$0xff] }
 0x3fa   : > { %v12114_v29 = vsub.f32 %v6216_v20, %v8911_v27  ;;  %13041 = vmatmul.msk.f32.vlgmr.msrb.gmra.mxu2 %vm6890_vm1, %v13671_v2  ;;  %v12115_v30 = vsub.f32 %v6217_v21, %v8931_v28  ;;  %v6226_v27 = vld [vmem:[#allocation2 + $0x370] sm:$0xff]  ;;  %v6816_v28 = vld [vmem:[#allocation5 + $0xdb8] sm:$0xff] }
 0x3fb   : > { %v12624_v32 = vadd.f32 %v12623_v25, %v12369_v22  ;;  %v12370_v33 = vmul.f32 %v12113_v26, %v12113_v26  ;;  %10388 = vmatpush.msrb.mxu2 %v6807_v24  ;;  %v6813_v24 = vld [vmem:[#allocation5 + $0xda0] sm:$0xff] }
 0x3fc   : > { %v12371_v37 = vmul.f32 %v12114_v29, %v12114_v29  ;;  %13039 = vmatmul.msk.f32.vlgmr.msrb.gmra.mxu0 %vm6890_vm1, %v13671_v2  ;;  %13040 = vmatmul.msk.f32.vlgmr.msrb.gmra.mxu1 %vm6890_vm1, %v13671_v2  ;;  %v12372_v41 = vmul.f32 %v12115_v30, %v12115_v30  ;;  %v6814_v29 = vld [vmem:[#allocation5 + $0xda8] sm:$0xff] }
 0x3fd   : > { %v12625_v40 = vadd.f32 %v12624_v32, %v12370_v33  ;;  %13042 = vmatmul.msk.f32.vlgmr.msrb.gmra.mxu3 %vm6890_vm1, %v13671_v2  ;;  %v8951_v42 = vpop.f32.mrf.mxu2  ;;  %10348 = vmatpush.msrb.mxu0 %v6805_v31  ;;  %v6559_v31 = vld [vmem:[#allocation5 + $0x5b0] sm:$0xff]  ;;  %v6557_v32 = vld [vmem:[#allocation5 + $0x5a0] sm:$0xff] }
 0x3fe   : > { %v12116_v45 = vsub.f32 %v6218_v34, %v8951_v42  ;;  %10408 = vmatpush.msrb.mxu3 %v6808_v35  ;;  %10368 = vmatpush.msrb.mxu1 %v6806_v36  ;;  %v6560_v36 = vld [vmem:[#allocation5 + $0x5b8] sm:$0xff]  ;;  %v6229_v42 = vld [vmem:[#allocation2 + $0x388] sm:$0xff] }
 0x3ff   : > { %v12626_v47 = vadd.f32 %v12625_v40, %v12371_v37  ;;  %10389 = vmatpush.msrb.mxu2 %v6551_v38  ;;  %10349 = vmatpush.msrb.mxu0 %v6549_v39  ;;  %v6558_v37 = vld [vmem:[#allocation5 + $0x5a8] sm:$0xff]  ;;  %v6227_v39 = vld [vmem:[#allocation2 + $0x378] sm:$0xff] }
 0x400   : > { %v12373_v50 = vmul.f32 %v12116_v45, %v12116_v45  ;;  %v8971_v51 = vpop.f32.mrf.mxu3  ;;  %10409 = vmatpush.msrb.mxu3 %v6552_v43  ;;  %10369 = vmatpush.msrb.mxu1 %v6550_v44  ;;  %v6819_v45 = vld [vmem:[#allocation5 + $0xdd0] sm:$0xff] }
 0x401   : > { %v12627_v53 = vadd.f32 %v12626_v47, %v12372_v41  ;;  %v12117_v54 = vsub.f32 %v6219_v46, %v8971_v51  ;;  %v8991_v55 = vpop.f32.mrf.mxu0  ;;  %v9011_v56 = vpop.f32.mrf.mxu1  ;;  %v6228_v41 = vld [vmem:[#allocation2 + $0x380] sm:$0xff] }
 0x402   : > { %v12118_v57 = vsub.f32 %v6220_v48, %v8991_v55  ;;  %13045 = vmatmul.msk.f32.vlgmr.msra.gmra.mxu2 %vm6890_vm1, %v13671_v2  ;;  %v12119_v58 = vsub.f32 %v6221_v49, %v9011_v56  ;;  %v6230_v55 = vld [vmem:[#allocation2 + $0x390] sm:$0xff]  ;;  %v6820_v56 = vld [vmem:[#allocation5 + $0xdd8] sm:$0xff] }
 0x403   : > { %v12628_v60 = vadd.f32 %v12627_v53, %v12373_v50  ;;  %v12374_v61 = vmul.f32 %v12117_v54, %v12117_v54  ;;  %10468 = vmatpush.msra.mxu2 %v6811_v52  ;;  %v6817_v52 = vld [vmem:[#allocation5 + $0xdc0] sm:$0xff] }
 0x404   : > { %v12375_v1 = vmul.f32 %v12118_v57, %v12118_v57  ;;  %13043 = vmatmul.msk.f32.vlgmr.msra.gmra.mxu0 %vm6890_vm1, %v13671_v2  ;;  %13044 = vmatmul.msk.f32.vlgmr.msra.gmra.mxu1 %vm6890_vm1, %v13671_v2  ;;  %v12376_v5 = vmul.f32 %v12119_v58, %v12119_v58  ;;  %v6818_v57 = vld [vmem:[#allocation5 + $0xdc8] sm:$0xff] }
 0x405   : > { %v12629_v17 = vadd.f32 %v12628_v60, %v12374_v61  ;;  %13046 = vmatmul.msk.f32.vlgmr.msra.gmra.mxu3 %vm6890_vm1, %v13671_v2  ;;  %v9031_v6 = vpop.f32.mrf.mxu2  ;;  %10428 = vmatpush.msra.mxu0 %v6809_v59  ;;  %v6563_v59 = vld [vmem:[#allocation5 + $0x5d0] sm:$0xff]  ;;  %v6561_v60 = vld [vmem:[#allocation5 + $0x5c0] sm:$0xff] }
 0x406   : > { %v12120_v10 = vsub.f32 %v6222_v62, %v9031_v6  ;;  %10488 = vmatpush.msra.mxu3 %v6812_v63  ;;  %10448 = vmatpush.msra.mxu1 %v6810_v0  ;;  %v6564_v0 = vld [vmem:[#allocation5 + $0x5d8] sm:$0xff]  ;;  %v6233_v6 = vld [vmem:[#allocation2 + $0x3a8] sm:$0xff] }
 0x407   : > { %v12630_v12 = vadd.f32 %v12629_v17, %v12375_v1  ;;  %10469 = vmatpush.msra.mxu2 %v6555_v3  ;;  %10429 = vmatpush.msra.mxu0 %v6553_v4  ;;  %v6562_v1 = vld [vmem:[#allocation5 + $0x5c8] sm:$0xff]  ;;  %v6231_v4 = vld [vmem:[#allocation2 + $0x398] sm:$0xff] }
 0x408   : > { %v12377_v15 = vmul.f32 %v12120_v10, %v12120_v10  ;;  %v9051_v16 = vpop.f32.mrf.mxu3  ;;  %10489 = vmatpush.msra.mxu3 %v6556_v8  ;;  %10449 = vmatpush.msra.mxu1 %v6554_v9  ;;  %v6823_v10 = vld [vmem:[#allocation5 + $0xdf0] sm:$0xff] }
 0x409   : > { %v12631_v19 = vadd.f32 %v12630_v12, %v12376_v5  ;;  %v12121_v7 = vsub.f32 %v6223_v11, %v9051_v16  ;;  %v9071_v20 = vpop.f32.mrf.mxu0  ;;  %v9091_v21 = vpop.f32.mrf.mxu1  ;;  %v6232_v5 = vld [vmem:[#allocation2 + $0x3a0] sm:$0xff] }
 0x40a   : > { %v12122_v22 = vsub.f32 %v6224_v13, %v9071_v20  ;;  %13049 = vmatmul.msk.f32.vlgmr.msrb.gmra.mxu2 %vm6890_vm1, %v13671_v2  ;;  %v12123_v23 = vsub.f32 %v6225_v14, %v9091_v21  ;;  %v6234_v20 = vld [vmem:[#allocation2 + $0x3b0] sm:$0xff]  ;;  %v6824_v21 = vld [vmem:[#allocation5 + $0xdf8] sm:$0xff] }
 0x40b   : > { %v12632_v25 = vadd.f32 %v12631_v19, %v12377_v15  ;;  %v12378_v26 = vmul.f32 %v12121_v7, %v12121_v7  ;;  %10548 = vmatpush.msrb.mxu2 %v6815_v18  ;;  %v6821_v18 = vld [vmem:[#allocation5 + $0xde0] sm:$0xff] }
 0x40c   : > { %v12379_v30 = vmul.f32 %v12122_v22, %v12122_v22  ;;  %13047 = vmatmul.msk.f32.vlgmr.msrb.gmra.mxu0 %vm6890_vm1, %v13671_v2  ;;  %13048 = vmatmul.msk.f32.vlgmr.msrb.gmra.mxu1 %vm6890_vm1, %v13671_v2  ;;  %v12380_v34 = vmul.f32 %v12123_v23, %v12123_v23  ;;  %v6822_v22 = vld [vmem:[#allocation5 + $0xde8] sm:$0xff] }
 0x40d   : > { %v12633_v33 = vadd.f32 %v12632_v25, %v12378_v26  ;;  %13050 = vmatmul.msk.f32.vlgmr.msrb.gmra.mxu3 %vm6890_vm1, %v13671_v2  ;;  %v9111_v35 = vpop.f32.mrf.mxu2  ;;  %10508 = vmatpush.msrb.mxu0 %v6813_v24  ;;  %v6567_v24 = vld [vmem:[#allocation5 + $0x5f0] sm:$0xff]  ;;  %v6565_v25 = vld [vmem:[#allocation5 + $0x5e0] sm:$0xff] }
 0x40e   : > { %v12124_v38 = vsub.f32 %v6226_v27, %v9111_v35  ;;  %10568 = vmatpush.msrb.mxu3 %v6816_v28  ;;  %10528 = vmatpush.msrb.mxu1 %v6814_v29  ;;  %v6568_v29 = vld [vmem:[#allocation5 + $0x5f8] sm:$0xff]  ;;  %v6237_v35 = vld [vmem:[#allocation2 + $0x3c8] sm:$0xff] }
 0x40f   : > { %v12634_v40 = vadd.f32 %v12633_v33, %v12379_v30  ;;  %10549 = vmatpush.msrb.mxu2 %v6559_v31  ;;  %10509 = vmatpush.msrb.mxu0 %v6557_v32  ;;  %v6566_v30 = vld [vmem:[#allocation5 + $0x5e8] sm:$0xff]  ;;  %v6235_v32 = vld [vmem:[#allocation2 + $0x3b8] sm:$0xff] }
 0x410   : > { %v12381_v43 = vmul.f32 %v12124_v38, %v12124_v38  ;;  %v9131_v44 = vpop.f32.mrf.mxu3  ;;  %10569 = vmatpush.msrb.mxu3 %v6560_v36  ;;  %10529 = vmatpush.msrb.mxu1 %v6558_v37  ;;  %v6827_v38 = vld [vmem:[#allocation5 + $0xe10] sm:$0xff] }
 0x411   : > { %v12635_v46 = vadd.f32 %v12634_v40, %v12380_v34  ;;  %v12125_v47 = vsub.f32 %v6227_v39, %v9131_v44  ;;  %v9151_v48 = vpop.f32.mrf.mxu0  ;;  %v9171_v49 = vpop.f32.mrf.mxu1  ;;  %v6236_v34 = vld [vmem:[#allocation2 + $0x3c0] sm:$0xff] }
 0x412   : > { %v12126_v50 = vsub.f32 %v6228_v41, %v9151_v48  ;;  %13053 = vmatmul.msk.f32.vlgmr.msra.gmra.mxu2 %vm6890_vm1, %v13671_v2  ;;  %v12127_v51 = vsub.f32 %v6229_v42, %v9171_v49  ;;  %v6238_v48 = vld [vmem:[#allocation2 + $0x3d0] sm:$0xff]  ;;  %v6828_v49 = vld [vmem:[#allocation5 + $0xe18] sm:$0xff] }
 0x413   : > { %v12636_v53 = vadd.f32 %v12635_v46, %v12381_v43  ;;  %v12382_v54 = vmul.f32 %v12125_v47, %v12125_v47  ;;  %10628 = vmatpush.msra.mxu2 %v6819_v45  ;;  %v6825_v45 = vld [vmem:[#allocation5 + $0xe00] sm:$0xff] }
 0x414   : > { %v12383_v58 = vmul.f32 %v12126_v50, %v12126_v50  ;;  %13051 = vmatmul.msk.f32.vlgmr.msra.gmra.mxu0 %vm6890_vm1, %v13671_v2  ;;  %13052 = vmatmul.msk.f32.vlgmr.msra.gmra.mxu1 %vm6890_vm1, %v13671_v2  ;;  %v12384_v62 = vmul.f32 %v12127_v51, %v12127_v51  ;;  %v6826_v50 = vld [vmem:[#allocation5 + $0xe08] sm:$0xff] }
 0x415   : > { %v12637_v61 = vadd.f32 %v12636_v53, %v12382_v54  ;;  %13054 = vmatmul.msk.f32.vlgmr.msra.gmra.mxu3 %vm6890_vm1, %v13671_v2  ;;  %v9191_v63 = vpop.f32.mrf.mxu2  ;;  %10588 = vmatpush.msra.mxu0 %v6817_v52  ;;  %v13777_v52 = vld [vmem:[#allocation7] sm:$0xff]  ;;  %v6571_v53 = vld [vmem:[#allocation5 + $0x610] sm:$0xff] }
 0x416   : > { %v12128_v3 = vsub.f32 %v6230_v55, %v9191_v63  ;;  %10648 = vmatpush.msra.mxu3 %v6820_v56  ;;  %10608 = vmatpush.msra.mxu1 %v6818_v57  ;;  %v6569_v54 = vld [vmem:[#allocation5 + $0x600] sm:$0xff]  ;;  %v6572_v57 = vld [vmem:[#allocation5 + $0x618] sm:$0xff]  ;;  %v6241_v63 = vld [vmem:[#allocation2 + $0x3e8] sm:$0xff] }
 0x417   : > { %v12638_v17 = vadd.f32 %v12637_v61, %v12383_v58  ;;  %10629 = vmatpush.msra.mxu2 %v6563_v59  ;;  %10589 = vmatpush.msra.mxu0 %v6561_v60  ;;  %v6570_v58 = vld [vmem:[#allocation5 + $0x608] sm:$0xff]  ;;  %v6239_v60 = vld [vmem:[#allocation2 + $0x3d8] sm:$0xff] }
 0x418   : > { %v12385_v8 = vmul.f32 %v12128_v3, %v12128_v3  ;;  %v9211_v9 = vpop.f32.mrf.mxu3  ;;  %10649 = vmatpush.msra.mxu3 %v6564_v0  ;;  %10609 = vmatpush.msra.mxu1 %v6562_v1  ;;  %v6831_v3 = vld [vmem:[#allocation5 + $0xe30] sm:$0xff] }
 0x419   : > { %v12639_v11 = vadd.f32 %v12638_v17, %v12384_v62  ;;  %v12129_v12 = vsub.f32 %v6231_v4, %v9211_v9  ;;  %v9231_v13 = vpop.f32.mrf.mxu0  ;;  %v9251_v14 = vpop.f32.mrf.mxu1  ;;  %v6240_v62 = vld [vmem:[#allocation2 + $0x3e0] sm:$0xff] }
 0x41a   : > { %v12130_v15 = vsub.f32 %v6232_v5, %v9231_v13  ;;  %13057 = vmatmul.msk.f32.vlgmr.msrb.gmra.mxu2 %vm6890_vm1, %v13671_v2  ;;  %v12131_v16 = vsub.f32 %v6233_v6, %v9251_v14  ;;  %v6242_v13 = vld [vmem:[#allocation2 + $0x3f0] sm:$0xff]  ;;  %v6832_v14 = vld [vmem:[#allocation5 + $0xe38] sm:$0xff] }
 0x41b   : > { %v12640_v19 = vadd.f32 %v12639_v11, %v12385_v8  ;;  %v12386_v7 = vmul.f32 %v12129_v12, %v12129_v12  ;;  %10708 = vmatpush.msrb.mxu2 %v6823_v10  ;;  %v6829_v10 = vld [vmem:[#allocation5 + $0xe20] sm:$0xff] }
 0x41c   : > { %v12387_v23 = vmul.f32 %v12130_v15, %v12130_v15  ;;  %13055 = vmatmul.msk.f32.vlgmr.msrb.gmra.mxu0 %vm6890_vm1, %v13671_v2  ;;  %13056 = vmatmul.msk.f32.vlgmr.msrb.gmra.mxu1 %vm6890_vm1, %v13671_v2  ;;  %v12388_v27 = vmul.f32 %v12131_v16, %v12131_v16  ;;  %v6830_v15 = vld [vmem:[#allocation5 + $0xe28] sm:$0xff] }
 0x41d   : > { %v12641_v26 = vadd.f32 %v12640_v19, %v12386_v7  ;;  %13058 = vmatmul.msk.f32.vlgmr.msrb.gmra.mxu3 %vm6890_vm1, %v13671_v2  ;;  %v9271_v28 = vpop.f32.mrf.mxu2  ;;  %10668 = vmatpush.msrb.mxu0 %v6821_v18  ;;  %v6575_v18 = vld [vmem:[#allocation5 + $0x630] sm:$0xff]  ;;  %v6573_v19 = vld [vmem:[#allocation5 + $0x620] sm:$0xff] }
 0x41e   : > { %v12132_v31 = vsub.f32 %v6234_v20, %v9271_v28  ;;  %10728 = vmatpush.msrb.mxu3 %v6824_v21  ;;  %10688 = vmatpush.msrb.mxu1 %v6822_v22  ;;  %v6576_v22 = vld [vmem:[#allocation5 + $0x638] sm:$0xff]  ;;  %v6245_v28 = vld [vmem:[#allocation2 + $0x408] sm:$0xff] }
 0x41f   : > { %v12642_v33 = vadd.f32 %v12641_v26, %v12387_v23  ;;  %10709 = vmatpush.msrb.mxu2 %v6567_v24  ;;  %10669 = vmatpush.msrb.mxu0 %v6565_v25  ;;  %v6574_v23 = vld [vmem:[#allocation5 + $0x628] sm:$0xff]  ;;  %v6243_v25 = vld [vmem:[#allocation2 + $0x3f8] sm:$0xff] }
 0x420   : > { %v12389_v36 = vmul.f32 %v12132_v31, %v12132_v31  ;;  %v9291_v37 = vpop.f32.mrf.mxu3  ;;  %10729 = vmatpush.msrb.mxu3 %v6568_v29  ;;  %10689 = vmatpush.msrb.mxu1 %v6566_v30  ;;  %v6835_v31 = vld [vmem:[#allocation5 + $0xe50] sm:$0xff] }
 0x421   : > { %v12643_v39 = vadd.f32 %v12642_v33, %v12388_v27  ;;  %v12133_v40 = vsub.f32 %v6235_v32, %v9291_v37  ;;  %v9311_v41 = vpop.f32.mrf.mxu0  ;;  %v9331_v42 = vpop.f32.mrf.mxu1  ;;  %v6244_v27 = vld [vmem:[#allocation2 + $0x400] sm:$0xff] }
 0x422   : > { %v12134_v43 = vsub.f32 %v6236_v34, %v9311_v41  ;;  %13061 = vmatmul.msk.f32.vlgmr.msra.gmra.mxu2 %vm6890_vm1, %v13671_v2  ;;  %v12135_v44 = vsub.f32 %v6237_v35, %v9331_v42  ;;  %v6246_v41 = vld [vmem:[#allocation2 + $0x410] sm:$0xff]  ;;  %v6836_v42 = vld [vmem:[#allocation5 + $0xe58] sm:$0xff] }
 0x423   : > { %v12644_v46 = vadd.f32 %v12643_v39, %v12389_v36  ;;  %v12390_v47 = vmul.f32 %v12133_v40, %v12133_v40  ;;  %10788 = vmatpush.msra.mxu2 %v6827_v38  ;;  %v6833_v38 = vld [vmem:[#allocation5 + $0xe40] sm:$0xff] }
 0x424   : > { %v12391_v51 = vmul.f32 %v12134_v43, %v12134_v43  ;;  %13059 = vmatmul.msk.f32.vlgmr.msra.gmra.mxu0 %vm6890_vm1, %v13777_v52  ;;  %13060 = vmatmul.msk.f32.vlgmr.msra.gmra.mxu1 %vm6890_vm1, %v13777_v52  ;;  %v12392_v55 = vmul.f32 %v12135_v44, %v12135_v44  ;;  %v6834_v43 = vld [vmem:[#allocation5 + $0xe48] sm:$0xff] }
 0x425   : > { %v12645_v2 = vadd.f32 %v12644_v46, %v12390_v47  ;;  %13062 = vmatmul.msk.f32.vlgmr.msra.gmra.mxu3 %vm6890_vm1, %v13777_v52  ;;  %v9351_v56 = vpop.f32.mrf.mxu2  ;;  %10748 = vmatpush.msra.mxu0 %v6825_v45  ;;  %v6579_v45 = vld [vmem:[#allocation5 + $0x650] sm:$0xff]  ;;  %v6577_v46 = vld [vmem:[#allocation5 + $0x640] sm:$0xff] }
 0x426   : > { %v12136_v59 = vsub.f32 %v6238_v48, %v9351_v56  ;;  %10808 = vmatpush.msra.mxu3 %v6828_v49  ;;  %10768 = vmatpush.msra.mxu1 %v6826_v50  ;;  %v6580_v50 = vld [vmem:[#allocation5 + $0x658] sm:$0xff]  ;;  %v6249_v56 = vld [vmem:[#allocation2 + $0x428] sm:$0xff] }
 0x427   : > { %v12646_v61 = vadd.f32 %v12645_v2, %v12391_v51  ;;  %10789 = vmatpush.msra.mxu2 %v6571_v53  ;;  %10749 = vmatpush.msra.mxu0 %v6569_v54  ;;  %v6578_v51 = vld [vmem:[#allocation5 + $0x648] sm:$0xff]  ;;  %v6247_v54 = vld [vmem:[#allocation2 + $0x418] sm:$0xff] }
 0x428   : > { %v12393_v0 = vmul.f32 %v12136_v59, %v12136_v59  ;;  %v9371_v1 = vpop.f32.mrf.mxu3  ;;  %10809 = vmatpush.msra.mxu3 %v6572_v57  ;;  %10769 = vmatpush.msra.mxu1 %v6570_v58  ;;  %v6839_v59 = vld [vmem:[#allocation5 + $0xe70] sm:$0xff] }
 0x429   : > { %v12647_v4 = vadd.f32 %v12646_v61, %v12392_v55  ;;  %v12137_v17 = vsub.f32 %v6239_v60, %v9371_v1  ;;  %v9391_v5 = vpop.f32.mrf.mxu0  ;;  %v9411_v6 = vpop.f32.mrf.mxu1  ;;  %v6248_v55 = vld [vmem:[#allocation2 + $0x420] sm:$0xff] }
 0x42a   : > { %v12138_v8 = vsub.f32 %v6240_v62, %v9391_v5  ;;  %13065 = vmatmul.msk.f32.vlgmr.msrb.gmra.mxu2 %vm6890_vm1, %v13777_v52  ;;  %v12139_v9 = vsub.f32 %v6241_v63, %v9411_v6  ;;  %v6250_v5 = vld [vmem:[#allocation2 + $0x430] sm:$0xff]  ;;  %v6840_v6 = vld [vmem:[#allocation5 + $0xe78] sm:$0xff] }
 0x42b   : > { %v12648_v11 = vadd.f32 %v12647_v4, %v12393_v0  ;;  %v12394_v12 = vmul.f32 %v12137_v17, %v12137_v17  ;;  %10868 = vmatpush.msrb.mxu2 %v6831_v3  ;;  %v6837_v3 = vld [vmem:[#allocation5 + $0xe60] sm:$0xff] }
 0x42c   : > { %v12395_v16 = vmul.f32 %v12138_v8, %v12138_v8  ;;  %13063 = vmatmul.msk.f32.vlgmr.msrb.gmra.mxu0 %vm6890_vm1, %v13777_v52  ;;  %13064 = vmatmul.msk.f32.vlgmr.msrb.gmra.mxu1 %vm6890_vm1, %v13777_v52  ;;  %v12396_v20 = vmul.f32 %v12139_v9, %v12139_v9  ;;  %v6838_v8 = vld [vmem:[#allocation5 + $0xe68] sm:$0xff] }
 0x42d   : > { %v12649_v7 = vadd.f32 %v12648_v11, %v12394_v12  ;;  %13066 = vmatmul.msk.f32.vlgmr.msrb.gmra.mxu3 %vm6890_vm1, %v13777_v52  ;;  %v9431_v21 = vpop.f32.mrf.mxu2  ;;  %10828 = vmatpush.msrb.mxu0 %v6829_v10  ;;  %v6583_v10 = vld [vmem:[#allocation5 + $0x670] sm:$0xff]  ;;  %v6581_v11 = vld [vmem:[#allocation5 + $0x660] sm:$0xff] }
 0x42e   : > { %v12140_v24 = vsub.f32 %v6242_v13, %v9431_v21  ;;  %10888 = vmatpush.msrb.mxu3 %v6832_v14  ;;  %10848 = vmatpush.msrb.mxu1 %v6830_v15  ;;  %v6584_v15 = vld [vmem:[#allocation5 + $0x678] sm:$0xff]  ;;  %v6253_v21 = vld [vmem:[#allocation2 + $0x448] sm:$0xff] }
 0x42f   : > { %v12650_v26 = vadd.f32 %v12649_v7, %v12395_v16  ;;  %10869 = vmatpush.msrb.mxu2 %v6575_v18  ;;  %10829 = vmatpush.msrb.mxu0 %v6573_v19  ;;  %v6582_v16 = vld [vmem:[#allocation5 + $0x668] sm:$0xff]  ;;  %v6251_v19 = vld [vmem:[#allocation2 + $0x438] sm:$0xff] }
 0x430   : > { %v12397_v29 = vmul.f32 %v12140_v24, %v12140_v24  ;;  %v9451_v30 = vpop.f32.mrf.mxu3  ;;  %10889 = vmatpush.msrb.mxu3 %v6576_v22  ;;  %10849 = vmatpush.msrb.mxu1 %v6574_v23  ;;  %v6843_v24 = vld [vmem:[#allocation5 + $0xe90] sm:$0xff] }
 0x431   : > { %v12651_v32 = vadd.f32 %v12650_v26, %v12396_v20  ;;  %v12141_v33 = vsub.f32 %v6243_v25, %v9451_v30  ;;  %v9471_v34 = vpop.f32.mrf.mxu0  ;;  %v9491_v35 = vpop.f32.mrf.mxu1  ;;  %v6252_v20 = vld [vmem:[#allocation2 + $0x440] sm:$0xff] }
 0x432   : > { %v12142_v36 = vsub.f32 %v6244_v27, %v9471_v34  ;;  %13069 = vmatmul.msk.f32.vlgmr.msra.gmra.mxu2 %vm6890_vm1, %v13777_v52  ;;  %v12143_v37 = vsub.f32 %v6245_v28, %v9491_v35  ;;  %v6254_v34 = vld [vmem:[#allocation2 + $0x450] sm:$0xff]  ;;  %v6844_v35 = vld [vmem:[#allocation5 + $0xe98] sm:$0xff] }
 0x433   : > { %v12652_v39 = vadd.f32 %v12651_v32, %v12397_v29  ;;  %v12398_v40 = vmul.f32 %v12141_v33, %v12141_v33  ;;  %10948 = vmatpush.msra.mxu2 %v6835_v31  ;;  %v6841_v31 = vld [vmem:[#allocation5 + $0xe80] sm:$0xff] }
 0x434   : > { %v12399_v44 = vmul.f32 %v12142_v36, %v12142_v36  ;;  %13067 = vmatmul.msk.f32.vlgmr.msra.gmra.mxu0 %vm6890_vm1, %v13777_v52  ;;  %13068 = vmatmul.msk.f32.vlgmr.msra.gmra.mxu1 %vm6890_vm1, %v13777_v52  ;;  %v12400_v48 = vmul.f32 %v12143_v37, %v12143_v37  ;;  %v6842_v36 = vld [vmem:[#allocation5 + $0xe88] sm:$0xff] }
 0x435   : > { %v12653_v47 = vadd.f32 %v12652_v39, %v12398_v40  ;;  %13070 = vmatmul.msk.f32.vlgmr.msra.gmra.mxu3 %vm6890_vm1, %v13777_v52  ;;  %v9511_v49 = vpop.f32.mrf.mxu2  ;;  %10908 = vmatpush.msra.mxu0 %v6833_v38  ;;  %v6587_v38 = vld [vmem:[#allocation5 + $0x690] sm:$0xff]  ;;  %v6585_v39 = vld [vmem:[#allocation5 + $0x680] sm:$0xff] }
 0x436   : > { %v12144_v53 = vsub.f32 %v6246_v41, %v9511_v49  ;;  %10968 = vmatpush.msra.mxu3 %v6836_v42  ;;  %10928 = vmatpush.msra.mxu1 %v6834_v43  ;;  %v6588_v43 = vld [vmem:[#allocation5 + $0x698] sm:$0xff]  ;;  %v6257_v49 = vld [vmem:[#allocation2 + $0x468] sm:$0xff] }
 0x437   : > { %v12654_v2 = vadd.f32 %v12653_v47, %v12399_v44  ;;  %10949 = vmatpush.msra.mxu2 %v6579_v45  ;;  %10909 = vmatpush.msra.mxu0 %v6577_v46  ;;  %v6586_v44 = vld [vmem:[#allocation5 + $0x688] sm:$0xff]  ;;  %v6255_v46 = vld [vmem:[#allocation2 + $0x458] sm:$0xff] }
 0x438   : > { %v12401_v57 = vmul.f32 %v12144_v53, %v12144_v53  ;;  %v9531_v58 = vpop.f32.mrf.mxu3  ;;  %10969 = vmatpush.msra.mxu3 %v6580_v50  ;;  %10929 = vmatpush.msra.mxu1 %v6578_v51  ;;  %v6847_v53 = vld [vmem:[#allocation5 + $0xeb0] sm:$0xff] }
 0x439   : > { %v12655_v60 = vadd.f32 %v12654_v2, %v12400_v48  ;;  %v12145_v61 = vsub.f32 %v6247_v54, %v9531_v58  ;;  %v9551_v62 = vpop.f32.mrf.mxu0  ;;  %v9571_v63 = vpop.f32.mrf.mxu1  ;;  %v6256_v48 = vld [vmem:[#allocation2 + $0x460] sm:$0xff] }
 0x43a   : > { %v12146_v0 = vsub.f32 %v6248_v55, %v9551_v62  ;;  %13073 = vmatmul.msk.f32.vlgmr.msrb.gmra.mxu2 %vm6890_vm1, %v13777_v52  ;;  %v12147_v1 = vsub.f32 %v6249_v56, %v9571_v63  ;;  %v6258_v62 = vld [vmem:[#allocation2 + $0x470] sm:$0xff]  ;;  %v6848_v63 = vld [vmem:[#allocation5 + $0xeb8] sm:$0xff] }
 0x43b   : > { %v12656_v4 = vadd.f32 %v12655_v60, %v12401_v57  ;;  %v12402_v17 = vmul.f32 %v12145_v61, %v12145_v61  ;;  %11028 = vmatpush.msrb.mxu2 %v6839_v59  ;;  %v6845_v59 = vld [vmem:[#allocation5 + $0xea0] sm:$0xff] }
 0x43c   : > { %v12403_v9 = vmul.f32 %v12146_v0, %v12146_v0  ;;  %13071 = vmatmul.msk.f32.vlgmr.msrb.gmra.mxu0 %vm6890_vm1, %v13777_v52  ;;  %13072 = vmatmul.msk.f32.vlgmr.msrb.gmra.mxu1 %vm6890_vm1, %v13777_v52  ;;  %v12404_v13 = vmul.f32 %v12147_v1, %v12147_v1  ;;  %v6846_v0 = vld [vmem:[#allocation5 + $0xea8] sm:$0xff] }
 0x43d   : > { %v12657_v12 = vadd.f32 %v12656_v4, %v12402_v17  ;;  %13074 = vmatmul.msk.f32.vlgmr.msrb.gmra.mxu3 %vm6890_vm1, %v13777_v52  ;;  %v9591_v14 = vpop.f32.mrf.mxu2  ;;  %10988 = vmatpush.msrb.mxu0 %v6837_v3  ;;  %v6591_v3 = vld [vmem:[#allocation5 + $0x6b0] sm:$0xff]  ;;  %v6589_v4 = vld [vmem:[#allocation5 + $0x6a0] sm:$0xff] }
 0x43e   : > { %v12148_v18 = vsub.f32 %v6250_v5, %v9591_v14  ;;  %11048 = vmatpush.msrb.mxu3 %v6840_v6  ;;  %11008 = vmatpush.msrb.mxu1 %v6838_v8  ;;  %v6592_v8 = vld [vmem:[#allocation5 + $0x6b8] sm:$0xff]  ;;  %v6261_v14 = vld [vmem:[#allocation2 + $0x488] sm:$0xff] }
 0x43f   : > { %v12658_v7 = vadd.f32 %v12657_v12, %v12403_v9  ;;  %11029 = vmatpush.msrb.mxu2 %v6583_v10  ;;  %10989 = vmatpush.msrb.mxu0 %v6581_v11  ;;  %v6590_v9 = vld [vmem:[#allocation5 + $0x6a8] sm:$0xff]  ;;  %v6259_v11 = vld [vmem:[#allocation2 + $0x478] sm:$0xff] }
 0x440   : > { %v12405_v22 = vmul.f32 %v12148_v18, %v12148_v18  ;;  %v9611_v23 = vpop.f32.mrf.mxu3  ;;  %11049 = vmatpush.msrb.mxu3 %v6584_v15  ;;  %11009 = vmatpush.msrb.mxu1 %v6582_v16  ;;  %v6851_v18 = vld [vmem:[#allocation5 + $0xed0] sm:$0xff] }
 0x441   : > { %v12659_v25 = vadd.f32 %v12658_v7, %v12404_v13  ;;  %v12149_v26 = vsub.f32 %v6251_v19, %v9611_v23  ;;  %v9631_v27 = vpop.f32.mrf.mxu0  ;;  %v9651_v28 = vpop.f32.mrf.mxu1  ;;  %v6260_v13 = vld [vmem:[#allocation2 + $0x480] sm:$0xff] }
 0x442   : > { %v12150_v29 = vsub.f32 %v6252_v20, %v9631_v27  ;;  %13077 = vmatmul.msk.f32.vlgmr.msra.gmra.mxu2 %vm6890_vm1, %v13777_v52  ;;  %v12151_v30 = vsub.f32 %v6253_v21, %v9651_v28  ;;  %v6262_v27 = vld [vmem:[#allocation2 + $0x490] sm:$0xff]  ;;  %v6852_v28 = vld [vmem:[#allocation5 + $0xed8] sm:$0xff] }
 0x443   : > { %v12660_v32 = vadd.f32 %v12659_v25, %v12405_v22  ;;  %v12406_v33 = vmul.f32 %v12149_v26, %v12149_v26  ;;  %11108 = vmatpush.msra.mxu2 %v6843_v24  ;;  %v6849_v24 = vld [vmem:[#allocation5 + $0xec0] sm:$0xff] }
 0x444   : > { %v12407_v37 = vmul.f32 %v12150_v29, %v12150_v29  ;;  %13075 = vmatmul.msk.f32.vlgmr.msra.gmra.mxu0 %vm6890_vm1, %v13777_v52  ;;  %13076 = vmatmul.msk.f32.vlgmr.msra.gmra.mxu1 %vm6890_vm1, %v13777_v52  ;;  %v12408_v41 = vmul.f32 %v12151_v30, %v12151_v30  ;;  %v6850_v29 = vld [vmem:[#allocation5 + $0xec8] sm:$0xff] }
 0x445   : > { %v12661_v40 = vadd.f32 %v12660_v32, %v12406_v33  ;;  %13078 = vmatmul.msk.f32.vlgmr.msra.gmra.mxu3 %vm6890_vm1, %v13777_v52  ;;  %v9671_v42 = vpop.f32.mrf.mxu2  ;;  %11068 = vmatpush.msra.mxu0 %v6841_v31  ;;  %v6595_v31 = vld [vmem:[#allocation5 + $0x6d0] sm:$0xff]  ;;  %v6593_v32 = vld [vmem:[#allocation5 + $0x6c0] sm:$0xff] }
 0x446   : > { %v12152_v45 = vsub.f32 %v6254_v34, %v9671_v42  ;;  %11128 = vmatpush.msra.mxu3 %v6844_v35  ;;  %11088 = vmatpush.msra.mxu1 %v6842_v36  ;;  %v6596_v36 = vld [vmem:[#allocation5 + $0x6d8] sm:$0xff]  ;;  %v6265_v42 = vld [vmem:[#allocation2 + $0x4a8] sm:$0xff] }
 0x447   : > { %v12662_v47 = vadd.f32 %v12661_v40, %v12407_v37  ;;  %11109 = vmatpush.msra.mxu2 %v6587_v38  ;;  %11069 = vmatpush.msra.mxu0 %v6585_v39  ;;  %v6594_v37 = vld [vmem:[#allocation5 + $0x6c8] sm:$0xff]  ;;  %v6263_v39 = vld [vmem:[#allocation2 + $0x498] sm:$0xff] }
 0x448   : > { %v12409_v50 = vmul.f32 %v12152_v45, %v12152_v45  ;;  %v9691_v51 = vpop.f32.mrf.mxu3  ;;  %11129 = vmatpush.msra.mxu3 %v6588_v43  ;;  %11089 = vmatpush.msra.mxu1 %v6586_v44  ;;  %v6855_v45 = vld [vmem:[#allocation5 + $0xef0] sm:$0xff] }
 0x449   : > { %v12663_v54 = vadd.f32 %v12662_v47, %v12408_v41  ;;  %v12153_v2 = vsub.f32 %v6255_v46, %v9691_v51  ;;  %v9711_v55 = vpop.f32.mrf.mxu0  ;;  %v9731_v56 = vpop.f32.mrf.mxu1  ;;  %v6264_v41 = vld [vmem:[#allocation2 + $0x4a0] sm:$0xff] }
 0x44a   : > { %v12154_v57 = vsub.f32 %v6256_v48, %v9711_v55  ;;  %13081 = vmatmul.msk.f32.vlgmr.msrb.gmra.mxu2 %vm6890_vm1, %v13777_v52  ;;  %v12155_v58 = vsub.f32 %v6257_v49, %v9731_v56  ;;  %v6266_v55 = vld [vmem:[#allocation2 + $0x4b0] sm:$0xff]  ;;  %v6856_v56 = vld [vmem:[#allocation5 + $0xef8] sm:$0xff] }
 0x44b   : > { %v12664_v60 = vadd.f32 %v12663_v54, %v12409_v50  ;;  %v12410_v61 = vmul.f32 %v12153_v2, %v12153_v2  ;;  %11188 = vmatpush.msrb.mxu2 %v6847_v53  ;;  %v6853_v53 = vld [vmem:[#allocation5 + $0xee0] sm:$0xff] }
 0x44c   : > { %v12411_v1 = vmul.f32 %v12154_v57, %v12154_v57  ;;  %13079 = vmatmul.msk.f32.vlgmr.msrb.gmra.mxu0 %vm6890_vm1, %v13777_v52  ;;  %13080 = vmatmul.msk.f32.vlgmr.msrb.gmra.mxu1 %vm6890_vm1, %v13777_v52  ;;  %v12412_v5 = vmul.f32 %v12155_v58, %v12155_v58  ;;  %v6854_v57 = vld [vmem:[#allocation5 + $0xee8] sm:$0xff] }
 0x44d   : > { %v12665_v17 = vadd.f32 %v12664_v60, %v12410_v61  ;;  %13082 = vmatmul.msk.f32.vlgmr.msrb.gmra.mxu3 %vm6890_vm1, %v13777_v52  ;;  %v9751_v6 = vpop.f32.mrf.mxu2  ;;  %11148 = vmatpush.msrb.mxu0 %v6845_v59  ;;  %v6599_v59 = vld [vmem:[#allocation5 + $0x6f0] sm:$0xff]  ;;  %v6597_v60 = vld [vmem:[#allocation5 + $0x6e0] sm:$0xff] }
 0x44e   : > { %v12156_v10 = vsub.f32 %v6258_v62, %v9751_v6  ;;  %11208 = vmatpush.msrb.mxu3 %v6848_v63  ;;  %11168 = vmatpush.msrb.mxu1 %v6846_v0  ;;  %v6600_v0 = vld [vmem:[#allocation5 + $0x6f8] sm:$0xff]  ;;  %v6269_v6 = vld [vmem:[#allocation2 + $0x4c8] sm:$0xff] }
 0x44f   : > { %v12666_v12 = vadd.f32 %v12665_v17, %v12411_v1  ;;  %11189 = vmatpush.msrb.mxu2 %v6591_v3  ;;  %11149 = vmatpush.msrb.mxu0 %v6589_v4  ;;  %v6598_v1 = vld [vmem:[#allocation5 + $0x6e8] sm:$0xff]  ;;  %v6267_v4 = vld [vmem:[#allocation2 + $0x4b8] sm:$0xff] }
 0x450   : > { %v12413_v15 = vmul.f32 %v12156_v10, %v12156_v10  ;;  %v9771_v16 = vpop.f32.mrf.mxu3  ;;  %11209 = vmatpush.msrb.mxu3 %v6592_v8  ;;  %11169 = vmatpush.msrb.mxu1 %v6590_v9  ;;  %v6859_v10 = vld [vmem:[#allocation5 + $0xf10] sm:$0xff] }
 0x451   : > { %v12667_v19 = vadd.f32 %v12666_v12, %v12412_v5  ;;  %v12157_v7 = vsub.f32 %v6259_v11, %v9771_v16  ;;  %v9791_v20 = vpop.f32.mrf.mxu0  ;;  %v9811_v21 = vpop.f32.mrf.mxu1  ;;  %v6268_v5 = vld [vmem:[#allocation2 + $0x4c0] sm:$0xff] }
 0x452   : > { %v12158_v22 = vsub.f32 %v6260_v13, %v9791_v20  ;;  %13085 = vmatmul.msk.f32.vlgmr.msra.gmra.mxu2 %vm6890_vm1, %v13777_v52  ;;  %v12159_v23 = vsub.f32 %v6261_v14, %v9811_v21  ;;  %v6270_v20 = vld [vmem:[#allocation2 + $0x4d0] sm:$0xff]  ;;  %v6860_v21 = vld [vmem:[#allocation5 + $0xf18] sm:$0xff] }
 0x453   : > { %v12668_v25 = vadd.f32 %v12667_v19, %v12413_v15  ;;  %v12414_v26 = vmul.f32 %v12157_v7, %v12157_v7  ;;  %11268 = vmatpush.msra.mxu2 %v6851_v18  ;;  %v6857_v18 = vld [vmem:[#allocation5 + $0xf00] sm:$0xff] }
 0x454   : > { %v12415_v30 = vmul.f32 %v12158_v22, %v12158_v22  ;;  %13083 = vmatmul.msk.f32.vlgmr.msra.gmra.mxu0 %vm6890_vm1, %v13777_v52  ;;  %13084 = vmatmul.msk.f32.vlgmr.msra.gmra.mxu1 %vm6890_vm1, %v13777_v52  ;;  %v12416_v34 = vmul.f32 %v12159_v23, %v12159_v23  ;;  %v6858_v22 = vld [vmem:[#allocation5 + $0xf08] sm:$0xff] }
 0x455   : > { %v12669_v33 = vadd.f32 %v12668_v25, %v12414_v26  ;;  %13086 = vmatmul.msk.f32.vlgmr.msra.gmra.mxu3 %vm6890_vm1, %v13777_v52  ;;  %v9831_v35 = vpop.f32.mrf.mxu2  ;;  %11228 = vmatpush.msra.mxu0 %v6849_v24  ;;  %v6603_v24 = vld [vmem:[#allocation5 + $0x710] sm:$0xff]  ;;  %v6601_v25 = vld [vmem:[#allocation5 + $0x700] sm:$0xff] }
 0x456   : > { %v12160_v38 = vsub.f32 %v6262_v27, %v9831_v35  ;;  %11288 = vmatpush.msra.mxu3 %v6852_v28  ;;  %11248 = vmatpush.msra.mxu1 %v6850_v29  ;;  %v6604_v29 = vld [vmem:[#allocation5 + $0x718] sm:$0xff]  ;;  %v6273_v35 = vld [vmem:[#allocation2 + $0x4e8] sm:$0xff] }
 0x457   : > { %v12670_v40 = vadd.f32 %v12669_v33, %v12415_v30  ;;  %11269 = vmatpush.msra.mxu2 %v6595_v31  ;;  %11229 = vmatpush.msra.mxu0 %v6593_v32  ;;  %v6602_v30 = vld [vmem:[#allocation5 + $0x708] sm:$0xff]  ;;  %v6271_v32 = vld [vmem:[#allocation2 + $0x4d8] sm:$0xff] }
 0x458   : > { %v12417_v43 = vmul.f32 %v12160_v38, %v12160_v38  ;;  %v9851_v44 = vpop.f32.mrf.mxu3  ;;  %11289 = vmatpush.msra.mxu3 %v6596_v36  ;;  %11249 = vmatpush.msra.mxu1 %v6594_v37  ;;  %v6863_v38 = vld [vmem:[#allocation5 + $0xf30] sm:$0xff] }
 0x459   : > { %v12671_v46 = vadd.f32 %v12670_v40, %v12416_v34  ;;  %v12161_v47 = vsub.f32 %v6263_v39, %v9851_v44  ;;  %v9871_v48 = vpop.f32.mrf.mxu0  ;;  %v9891_v49 = vpop.f32.mrf.mxu1  ;;  %v6272_v34 = vld [vmem:[#allocation2 + $0x4e0] sm:$0xff] }
 0x45a   : > { %v12162_v50 = vsub.f32 %v6264_v41, %v9871_v48  ;;  %13089 = vmatmul.msk.f32.vlgmr.msrb.gmra.mxu2 %vm6890_vm1, %v13777_v52  ;;  %v12163_v51 = vsub.f32 %v6265_v42, %v9891_v49  ;;  %v6274_v48 = vld [vmem:[#allocation2 + $0x4f0] sm:$0xff]  ;;  %v6864_v49 = vld [vmem:[#allocation5 + $0xf38] sm:$0xff] }
 0x45b   : > { %v12672_v54 = vadd.f32 %v12671_v46, %v12417_v43  ;;  %v12418_v2 = vmul.f32 %v12161_v47, %v12161_v47  ;;  %11348 = vmatpush.msrb.mxu2 %v6855_v45  ;;  %v6861_v45 = vld [vmem:[#allocation5 + $0xf20] sm:$0xff] }
 0x45c   : > { %v12419_v58 = vmul.f32 %v12162_v50, %v12162_v50  ;;  %13087 = vmatmul.msk.f32.vlgmr.msrb.gmra.mxu0 %vm6890_vm1, %v13777_v52  ;;  %13088 = vmatmul.msk.f32.vlgmr.msrb.gmra.mxu1 %vm6890_vm1, %v13777_v52  ;;  %v12420_v62 = vmul.f32 %v12163_v51, %v12163_v51  ;;  %v6862_v50 = vld [vmem:[#allocation5 + $0xf28] sm:$0xff] }
 0x45d   : > { %v12673_v61 = vadd.f32 %v12672_v54, %v12418_v2  ;;  %13090 = vmatmul.msk.f32.vlgmr.msrb.gmra.mxu3 %vm6890_vm1, %v13777_v52  ;;  %v9911_v63 = vpop.f32.mrf.mxu2  ;;  %11308 = vmatpush.msrb.mxu0 %v6853_v53  ;;  %v6607_v53 = vld [vmem:[#allocation5 + $0x730] sm:$0xff]  ;;  %v6605_v54 = vld [vmem:[#allocation5 + $0x720] sm:$0xff] }
 0x45e   : > { %v12164_v3 = vsub.f32 %v6266_v55, %v9911_v63  ;;  %11368 = vmatpush.msrb.mxu3 %v6856_v56  ;;  %11328 = vmatpush.msrb.mxu1 %v6854_v57  ;;  %v6608_v57 = vld [vmem:[#allocation5 + $0x738] sm:$0xff]  ;;  %v6277_v63 = vld [vmem:[#allocation2 + $0x508] sm:$0xff] }
 0x45f   : > { %v12674_v17 = vadd.f32 %v12673_v61, %v12419_v58  ;;  %11349 = vmatpush.msrb.mxu2 %v6599_v59  ;;  %11309 = vmatpush.msrb.mxu0 %v6597_v60  ;;  %v6606_v58 = vld [vmem:[#allocation5 + $0x728] sm:$0xff]  ;;  %v6275_v60 = vld [vmem:[#allocation2 + $0x4f8] sm:$0xff] }
 0x460   : > { %v12421_v8 = vmul.f32 %v12164_v3, %v12164_v3  ;;  %v9931_v9 = vpop.f32.mrf.mxu3  ;;  %11369 = vmatpush.msrb.mxu3 %v6600_v0  ;;  %11329 = vmatpush.msrb.mxu1 %v6598_v1  ;;  %v6867_v3 = vld [vmem:[#allocation5 + $0xf50] sm:$0xff] }
 0x461   : > { %v12675_v11 = vadd.f32 %v12674_v17, %v12420_v62  ;;  %v12165_v12 = vsub.f32 %v6267_v4, %v9931_v9  ;;  %v9951_v13 = vpop.f32.mrf.mxu0  ;;  %v9971_v14 = vpop.f32.mrf.mxu1  ;;  %v6276_v62 = vld [vmem:[#allocation2 + $0x500] sm:$0xff] }
 0x462   : > { %v12166_v15 = vsub.f32 %v6268_v5, %v9951_v13  ;;  %13093 = vmatmul.msk.f32.vlgmr.msra.gmra.mxu2 %vm6890_vm1, %v13777_v52  ;;  %v12167_v16 = vsub.f32 %v6269_v6, %v9971_v14  ;;  %v6278_v13 = vld [vmem:[#allocation2 + $0x510] sm:$0xff]  ;;  %v6868_v14 = vld [vmem:[#allocation5 + $0xf58] sm:$0xff] }
 0x463   : > { %v12676_v19 = vadd.f32 %v12675_v11, %v12421_v8  ;;  %v12422_v7 = vmul.f32 %v12165_v12, %v12165_v12  ;;  %11428 = vmatpush.msra.mxu2 %v6859_v10  ;;  %v6865_v10 = vld [vmem:[#allocation5 + $0xf40] sm:$0xff] }
 0x464   : > { %v12423_v23 = vmul.f32 %v12166_v15, %v12166_v15  ;;  %13091 = vmatmul.msk.f32.vlgmr.msra.gmra.mxu0 %vm6890_vm1, %v13777_v52  ;;  %13092 = vmatmul.msk.f32.vlgmr.msra.gmra.mxu1 %vm6890_vm1, %v13777_v52  ;;  %v12424_v27 = vmul.f32 %v12167_v16, %v12167_v16  ;;  %v6866_v15 = vld [vmem:[#allocation5 + $0xf48] sm:$0xff] }
 0x465   : > { %v12677_v26 = vadd.f32 %v12676_v19, %v12422_v7  ;;  %13094 = vmatmul.msk.f32.vlgmr.msra.gmra.mxu3 %vm6890_vm1, %v13777_v52  ;;  %v9991_v28 = vpop.f32.mrf.mxu2  ;;  %11388 = vmatpush.msra.mxu0 %v6857_v18  ;;  %v6611_v18 = vld [vmem:[#allocation5 + $0x750] sm:$0xff]  ;;  %v6609_v19 = vld [vmem:[#allocation5 + $0x740] sm:$0xff] }
 0x466   : > { %v12168_v31 = vsub.f32 %v6270_v20, %v9991_v28  ;;  %11448 = vmatpush.msra.mxu3 %v6860_v21  ;;  %11408 = vmatpush.msra.mxu1 %v6858_v22  ;;  %v6612_v22 = vld [vmem:[#allocation5 + $0x758] sm:$0xff]  ;;  %v6281_v28 = vld [vmem:[#allocation2 + $0x528] sm:$0xff] }
 0x467   : > { %v12678_v33 = vadd.f32 %v12677_v26, %v12423_v23  ;;  %11429 = vmatpush.msra.mxu2 %v6603_v24  ;;  %11389 = vmatpush.msra.mxu0 %v6601_v25  ;;  %v6610_v23 = vld [vmem:[#allocation5 + $0x748] sm:$0xff]  ;;  %v6279_v25 = vld [vmem:[#allocation2 + $0x518] sm:$0xff] }
 0x468   : > { %v12425_v36 = vmul.f32 %v12168_v31, %v12168_v31  ;;  %v10011_v37 = vpop.f32.mrf.mxu3  ;;  %11449 = vmatpush.msra.mxu3 %v6604_v29  ;;  %11409 = vmatpush.msra.mxu1 %v6602_v30  ;;  %v6871_v31 = vld [vmem:[#allocation5 + $0xf70] sm:$0xff] }
 0x469   : > { %v12679_v39 = vadd.f32 %v12678_v33, %v12424_v27  ;;  %v12169_v40 = vsub.f32 %v6271_v32, %v10011_v37  ;;  %v10031_v41 = vpop.f32.mrf.mxu0  ;;  %v10051_v42 = vpop.f32.mrf.mxu1  ;;  %v6280_v27 = vld [vmem:[#allocation2 + $0x520] sm:$0xff] }
 0x46a   : > { %v12170_v43 = vsub.f32 %v6272_v34, %v10031_v41  ;;  %13097 = vmatmul.msk.f32.vlgmr.msrb.gmra.mxu2 %vm6890_vm1, %v13777_v52  ;;  %v12171_v44 = vsub.f32 %v6273_v35, %v10051_v42  ;;  %v6282_v41 = vld [vmem:[#allocation2 + $0x530] sm:$0xff]  ;;  %v6872_v42 = vld [vmem:[#allocation5 + $0xf78] sm:$0xff] }
 0x46b   : > { %v12680_v46 = vadd.f32 %v12679_v39, %v12425_v36  ;;  %v12426_v47 = vmul.f32 %v12169_v40, %v12169_v40  ;;  %11508 = vmatpush.msrb.mxu2 %v6863_v38  ;;  %v6869_v38 = vld [vmem:[#allocation5 + $0xf60] sm:$0xff] }
 0x46c   : > { %v12427_v51 = vmul.f32 %v12170_v43, %v12170_v43  ;;  %13095 = vmatmul.msk.f32.vlgmr.msrb.gmra.mxu0 %vm6890_vm1, %v13777_v52  ;;  %13096 = vmatmul.msk.f32.vlgmr.msrb.gmra.mxu1 %vm6890_vm1, %v13777_v52  ;;  %v12428_v55 = vmul.f32 %v12171_v44, %v12171_v44  ;;  %v6870_v43 = vld [vmem:[#allocation5 + $0xf68] sm:$0xff] }
 0x46d   : > { %v12681_v2 = vadd.f32 %v12680_v46, %v12426_v47  ;;  %13098 = vmatmul.msk.f32.vlgmr.msrb.gmra.mxu3 %vm6890_vm1, %v13777_v52  ;;  %v10071_v56 = vpop.f32.mrf.mxu2  ;;  %11468 = vmatpush.msrb.mxu0 %v6861_v45  ;;  %v6615_v45 = vld [vmem:[#allocation5 + $0x770] sm:$0xff]  ;;  %v6613_v46 = vld [vmem:[#allocation5 + $0x760] sm:$0xff] }
 0x46e   : > { %v12172_v59 = vsub.f32 %v6274_v48, %v10071_v56  ;;  %11528 = vmatpush.msrb.mxu3 %v6864_v49  ;;  %11488 = vmatpush.msrb.mxu1 %v6862_v50  ;;  %v6616_v50 = vld [vmem:[#allocation5 + $0x778] sm:$0xff]  ;;  %v6285_v56 = vld [vmem:[#allocation2 + $0x548] sm:$0xff] }
 0x46f   : > { %v12682_v61 = vadd.f32 %v12681_v2, %v12427_v51  ;;  %11509 = vmatpush.msrb.mxu2 %v6607_v53  ;;  %11469 = vmatpush.msrb.mxu0 %v6605_v54  ;;  %v6614_v51 = vld [vmem:[#allocation5 + $0x768] sm:$0xff]  ;;  %v6283_v54 = vld [vmem:[#allocation2 + $0x538] sm:$0xff] }
 0x470   : > { %v12429_v0 = vmul.f32 %v12172_v59, %v12172_v59  ;;  %v10091_v1 = vpop.f32.mrf.mxu3  ;;  %11529 = vmatpush.msrb.mxu3 %v6608_v57  ;;  %11489 = vmatpush.msrb.mxu1 %v6606_v58  ;;  %v6875_v59 = vld [vmem:[#allocation5 + $0xf90] sm:$0xff] }
 0x471   : > { %v12683_v4 = vadd.f32 %v12682_v61, %v12428_v55  ;;  %v12173_v17 = vsub.f32 %v6275_v60, %v10091_v1  ;;  %v10111_v5 = vpop.f32.mrf.mxu0  ;;  %v10131_v6 = vpop.f32.mrf.mxu1  ;;  %v6284_v55 = vld [vmem:[#allocation2 + $0x540] sm:$0xff] }
 0x472   : > { %v12174_v8 = vsub.f32 %v6276_v62, %v10111_v5  ;;  %13101 = vmatmul.msk.f32.vlgmr.msra.gmra.mxu2 %vm6890_vm1, %v13777_v52  ;;  %v12175_v9 = vsub.f32 %v6277_v63, %v10131_v6  ;;  %v6286_v5 = vld [vmem:[#allocation2 + $0x550] sm:$0xff]  ;;  %v6876_v6 = vld [vmem:[#allocation5 + $0xf98] sm:$0xff] }
 0x473   : > { %v12684_v11 = vadd.f32 %v12683_v4, %v12429_v0  ;;  %v12430_v12 = vmul.f32 %v12173_v17, %v12173_v17  ;;  %11588 = vmatpush.msra.mxu2 %v6867_v3  ;;  %v6873_v3 = vld [vmem:[#allocation5 + $0xf80] sm:$0xff] }
 0x474   : > { %v12431_v16 = vmul.f32 %v12174_v8, %v12174_v8  ;;  %13099 = vmatmul.msk.f32.vlgmr.msra.gmra.mxu0 %vm6890_vm1, %v13777_v52  ;;  %13100 = vmatmul.msk.f32.vlgmr.msra.gmra.mxu1 %vm6890_vm1, %v13777_v52  ;;  %v12432_v20 = vmul.f32 %v12175_v9, %v12175_v9  ;;  %v6874_v8 = vld [vmem:[#allocation5 + $0xf88] sm:$0xff] }
 0x475   : > { %v12685_v7 = vadd.f32 %v12684_v11, %v12430_v12  ;;  %13102 = vmatmul.msk.f32.vlgmr.msra.gmra.mxu3 %vm6890_vm1, %v13777_v52  ;;  %v10151_v21 = vpop.f32.mrf.mxu2  ;;  %11548 = vmatpush.msra.mxu0 %v6865_v10  ;;  %v6619_v10 = vld [vmem:[#allocation5 + $0x790] sm:$0xff]  ;;  %v6617_v11 = vld [vmem:[#allocation5 + $0x780] sm:$0xff] }
 0x476   : > { %v12176_v24 = vsub.f32 %v6278_v13, %v10151_v21  ;;  %11608 = vmatpush.msra.mxu3 %v6868_v14  ;;  %11568 = vmatpush.msra.mxu1 %v6866_v15  ;;  %v6620_v15 = vld [vmem:[#allocation5 + $0x798] sm:$0xff]  ;;  %v6289_v21 = vld [vmem:[#allocation2 + $0x568] sm:$0xff] }
 0x477   : > { %v12686_v26 = vadd.f32 %v12685_v7, %v12431_v16  ;;  %11589 = vmatpush.msra.mxu2 %v6611_v18  ;;  %11549 = vmatpush.msra.mxu0 %v6609_v19  ;;  %v6618_v16 = vld [vmem:[#allocation5 + $0x788] sm:$0xff]  ;;  %v6287_v19 = vld [vmem:[#allocation2 + $0x558] sm:$0xff] }
 0x478   : > { %v12433_v29 = vmul.f32 %v12176_v24, %v12176_v24  ;;  %v10171_v30 = vpop.f32.mrf.mxu3  ;;  %11609 = vmatpush.msra.mxu3 %v6612_v22  ;;  %11569 = vmatpush.msra.mxu1 %v6610_v23  ;;  %v6879_v24 = vld [vmem:[#allocation5 + $0xfb0] sm:$0xff] }
 0x479   : > { %v12687_v32 = vadd.f32 %v12686_v26, %v12432_v20  ;;  %v12177_v33 = vsub.f32 %v6279_v25, %v10171_v30  ;;  %v10191_v34 = vpop.f32.mrf.mxu0  ;;  %v10211_v35 = vpop.f32.mrf.mxu1  ;;  %v6288_v20 = vld [vmem:[#allocation2 + $0x560] sm:$0xff] }
 0x47a   : > { %v12178_v36 = vsub.f32 %v6280_v27, %v10191_v34  ;;  %13105 = vmatmul.msk.f32.vlgmr.msrb.gmra.mxu2 %vm6890_vm1, %v13777_v52  ;;  %v12179_v37 = vsub.f32 %v6281_v28, %v10211_v35  ;;  %v6290_v34 = vld [vmem:[#allocation2 + $0x570] sm:$0xff]  ;;  %v6880_v35 = vld [vmem:[#allocation5 + $0xfb8] sm:$0xff] }
 0x47b   : > { %v12688_v39 = vadd.f32 %v12687_v32, %v12433_v29  ;;  %v12434_v40 = vmul.f32 %v12177_v33, %v12177_v33  ;;  %11668 = vmatpush.msrb.mxu2 %v6871_v31  ;;  %v6877_v31 = vld [vmem:[#allocation5 + $0xfa0] sm:$0xff] }
 0x47c   : > { %v12435_v44 = vmul.f32 %v12178_v36, %v12178_v36  ;;  %13103 = vmatmul.msk.f32.vlgmr.msrb.gmra.mxu0 %vm6890_vm1, %v13777_v52  ;;  %13104 = vmatmul.msk.f32.vlgmr.msrb.gmra.mxu1 %vm6890_vm1, %v13777_v52  ;;  %v12436_v48 = vmul.f32 %v12179_v37, %v12179_v37  ;;  %v6878_v36 = vld [vmem:[#allocation5 + $0xfa8] sm:$0xff] }
 0x47d   : > { %v12689_v47 = vadd.f32 %v12688_v39, %v12434_v40  ;;  %13106 = vmatmul.msk.f32.vlgmr.msrb.gmra.mxu3 %vm6890_vm1, %v13777_v52  ;;  %v10231_v49 = vpop.f32.mrf.mxu2  ;;  %11628 = vmatpush.msrb.mxu0 %v6869_v38  ;;  %v13883_v38 = vld [vmem:[#allocation7] sm:$0xff]  ;;  %v6623_v39 = vld [vmem:[#allocation5 + $0x7b0] sm:$0xff] }
 0x47e   : > { %v12180_v53 = vsub.f32 %v6282_v41, %v10231_v49  ;;  %11688 = vmatpush.msrb.mxu3 %v6872_v42  ;;  %11648 = vmatpush.msrb.mxu1 %v6870_v43  ;;  %v6621_v40 = vld [vmem:[#allocation5 + $0x7a0] sm:$0xff]  ;;  %v6624_v43 = vld [vmem:[#allocation5 + $0x7b8] sm:$0xff]  ;;  %v6293_v49 = vld [vmem:[#allocation2 + $0x588] sm:$0xff] }
 0x47f   : > { %v12690_v2 = vadd.f32 %v12689_v47, %v12435_v44  ;;  %11669 = vmatpush.msrb.mxu2 %v6615_v45  ;;  %11629 = vmatpush.msrb.mxu0 %v6613_v46  ;;  %v6622_v44 = vld [vmem:[#allocation5 + $0x7a8] sm:$0xff]  ;;  %v6291_v46 = vld [vmem:[#allocation2 + $0x578] sm:$0xff] }
 0x480   : > { %v12437_v57 = vmul.f32 %v12180_v53, %v12180_v53  ;;  %v10251_v58 = vpop.f32.mrf.mxu3  ;;  %11689 = vmatpush.msrb.mxu3 %v6616_v50  ;;  %11649 = vmatpush.msrb.mxu1 %v6614_v51  ;;  %v6883_v53 = vld [vmem:[#allocation5 + $0xfd0] sm:$0xff] }
 0x481   : > { %v12691_v60 = vadd.f32 %v12690_v2, %v12436_v48  ;;  %v12181_v61 = vsub.f32 %v6283_v54, %v10251_v58  ;;  %v10271_v62 = vpop.f32.mrf.mxu0  ;;  %v10291_v63 = vpop.f32.mrf.mxu1  ;;  %v6292_v48 = vld [vmem:[#allocation2 + $0x580] sm:$0xff] }
 0x482   : > { %v12182_v0 = vsub.f32 %v6284_v55, %v10271_v62  ;;  %13109 = vmatmul.msk.f32.vlgmr.msra.gmra.mxu2 %vm6890_vm1, %v13777_v52  ;;  %v12183_v1 = vsub.f32 %v6285_v56, %v10291_v63  ;;  %v6294_v62 = vld [vmem:[#allocation2 + $0x590] sm:$0xff]  ;;  %v6884_v63 = vld [vmem:[#allocation5 + $0xfd8] sm:$0xff] }
 0x483   : > { %v12692_v4 = vadd.f32 %v12691_v60, %v12437_v57  ;;  %v12438_v17 = vmul.f32 %v12181_v61, %v12181_v61  ;;  %11748 = vmatpush.msra.mxu2 %v6875_v59  ;;  %v6881_v59 = vld [vmem:[#allocation5 + $0xfc0] sm:$0xff] }
 0x484   : > { %v12439_v9 = vmul.f32 %v12182_v0, %v12182_v0  ;;  %13107 = vmatmul.msk.f32.vlgmr.msra.gmra.mxu0 %vm6890_vm1, %v13777_v52  ;;  %13108 = vmatmul.msk.f32.vlgmr.msra.gmra.mxu1 %vm6890_vm1, %v13777_v52  ;;  %v12440_v13 = vmul.f32 %v12183_v1, %v12183_v1  ;;  %v6882_v0 = vld [vmem:[#allocation5 + $0xfc8] sm:$0xff] }
 0x485   : > { %v12693_v12 = vadd.f32 %v12692_v4, %v12438_v17  ;;  %13110 = vmatmul.msk.f32.vlgmr.msra.gmra.mxu3 %vm6890_vm1, %v13777_v52  ;;  %v10311_v14 = vpop.f32.mrf.mxu2  ;;  %11708 = vmatpush.msra.mxu0 %v6873_v3  ;;  %v6627_v3 = vld [vmem:[#allocation5 + $0x7d0] sm:$0xff]  ;;  %v6625_v4 = vld [vmem:[#allocation5 + $0x7c0] sm:$0xff] }
 0x486   : > { %v12184_v18 = vsub.f32 %v6286_v5, %v10311_v14  ;;  %11768 = vmatpush.msra.mxu3 %v6876_v6  ;;  %11728 = vmatpush.msra.mxu1 %v6874_v8  ;;  %v6628_v8 = vld [vmem:[#allocation5 + $0x7d8] sm:$0xff]  ;;  %v6297_v14 = vld [vmem:[#allocation2 + $0x5a8] sm:$0xff] }
 0x487   : > { %v12694_v7 = vadd.f32 %v12693_v12, %v12439_v9  ;;  %11749 = vmatpush.msra.mxu2 %v6619_v10  ;;  %11709 = vmatpush.msra.mxu0 %v6617_v11  ;;  %v6626_v9 = vld [vmem:[#allocation5 + $0x7c8] sm:$0xff]  ;;  %v6295_v11 = vld [vmem:[#allocation2 + $0x598] sm:$0xff] }
 0x488   : > { %v12441_v22 = vmul.f32 %v12184_v18, %v12184_v18  ;;  %v10331_v23 = vpop.f32.mrf.mxu3  ;;  %11769 = vmatpush.msra.mxu3 %v6620_v15  ;;  %11729 = vmatpush.msra.mxu1 %v6618_v16  ;;  %v6887_v18 = vld [vmem:[#allocation5 + $0xff0] sm:$0xff] }
 0x489   : > { %v12695_v25 = vadd.f32 %v12694_v7, %v12440_v13  ;;  %v12185_v26 = vsub.f32 %v6287_v19, %v10331_v23  ;;  %v10351_v27 = vpop.f32.mrf.mxu0  ;;  %v10371_v28 = vpop.f32.mrf.mxu1  ;;  %v6296_v13 = vld [vmem:[#allocation2 + $0x5a0] sm:$0xff] }
 0x48a   : > { %v12186_v29 = vsub.f32 %v6288_v20, %v10351_v27  ;;  %13113 = vmatmul.msk.f32.vlgmr.msrb.gmra.mxu2 %vm6890_vm1, %v13777_v52  ;;  %v12187_v30 = vsub.f32 %v6289_v21, %v10371_v28  ;;  %v6298_v27 = vld [vmem:[#allocation2 + $0x5b0] sm:$0xff]  ;;  %v6888_v28 = vld [vmem:[#allocation5 + $0xff8] sm:$0xff] }
 0x48b   : > { %v12696_v32 = vadd.f32 %v12695_v25, %v12441_v22  ;;  %v12442_v33 = vmul.f32 %v12185_v26, %v12185_v26  ;;  %11828 = vmatpush.msrb.mxu2 %v6879_v24  ;;  %v6885_v24 = vld [vmem:[#allocation5 + $0xfe0] sm:$0xff] }
 0x48c   : > { %v12443_v37 = vmul.f32 %v12186_v29, %v12186_v29  ;;  %13111 = vmatmul.msk.f32.vlgmr.msrb.gmra.mxu0 %vm6890_vm1, %v13883_v38  ;;  %13112 = vmatmul.msk.f32.vlgmr.msrb.gmra.mxu1 %vm6890_vm1, %v13883_v38  ;;  %v12444_v41 = vmul.f32 %v12187_v30, %v12187_v30  ;;  %v6886_v29 = vld [vmem:[#allocation5 + $0xfe8] sm:$0xff] }
 0x48d   : > { %v12697_v52 = vadd.f32 %v12696_v32, %v12442_v33  ;;  %13114 = vmatmul.msk.f32.vlgmr.msrb.gmra.mxu3 %vm6890_vm1, %v13883_v38  ;;  %v10391_v42 = vpop.f32.mrf.mxu2  ;;  %11788 = vmatpush.msrb.mxu0 %v6877_v31  ;;  %v6631_v31 = vld [vmem:[#allocation5 + $0x7f0] sm:$0xff]  ;;  %v6629_v32 = vld [vmem:[#allocation5 + $0x7e0] sm:$0xff] }
 0x48e   : > { %v12188_v45 = vsub.f32 %v6290_v34, %v10391_v42  ;;  %11848 = vmatpush.msrb.mxu3 %v6880_v35  ;;  %11808 = vmatpush.msrb.mxu1 %v6878_v36  ;;  %v6632_v36 = vld [vmem:[#allocation5 + $0x7f8] sm:$0xff]  ;;  %v6301_v42 = vld [vmem:[#allocation2 + $0x5c8] sm:$0xff] }
 0x48f   : > { %v12698_v47 = vadd.f32 %v12697_v52, %v12443_v37  ;;  %11829 = vmatpush.msrb.mxu2 %v6623_v39  ;;  %11789 = vmatpush.msrb.mxu0 %v6621_v40  ;;  %v6630_v37 = vld [vmem:[#allocation5 + $0x7e8] sm:$0xff]  ;;  %v6299_v40 = vld [vmem:[#allocation2 + $0x5b8] sm:$0xff] }
 0x490   : > { %v12445_v50 = vmul.f32 %v12188_v45, %v12188_v45  ;;  %v10411_v51 = vpop.f32.mrf.mxu3  ;;  %11849 = vmatpush.msrb.mxu3 %v6624_v43  ;;  %11809 = vmatpush.msrb.mxu1 %v6622_v44 }
 0x491   : > { %v12699_v54 = vadd.f32 %v12698_v47, %v12444_v41  ;;  %v12189_v2 = vsub.f32 %v6291_v46, %v10411_v51  ;;  %v10431_v55 = vpop.f32.mrf.mxu0  ;;  %v10451_v56 = vpop.f32.mrf.mxu1  ;;  %v6300_v41 = vld [vmem:[#allocation2 + $0x5c0] sm:$0xff] }
 0x492   : > { %v12190_v57 = vsub.f32 %v6292_v48, %v10431_v55  ;;  %13117 = vmatmul.msk.f32.vlgmr.msra.gmra.mxu2 %vm6890_vm1, %v13883_v38  ;;  %v12191_v58 = vsub.f32 %v6293_v49, %v10451_v56 }
 0x493   : > { %v12700_v60 = vadd.f32 %v12699_v54, %v12445_v50  ;;  %v12446_v61 = vmul.f32 %v12189_v2, %v12189_v2  ;;  %11908 = vmatpush.msra.mxu2 %v6883_v53  ;;  %v6302_v54 = vld [vmem:[#allocation2 + $0x5d0] sm:$0xff] }
 0x494   : > { %v12447_v1 = vmul.f32 %v12190_v57, %v12190_v57  ;;  %13115 = vmatmul.msk.f32.vlgmr.msra.gmra.mxu0 %vm6890_vm1, %v13883_v38  ;;  %13116 = vmatmul.msk.f32.vlgmr.msra.gmra.mxu1 %vm6890_vm1, %v13883_v38  ;;  %v12448_v5 = vmul.f32 %v12191_v58, %v12191_v58 }
 0x495   : > { %v12701_v17 = vadd.f32 %v12700_v60, %v12446_v61  ;;  %13118 = vmatmul.msk.f32.vlgmr.msra.gmra.mxu3 %vm6890_vm1, %v13883_v38  ;;  %v10471_v6 = vpop.f32.mrf.mxu2  ;;  %11868 = vmatpush.msra.mxu0 %v6881_v59  ;;  %v6303_v59 = vld [vmem:[#allocation2 + $0x5d8] sm:$0xff]  ;;  %v6304_v61 = vld [vmem:[#allocation2 + $0x5e0] sm:$0xff] }
 0x496   : > { %v12192_v10 = vsub.f32 %v6294_v62, %v10471_v6  ;;  %11928 = vmatpush.msra.mxu3 %v6884_v63  ;;  %11888 = vmatpush.msra.mxu1 %v6882_v0  ;;  %v6305_v62 = vld [vmem:[#allocation2 + $0x5e8] sm:$0xff] }
 0x497   : > { %v12702_v12 = vadd.f32 %v12701_v17, %v12447_v1  ;;  %11909 = vmatpush.msra.mxu2 %v6627_v3  ;;  %11869 = vmatpush.msra.mxu0 %v6625_v4 }
 0x498   : > { %v12449_v15 = vmul.f32 %v12192_v10, %v12192_v10  ;;  %v10491_v16 = vpop.f32.mrf.mxu3  ;;  %11929 = vmatpush.msra.mxu3 %v6628_v8  ;;  %11889 = vmatpush.msra.mxu1 %v6626_v9  ;;  %v6306_v10 = vld [vmem:[#allocation2 + $0x5f0] sm:$0xff] }
 0x499   : > { %v12703_v19 = vadd.f32 %v12702_v12, %v12448_v5  ;;  %v12193_v7 = vsub.f32 %v6295_v11, %v10491_v16  ;;  %v10511_v20 = vpop.f32.mrf.mxu0  ;;  %v10531_v21 = vpop.f32.mrf.mxu1  ;;  %v6307_v16 = vld [vmem:[#allocation2 + $0x5f8] sm:$0xff] }
 0x49a   : > { %v12194_v22 = vsub.f32 %v6296_v13, %v10511_v20  ;;  %13121 = vmatmul.msk.f32.vlgmr.msrb.gmra.mxu2 %vm6890_vm1, %v13883_v38  ;;  %v12195_v23 = vsub.f32 %v6297_v14, %v10531_v21 }
 0x49b   : > { %v12704_v25 = vadd.f32 %v12703_v19, %v12449_v15  ;;  %v12450_v26 = vmul.f32 %v12193_v7, %v12193_v7  ;;  %11988 = vmatpush.msrb.mxu2 %v6887_v18  ;;  %v6308_v19 = vld [vmem:[#allocation2 + $0x600] sm:$0xff]  ;;  %v6309_v7 = vld [vmem:[#allocation2 + $0x608] sm:$0xff] }
 0x49c   : > { %v12451_v30 = vmul.f32 %v12194_v22, %v12194_v22  ;;  %13119 = vmatmul.msk.f32.vlgmr.msrb.gmra.mxu0 %vm6890_vm1, %v13883_v38  ;;  %13120 = vmatmul.msk.f32.vlgmr.msrb.gmra.mxu1 %vm6890_vm1, %v13883_v38  ;;  %v12452_v34 = vmul.f32 %v12195_v23, %v12195_v23 }
 0x49d   : > { %v12705_v33 = vadd.f32 %v12704_v25, %v12450_v26  ;;  %13122 = vmatmul.msk.f32.vlgmr.msrb.gmra.mxu3 %vm6890_vm1, %v13883_v38  ;;  %v10551_v35 = vpop.f32.mrf.mxu2  ;;  %11948 = vmatpush.msrb.mxu0 %v6885_v24 }
 0x49e   : > { %v12196_v39 = vsub.f32 %v6298_v27, %v10551_v35  ;;  %12008 = vmatpush.msrb.mxu3 %v6888_v28  ;;  %11968 = vmatpush.msrb.mxu1 %v6886_v29  ;;  %v6311_v35 = vld [vmem:[#allocation2 + $0x618] sm:$0xff] }
 0x49f   : > { %v12706_v52 = vadd.f32 %v12705_v33, %v12451_v30  ;;  %11989 = vmatpush.msrb.mxu2 %v6631_v31  ;;  %11949 = vmatpush.msrb.mxu0 %v6629_v32  ;;  %v6310_v30 = vld [vmem:[#allocation2 + $0x610] sm:$0xff] }
 0x4a0   : > { %v12453_v43 = vmul.f32 %v12196_v39, %v12196_v39  ;;  %v10571_v44 = vpop.f32.mrf.mxu3  ;;  %12009 = vmatpush.msrb.mxu3 %v6632_v36  ;;  %11969 = vmatpush.msrb.mxu1 %v6630_v37  ;;  %v6312_v37 = vld [vmem:[#allocation2 + $0x620] sm:$0xff]  ;;  %v6313_v39 = vld [vmem:[#allocation2 + $0x628] sm:$0xff] }
 0x4a1   : > { %v12707_v45 = vadd.f32 %v12706_v52, %v12452_v34  ;;  %v12197_v46 = vsub.f32 %v6299_v40, %v10571_v44  ;;  %v10591_v47 = vpop.f32.mrf.mxu0  ;;  %v10611_v48 = vpop.f32.mrf.mxu1 }
 0x4a2   : > { %v12198_v49 = vsub.f32 %v6300_v41, %v10591_v47  ;;  %13125 = vmatmul.msk.f32.vlgmr.msra.gmra.mxu2 %vm6890_vm1, %v13883_v38  ;;  %v12199_v50 = vsub.f32 %v6301_v42, %v10611_v48 }
 0x4a3   : > { %v12708_v51 = vadd.f32 %v12707_v45, %v12453_v43  ;;  %v12454_v53 = vmul.f32 %v12197_v46, %v12197_v46 }
 0x4a4   : > { %v12455_v2 = vmul.f32 %v12198_v49, %v12198_v49  ;;  %13123 = vmatmul.msk.f32.vlgmr.msra.gmra.mxu0 %vm6890_vm1, %v13883_v38  ;;  %13124 = vmatmul.msk.f32.vlgmr.msra.gmra.mxu1 %vm6890_vm1, %v13883_v38  ;;  %v12456_v56 = vmul.f32 %v12199_v50, %v12199_v50  ;;  %v6314_v49 = vld [vmem:[#allocation2 + $0x630] sm:$0xff] }
 0x4a5   : > { %v12709_v55 = vadd.f32 %v12708_v51, %v12454_v53  ;;  %13126 = vmatmul.msk.f32.vlgmr.msra.gmra.mxu3 %vm6890_vm1, %v13883_v38  ;;  %v10631_v57 = vpop.f32.mrf.mxu2 }
 0x4a6   : > { %v12200_v58 = vsub.f32 %v6302_v54, %v10631_v57  ;;  %v6316_v57 = vld [vmem:[#allocation2 + $0x640] sm:$0xff] }
 0x4a7   : > { %v12710_v60 = vadd.f32 %v12709_v55, %v12455_v2  ;;  %v6315_v55 = vld [vmem:[#allocation2 + $0x638] sm:$0xff] }
 0x4a8   : > { %v12457_v63 = vmul.f32 %v12200_v58, %v12200_v58  ;;  %v10651_v0 = vpop.f32.mrf.mxu3  ;;  %v6317_v58 = vld [vmem:[#allocation2 + $0x648] sm:$0xff] }
 0x4a9   : > { %v12711_v1 = vadd.f32 %v12710_v60, %v12456_v56  ;;  %v12201_v3 = vsub.f32 %v6303_v59, %v10651_v0  ;;  %v10671_v4 = vpop.f32.mrf.mxu0  ;;  %v10691_v17 = vpop.f32.mrf.mxu1 }
 0x4aa   : > { %v12202_v5 = vsub.f32 %v6304_v61, %v10671_v4  ;;  %13129 = vmatmul.msk.f32.vlgmr.msrb.gmra.mxu2 %vm6890_vm1, %v13883_v38  ;;  %v12203_v6 = vsub.f32 %v6305_v62, %v10691_v17 }
 0x4ab   : > { %v12712_v8 = vadd.f32 %v12711_v1, %v12457_v63  ;;  %v12458_v9 = vmul.f32 %v12201_v3, %v12201_v3 }
 0x4ac   : > { %v12459_v11 = vmul.f32 %v12202_v5, %v12202_v5  ;;  %13127 = vmatmul.msk.f32.vlgmr.msrb.gmra.mxu0 %vm6890_vm1, %v13883_v38  ;;  %13128 = vmatmul.msk.f32.vlgmr.msrb.gmra.mxu1 %vm6890_vm1, %v13883_v38  ;;  %v12460_v13 = vmul.f32 %v12203_v6, %v12203_v6  ;;  %v6318_v5 = vld [vmem:[#allocation2 + $0x650] sm:$0xff] }
 0x4ad   : > { %v12713_v12 = vadd.f32 %v12712_v8, %v12458_v9  ;;  %13130 = vmatmul.msk.f32.vlgmr.msrb.gmra.mxu3 %vm6890_vm1, %v13883_v38  ;;  %v10711_v14 = vpop.f32.mrf.mxu2 }
 0x4ae   : > { %v12204_v15 = vsub.f32 %v6306_v10, %v10711_v14  ;;  %v6320_v14 = vld [vmem:[#allocation2 + $0x660] sm:$0xff] }
 0x4af   : > { %v12714_v18 = vadd.f32 %v12713_v12, %v12459_v11  ;;  %v6319_v12 = vld [vmem:[#allocation2 + $0x658] sm:$0xff] }
 0x4b0   : > { %v12461_v20 = vmul.f32 %v12204_v15, %v12204_v15  ;;  %v10731_v21 = vpop.f32.mrf.mxu3  ;;  %v6321_v15 = vld [vmem:[#allocation2 + $0x668] sm:$0xff] }
 0x4b1   : > { %v12715_v22 = vadd.f32 %v12714_v18, %v12460_v13  ;;  %v12205_v23 = vsub.f32 %v6307_v16, %v10731_v21  ;;  %v10751_v24 = vpop.f32.mrf.mxu0  ;;  %v10771_v25 = vpop.f32.mrf.mxu1 }
 0x4b2   : > { %v12206_v26 = vsub.f32 %v6308_v19, %v10751_v24  ;;  %v12207_v27 = vsub.f32 %v6309_v7, %v10771_v25 }
 0x4b3   : > { %v12716_v28 = vadd.f32 %v12715_v22, %v12461_v20  ;;  %v12462_v29 = vmul.f32 %v12205_v23, %v12205_v23 }
 0x4b4   : > { %v12463_v31 = vmul.f32 %v12206_v26, %v12206_v26  ;;  %v12464_v38 = vmul.f32 %v12207_v27, %v12207_v27  ;;  %v6322_v26 = vld [vmem:[#allocation2 + $0x670] sm:$0xff] }
 0x4b5   : > { %v12717_v32 = vadd.f32 %v12716_v28, %v12462_v29  ;;  %v10791_v33 = vpop.f32.mrf.mxu2 }
 0x4b6   : > { %v12208_v34 = vsub.f32 %v6310_v30, %v10791_v33  ;;  %v6324_v33 = vld [vmem:[#allocation2 + $0x680] sm:$0xff] }
 0x4b7   : > { %v12718_v36 = vadd.f32 %v12717_v32, %v12463_v31  ;;  %v6323_v32 = vld [vmem:[#allocation2 + $0x678] sm:$0xff] }
 0x4b8   : > { %v12465_v40 = vmul.f32 %v12208_v34, %v12208_v34  ;;  %v10811_v52 = vpop.f32.mrf.mxu3  ;;  %v6325_v34 = vld [vmem:[#allocation2 + $0x688] sm:$0xff] }
 0x4b9   : > { %v12719_v41 = vadd.f32 %v12718_v36, %v12464_v38  ;;  %v12209_v42 = vsub.f32 %v6311_v35, %v10811_v52  ;;  %v10831_v43 = vpop.f32.mrf.mxu0  ;;  %v10851_v44 = vpop.f32.mrf.mxu1 }
 0x4ba   : > { %v12210_v45 = vsub.f32 %v6312_v37, %v10831_v43  ;;  %v12211_v46 = vsub.f32 %v6313_v39, %v10851_v44 }
 0x4bb   : > { %v12720_v47 = vadd.f32 %v12719_v41, %v12465_v40  ;;  %v12466_v48 = vmul.f32 %v12209_v42, %v12209_v42 }
 0x4bc   : > { %v12467_v50 = vmul.f32 %v12210_v45, %v12210_v45  ;;  %v12468_v53 = vmul.f32 %v12211_v46, %v12211_v46  ;;  %v6326_v45 = vld [vmem:[#allocation2 + $0x690] sm:$0xff] }
 0x4bd   : > { %v12721_v51 = vadd.f32 %v12720_v47, %v12466_v48  ;;  %v10871_v54 = vpop.f32.mrf.mxu2 }
 0x4be   : > { %v12212_v2 = vsub.f32 %v6314_v49, %v10871_v54  ;;  %v6328_v54 = vld [vmem:[#allocation2 + $0x6a0] sm:$0xff] }
 0x4bf   : > { %v12722_v56 = vadd.f32 %v12721_v51, %v12467_v50  ;;  %v6327_v51 = vld [vmem:[#allocation2 + $0x698] sm:$0xff] }
 0x4c0   : > { %v12469_v59 = vmul.f32 %v12212_v2, %v12212_v2  ;;  %v10891_v60 = vpop.f32.mrf.mxu3  ;;  %v6329_v2 = vld [vmem:[#allocation2 + $0x6a8] sm:$0xff] }
 0x4c1   : > { %v12723_v61 = vadd.f32 %v12722_v56, %v12468_v53  ;;  %v12213_v62 = vsub.f32 %v6315_v55, %v10891_v60  ;;  %v10911_v63 = vpop.f32.mrf.mxu0  ;;  %v10931_v0 = vpop.f32.mrf.mxu1 }
 0x4c2   : > { %v12214_v1 = vsub.f32 %v6316_v57, %v10911_v63  ;;  %v12215_v3 = vsub.f32 %v6317_v58, %v10931_v0 }
 0x4c3   : > { %v12724_v4 = vadd.f32 %v12723_v61, %v12469_v59  ;;  %v12470_v17 = vmul.f32 %v12213_v62, %v12213_v62 }
 0x4c4   : > { %v12471_v6 = vmul.f32 %v12214_v1, %v12214_v1  ;;  %v12472_v9 = vmul.f32 %v12215_v3, %v12215_v3  ;;  %v6330_v1 = vld [vmem:[#allocation2 + $0x6b0] sm:$0xff] }
 0x4c5   : > { %v12725_v8 = vadd.f32 %v12724_v4, %v12470_v17  ;;  %v10951_v10 = vpop.f32.mrf.mxu2 }
 0x4c6   : > { %v12216_v11 = vsub.f32 %v6318_v5, %v10951_v10  ;;  %v6332_v10 = vld [vmem:[#allocation2 + $0x6c0] sm:$0xff] }
 0x4c7   : > { %v12726_v13 = vadd.f32 %v12725_v8, %v12471_v6  ;;  %v6331_v8 = vld [vmem:[#allocation2 + $0x6b8] sm:$0xff] }
 0x4c8   : > { %v12473_v16 = vmul.f32 %v12216_v11, %v12216_v11  ;;  %v10971_v18 = vpop.f32.mrf.mxu3  ;;  %v6333_v11 = vld [vmem:[#allocation2 + $0x6c8] sm:$0xff] }
 0x4c9   : > { %v12727_v19 = vadd.f32 %v12726_v13, %v12472_v9  ;;  %v12217_v7 = vsub.f32 %v6319_v12, %v10971_v18  ;;  %v10991_v20 = vpop.f32.mrf.mxu0  ;;  %v11011_v21 = vpop.f32.mrf.mxu1 }
 0x4ca   : > { %v12218_v22 = vsub.f32 %v6320_v14, %v10991_v20  ;;  %v12219_v23 = vsub.f32 %v6321_v15, %v11011_v21 }
 0x4cb   : > { %v12728_v24 = vadd.f32 %v12727_v19, %v12473_v16  ;;  %v12474_v25 = vmul.f32 %v12217_v7, %v12217_v7 }
 0x4cc   : > { %v12475_v27 = vmul.f32 %v12218_v22, %v12218_v22  ;;  %v12476_v29 = vmul.f32 %v12219_v23, %v12219_v23  ;;  %v6334_v22 = vld [vmem:[#allocation2 + $0x6d0] sm:$0xff] }
 0x4cd   : > { %v12729_v28 = vadd.f32 %v12728_v24, %v12474_v25  ;;  %v11031_v30 = vpop.f32.mrf.mxu2 }
 0x4ce   : > { %v12220_v31 = vsub.f32 %v6322_v26, %v11031_v30  ;;  %v6336_v30 = vld [vmem:[#allocation2 + $0x6e0] sm:$0xff] }
 0x4cf   : > { %v12730_v38 = vadd.f32 %v12729_v28, %v12475_v27  ;;  %v6335_v28 = vld [vmem:[#allocation2 + $0x6d8] sm:$0xff] }
 0x4d0   : > { %v12477_v35 = vmul.f32 %v12220_v31, %v12220_v31  ;;  %v11051_v36 = vpop.f32.mrf.mxu3  ;;  %v6337_v31 = vld [vmem:[#allocation2 + $0x6e8] sm:$0xff] }
 0x4d1   : > { %v12731_v37 = vadd.f32 %v12730_v38, %v12476_v29  ;;  %v12221_v39 = vsub.f32 %v6323_v32, %v11051_v36  ;;  %v11071_v40 = vpop.f32.mrf.mxu0  ;;  %v11091_v52 = vpop.f32.mrf.mxu1 }
 0x4d2   : > { %v12222_v41 = vsub.f32 %v6324_v33, %v11071_v40  ;;  %v12223_v42 = vsub.f32 %v6325_v34, %v11091_v52 }
 0x4d3   : > { %v12732_v43 = vadd.f32 %v12731_v37, %v12477_v35  ;;  %v12478_v44 = vmul.f32 %v12221_v39, %v12221_v39 }
 0x4d4   : > { %v12479_v46 = vmul.f32 %v12222_v41, %v12222_v41  ;;  %v12480_v48 = vmul.f32 %v12223_v42, %v12223_v42  ;;  %v6338_v41 = vld [vmem:[#allocation2 + $0x6f0] sm:$0xff] }
 0x4d5   : > { %v12733_v47 = vadd.f32 %v12732_v43, %v12478_v44  ;;  %v11111_v49 = vpop.f32.mrf.mxu2 }
 0x4d6   : > { %v12224_v50 = vsub.f32 %v6326_v45, %v11111_v49  ;;  %v6340_v49 = vld [vmem:[#allocation2 + $0x700] sm:$0xff] }
 0x4d7   : > { %v12734_v53 = vadd.f32 %v12733_v47, %v12479_v46  ;;  %v6339_v47 = vld [vmem:[#allocation2 + $0x6f8] sm:$0xff] }
 0x4d8   : > { %v12481_v55 = vmul.f32 %v12224_v50, %v12224_v50  ;;  %v11131_v56 = vpop.f32.mrf.mxu3  ;;  %v6341_v50 = vld [vmem:[#allocation2 + $0x708] sm:$0xff] }
 0x4d9   : > { %v12735_v57 = vadd.f32 %v12734_v53, %v12480_v48  ;;  %v12225_v58 = vsub.f32 %v6327_v51, %v11131_v56  ;;  %v11151_v59 = vpop.f32.mrf.mxu0  ;;  %v11171_v60 = vpop.f32.mrf.mxu1 }
 0x4da   : > { %v12226_v61 = vsub.f32 %v6328_v54, %v11151_v59  ;;  %v12227_v62 = vsub.f32 %v6329_v2, %v11171_v60 }
 0x4db   : > { %v12736_v63 = vadd.f32 %v12735_v57, %v12481_v55  ;;  %v12482_v0 = vmul.f32 %v12225_v58, %v12225_v58 }
 0x4dc   : > { %v12483_v3 = vmul.f32 %v12226_v61, %v12226_v61  ;;  %v12484_v17 = vmul.f32 %v12227_v62, %v12227_v62  ;;  %v6342_v61 = vld [vmem:[#allocation2 + $0x710] sm:$0xff] }
 0x4dd   : > { %v12737_v4 = vadd.f32 %v12736_v63, %v12482_v0  ;;  %v11191_v5 = vpop.f32.mrf.mxu2 }
 0x4de   : > { %v12228_v6 = vsub.f32 %v6330_v1, %v11191_v5  ;;  %v6344_v5 = vld [vmem:[#allocation2 + $0x720] sm:$0xff] }
 0x4df   : > { %v12738_v9 = vadd.f32 %v12737_v4, %v12483_v3  ;;  %v6343_v4 = vld [vmem:[#allocation2 + $0x718] sm:$0xff] }
 0x4e0   : > { %v12485_v12 = vmul.f32 %v12228_v6, %v12228_v6  ;;  %v11211_v13 = vpop.f32.mrf.mxu3  ;;  %v6345_v6 = vld [vmem:[#allocation2 + $0x728] sm:$0xff] }
 0x4e1   : > { %v12739_v14 = vadd.f32 %v12738_v9, %v12484_v17  ;;  %v12229_v15 = vsub.f32 %v6331_v8, %v11211_v13  ;;  %v11231_v16 = vpop.f32.mrf.mxu0  ;;  %v11251_v18 = vpop.f32.mrf.mxu1 }
 0x4e2   : > { %v12230_v19 = vsub.f32 %v6332_v10, %v11231_v16  ;;  %v12231_v7 = vsub.f32 %v6333_v11, %v11251_v18 }
 0x4e3   : > { %v12740_v20 = vadd.f32 %v12739_v14, %v12485_v12  ;;  %v12486_v21 = vmul.f32 %v12229_v15, %v12229_v15 }
 0x4e4   : > { %v12487_v23 = vmul.f32 %v12230_v19, %v12230_v19  ;;  %v12488_v25 = vmul.f32 %v12231_v7, %v12231_v7  ;;  %v6346_v19 = vld [vmem:[#allocation2 + $0x730] sm:$0xff] }
 0x4e5   : > { %v12741_v24 = vadd.f32 %v12740_v20, %v12486_v21  ;;  %v11271_v26 = vpop.f32.mrf.mxu2 }
 0x4e6   : > { %v12232_v27 = vsub.f32 %v6334_v22, %v11271_v26  ;;  %v6348_v26 = vld [vmem:[#allocation2 + $0x740] sm:$0xff] }
 0x4e7   : > { %v12742_v29 = vadd.f32 %v12741_v24, %v12487_v23  ;;  %v6347_v24 = vld [vmem:[#allocation2 + $0x738] sm:$0xff] }
 0x4e8   : > { %v12489_v32 = vmul.f32 %v12232_v27, %v12232_v27  ;;  %v11291_v38 = vpop.f32.mrf.mxu3  ;;  %v6349_v27 = vld [vmem:[#allocation2 + $0x748] sm:$0xff] }
 0x4e9   : > { %v12743_v33 = vadd.f32 %v12742_v29, %v12488_v25  ;;  %v12233_v34 = vsub.f32 %v6335_v28, %v11291_v38  ;;  %v11311_v35 = vpop.f32.mrf.mxu0  ;;  %v11331_v36 = vpop.f32.mrf.mxu1 }
 0x4ea   : > { %v12234_v37 = vsub.f32 %v6336_v30, %v11311_v35  ;;  %v12235_v39 = vsub.f32 %v6337_v31, %v11331_v36 }
 0x4eb   : > { %v12744_v40 = vadd.f32 %v12743_v33, %v12489_v32  ;;  %v12490_v52 = vmul.f32 %v12233_v34, %v12233_v34 }
 0x4ec   : > { %v12491_v42 = vmul.f32 %v12234_v37, %v12234_v37  ;;  %v12492_v44 = vmul.f32 %v12235_v39, %v12235_v39  ;;  %v6350_v37 = vld [vmem:[#allocation2 + $0x750] sm:$0xff] }
 0x4ed   : > { %v12745_v43 = vadd.f32 %v12744_v40, %v12490_v52  ;;  %v11351_v45 = vpop.f32.mrf.mxu2 }
 0x4ee   : > { %v12236_v46 = vsub.f32 %v6338_v41, %v11351_v45  ;;  %v6352_v45 = vld [vmem:[#allocation2 + $0x760] sm:$0xff] }
 0x4ef   : > { %v12746_v48 = vadd.f32 %v12745_v43, %v12491_v42  ;;  %v6351_v43 = vld [vmem:[#allocation2 + $0x758] sm:$0xff] }
 0x4f0   : > { %v12493_v51 = vmul.f32 %v12236_v46, %v12236_v46  ;;  %v11371_v53 = vpop.f32.mrf.mxu3  ;;  %v6353_v46 = vld [vmem:[#allocation2 + $0x768] sm:$0xff] }
 0x4f1   : > { %v12747_v54 = vadd.f32 %v12746_v48, %v12492_v44  ;;  %v12237_v2 = vsub.f32 %v6339_v47, %v11371_v53  ;;  %v11391_v55 = vpop.f32.mrf.mxu0  ;;  %v11411_v56 = vpop.f32.mrf.mxu1 }
 0x4f2   : > { %v12238_v57 = vsub.f32 %v6340_v49, %v11391_v55  ;;  %v12239_v58 = vsub.f32 %v6341_v50, %v11411_v56 }
 0x4f3   : > { %v12748_v59 = vadd.f32 %v12747_v54, %v12493_v51  ;;  %v12494_v60 = vmul.f32 %v12237_v2, %v12237_v2 }
 0x4f4   : > { %v12495_v62 = vmul.f32 %v12238_v57, %v12238_v57  ;;  %v12496_v0 = vmul.f32 %v12239_v58, %v12239_v58  ;;  %v6354_v57 = vld [vmem:[#allocation2 + $0x770] sm:$0xff] }
 0x4f5   : > { %v12749_v63 = vadd.f32 %v12748_v59, %v12494_v60  ;;  %v11431_v1 = vpop.f32.mrf.mxu2 }
 0x4f6   : > { %v12240_v3 = vsub.f32 %v6342_v61, %v11431_v1  ;;  %v6356_v1 = vld [vmem:[#allocation2 + $0x780] sm:$0xff] }
 0x4f7   : > { %v12750_v17 = vadd.f32 %v12749_v63, %v12495_v62  ;;  %v6355_v63 = vld [vmem:[#allocation2 + $0x778] sm:$0xff] }
 0x4f8   : > { %v12497_v8 = vmul.f32 %v12240_v3, %v12240_v3  ;;  %v11451_v9 = vpop.f32.mrf.mxu3  ;;  %v6357_v3 = vld [vmem:[#allocation2 + $0x788] sm:$0xff] }
 0x4f9   : > { %v12751_v10 = vadd.f32 %v12750_v17, %v12496_v0  ;;  %v12241_v11 = vsub.f32 %v6343_v4, %v11451_v9  ;;  %v11471_v12 = vpop.f32.mrf.mxu0  ;;  %v11491_v13 = vpop.f32.mrf.mxu1 }
 0x4fa   : > { %v12242_v14 = vsub.f32 %v6344_v5, %v11471_v12  ;;  %v12243_v15 = vsub.f32 %v6345_v6, %v11491_v13 }
 0x4fb   : > { %v12752_v16 = vadd.f32 %v12751_v10, %v12497_v8  ;;  %v12498_v18 = vmul.f32 %v12241_v11, %v12241_v11 }
 0x4fc   : > { %v12499_v7 = vmul.f32 %v12242_v14, %v12242_v14  ;;  %v12500_v21 = vmul.f32 %v12243_v15, %v12243_v15  ;;  %v6358_v14 = vld [vmem:[#allocation2 + $0x790] sm:$0xff] }
 0x4fd   : > { %v12753_v20 = vadd.f32 %v12752_v16, %v12498_v18  ;;  %v11511_v22 = vpop.f32.mrf.mxu2 }
 0x4fe   : > { %v12244_v23 = vsub.f32 %v6346_v19, %v11511_v22  ;;  %v6360_v22 = vld [vmem:[#allocation2 + $0x7a0] sm:$0xff] }
 0x4ff   : > { %v12754_v25 = vadd.f32 %v12753_v20, %v12499_v7  ;;  %v6359_v20 = vld [vmem:[#allocation2 + $0x798] sm:$0xff] }
 0x500   : > { %v12501_v28 = vmul.f32 %v12244_v23, %v12244_v23  ;;  %v11531_v29 = vpop.f32.mrf.mxu3  ;;  %v6361_v23 = vld [vmem:[#allocation2 + $0x7a8] sm:$0xff] }
 0x501   : > { %v12755_v30 = vadd.f32 %v12754_v25, %v12500_v21  ;;  %v12245_v31 = vsub.f32 %v6347_v24, %v11531_v29  ;;  %v11551_v32 = vpop.f32.mrf.mxu0  ;;  %v11571_v38 = vpop.f32.mrf.mxu1 }
 0x502   : > { %v12246_v33 = vsub.f32 %v6348_v26, %v11551_v32  ;;  %v12247_v34 = vsub.f32 %v6349_v27, %v11571_v38  ;;  %v13324_v26 = vmov 0.0  }
 0x503   : > { %v12756_v35 = vadd.f32 %v12755_v30, %v12501_v28  ;;  %v12502_v36 = vmul.f32 %v12245_v31, %v12245_v31  ;;  %6115 = vst.msk [vmem:[%s13951_s3] sm:$0xff] %vm6114_vm2, %v13324_v26 }
 0x504   : > { %v12503_v39 = vmul.f32 %v12246_v33, %v12246_v33  ;;  %v12504_v52 = vmul.f32 %v12247_v34, %v12247_v34  ;;  %v6362_v34 = vld [vmem:[#allocation2 + $0x7b0] sm:$0xff] }
 0x505   : > { %v12757_v40 = vadd.f32 %v12756_v35, %v12502_v36  ;;  %v11591_v41 = vpop.f32.mrf.mxu2 }
 0x506   : > { %v12248_v42 = vsub.f32 %v6350_v37, %v11591_v41 }
 0x507   : > { %v12758_v44 = vadd.f32 %v12757_v40, %v12503_v39 }
 0x508   : > { %v12505_v47 = vmul.f32 %v12248_v42, %v12248_v42  ;;  %v11611_v48 = vpop.f32.mrf.mxu3  ;;  %v6364_v42 = vld [vmem:[#allocation2 + $0x7c0] sm:$0xff] }
 0x509   : > { %v12759_v49 = vadd.f32 %v12758_v44, %v12504_v52  ;;  %v12249_v50 = vsub.f32 %v6351_v43, %v11611_v48  ;;  %v11631_v51 = vpop.f32.mrf.mxu0  ;;  %v11651_v53 = vpop.f32.mrf.mxu1  ;;  %v6363_v52 = vld [vmem:[#allocation2 + $0x7b8] sm:$0xff]  ;;  %v6365_v43 = vld [vmem:[#allocation2 + $0x7c8] sm:$0xff] }
 0x50a   : > { %v12250_v54 = vsub.f32 %v6352_v45, %v11631_v51  ;;  %v12251_v2 = vsub.f32 %v6353_v46, %v11651_v53  ;;  %v12270_v26 = vld [vmem:[%s13951_s3] sm:$0xff] }
 0x50b   : > { %v12760_v55 = vadd.f32 %v12759_v49, %v12505_v47  ;;  %v12506_v56 = vmul.f32 %v12249_v50, %v12249_v50 }
 0x50c   : > { %v12507_v58 = vmul.f32 %v12250_v54, %v12250_v54  ;;  %v12508_v60 = vmul.f32 %v12251_v2, %v12251_v2  ;;  %v6366_v2 = vld [vmem:[#allocation2 + $0x7d0] sm:$0xff] }
 0x50d   : > { %v12761_v59 = vadd.f32 %v12760_v55, %v12506_v56  ;;  %v11671_v61 = vpop.f32.mrf.mxu2 }
 0x50e   : > { %v12252_v62 = vsub.f32 %v6354_v57, %v11671_v61 }
 0x50f   : > { %v12762_v0 = vadd.f32 %v12761_v59, %v12507_v58 }
 0x510   : > { %v12509_v4 = vmul.f32 %v12252_v62, %v12252_v62  ;;  %v11691_v17 = vpop.f32.mrf.mxu3  ;;  %v6368_v62 = vld [vmem:[#allocation2 + $0x7e0] sm:$0xff] }
 0x511   : > { %v12763_v5 = vadd.f32 %v12762_v0, %v12508_v60  ;;  %v12253_v6 = vsub.f32 %v6355_v63, %v11691_v17  ;;  %v11711_v8 = vpop.f32.mrf.mxu0  ;;  %v11731_v9 = vpop.f32.mrf.mxu1  ;;  %v6367_v60 = vld [vmem:[#allocation2 + $0x7d8] sm:$0xff]  ;;  %v6369_v63 = vld [vmem:[#allocation2 + $0x7e8] sm:$0xff] }
 0x512   : > { %v12254_v10 = vsub.f32 %v6356_v1, %v11711_v8  ;;  %v12255_v11 = vsub.f32 %v6357_v3, %v11731_v9 }
 0x513   : > { %v12764_v12 = vadd.f32 %v12763_v5, %v12509_v4  ;;  %v12510_v13 = vmul.f32 %v12253_v6, %v12253_v6 }
 0x514   : > { %v12511_v15 = vmul.f32 %v12254_v10, %v12254_v10  ;;  %v12512_v18 = vmul.f32 %v12255_v11, %v12255_v11  ;;  %v6370_v11 = vld [vmem:[#allocation2 + $0x7f0] sm:$0xff] }
 0x515   : > { %v12765_v16 = vadd.f32 %v12764_v12, %v12510_v13  ;;  %v11751_v19 = vpop.f32.mrf.mxu2 }
 0x516   : > { %v12256_v7 = vsub.f32 %v6358_v14, %v11751_v19 }
 0x517   : > { %v12766_v21 = vadd.f32 %v12765_v16, %v12511_v15 }
 0x518   : > { %v12513_v24 = vmul.f32 %v12256_v7, %v12256_v7  ;;  %v11771_v25 = vpop.f32.mrf.mxu3 }
 0x519   : > { %v12767_v27 = vadd.f32 %v12766_v21, %v12512_v18  ;;  %v12257_v28 = vsub.f32 %v6359_v20, %v11771_v25  ;;  %v11791_v29 = vpop.f32.mrf.mxu0  ;;  %v11811_v30 = vpop.f32.mrf.mxu1  ;;  %v6371_v18 = vld [vmem:[#allocation2 + $0x7f8] sm:$0xff] }
 0x51a   : > { %v12258_v31 = vsub.f32 %v6360_v22, %v11791_v29  ;;  %v12259_v32 = vsub.f32 %v6361_v23, %v11811_v30 }
 0x51b   : > { %v12768_v38 = vadd.f32 %v12767_v27, %v12513_v24  ;;  %v12514_v33 = vmul.f32 %v12257_v28, %v12257_v28 }
 0x51c   : > { %v12515_v35 = vmul.f32 %v12258_v31, %v12258_v31  ;;  %v12516_v37 = vmul.f32 %v12259_v32, %v12259_v32 }
 0x51d   : > { %v12769_v36 = vadd.f32 %v12768_v38, %v12514_v33  ;;  %v11831_v39 = vpop.f32.mrf.mxu2 }
 0x51e   : > { %v12260_v40 = vsub.f32 %v6362_v34, %v11831_v39 }
 0x51f   : > { %v12770_v41 = vadd.f32 %v12769_v36, %v12515_v35 }
 0x520   : > { %v12517_v44 = vmul.f32 %v12260_v40, %v12260_v40  ;;  %v11851_v45 = vpop.f32.mrf.mxu3 }
 0x521   : > { %v12771_v46 = vadd.f32 %v12770_v41, %v12516_v37  ;;  %v12261_v47 = vsub.f32 %v6363_v52, %v11851_v45  ;;  %v11871_v48 = vpop.f32.mrf.mxu0  ;;  %v11891_v49 = vpop.f32.mrf.mxu1 }
 0x522   : > { %v12262_v50 = vsub.f32 %v6364_v42, %v11871_v48  ;;  %v12263_v51 = vsub.f32 %v6365_v43, %v11891_v49 }
 0x523   : > { %v12772_v53 = vadd.f32 %v12771_v46, %v12517_v44  ;;  %v12518_v54 = vmul.f32 %v12261_v47, %v12261_v47 }
 0x524   : > { %v12519_v55 = vmul.f32 %v12262_v50, %v12262_v50  ;;  %v12520_v57 = vmul.f32 %v12263_v51, %v12263_v51 }
 0x525   : > { %v12773_v56 = vadd.f32 %v12772_v53, %v12518_v54  ;;  %v11911_v58 = vpop.f32.mrf.mxu2 }
 0x526   : > { %v12264_v59 = vsub.f32 %v6366_v2, %v11911_v58 }
 0x527   : > { %v12774_v61 = vadd.f32 %v12773_v56, %v12519_v55 }
 0x528   : > { %v12521_v0 = vmul.f32 %v12264_v59, %v12264_v59  ;;  %v11931_v1 = vpop.f32.mrf.mxu3 }
 0x529   : > { %v12775_v3 = vadd.f32 %v12774_v61, %v12520_v57  ;;  %v12265_v4 = vsub.f32 %v6367_v60, %v11931_v1  ;;  %v11951_v17 = vpop.f32.mrf.mxu0  ;;  %v11971_v5 = vpop.f32.mrf.mxu1 }
 0x52a   : > { %v12266_v6 = vsub.f32 %v6368_v62, %v11951_v17  ;;  %v12267_v8 = vsub.f32 %v6369_v63, %v11971_v5 }
 0x52b   : > { %v12776_v9 = vadd.f32 %v12775_v3, %v12521_v0  ;;  %v12522_v10 = vmul.f32 %v12265_v4, %v12265_v4 }
 0x52c   : > { %v12523_v12 = vmul.f32 %v12266_v6, %v12266_v6  ;;  %v12524_v14 = vmul.f32 %v12267_v8, %v12267_v8 }
 0x52d   : > { %v12777_v13 = vadd.f32 %v12776_v9, %v12522_v10  ;;  %v11991_v15 = vpop.f32.mrf.mxu2 }
 0x52e   : > { %v12268_v16 = vsub.f32 %v6370_v11, %v11991_v15 }
 0x52f   : > { %v12778_v19 = vadd.f32 %v12777_v13, %v12523_v12 }
 0x530   : > { %v12525_v7 = vmul.f32 %v12268_v16, %v12268_v16  ;;  %v12011_v20 = vpop.f32.mrf.mxu3 }
 0x531   : > { %v12779_v21 = vadd.f32 %v12778_v19, %v12524_v14  ;;  %v12269_v22 = vsub.f32 %v6371_v18, %v12011_v20 }
 0x533   : > { %v12526_v23 = vmul.f32 %v12269_v22, %v12269_v22  ;;  %v12780_v24 = vadd.f32 %v12779_v21, %v12525_v7 }
 0x535   : > { %v12781_v25 = vadd.f32 %v12780_v24, %v12526_v23 }
 0x537   : > { %12782 = vadd.xlane.f32.xlu0 %v12781_v25 }
 0x5aa   : > { %v12783_v27 = vpop.xlane.xlu0 %12782 }
 0x5ab   : > { %v12784_v28 = vadd.f32 %v12783_v27, %v12270_v26 }
 0x5ad   : > { %12786 = vst.msk [vmem:[%s13951_s3] sm:$0xff] %vm6114_vm2, %v12784_v28 }
 0x5ae PF: > { %p13158_p9 = scmp.eq.s32.totalorder %s12866_s15, 1  ;;  %s12795_s12 = sshll.u32 %s13950_s2, 4  ;;  %s12796_s12 = int_to_ptr.hbm [resolvable:$true] %s12795_s12 }
 0x5af   : > { %s13325_s17 = smov [#allocation7]  }
 0x5b0   : > { %s12793_s18 = sshll.u32 %s13325_s17, 4  ;;  %s12794_s18 = int_to_ptr.vmem [resolvable:$true] %s12793_s18 }
 0x5b1   : > { %13144 = dma.vmem_to_hbm [thread:$0]  (%p13158_p9), %s12794_s18, 128, %s12796_s12, [#allocation4]  }
 0x5b2   : > { %13304 = dma.done.wait (%p13158_p9), [#allocation4], 128  }
 0x5b3   : > { %13306 = vsyncadd (%p13158_p9), [#allocation4], 4294967168 }
 0x5b4 PF: > { %s17_s14 = sadd.s32 1, %s13317_s14   ;;  %s13954_s12 = smov %s13313_s13 }
 0x5b5   : > { %p14_p10 = scmp.ge.s32.totalorder %s17_s14, 4   ;;  %s13955_s13 = smov %s13957_s16 }
 0x5b7   :  { %16 = sbr.rel (!%p14_p10) target bundleno = 4 (0x4), region = 88 }
 0x5bc   :  { %12815 = vsyncpa [#allocation3], 1 }
 0x5bd   :  { %12817 = vsyncpa [#allocation3 + $0x1], 1 }
 0x5be   :  { %12818 = vsyncpa [#allocation6], 1 }
 0x5bf   :  { %12819 = vsyncpa [#allocation4], 1 }
 0x5c0   :  { %12821 = vsyncpa [#allocation4 + $0x1], 1 }

</bundles_post_ra>
